<compile_context>
chip_gen: v7x
topology: tpu7x:2x2x1
jax: 0.10.0
libtpu: 0.0.40
codegen_flags: <defaults>
</compile_context>

<pallas_src>
import functools
import math

import jax
import jax.numpy as jnp
from jax.experimental import pallas as pl
from jax.experimental.pallas import tpu as pltpu

LANE = 128


def _round_up(x, m):
    return (x + m - 1) // m * m


# ----------------------------------------------------------------------------
# In-kernel activations (VPU/EUP-safe primitives only)
# ----------------------------------------------------------------------------
def _erf_approx(x):
    # Eigen/XLA-style float32 rational approximation of erf; the final divide
    # goes to the EUP via pl.reciprocal so it stays off the VPU slots.
    x = jnp.clip(x, -4.0, 4.0)
    x2 = x * x
    alpha = (-2.72614225801306e-10, 2.77068142495902e-08, -2.10102402082508e-06,
             -5.69250639462346e-05, -7.34990630326855e-04, -2.95459980854025e-03,
             -1.60960333262415e-02)
    beta = (-1.45660718464996e-05, -2.13374055278905e-04, -1.68282697438203e-03,
            -7.37332916720468e-03, -1.42647390514189e-02)
    p = jnp.full_like(x2, alpha[0])
    for c in alpha[1:]:
        p = p * x2 + c
    p = p * x
    q = jnp.full_like(x2, beta[0])
    for c in beta[1:]:
        q = q * x2 + c
    return p * pl.reciprocal(q, approx=True)


def _gelu_exact(x):
    # nn.GELU() default (approximate='none'): 0.5*x*(1+erf(x/sqrt(2)))
    return 0.5 * x * (1.0 + _erf_approx(x * (1.0 / math.sqrt(2.0))))


_ACTS = {
    "none": lambda v: v,
    "relu": lambda v: jnp.maximum(v, 0.0),
    "sigmoid": jax.nn.sigmoid,
    "gelu": _gelu_exact,
}


# ----------------------------------------------------------------------------
# Fused 3x3 'same' conv + bias + activation (flat spatial layout)
# ----------------------------------------------------------------------------
def _conv3x3_kernel(x_ref, w_ref, b_ref, ml_ref, mr_ref, o_ref, *, W, act):
    # x_ref : (1, H*W + 2*W + 2, Cin)  zero-padded flat image (one batch elem)
    # w_ref : (9, Cin, Cout)           taps ordered (dy, dx)
    # b_ref : (1, Cout)
    # ml_ref: (H*W, 1)  0 where w == 0      (masks row-wrap of left taps)
    # mr_ref: (H*W, 1)  0 where w == W - 1  (masks row-wrap of right taps)
    # o_ref : (1, H*W, Cout)
    HW = o_ref.shape[1]
    cout = o_ref.shape[2]
    acc = jnp.zeros((HW, cout), jnp.float32)
    for dy in range(3):
        for dx in range(3):
            patch = x_ref[0, pl.ds(dy * W + dx, HW), :]
            if dx == 0:
                patch = patch * ml_ref[...]
            elif dx == 2:
                patch = patch * mr_ref[...]
            acc = acc + jnp.dot(patch, w_ref[dy * 3 + dx],
                                preferred_element_type=jnp.float32)
    acc = acc + b_ref[...]
    o_ref[0] = _ACTS[act](acc)


def conv3x3_act(x_flat, w9, b, H, W, act):
    """'same' 3x3 conv + bias + act.  x_flat: (N, H*W, Cin) -> (N, H*W, Cout)."""
    N, HW, Cin = x_flat.shape
    assert HW == H * W
    Cout = w9.shape[-1]
    L = HW + 2 * W + 2
    # Zero pad of (W+1) flat rows at each end == one pad image-row top/bottom
    # plus a one-row guard so every tap's contiguous slice stays in bounds.
    xp = jnp.pad(x_flat, ((0, 0), (W + 1, W + 1), (0, 0)))
    col = jnp.arange(HW, dtype=jnp.int32) % W
    ml = (col != 0).astype(jnp.float32)[:, None]
    mr = (col != W - 1).astype(jnp.float32)[:, None]
    kernel = functools.partial(_conv3x3_kernel, W=W, act=act)
    return pl.pallas_call(
        kernel,
        out_shape=jax.ShapeDtypeStruct((N, HW, Cout), jnp.float32),
        grid=(N,),
        in_specs=[
            pl.BlockSpec((1, L, Cin), lambda n: (n, 0, 0)),
            pl.BlockSpec((9, Cin, Cout), lambda n: (0, 0, 0)),
            pl.BlockSpec((1, Cout), lambda n: (0, 0)),
            pl.BlockSpec((HW, 1), lambda n: (0, 0)),
            pl.BlockSpec((HW, 1), lambda n: (0, 0)),
        ],
        out_specs=pl.BlockSpec((1, HW, Cout), lambda n: (n, 0, 0)),
        compiler_params=pltpu.CompilerParams(
            dimension_semantics=("parallel",)),
    )(xp, w9, b, ml, mr)


# ----------------------------------------------------------------------------
# Fused 2x2 max pool (single read of x, 4-way max inside the kernel)
# ----------------------------------------------------------------------------
def _maxpool_kernel(x_ref, o_ref):
    # x_ref: (Ho, 2, Wo, 2*C) one batch element; o_ref: (Ho, Wo, C)
    C = o_ref.shape[-1]
    m = jnp.maximum(x_ref[:, 0, :, :], x_ref[:, 1, :, :])   # max over row pair
    o_ref[...] = jnp.maximum(m[..., :C], m[..., C:])         # max over col pair


def maxpool2x2_flat(x_flat, H, W):
    """nn.MaxPool2d(2).  x_flat: (N, H*W, C) -> (N, (H//2)*(W//2), C)."""
    N, HW, C = x_flat.shape
    assert HW == H * W and H % 2 == 0 and W % 2 == 0
    Ho, Wo = H // 2, W // 2
    xr = x_flat.reshape(N * Ho, 2, Wo, 2 * C)   # pure metadata reshape
    out = pl.pallas_call(
        _maxpool_kernel,
        out_shape=jax.ShapeDtypeStruct((N * Ho, Wo, C), x_flat.dtype),
        grid=(N,),
        in_specs=[pl.BlockSpec((Ho, 2, Wo, 2 * C), lambda n: (n, 0, 0, 0))],
        out_specs=pl.BlockSpec((Ho, Wo, C), lambda n: (n, 0, 0)),
        compiler_params=pltpu.CompilerParams(
            dimension_semantics=("parallel",)),
    )(xr)
    return out.reshape(N, Ho * Wo, C)


# ----------------------------------------------------------------------------
# Fused FC tail: fc1 -> sigmoid -> fc2 -> relu -> fc3 (single pallas_call)
# ----------------------------------------------------------------------------
def _fc_tail_kernel(x_ref, w1_ref, b1_ref, w2_ref, b2_ref, w3_ref, b3_ref, o_ref):
    h = jnp.dot(x_ref[...], w1_ref[...], preferred_element_type=jnp.float32)
    h = jax.nn.sigmoid(h + b1_ref[...])
    h = jnp.dot(h, w2_ref[...], preferred_element_type=jnp.float32) + b2_ref[...]
    h = jnp.maximum(h, 0.0)
    o_ref[...] = (jnp.dot(h, w3_ref[...], preferred_element_type=jnp.float32)
                  + b3_ref[...])


def fc_tail(x, w1, b1, w2, b2, w3, b3):
    M, K = x.shape
    H1, H2, Nout = w1.shape[1], w2.shape[1], w3.shape[1]
    full = lambda shp: pl.BlockSpec(shp, lambda i: (0,) * len(shp))
    return pl.pallas_call(
        _fc_tail_kernel,
        out_shape=jax.ShapeDtypeStruct((M, Nout), jnp.float32),
        grid=(1,),
        in_specs=[full((M, K)), full((K, H1)), full((1, H1)),
                  full((H1, H2)), full((1, H2)),
                  full((H2, Nout)), full((1, Nout))],
        out_specs=full((M, Nout)),
    )(x, w1, b1, w2, b2, w3, b3)


# ----------------------------------------------------------------------------
# One-time parameter preparation (done outside the jitted forward)
# ----------------------------------------------------------------------------
def _pad_last(a, target):
    pad = target - a.shape[-1]
    return a if pad == 0 else jnp.pad(a, [(0, 0)] * (a.ndim - 1) + [(0, pad)])


def _prep_conv(w, b, cin_pad=None, cout_pad=None):
    # w: PyTorch Conv2d layout (Cout, Cin, 3, 3) -> (9, Cin_pad, Cout_pad)
    Cout, Cin, _, _ = w.shape
    cout_pad = cout_pad or _round_up(Cout, LANE)
    cin_pad = cin_pad or Cin
    w9 = jnp.transpose(w, (2, 3, 1, 0)).reshape(9, Cin, Cout)   # taps (dy, dx)
    w9 = _pad_last(w9, cout_pad)
    if cin_pad != Cin:
        w9 = jnp.pad(w9, ((0, 0), (0, cin_pad - Cin), (0, 0)))
    b2 = _pad_last(b.reshape(1, Cout), cout_pad)
    return w9.astype(jnp.float32), b2.astype(jnp.float32)


def _prep_convt(wt, b, cin_pad=None, cout_pad=None):
    # ConvTranspose2d(Cin, Cout, 3, s=1, p=1) == 'same' conv with kernel
    # spatially flipped and in/out channels swapped.
    w_eq = jnp.transpose(wt[:, :, ::-1, ::-1], (1, 0, 2, 3))    # (Cout, Cin, 3, 3)
    return _prep_conv(w_eq, b, cin_pad=cin_pad, cout_pad=cout_pad)


def _prep_fc(w, b, in_pad=None, out_pad=None):
    # w: PyTorch Linear layout (Nout, K) -> (K_pad, Nout_pad)
    Nout, K = w.shape
    in_pad = in_pad or K
    out_pad = out_pad or _round_up(Nout, LANE)
    wt = _pad_last(jnp.transpose(w), out_pad)
    if in_pad != K:
        wt = jnp.pad(wt, ((0, in_pad - K), (0, 0)))
    b2 = _pad_last(b.reshape(1, Nout), out_pad)
    return wt.astype(jnp.float32), b2.astype(jnp.float32)


def _prep_fc1(w, b, ch, hh, ww, out_pad=None):
    # fc1 expects NCHW flatten order; re-order its columns to NHWC flatten
    # (which is what the flat conv output produces), then transpose/pad.
    Nout = w.shape[0]
    w_nhwc = (w.reshape(Nout, ch, hh, ww)
               .transpose(0, 2, 3, 1)
               .reshape(Nout, hh * ww * ch))
    return _prep_fc(w_nhwc, b, out_pad=out_pad)


def prepare_params(p, in_hw=16):
    h = in_hw // 4                       # two 2x2 max-pools
    kp = {}
    kp["c1_w"], kp["c1_b"] = _prep_conv(p["conv1_w"], p["conv1_b"], cout_pad=LANE)
    kp["c2_w"], kp["c2_b"] = _prep_conv(p["conv2_w"], p["conv2_b"],
                                        cin_pad=LANE, cout_pad=LANE)
    kp["c3_w"], kp["c3_b"] = _prep_conv(p["conv3_w"], p["conv3_b"],
                                        cin_pad=LANE, cout_pad=LANE)
    kp["ct_w"], kp["ct_b"] = _prep_convt(p["convt_w"], p["convt_b"],
                                         cin_pad=LANE, cout_pad=LANE)
    kp["f1_w"], kp["f1_b"] = _prep_fc1(p["fc1_w"], p["fc1_b"],
                                       ch=128, hh=h, ww=h, out_pad=LANE)
    kp["f2_w"], kp["f2_b"] = _prep_fc(p["fc2_w"], p["fc2_b"],
                                      in_pad=LANE, out_pad=LANE)
    kp["f3_w"], kp["f3_b"] = _prep_fc(p["fc3_w"], p["fc3_b"],
                                      in_pad=LANE, out_pad=LANE)
    return kp


# ----------------------------------------------------------------------------
# Full forward pass (matches nn.Sequential in Random_Attempt)
# ----------------------------------------------------------------------------
def random_attempt_forward(x_nchw, kp, *, class_cnt):
    N, _, H, W = x_nchw.shape
    x = jnp.transpose(x_nchw, (0, 2, 3, 1)).astype(jnp.float32)   # NCHW -> NHWC
    x = x.reshape(N, H * W, x.shape[-1])                          # flat spatial
    x = conv3x3_act(x, kp["c1_w"], kp["c1_b"], H, W, "relu")
    x = conv3x3_act(x, kp["c2_w"], kp["c2_b"], H, W, "relu")
    x = maxpool2x2_flat(x, H, W)
    H, W = H // 2, W // 2
    x = conv3x3_act(x, kp["c3_w"], kp["c3_b"], H, W, "relu")
    x = maxpool2x2_flat(x, H, W)
    H, W = H // 2, W // 2
    x = conv3x3_act(x, kp["ct_w"], kp["ct_b"], H, W, "gelu")
    x = x.reshape(N, -1)            # NHWC flatten; fc1 cols were pre-permuted
    x = fc_tail(x, kp["f1_w"], kp["f1_b"], kp["f2_w"], kp["f2_b"],
                kp["f3_w"], kp["f3_b"])
    return x[:, :class_cnt]


# ----------------------------------------------------------------------------
# Deterministic example weights in PyTorch layouts
# ----------------------------------------------------------------------------
def init_params(key, class_cnt, in_hw=16):
    ks = jax.random.split(key, 14)

    def nrm(k, shape, scale):
        return scale * jax.random.normal(k, shape, jnp.float32)

    h = in_hw // 4
    flat = 128 * h * h                # LazyLinear input size (NCHW flatten)
    return {
        "conv1_w": nrm(ks[0], (32, 3, 3, 3), 0.10),   "conv1_b": nrm(ks[1], (32,), 0.10),
        "conv2_w": nrm(ks[2], (32, 32, 3, 3), 0.05),  "conv2_b": nrm(ks[3], (32,), 0.05),
        "conv3_w": nrm(ks[4], (64, 32, 3, 3), 0.05),  "conv3_b": nrm(ks[5], (64,), 0.05),
        "convt_w": nrm(ks[6], (64, 128, 3, 3), 0.05), "convt_b": nrm(ks[7], (128,), 0.05),
        "fc1_w": nrm(ks[8], (64, flat), 0.02),        "fc1_b": nrm(ks[9], (64,), 0.02),
        "fc2_w": nrm(ks[10], (32, 64), 0.05),         "fc2_b": nrm(ks[11], (32,), 0.05),
        "fc3_w": nrm(ks[12], (class_cnt, 32), 0.05),  "fc3_b": nrm(ks[13], (class_cnt,), 0.05),
    }


if __name__ == "__main__":
    key = jax.random.PRNGKey(0)
    k_x, k_p = jax.random.split(key)

    class_cnt = 10
    x = jax.random.normal(k_x, (2, 3, 16, 16), jnp.float32)   # NCHW, like PyTorch
    raw_params = init_params(k_p, class_cnt, in_hw=16)
    kernel_params = prepare_params(raw_params, in_hw=16)      # one-time prep

    fwd = jax.jit(functools.partial(random_attempt_forward, class_cnt=class_cnt))
    out = fwd(x, kernel_params)
    jax.block_until_ready(out)

    assert out.shape == (2, class_cnt), out.shape
    assert out.dtype == jnp.float32
    assert bool(jnp.all(jnp.isfinite(out)))
    print("KERNEL_OK")
</pallas_src>

<mosaic_0001>
module attributes {stable_mosaic.version = 11 : i64} {
  func.func @_conv3x3_kernel(%arg0: i32, %arg1: memref<1x290x3xf32, #tpu.memory_space<vmem>>, %arg2: memref<9x3x128xf32, #tpu.memory_space<vmem>>, %arg3: memref<1x128xf32, #tpu.memory_space<vmem>>, %arg4: memref<256x1xf32, #tpu.memory_space<vmem>>, %arg5: memref<256x1xf32, #tpu.memory_space<vmem>>, %arg6: memref<1x256x128xf32, #tpu.memory_space<vmem>>) attributes {dimension_semantics = [#tpu.dimension_semantics<parallel>], iteration_bounds = array<i64: 2>, scalar_prefetch = 0 : i64, scratch_operands = 0 : i64, tpu.core_type = #tpu.core_type<tc>, window_params = [{transform_indices = @transform_0, window_bounds = array<i64: 1, 290, 3>}, {pipeline_mode = #tpu.pipeline_mode<synchronous>, transform_indices = @transform_1, window_bounds = array<i64: 9, 3, 128>}, {pipeline_mode = #tpu.pipeline_mode<synchronous>, transform_indices = @transform_2, window_bounds = array<i64: 1, 128>}, {pipeline_mode = #tpu.pipeline_mode<synchronous>, transform_indices = @transform_3, window_bounds = array<i64: 256, 1>}, {pipeline_mode = #tpu.pipeline_mode<synchronous>, transform_indices = @transform_4, window_bounds = array<i64: 256, 1>}, {transform_indices = @transform_5, window_bounds = array<i64: 1, 256, 128>}]} {
    %cst = arith.constant 0.000000e+00 : f32
    %0 = vector.broadcast %cst : f32 to vector<256x128xf32>
    %c0 = arith.constant 0 : index
    %c0_0 = arith.constant 0 : index
    %c0_1 = arith.constant 0 : index
    %1 = vector.load %arg1[%c0, %c0_0, %c0_1] : memref<1x290x3xf32, #tpu.memory_space<vmem>>, vector<1x256x3xf32>
    %2 = vector.shape_cast %1 : vector<1x256x3xf32> to vector<256x3xf32>
    %c0_2 = arith.constant 0 : index
    %c0_3 = arith.constant 0 : index
    %3 = vector.load %arg4[%c0_2, %c0_3] : memref<256x1xf32, #tpu.memory_space<vmem>>, vector<256x1xf32>
    %4 = vector.broadcast %3 : vector<256x1xf32> to vector<256x3xf32>
    %5 = arith.mulf %2, %4 : vector<256x3xf32>
    %c0_4 = arith.constant 0 : index
    %c0_5 = arith.constant 0 : index
    %c0_6 = arith.constant 0 : index
    %6 = vector.load %arg2[%c0_4, %c0_5, %c0_6] : memref<9x3x128xf32, #tpu.memory_space<vmem>>, vector<1x3x128xf32>
    %7 = vector.shape_cast %6 : vector<1x3x128xf32> to vector<3x128xf32>
    %cst_7 = arith.constant dense<0.000000e+00> : vector<256x128xf32>
    %8 = tpu.matmul %5, %7, %cst_7 {dimension_numbers = #tpu.dot_dimension_numbers<[1], [0], [0], [1], [0, 0, 1, 1], [], []>} : vector<256x3xf32>, vector<3x128xf32>, vector<256x128xf32> -> vector<256x128xf32>
    %9 = arith.addf %0, %8 : vector<256x128xf32>
    %c0_8 = arith.constant 0 : index
    %c1 = arith.constant 1 : index
    %c0_9 = arith.constant 0 : index
    %10 = vector.load %arg1[%c0_8, %c1, %c0_9] : memref<1x290x3xf32, #tpu.memory_space<vmem>>, vector<1x256x3xf32>
    %11 = vector.shape_cast %10 : vector<1x256x3xf32> to vector<256x3xf32>
    %c1_10 = arith.constant 1 : index
    %c0_11 = arith.constant 0 : index
    %c0_12 = arith.constant 0 : index
    %12 = vector.load %arg2[%c1_10, %c0_11, %c0_12] : memref<9x3x128xf32, #tpu.memory_space<vmem>>, vector<1x3x128xf32>
    %13 = vector.shape_cast %12 : vector<1x3x128xf32> to vector<3x128xf32>
    %cst_13 = arith.constant dense<0.000000e+00> : vector<256x128xf32>
    %14 = tpu.matmul %11, %13, %cst_13 {dimension_numbers = #tpu.dot_dimension_numbers<[1], [0], [0], [1], [0, 0, 1, 1], [], []>} : vector<256x3xf32>, vector<3x128xf32>, vector<256x128xf32> -> vector<256x128xf32>
    %15 = arith.addf %9, %14 : vector<256x128xf32>
    %c0_14 = arith.constant 0 : index
    %c2 = arith.constant 2 : index
    %c0_15 = arith.constant 0 : index
    %16 = vector.load %arg1[%c0_14, %c2, %c0_15] : memref<1x290x3xf32, #tpu.memory_space<vmem>>, vector<1x256x3xf32>
    %17 = vector.shape_cast %16 : vector<1x256x3xf32> to vector<256x3xf32>
    %c0_16 = arith.constant 0 : index
    %c0_17 = arith.constant 0 : index
    %18 = vector.load %arg5[%c0_16, %c0_17] : memref<256x1xf32, #tpu.memory_space<vmem>>, vector<256x1xf32>
    %19 = vector.broadcast %18 : vector<256x1xf32> to vector<256x3xf32>
    %20 = arith.mulf %17, %19 : vector<256x3xf32>
    %c2_18 = arith.constant 2 : index
    %c0_19 = arith.constant 0 : index
    %c0_20 = arith.constant 0 : index
    %21 = vector.load %arg2[%c2_18, %c0_19, %c0_20] : memref<9x3x128xf32, #tpu.memory_space<vmem>>, vector<1x3x128xf32>
    %22 = vector.shape_cast %21 : vector<1x3x128xf32> to vector<3x128xf32>
    %cst_21 = arith.constant dense<0.000000e+00> : vector<256x128xf32>
    %23 = tpu.matmul %20, %22, %cst_21 {dimension_numbers = #tpu.dot_dimension_numbers<[1], [0], [0], [1], [0, 0, 1, 1], [], []>} : vector<256x3xf32>, vector<3x128xf32>, vector<256x128xf32> -> vector<256x128xf32>
    %24 = arith.addf %15, %23 : vector<256x128xf32>
    %c0_22 = arith.constant 0 : index
    %c16 = arith.constant 16 : index
    %c0_23 = arith.constant 0 : index
    %25 = vector.load %arg1[%c0_22, %c16, %c0_23] : memref<1x290x3xf32, #tpu.memory_space<vmem>>, vector<1x256x3xf32>
    %26 = vector.shape_cast %25 : vector<1x256x3xf32> to vector<256x3xf32>
    %c0_24 = arith.constant 0 : index
    %c0_25 = arith.constant 0 : index
    %27 = vector.load %arg4[%c0_24, %c0_25] : memref<256x1xf32, #tpu.memory_space<vmem>>, vector<256x1xf32>
    %28 = vector.broadcast %27 : vector<256x1xf32> to vector<256x3xf32>
    %29 = arith.mulf %26, %28 : vector<256x3xf32>
    %c3 = arith.constant 3 : index
    %c0_26 = arith.constant 0 : index
    %c0_27 = arith.constant 0 : index
    %30 = vector.load %arg2[%c3, %c0_26, %c0_27] : memref<9x3x128xf32, #tpu.memory_space<vmem>>, vector<1x3x128xf32>
    %31 = vector.shape_cast %30 : vector<1x3x128xf32> to vector<3x128xf32>
    %cst_28 = arith.constant dense<0.000000e+00> : vector<256x128xf32>
    %32 = tpu.matmul %29, %31, %cst_28 {dimension_numbers = #tpu.dot_dimension_numbers<[1], [0], [0], [1], [0, 0, 1, 1], [], []>} : vector<256x3xf32>, vector<3x128xf32>, vector<256x128xf32> -> vector<256x128xf32>
    %33 = arith.addf %24, %32 : vector<256x128xf32>
    %c0_29 = arith.constant 0 : index
    %c17 = arith.constant 17 : index
    %c0_30 = arith.constant 0 : index
    %34 = vector.load %arg1[%c0_29, %c17, %c0_30] : memref<1x290x3xf32, #tpu.memory_space<vmem>>, vector<1x256x3xf32>
    %35 = vector.shape_cast %34 : vector<1x256x3xf32> to vector<256x3xf32>
    %c4 = arith.constant 4 : index
    %c0_31 = arith.constant 0 : index
    %c0_32 = arith.constant 0 : index
    %36 = vector.load %arg2[%c4, %c0_31, %c0_32] : memref<9x3x128xf32, #tpu.memory_space<vmem>>, vector<1x3x128xf32>
    %37 = vector.shape_cast %36 : vector<1x3x128xf32> to vector<3x128xf32>
    %cst_33 = arith.constant dense<0.000000e+00> : vector<256x128xf32>
    %38 = tpu.matmul %35, %37, %cst_33 {dimension_numbers = #tpu.dot_dimension_numbers<[1], [0], [0], [1], [0, 0, 1, 1], [], []>} : vector<256x3xf32>, vector<3x128xf32>, vector<256x128xf32> -> vector<256x128xf32>
    %39 = arith.addf %33, %38 : vector<256x128xf32>
    %c0_34 = arith.constant 0 : index
    %c18 = arith.constant 18 : index
    %c0_35 = arith.constant 0 : index
    %40 = vector.load %arg1[%c0_34, %c18, %c0_35] : memref<1x290x3xf32, #tpu.memory_space<vmem>>, vector<1x256x3xf32>
    %41 = vector.shape_cast %40 : vector<1x256x3xf32> to vector<256x3xf32>
    %c0_36 = arith.constant 0 : index
    %c0_37 = arith.constant 0 : index
    %42 = vector.load %arg5[%c0_36, %c0_37] : memref<256x1xf32, #tpu.memory_space<vmem>>, vector<256x1xf32>
    %43 = vector.broadcast %42 : vector<256x1xf32> to vector<256x3xf32>
    %44 = arith.mulf %41, %43 : vector<256x3xf32>
    %c5 = arith.constant 5 : index
    %c0_38 = arith.constant 0 : index
    %c0_39 = arith.constant 0 : index
    %45 = vector.load %arg2[%c5, %c0_38, %c0_39] : memref<9x3x128xf32, #tpu.memory_space<vmem>>, vector<1x3x128xf32>
    %46 = vector.shape_cast %45 : vector<1x3x128xf32> to vector<3x128xf32>
    %cst_40 = arith.constant dense<0.000000e+00> : vector<256x128xf32>
    %47 = tpu.matmul %44, %46, %cst_40 {dimension_numbers = #tpu.dot_dimension_numbers<[1], [0], [0], [1], [0, 0, 1, 1], [], []>} : vector<256x3xf32>, vector<3x128xf32>, vector<256x128xf32> -> vector<256x128xf32>
    %48 = arith.addf %39, %47 : vector<256x128xf32>
    %c0_41 = arith.constant 0 : index
    %c32 = arith.constant 32 : index
    %c0_42 = arith.constant 0 : index
    %49 = vector.load %arg1[%c0_41, %c32, %c0_42] : memref<1x290x3xf32, #tpu.memory_space<vmem>>, vector<1x256x3xf32>
    %50 = vector.shape_cast %49 : vector<1x256x3xf32> to vector<256x3xf32>
    %c0_43 = arith.constant 0 : index
    %c0_44 = arith.constant 0 : index
    %51 = vector.load %arg4[%c0_43, %c0_44] : memref<256x1xf32, #tpu.memory_space<vmem>>, vector<256x1xf32>
    %52 = vector.broadcast %51 : vector<256x1xf32> to vector<256x3xf32>
    %53 = arith.mulf %50, %52 : vector<256x3xf32>
    %c6 = arith.constant 6 : index
    %c0_45 = arith.constant 0 : index
    %c0_46 = arith.constant 0 : index
    %54 = vector.load %arg2[%c6, %c0_45, %c0_46] : memref<9x3x128xf32, #tpu.memory_space<vmem>>, vector<1x3x128xf32>
    %55 = vector.shape_cast %54 : vector<1x3x128xf32> to vector<3x128xf32>
    %cst_47 = arith.constant dense<0.000000e+00> : vector<256x128xf32>
    %56 = tpu.matmul %53, %55, %cst_47 {dimension_numbers = #tpu.dot_dimension_numbers<[1], [0], [0], [1], [0, 0, 1, 1], [], []>} : vector<256x3xf32>, vector<3x128xf32>, vector<256x128xf32> -> vector<256x128xf32>
    %57 = arith.addf %48, %56 : vector<256x128xf32>
    %c0_48 = arith.constant 0 : index
    %c33 = arith.constant 33 : index
    %c0_49 = arith.constant 0 : index
    %58 = vector.load %arg1[%c0_48, %c33, %c0_49] : memref<1x290x3xf32, #tpu.memory_space<vmem>>, vector<1x256x3xf32>
    %59 = vector.shape_cast %58 : vector<1x256x3xf32> to vector<256x3xf32>
    %c7 = arith.constant 7 : index
    %c0_50 = arith.constant 0 : index
    %c0_51 = arith.constant 0 : index
    %60 = vector.load %arg2[%c7, %c0_50, %c0_51] : memref<9x3x128xf32, #tpu.memory_space<vmem>>, vector<1x3x128xf32>
    %61 = vector.shape_cast %60 : vector<1x3x128xf32> to vector<3x128xf32>
    %cst_52 = arith.constant dense<0.000000e+00> : vector<256x128xf32>
    %62 = tpu.matmul %59, %61, %cst_52 {dimension_numbers = #tpu.dot_dimension_numbers<[1], [0], [0], [1], [0, 0, 1, 1], [], []>} : vector<256x3xf32>, vector<3x128xf32>, vector<256x128xf32> -> vector<256x128xf32>
    %63 = arith.addf %57, %62 : vector<256x128xf32>
    %c0_53 = arith.constant 0 : index
    %c34 = arith.constant 34 : index
    %c0_54 = arith.constant 0 : index
    %64 = vector.load %arg1[%c0_53, %c34, %c0_54] : memref<1x290x3xf32, #tpu.memory_space<vmem>>, vector<1x256x3xf32>
    %65 = vector.shape_cast %64 : vector<1x256x3xf32> to vector<256x3xf32>
    %c0_55 = arith.constant 0 : index
    %c0_56 = arith.constant 0 : index
    %66 = vector.load %arg5[%c0_55, %c0_56] : memref<256x1xf32, #tpu.memory_space<vmem>>, vector<256x1xf32>
    %67 = vector.broadcast %66 : vector<256x1xf32> to vector<256x3xf32>
    %68 = arith.mulf %65, %67 : vector<256x3xf32>
    %c8 = arith.constant 8 : index
    %c0_57 = arith.constant 0 : index
    %c0_58 = arith.constant 0 : index
    %69 = vector.load %arg2[%c8, %c0_57, %c0_58] : memref<9x3x128xf32, #tpu.memory_space<vmem>>, vector<1x3x128xf32>
    %70 = vector.shape_cast %69 : vector<1x3x128xf32> to vector<3x128xf32>
    %cst_59 = arith.constant dense<0.000000e+00> : vector<256x128xf32>
    %71 = tpu.matmul %68, %70, %cst_59 {dimension_numbers = #tpu.dot_dimension_numbers<[1], [0], [0], [1], [0, 0, 1, 1], [], []>} : vector<256x3xf32>, vector<3x128xf32>, vector<256x128xf32> -> vector<256x128xf32>
    %72 = arith.addf %63, %71 : vector<256x128xf32>
    %c0_60 = arith.constant 0 : index
    %c0_61 = arith.constant 0 : index
    %73 = vector.load %arg3[%c0_60, %c0_61] : memref<1x128xf32, #tpu.memory_space<vmem>>, vector<1x128xf32>
    %74 = vector.broadcast %73 : vector<1x128xf32> to vector<256x128xf32>
    %75 = arith.addf %72, %74 : vector<256x128xf32>
    %cst_62 = arith.constant 0.000000e+00 : f32
    %76 = vector.broadcast %cst_62 : f32 to vector<256x128xf32>
    %77 = arith.maximumf %75, %76 : vector<256x128xf32>
    %c0_63 = arith.constant 0 : index
    %c0_64 = arith.constant 0 : index
    %c0_65 = arith.constant 0 : index
    %78 = vector.load %arg6[%c0_63, %c0_64, %c0_65] : memref<1x256x128xf32, #tpu.memory_space<vmem>>, vector<1x256x128xf32>
    %79 = vector.shape_cast %78 : vector<1x256x128xf32> to vector<256x128xf32>
    %80 = vector.shape_cast %77 : vector<256x128xf32> to vector<1x256x128xf32>
    tpu.vector_store %arg6[%c0_63, %c0_64, %c0_65], %80 {strides = array<i32>} : memref<1x256x128xf32, #tpu.memory_space<vmem>>, vector<1x256x128xf32>,
    return
  }
  func.func @transform_0(%arg0: i32) -> (i32, i32, i32) {
    %c0_i32 = arith.constant 0 : i32
    %c0_i32_0 = arith.constant 0 : i32
    %c0_i32_1 = arith.constant 0 : i32
    return %arg0, %c0_i32, %c0_i32_0 : i32, i32, i32
  }
  func.func @transform_1(%arg0: i32) -> (i32, i32, i32) {
    %c0_i32 = arith.constant 0 : i32
    %c0_i32_0 = arith.constant 0 : i32
    %c0_i32_1 = arith.constant 0 : i32
    %c0_i32_2 = arith.constant 0 : i32
    return %c0_i32, %c0_i32_0, %c0_i32_1 : i32, i32, i32
  }
  func.func @transform_2(%arg0: i32) -> (i32, i32) {
    %c0_i32 = arith.constant 0 : i32
    %c0_i32_0 = arith.constant 0 : i32
    %c0_i32_1 = arith.constant 0 : i32
    return %c0_i32, %c0_i32_0 : i32, i32
  }
  func.func @transform_3(%arg0: i32) -> (i32, i32) {
    %c0_i32 = arith.constant 0 : i32
    %c0_i32_0 = arith.constant 0 : i32
    %c0_i32_1 = arith.constant 0 : i32
    return %c0_i32, %c0_i32_0 : i32, i32
  }
  func.func @transform_4(%arg0: i32) -> (i32, i32) {
    %c0_i32 = arith.constant 0 : i32
    %c0_i32_0 = arith.constant 0 : i32
    %c0_i32_1 = arith.constant 0 : i32
    return %c0_i32, %c0_i32_0 : i32, i32
  }
  func.func @transform_5(%arg0: i32) -> (i32, i32, i32) {
    %c0_i32 = arith.constant 0 : i32
    %c0_i32_0 = arith.constant 0 : i32
    %c0_i32_1 = arith.constant 0 : i32
    return %arg0, %c0_i32, %c0_i32_0 : i32, i32, i32
  }
}

module attributes {stable_mosaic.version = 11 : i64} {
  func.func @_conv3x3_kernel(%arg0: i32, %arg1: memref<1x290x128xf32, #tpu.memory_space<vmem>>, %arg2: memref<9x128x128xf32, #tpu.memory_space<vmem>>, %arg3: memref<1x128xf32, #tpu.memory_space<vmem>>, %arg4: memref<256x1xf32, #tpu.memory_space<vmem>>, %arg5: memref<256x1xf32, #tpu.memory_space<vmem>>, %arg6: memref<1x256x128xf32, #tpu.memory_space<vmem>>) attributes {dimension_semantics = [#tpu.dimension_semantics<parallel>], iteration_bounds = array<i64: 2>, scalar_prefetch = 0 : i64, scratch_operands = 0 : i64, tpu.core_type = #tpu.core_type<tc>, window_params = [{transform_indices = @transform_0, window_bounds = array<i64: 1, 290, 128>}, {pipeline_mode = #tpu.pipeline_mode<synchronous>, transform_indices = @transform_1, window_bounds = array<i64: 9, 128, 128>}, {pipeline_mode = #tpu.pipeline_mode<synchronous>, transform_indices = @transform_2, window_bounds = array<i64: 1, 128>}, {pipeline_mode = #tpu.pipeline_mode<synchronous>, transform_indices = @transform_3, window_bounds = array<i64: 256, 1>}, {pipeline_mode = #tpu.pipeline_mode<synchronous>, transform_indices = @transform_4, window_bounds = array<i64: 256, 1>}, {transform_indices = @transform_5, window_bounds = array<i64: 1, 256, 128>}]} {
    %cst = arith.constant 0.000000e+00 : f32
    %0 = vector.broadcast %cst : f32 to vector<256x128xf32>
    %c0 = arith.constant 0 : index
    %c0_0 = arith.constant 0 : index
    %c0_1 = arith.constant 0 : index
    %1 = vector.load %arg1[%c0, %c0_0, %c0_1] : memref<1x290x128xf32, #tpu.memory_space<vmem>>, vector<1x256x128xf32>
    %2 = vector.shape_cast %1 : vector<1x256x128xf32> to vector<256x128xf32>
    %c0_2 = arith.constant 0 : index
    %c0_3 = arith.constant 0 : index
    %3 = vector.load %arg4[%c0_2, %c0_3] : memref<256x1xf32, #tpu.memory_space<vmem>>, vector<256x1xf32>
    %4 = vector.broadcast %3 : vector<256x1xf32> to vector<256x128xf32>
    %5 = arith.mulf %2, %4 : vector<256x128xf32>
    %c0_4 = arith.constant 0 : index
    %c0_5 = arith.constant 0 : index
    %c0_6 = arith.constant 0 : index
    %6 = vector.load %arg2[%c0_4, %c0_5, %c0_6] : memref<9x128x128xf32, #tpu.memory_space<vmem>>, vector<1x128x128xf32>
    %7 = vector.shape_cast %6 : vector<1x128x128xf32> to vector<128x128xf32>
    %cst_7 = arith.constant dense<0.000000e+00> : vector<256x128xf32>
    %8 = tpu.matmul %5, %7, %cst_7 {dimension_numbers = #tpu.dot_dimension_numbers<[1], [0], [0], [1], [0, 0, 1, 1], [], []>} : vector<256x128xf32>, vector<128x128xf32>, vector<256x128xf32> -> vector<256x128xf32>
    %9 = arith.addf %0, %8 : vector<256x128xf32>
    %c0_8 = arith.constant 0 : index
    %c1 = arith.constant 1 : index
    %c0_9 = arith.constant 0 : index
    %10 = vector.load %arg1[%c0_8, %c1, %c0_9] : memref<1x290x128xf32, #tpu.memory_space<vmem>>, vector<1x256x128xf32>
    %11 = vector.shape_cast %10 : vector<1x256x128xf32> to vector<256x128xf32>
    %c1_10 = arith.constant 1 : index
    %c0_11 = arith.constant 0 : index
    %c0_12 = arith.constant 0 : index
    %12 = vector.load %arg2[%c1_10, %c0_11, %c0_12] : memref<9x128x128xf32, #tpu.memory_space<vmem>>, vector<1x128x128xf32>
    %13 = vector.shape_cast %12 : vector<1x128x128xf32> to vector<128x128xf32>
    %cst_13 = arith.constant dense<0.000000e+00> : vector<256x128xf32>
    %14 = tpu.matmul %11, %13, %cst_13 {dimension_numbers = #tpu.dot_dimension_numbers<[1], [0], [0], [1], [0, 0, 1, 1], [], []>} : vector<256x128xf32>, vector<128x128xf32>, vector<256x128xf32> -> vector<256x128xf32>
    %15 = arith.addf %9, %14 : vector<256x128xf32>
    %c0_14 = arith.constant 0 : index
    %c2 = arith.constant 2 : index
    %c0_15 = arith.constant 0 : index
    %16 = vector.load %arg1[%c0_14, %c2, %c0_15] : memref<1x290x128xf32, #tpu.memory_space<vmem>>, vector<1x256x128xf32>
    %17 = vector.shape_cast %16 : vector<1x256x128xf32> to vector<256x128xf32>
    %c0_16 = arith.constant 0 : index
    %c0_17 = arith.constant 0 : index
    %18 = vector.load %arg5[%c0_16, %c0_17] : memref<256x1xf32, #tpu.memory_space<vmem>>, vector<256x1xf32>
    %19 = vector.broadcast %18 : vector<256x1xf32> to vector<256x128xf32>
    %20 = arith.mulf %17, %19 : vector<256x128xf32>
    %c2_18 = arith.constant 2 : index
    %c0_19 = arith.constant 0 : index
    %c0_20 = arith.constant 0 : index
    %21 = vector.load %arg2[%c2_18, %c0_19, %c0_20] : memref<9x128x128xf32, #tpu.memory_space<vmem>>, vector<1x128x128xf32>
    %22 = vector.shape_cast %21 : vector<1x128x128xf32> to vector<128x128xf32>
    %cst_21 = arith.constant dense<0.000000e+00> : vector<256x128xf32>
    %23 = tpu.matmul %20, %22, %cst_21 {dimension_numbers = #tpu.dot_dimension_numbers<[1], [0], [0], [1], [0, 0, 1, 1], [], []>} : vector<256x128xf32>, vector<128x128xf32>, vector<256x128xf32> -> vector<256x128xf32>
    %24 = arith.addf %15, %23 : vector<256x128xf32>
    %c0_22 = arith.constant 0 : index
    %c16 = arith.constant 16 : index
    %c0_23 = arith.constant 0 : index
    %25 = vector.load %arg1[%c0_22, %c16, %c0_23] : memref<1x290x128xf32, #tpu.memory_space<vmem>>, vector<1x256x128xf32>
    %26 = vector.shape_cast %25 : vector<1x256x128xf32> to vector<256x128xf32>
    %c0_24 = arith.constant 0 : index
    %c0_25 = arith.constant 0 : index
    %27 = vector.load %arg4[%c0_24, %c0_25] : memref<256x1xf32, #tpu.memory_space<vmem>>, vector<256x1xf32>
    %28 = vector.broadcast %27 : vector<256x1xf32> to vector<256x128xf32>
    %29 = arith.mulf %26, %28 : vector<256x128xf32>
    %c3 = arith.constant 3 : index
    %c0_26 = arith.constant 0 : index
    %c0_27 = arith.constant 0 : index
    %30 = vector.load %arg2[%c3, %c0_26, %c0_27] : memref<9x128x128xf32, #tpu.memory_space<vmem>>, vector<1x128x128xf32>
    %31 = vector.shape_cast %30 : vector<1x128x128xf32> to vector<128x128xf32>
    %cst_28 = arith.constant dense<0.000000e+00> : vector<256x128xf32>
    %32 = tpu.matmul %29, %31, %cst_28 {dimension_numbers = #tpu.dot_dimension_numbers<[1], [0], [0], [1], [0, 0, 1, 1], [], []>} : vector<256x128xf32>, vector<128x128xf32>, vector<256x128xf32> -> vector<256x128xf32>
    %33 = arith.addf %24, %32 : vector<256x128xf32>
    %c0_29 = arith.constant 0 : index
    %c17 = arith.constant 17 : index
    %c0_30 = arith.constant 0 : index
    %34 = vector.load %arg1[%c0_29, %c17, %c0_30] : memref<1x290x128xf32, #tpu.memory_space<vmem>>, vector<1x256x128xf32>
    %35 = vector.shape_cast %34 : vector<1x256x128xf32> to vector<256x128xf32>
    %c4 = arith.constant 4 : index
    %c0_31 = arith.constant 0 : index
    %c0_32 = arith.constant 0 : index
    %36 = vector.load %arg2[%c4, %c0_31, %c0_32] : memref<9x128x128xf32, #tpu.memory_space<vmem>>, vector<1x128x128xf32>
    %37 = vector.shape_cast %36 : vector<1x128x128xf32> to vector<128x128xf32>
    %cst_33 = arith.constant dense<0.000000e+00> : vector<256x128xf32>
    %38 = tpu.matmul %35, %37, %cst_33 {dimension_numbers = #tpu.dot_dimension_numbers<[1], [0], [0], [1], [0, 0, 1, 1], [], []>} : vector<256x128xf32>, vector<128x128xf32>, vector<256x128xf32> -> vector<256x128xf32>
    %39 = arith.addf %33, %38 : vector<256x128xf32>
    %c0_34 = arith.constant 0 : index
    %c18 = arith.constant 18 : index
    %c0_35 = arith.constant 0 : index
    %40 = vector.load %arg1[%c0_34, %c18, %c0_35] : memref<1x290x128xf32, #tpu.memory_space<vmem>>, vector<1x256x128xf32>
    %41 = vector.shape_cast %40 : vector<1x256x128xf32> to vector<256x128xf32>
    %c0_36 = arith.constant 0 : index
    %c0_37 = arith.constant 0 : index
    %42 = vector.load %arg5[%c0_36, %c0_37] : memref<256x1xf32, #tpu.memory_space<vmem>>, vector<256x1xf32>
    %43 = vector.broadcast %42 : vector<256x1xf32> to vector<256x128xf32>
    %44 = arith.mulf %41, %43 : vector<256x128xf32>
    %c5 = arith.constant 5 : index
    %c0_38 = arith.constant 0 : index
    %c0_39 = arith.constant 0 : index
    %45 = vector.load %arg2[%c5, %c0_38, %c0_39] : memref<9x128x128xf32, #tpu.memory_space<vmem>>, vector<1x128x128xf32>
    %46 = vector.shape_cast %45 : vector<1x128x128xf32> to vector<128x128xf32>
    %cst_40 = arith.constant dense<0.000000e+00> : vector<256x128xf32>
    %47 = tpu.matmul %44, %46, %cst_40 {dimension_numbers = #tpu.dot_dimension_numbers<[1], [0], [0], [1], [0, 0, 1, 1], [], []>} : vector<256x128xf32>, vector<128x128xf32>, vector<256x128xf32> -> vector<256x128xf32>
    %48 = arith.addf %39, %47 : vector<256x128xf32>
    %c0_41 = arith.constant 0 : index
    %c32 = arith.constant 32 : index
    %c0_42 = arith.constant 0 : index
    %49 = vector.load %arg1[%c0_41, %c32, %c0_42] : memref<1x290x128xf32, #tpu.memory_space<vmem>>, vector<1x256x128xf32>
    %50 = vector.shape_cast %49 : vector<1x256x128xf32> to vector<256x128xf32>
    %c0_43 = arith.constant 0 : index
    %c0_44 = arith.constant 0 : index
    %51 = vector.load %arg4[%c0_43, %c0_44] : memref<256x1xf32, #tpu.memory_space<vmem>>, vector<256x1xf32>
    %52 = vector.broadcast %51 : vector<256x1xf32> to vector<256x128xf32>
    %53 = arith.mulf %50, %52 : vector<256x128xf32>
    %c6 = arith.constant 6 : index
    %c0_45 = arith.constant 0 : index
    %c0_46 = arith.constant 0 : index
    %54 = vector.load %arg2[%c6, %c0_45, %c0_46] : memref<9x128x128xf32, #tpu.memory_space<vmem>>, vector<1x128x128xf32>
    %55 = vector.shape_cast %54 : vector<1x128x128xf32> to vector<128x128xf32>
    %cst_47 = arith.constant dense<0.000000e+00> : vector<256x128xf32>
    %56 = tpu.matmul %53, %55, %cst_47 {dimension_numbers = #tpu.dot_dimension_numbers<[1], [0], [0], [1], [0, 0, 1, 1], [], []>} : vector<256x128xf32>, vector<128x128xf32>, vector<256x128xf32> -> vector<256x128xf32>
    %57 = arith.addf %48, %56 : vector<256x128xf32>
    %c0_48 = arith.constant 0 : index
    %c33 = arith.constant 33 : index
    %c0_49 = arith.constant 0 : index
    %58 = vector.load %arg1[%c0_48, %c33, %c0_49] : memref<1x290x128xf32, #tpu.memory_space<vmem>>, vector<1x256x128xf32>
    %59 = vector.shape_cast %58 : vector<1x256x128xf32> to vector<256x128xf32>
    %c7 = arith.constant 7 : index
    %c0_50 = arith.constant 0 : index
    %c0_51 = arith.constant 0 : index
    %60 = vector.load %arg2[%c7, %c0_50, %c0_51] : memref<9x128x128xf32, #tpu.memory_space<vmem>>, vector<1x128x128xf32>
    %61 = vector.shape_cast %60 : vector<1x128x128xf32> to vector<128x128xf32>
    %cst_52 = arith.constant dense<0.000000e+00> : vector<256x128xf32>
    %62 = tpu.matmul %59, %61, %cst_52 {dimension_numbers = #tpu.dot_dimension_numbers<[1], [0], [0], [1], [0, 0, 1, 1], [], []>} : vector<256x128xf32>, vector<128x128xf32>, vector<256x128xf32> -> vector<256x128xf32>
    %63 = arith.addf %57, %62 : vector<256x128xf32>
    %c0_53 = arith.constant 0 : index
    %c34 = arith.constant 34 : index
    %c0_54 = arith.constant 0 : index
    %64 = vector.load %arg1[%c0_53, %c34, %c0_54] : memref<1x290x128xf32, #tpu.memory_space<vmem>>, vector<1x256x128xf32>
    %65 = vector.shape_cast %64 : vector<1x256x128xf32> to vector<256x128xf32>
    %c0_55 = arith.constant 0 : index
    %c0_56 = arith.constant 0 : index
    %66 = vector.load %arg5[%c0_55, %c0_56] : memref<256x1xf32, #tpu.memory_space<vmem>>, vector<256x1xf32>
    %67 = vector.broadcast %66 : vector<256x1xf32> to vector<256x128xf32>
    %68 = arith.mulf %65, %67 : vector<256x128xf32>
    %c8 = arith.constant 8 : index
    %c0_57 = arith.constant 0 : index
    %c0_58 = arith.constant 0 : index
    %69 = vector.load %arg2[%c8, %c0_57, %c0_58] : memref<9x128x128xf32, #tpu.memory_space<vmem>>, vector<1x128x128xf32>
    %70 = vector.shape_cast %69 : vector<1x128x128xf32> to vector<128x128xf32>
    %cst_59 = arith.constant dense<0.000000e+00> : vector<256x128xf32>
    %71 = tpu.matmul %68, %70, %cst_59 {dimension_numbers = #tpu.dot_dimension_numbers<[1], [0], [0], [1], [0, 0, 1, 1], [], []>} : vector<256x128xf32>, vector<128x128xf32>, vector<256x128xf32> -> vector<256x128xf32>
    %72 = arith.addf %63, %71 : vector<256x128xf32>
    %c0_60 = arith.constant 0 : index
    %c0_61 = arith.constant 0 : index
    %73 = vector.load %arg3[%c0_60, %c0_61] : memref<1x128xf32, #tpu.memory_space<vmem>>, vector<1x128xf32>
    %74 = vector.broadcast %73 : vector<1x128xf32> to vector<256x128xf32>
    %75 = arith.addf %72, %74 : vector<256x128xf32>
    %cst_62 = arith.constant 0.000000e+00 : f32
    %76 = vector.broadcast %cst_62 : f32 to vector<256x128xf32>
    %77 = arith.maximumf %75, %76 : vector<256x128xf32>
    %c0_63 = arith.constant 0 : index
    %c0_64 = arith.constant 0 : index
    %c0_65 = arith.constant 0 : index
    %78 = vector.load %arg6[%c0_63, %c0_64, %c0_65] : memref<1x256x128xf32, #tpu.memory_space<vmem>>, vector<1x256x128xf32>
    %79 = vector.shape_cast %78 : vector<1x256x128xf32> to vector<256x128xf32>
    %80 = vector.shape_cast %77 : vector<256x128xf32> to vector<1x256x128xf32>
    tpu.vector_store %arg6[%c0_63, %c0_64, %c0_65], %80 {strides = array<i32>} : memref<1x256x128xf32, #tpu.memory_space<vmem>>, vector<1x256x128xf32>,
    return
  }
  func.func @transform_0(%arg0: i32) -> (i32, i32, i32) {
    %c0_i32 = arith.constant 0 : i32
    %c0_i32_0 = arith.constant 0 : i32
    %c0_i32_1 = arith.constant 0 : i32
    return %arg0, %c0_i32, %c0_i32_0 : i32, i32, i32
  }
  func.func @transform_1(%arg0: i32) -> (i32, i32, i32) {
    %c0_i32 = arith.constant 0 : i32
    %c0_i32_0 = arith.constant 0 : i32
    %c0_i32_1 = arith.constant 0 : i32
    %c0_i32_2 = arith.constant 0 : i32
    return %c0_i32, %c0_i32_0, %c0_i32_1 : i32, i32, i32
  }
  func.func @transform_2(%arg0: i32) -> (i32, i32) {
    %c0_i32 = arith.constant 0 : i32
    %c0_i32_0 = arith.constant 0 : i32
    %c0_i32_1 = arith.constant 0 : i32
    return %c0_i32, %c0_i32_0 : i32, i32
  }
  func.func @transform_3(%arg0: i32) -> (i32, i32) {
    %c0_i32 = arith.constant 0 : i32
    %c0_i32_0 = arith.constant 0 : i32
    %c0_i32_1 = arith.constant 0 : i32
    return %c0_i32, %c0_i32_0 : i32, i32
  }
  func.func @transform_4(%arg0: i32) -> (i32, i32) {
    %c0_i32 = arith.constant 0 : i32
    %c0_i32_0 = arith.constant 0 : i32
    %c0_i32_1 = arith.constant 0 : i32
    return %c0_i32, %c0_i32_0 : i32, i32
  }
  func.func @transform_5(%arg0: i32) -> (i32, i32, i32) {
    %c0_i32 = arith.constant 0 : i32
    %c0_i32_0 = arith.constant 0 : i32
    %c0_i32_1 = arith.constant 0 : i32
    return %arg0, %c0_i32, %c0_i32_0 : i32, i32, i32
  }
}

module attributes {stable_mosaic.version = 11 : i64} {
  func.func @_maxpool_kernel(%arg0: i32, %arg1: memref<8x2x8x256xf32, #tpu.memory_space<vmem>>, %arg2: memref<8x8x128xf32, #tpu.memory_space<vmem>>) attributes {dimension_semantics = [#tpu.dimension_semantics<parallel>], iteration_bounds = array<i64: 2>, scalar_prefetch = 0 : i64, scratch_operands = 0 : i64, tpu.core_type = #tpu.core_type<tc>, window_params = [{transform_indices = @transform_0, window_bounds = array<i64: 8, 2, 8, 256>}, {transform_indices = @transform_1, window_bounds = array<i64: 8, 8, 128>}]} {
    %c0 = arith.constant 0 : index
    %c0_0 = arith.constant 0 : index
    %c0_1 = arith.constant 0 : index
    %c0_2 = arith.constant 0 : index
    %0 = vector.load %arg1[%c0, %c0_0, %c0_1, %c0_2] : memref<8x2x8x256xf32, #tpu.memory_space<vmem>>, vector<8x1x8x256xf32>
    %1 = vector.shape_cast %0 : vector<8x1x8x256xf32> to vector<8x8x256xf32>
    %c0_3 = arith.constant 0 : index
    %c1 = arith.constant 1 : index
    %c0_4 = arith.constant 0 : index
    %c0_5 = arith.constant 0 : index
    %2 = vector.load %arg1[%c0_3, %c1, %c0_4, %c0_5] : memref<8x2x8x256xf32, #tpu.memory_space<vmem>>, vector<8x1x8x256xf32>
    %3 = vector.shape_cast %2 : vector<8x1x8x256xf32> to vector<8x8x256xf32>
    %4 = arith.maximumf %1, %3 : vector<8x8x256xf32>
    %5 = vector.extract_strided_slice %4 {offsets = [0, 0, 0], sizes = [8, 8, 128], strides = [1, 1, 1]} : vector<8x8x256xf32> to vector<8x8x128xf32>
    %6 = vector.extract_strided_slice %4 {offsets = [0, 0, 128], sizes = [8, 8, 128], strides = [1, 1, 1]} : vector<8x8x256xf32> to vector<8x8x128xf32>
    %7 = arith.maximumf %5, %6 : vector<8x8x128xf32>
    %c0_6 = arith.constant 0 : index
    %c0_7 = arith.constant 0 : index
    %c0_8 = arith.constant 0 : index
    %8 = vector.load %arg2[%c0_6, %c0_7, %c0_8] : memref<8x8x128xf32, #tpu.memory_space<vmem>>, vector<8x8x128xf32>
    tpu.vector_store %arg2[%c0_6, %c0_7, %c0_8], %7 {strides = array<i32>} : memref<8x8x128xf32, #tpu.memory_space<vmem>>, vector<8x8x128xf32>,
    return
  }
  func.func @transform_0(%arg0: i32) -> (i32, i32, i32, i32) {
    %c0_i32 = arith.constant 0 : i32
    %c0_i32_0 = arith.constant 0 : i32
    %c0_i32_1 = arith.constant 0 : i32
    %c0_i32_2 = arith.constant 0 : i32
    return %arg0, %c0_i32, %c0_i32_0, %c0_i32_1 : i32, i32, i32, i32
  }
  func.func @transform_1(%arg0: i32) -> (i32, i32, i32) {
    %c0_i32 = arith.constant 0 : i32
    %c0_i32_0 = arith.constant 0 : i32
    %c0_i32_1 = arith.constant 0 : i32
    return %arg0, %c0_i32, %c0_i32_0 : i32, i32, i32
  }
}

module attributes {stable_mosaic.version = 11 : i64} {
  func.func @_conv3x3_kernel(%arg0: i32, %arg1: memref<1x82x128xf32, #tpu.memory_space<vmem>>, %arg2: memref<9x128x128xf32, #tpu.memory_space<vmem>>, %arg3: memref<1x128xf32, #tpu.memory_space<vmem>>, %arg4: memref<64x1xf32, #tpu.memory_space<vmem>>, %arg5: memref<64x1xf32, #tpu.memory_space<vmem>>, %arg6: memref<1x64x128xf32, #tpu.memory_space<vmem>>) attributes {dimension_semantics = [#tpu.dimension_semantics<parallel>], iteration_bounds = array<i64: 2>, scalar_prefetch = 0 : i64, scratch_operands = 0 : i64, tpu.core_type = #tpu.core_type<tc>, window_params = [{transform_indices = @transform_0, window_bounds = array<i64: 1, 82, 128>}, {pipeline_mode = #tpu.pipeline_mode<synchronous>, transform_indices = @transform_1, window_bounds = array<i64: 9, 128, 128>}, {pipeline_mode = #tpu.pipeline_mode<synchronous>, transform_indices = @transform_2, window_bounds = array<i64: 1, 128>}, {pipeline_mode = #tpu.pipeline_mode<synchronous>, transform_indices = @transform_3, window_bounds = array<i64: 64, 1>}, {pipeline_mode = #tpu.pipeline_mode<synchronous>, transform_indices = @transform_4, window_bounds = array<i64: 64, 1>}, {transform_indices = @transform_5, window_bounds = array<i64: 1, 64, 128>}]} {
    %cst = arith.constant 0.000000e+00 : f32
    %0 = vector.broadcast %cst : f32 to vector<64x128xf32>
    %c0 = arith.constant 0 : index
    %c0_0 = arith.constant 0 : index
    %c0_1 = arith.constant 0 : index
    %1 = vector.load %arg1[%c0, %c0_0, %c0_1] : memref<1x82x128xf32, #tpu.memory_space<vmem>>, vector<1x64x128xf32>
    %2 = vector.shape_cast %1 : vector<1x64x128xf32> to vector<64x128xf32>
    %c0_2 = arith.constant 0 : index
    %c0_3 = arith.constant 0 : index
    %3 = vector.load %arg4[%c0_2, %c0_3] : memref<64x1xf32, #tpu.memory_space<vmem>>, vector<64x1xf32>
    %4 = vector.broadcast %3 : vector<64x1xf32> to vector<64x128xf32>
    %5 = arith.mulf %2, %4 : vector<64x128xf32>
    %c0_4 = arith.constant 0 : index
    %c0_5 = arith.constant 0 : index
    %c0_6 = arith.constant 0 : index
    %6 = vector.load %arg2[%c0_4, %c0_5, %c0_6] : memref<9x128x128xf32, #tpu.memory_space<vmem>>, vector<1x128x128xf32>
    %7 = vector.shape_cast %6 : vector<1x128x128xf32> to vector<128x128xf32>
    %cst_7 = arith.constant dense<0.000000e+00> : vector<64x128xf32>
    %8 = tpu.matmul %5, %7, %cst_7 {dimension_numbers = #tpu.dot_dimension_numbers<[1], [0], [0], [1], [0, 0, 1, 1], [], []>} : vector<64x128xf32>, vector<128x128xf32>, vector<64x128xf32> -> vector<64x128xf32>
    %9 = arith.addf %0, %8 : vector<64x128xf32>
    %c0_8 = arith.constant 0 : index
    %c1 = arith.constant 1 : index
    %c0_9 = arith.constant 0 : index
    %10 = vector.load %arg1[%c0_8, %c1, %c0_9] : memref<1x82x128xf32, #tpu.memory_space<vmem>>, vector<1x64x128xf32>
    %11 = vector.shape_cast %10 : vector<1x64x128xf32> to vector<64x128xf32>
    %c1_10 = arith.constant 1 : index
    %c0_11 = arith.constant 0 : index
    %c0_12 = arith.constant 0 : index
    %12 = vector.load %arg2[%c1_10, %c0_11, %c0_12] : memref<9x128x128xf32, #tpu.memory_space<vmem>>, vector<1x128x128xf32>
    %13 = vector.shape_cast %12 : vector<1x128x128xf32> to vector<128x128xf32>
    %cst_13 = arith.constant dense<0.000000e+00> : vector<64x128xf32>
    %14 = tpu.matmul %11, %13, %cst_13 {dimension_numbers = #tpu.dot_dimension_numbers<[1], [0], [0], [1], [0, 0, 1, 1], [], []>} : vector<64x128xf32>, vector<128x128xf32>, vector<64x128xf32> -> vector<64x128xf32>
    %15 = arith.addf %9, %14 : vector<64x128xf32>
    %c0_14 = arith.constant 0 : index
    %c2 = arith.constant 2 : index
    %c0_15 = arith.constant 0 : index
    %16 = vector.load %arg1[%c0_14, %c2, %c0_15] : memref<1x82x128xf32, #tpu.memory_space<vmem>>, vector<1x64x128xf32>
    %17 = vector.shape_cast %16 : vector<1x64x128xf32> to vector<64x128xf32>
    %c0_16 = arith.constant 0 : index
    %c0_17 = arith.constant 0 : index
    %18 = vector.load %arg5[%c0_16, %c0_17] : memref<64x1xf32, #tpu.memory_space<vmem>>, vector<64x1xf32>
    %19 = vector.broadcast %18 : vector<64x1xf32> to vector<64x128xf32>
    %20 = arith.mulf %17, %19 : vector<64x128xf32>
    %c2_18 = arith.constant 2 : index
    %c0_19 = arith.constant 0 : index
    %c0_20 = arith.constant 0 : index
    %21 = vector.load %arg2[%c2_18, %c0_19, %c0_20] : memref<9x128x128xf32, #tpu.memory_space<vmem>>, vector<1x128x128xf32>
    %22 = vector.shape_cast %21 : vector<1x128x128xf32> to vector<128x128xf32>
    %cst_21 = arith.constant dense<0.000000e+00> : vector<64x128xf32>
    %23 = tpu.matmul %20, %22, %cst_21 {dimension_numbers = #tpu.dot_dimension_numbers<[1], [0], [0], [1], [0, 0, 1, 1], [], []>} : vector<64x128xf32>, vector<128x128xf32>, vector<64x128xf32> -> vector<64x128xf32>
    %24 = arith.addf %15, %23 : vector<64x128xf32>
    %c0_22 = arith.constant 0 : index
    %c8 = arith.constant 8 : index
    %c0_23 = arith.constant 0 : index
    %25 = vector.load %arg1[%c0_22, %c8, %c0_23] : memref<1x82x128xf32, #tpu.memory_space<vmem>>, vector<1x64x128xf32>
    %26 = vector.shape_cast %25 : vector<1x64x128xf32> to vector<64x128xf32>
    %c0_24 = arith.constant 0 : index
    %c0_25 = arith.constant 0 : index
    %27 = vector.load %arg4[%c0_24, %c0_25] : memref<64x1xf32, #tpu.memory_space<vmem>>, vector<64x1xf32>
    %28 = vector.broadcast %27 : vector<64x1xf32> to vector<64x128xf32>
    %29 = arith.mulf %26, %28 : vector<64x128xf32>
    %c3 = arith.constant 3 : index
    %c0_26 = arith.constant 0 : index
    %c0_27 = arith.constant 0 : index
    %30 = vector.load %arg2[%c3, %c0_26, %c0_27] : memref<9x128x128xf32, #tpu.memory_space<vmem>>, vector<1x128x128xf32>
    %31 = vector.shape_cast %30 : vector<1x128x128xf32> to vector<128x128xf32>
    %cst_28 = arith.constant dense<0.000000e+00> : vector<64x128xf32>
    %32 = tpu.matmul %29, %31, %cst_28 {dimension_numbers = #tpu.dot_dimension_numbers<[1], [0], [0], [1], [0, 0, 1, 1], [], []>} : vector<64x128xf32>, vector<128x128xf32>, vector<64x128xf32> -> vector<64x128xf32>
    %33 = arith.addf %24, %32 : vector<64x128xf32>
    %c0_29 = arith.constant 0 : index
    %c9 = arith.constant 9 : index
    %c0_30 = arith.constant 0 : index
    %34 = vector.load %arg1[%c0_29, %c9, %c0_30] : memref<1x82x128xf32, #tpu.memory_space<vmem>>, vector<1x64x128xf32>
    %35 = vector.shape_cast %34 : vector<1x64x128xf32> to vector<64x128xf32>
    %c4 = arith.constant 4 : index
    %c0_31 = arith.constant 0 : index
    %c0_32 = arith.constant 0 : index
    %36 = vector.load %arg2[%c4, %c0_31, %c0_32] : memref<9x128x128xf32, #tpu.memory_space<vmem>>, vector<1x128x128xf32>
    %37 = vector.shape_cast %36 : vector<1x128x128xf32> to vector<128x128xf32>
    %cst_33 = arith.constant dense<0.000000e+00> : vector<64x128xf32>
    %38 = tpu.matmul %35, %37, %cst_33 {dimension_numbers = #tpu.dot_dimension_numbers<[1], [0], [0], [1], [0, 0, 1, 1], [], []>} : vector<64x128xf32>, vector<128x128xf32>, vector<64x128xf32> -> vector<64x128xf32>
    %39 = arith.addf %33, %38 : vector<64x128xf32>
    %c0_34 = arith.constant 0 : index
    %c10 = arith.constant 10 : index
    %c0_35 = arith.constant 0 : index
    %40 = vector.load %arg1[%c0_34, %c10, %c0_35] : memref<1x82x128xf32, #tpu.memory_space<vmem>>, vector<1x64x128xf32>
    %41 = vector.shape_cast %40 : vector<1x64x128xf32> to vector<64x128xf32>
    %c0_36 = arith.constant 0 : index
    %c0_37 = arith.constant 0 : index
    %42 = vector.load %arg5[%c0_36, %c0_37] : memref<64x1xf32, #tpu.memory_space<vmem>>, vector<64x1xf32>
    %43 = vector.broadcast %42 : vector<64x1xf32> to vector<64x128xf32>
    %44 = arith.mulf %41, %43 : vector<64x128xf32>
    %c5 = arith.constant 5 : index
    %c0_38 = arith.constant 0 : index
    %c0_39 = arith.constant 0 : index
    %45 = vector.load %arg2[%c5, %c0_38, %c0_39] : memref<9x128x128xf32, #tpu.memory_space<vmem>>, vector<1x128x128xf32>
    %46 = vector.shape_cast %45 : vector<1x128x128xf32> to vector<128x128xf32>
    %cst_40 = arith.constant dense<0.000000e+00> : vector<64x128xf32>
    %47 = tpu.matmul %44, %46, %cst_40 {dimension_numbers = #tpu.dot_dimension_numbers<[1], [0], [0], [1], [0, 0, 1, 1], [], []>} : vector<64x128xf32>, vector<128x128xf32>, vector<64x128xf32> -> vector<64x128xf32>
    %48 = arith.addf %39, %47 : vector<64x128xf32>
    %c0_41 = arith.constant 0 : index
    %c16 = arith.constant 16 : index
    %c0_42 = arith.constant 0 : index
    %49 = vector.load %arg1[%c0_41, %c16, %c0_42] : memref<1x82x128xf32, #tpu.memory_space<vmem>>, vector<1x64x128xf32>
    %50 = vector.shape_cast %49 : vector<1x64x128xf32> to vector<64x128xf32>
    %c0_43 = arith.constant 0 : index
    %c0_44 = arith.constant 0 : index
    %51 = vector.load %arg4[%c0_43, %c0_44] : memref<64x1xf32, #tpu.memory_space<vmem>>, vector<64x1xf32>
    %52 = vector.broadcast %51 : vector<64x1xf32> to vector<64x128xf32>
    %53 = arith.mulf %50, %52 : vector<64x128xf32>
    %c6 = arith.constant 6 : index
    %c0_45 = arith.constant 0 : index
    %c0_46 = arith.constant 0 : index
    %54 = vector.load %arg2[%c6, %c0_45, %c0_46] : memref<9x128x128xf32, #tpu.memory_space<vmem>>, vector<1x128x128xf32>
    %55 = vector.shape_cast %54 : vector<1x128x128xf32> to vector<128x128xf32>
    %cst_47 = arith.constant dense<0.000000e+00> : vector<64x128xf32>
    %56 = tpu.matmul %53, %55, %cst_47 {dimension_numbers = #tpu.dot_dimension_numbers<[1], [0], [0], [1], [0, 0, 1, 1], [], []>} : vector<64x128xf32>, vector<128x128xf32>, vector<64x128xf32> -> vector<64x128xf32>
    %57 = arith.addf %48, %56 : vector<64x128xf32>
    %c0_48 = arith.constant 0 : index
    %c17 = arith.constant 17 : index
    %c0_49 = arith.constant 0 : index
    %58 = vector.load %arg1[%c0_48, %c17, %c0_49] : memref<1x82x128xf32, #tpu.memory_space<vmem>>, vector<1x64x128xf32>
    %59 = vector.shape_cast %58 : vector<1x64x128xf32> to vector<64x128xf32>
    %c7 = arith.constant 7 : index
    %c0_50 = arith.constant 0 : index
    %c0_51 = arith.constant 0 : index
    %60 = vector.load %arg2[%c7, %c0_50, %c0_51] : memref<9x128x128xf32, #tpu.memory_space<vmem>>, vector<1x128x128xf32>
    %61 = vector.shape_cast %60 : vector<1x128x128xf32> to vector<128x128xf32>
    %cst_52 = arith.constant dense<0.000000e+00> : vector<64x128xf32>
    %62 = tpu.matmul %59, %61, %cst_52 {dimension_numbers = #tpu.dot_dimension_numbers<[1], [0], [0], [1], [0, 0, 1, 1], [], []>} : vector<64x128xf32>, vector<128x128xf32>, vector<64x128xf32> -> vector<64x128xf32>
    %63 = arith.addf %57, %62 : vector<64x128xf32>
    %c0_53 = arith.constant 0 : index
    %c18 = arith.constant 18 : index
    %c0_54 = arith.constant 0 : index
    %64 = vector.load %arg1[%c0_53, %c18, %c0_54] : memref<1x82x128xf32, #tpu.memory_space<vmem>>, vector<1x64x128xf32>
    %65 = vector.shape_cast %64 : vector<1x64x128xf32> to vector<64x128xf32>
    %c0_55 = arith.constant 0 : index
    %c0_56 = arith.constant 0 : index
    %66 = vector.load %arg5[%c0_55, %c0_56] : memref<64x1xf32, #tpu.memory_space<vmem>>, vector<64x1xf32>
    %67 = vector.broadcast %66 : vector<64x1xf32> to vector<64x128xf32>
    %68 = arith.mulf %65, %67 : vector<64x128xf32>
    %c8_57 = arith.constant 8 : index
    %c0_58 = arith.constant 0 : index
    %c0_59 = arith.constant 0 : index
    %69 = vector.load %arg2[%c8_57, %c0_58, %c0_59] : memref<9x128x128xf32, #tpu.memory_space<vmem>>, vector<1x128x128xf32>
    %70 = vector.shape_cast %69 : vector<1x128x128xf32> to vector<128x128xf32>
    %cst_60 = arith.constant dense<0.000000e+00> : vector<64x128xf32>
    %71 = tpu.matmul %68, %70, %cst_60 {dimension_numbers = #tpu.dot_dimension_numbers<[1], [0], [0], [1], [0, 0, 1, 1], [], []>} : vector<64x128xf32>, vector<128x128xf32>, vector<64x128xf32> -> vector<64x128xf32>
    %72 = arith.addf %63, %71 : vector<64x128xf32>
    %c0_61 = arith.constant 0 : index
    %c0_62 = arith.constant 0 : index
    %73 = vector.load %arg3[%c0_61, %c0_62] : memref<1x128xf32, #tpu.memory_space<vmem>>, vector<1x128xf32>
    %74 = vector.broadcast %73 : vector<1x128xf32> to vector<64x128xf32>
    %75 = arith.addf %72, %74 : vector<64x128xf32>
    %cst_63 = arith.constant 0.000000e+00 : f32
    %76 = vector.broadcast %cst_63 : f32 to vector<64x128xf32>
    %77 = arith.maximumf %75, %76 : vector<64x128xf32>
    %c0_64 = arith.constant 0 : index
    %c0_65 = arith.constant 0 : index
    %c0_66 = arith.constant 0 : index
    %78 = vector.load %arg6[%c0_64, %c0_65, %c0_66] : memref<1x64x128xf32, #tpu.memory_space<vmem>>, vector<1x64x128xf32>
    %79 = vector.shape_cast %78 : vector<1x64x128xf32> to vector<64x128xf32>
    %80 = vector.shape_cast %77 : vector<64x128xf32> to vector<1x64x128xf32>
    tpu.vector_store %arg6[%c0_64, %c0_65, %c0_66], %80 {strides = array<i32>} : memref<1x64x128xf32, #tpu.memory_space<vmem>>, vector<1x64x128xf32>,
    return
  }
  func.func @transform_0(%arg0: i32) -> (i32, i32, i32) {
    %c0_i32 = arith.constant 0 : i32
    %c0_i32_0 = arith.constant 0 : i32
    %c0_i32_1 = arith.constant 0 : i32
    return %arg0, %c0_i32, %c0_i32_0 : i32, i32, i32
  }
  func.func @transform_1(%arg0: i32) -> (i32, i32, i32) {
    %c0_i32 = arith.constant 0 : i32
    %c0_i32_0 = arith.constant 0 : i32
    %c0_i32_1 = arith.constant 0 : i32
    %c0_i32_2 = arith.constant 0 : i32
    return %c0_i32, %c0_i32_0, %c0_i32_1 : i32, i32, i32
  }
  func.func @transform_2(%arg0: i32) -> (i32, i32) {
    %c0_i32 = arith.constant 0 : i32
    %c0_i32_0 = arith.constant 0 : i32
    %c0_i32_1 = arith.constant 0 : i32
    return %c0_i32, %c0_i32_0 : i32, i32
  }
  func.func @transform_3(%arg0: i32) -> (i32, i32) {
    %c0_i32 = arith.constant 0 : i32
    %c0_i32_0 = arith.constant 0 : i32
    %c0_i32_1 = arith.constant 0 : i32
    return %c0_i32, %c0_i32_0 : i32, i32
  }
  func.func @transform_4(%arg0: i32) -> (i32, i32) {
    %c0_i32 = arith.constant 0 : i32
    %c0_i32_0 = arith.constant 0 : i32
    %c0_i32_1 = arith.constant 0 : i32
    return %c0_i32, %c0_i32_0 : i32, i32
  }
  func.func @transform_5(%arg0: i32) -> (i32, i32, i32) {
    %c0_i32 = arith.constant 0 : i32
    %c0_i32_0 = arith.constant 0 : i32
    %c0_i32_1 = arith.constant 0 : i32
    return %arg0, %c0_i32, %c0_i32_0 : i32, i32, i32
  }
}

module attributes {stable_mosaic.version = 11 : i64} {
  func.func @_maxpool_kernel(%arg0: i32, %arg1: memref<4x2x4x256xf32, #tpu.memory_space<vmem>>, %arg2: memref<4x4x128xf32, #tpu.memory_space<vmem>>) attributes {dimension_semantics = [#tpu.dimension_semantics<parallel>], iteration_bounds = array<i64: 2>, scalar_prefetch = 0 : i64, scratch_operands = 0 : i64, tpu.core_type = #tpu.core_type<tc>, window_params = [{transform_indices = @transform_0, window_bounds = array<i64: 4, 2, 4, 256>}, {transform_indices = @transform_1, window_bounds = array<i64: 4, 4, 128>}]} {
    %c0 = arith.constant 0 : index
    %c0_0 = arith.constant 0 : index
    %c0_1 = arith.constant 0 : index
    %c0_2 = arith.constant 0 : index
    %0 = vector.load %arg1[%c0, %c0_0, %c0_1, %c0_2] : memref<4x2x4x256xf32, #tpu.memory_space<vmem>>, vector<4x1x4x256xf32>
    %1 = vector.shape_cast %0 : vector<4x1x4x256xf32> to vector<4x4x256xf32>
    %c0_3 = arith.constant 0 : index
    %c1 = arith.constant 1 : index
    %c0_4 = arith.constant 0 : index
    %c0_5 = arith.constant 0 : index
    %2 = vector.load %arg1[%c0_3, %c1, %c0_4, %c0_5] : memref<4x2x4x256xf32, #tpu.memory_space<vmem>>, vector<4x1x4x256xf32>
    %3 = vector.shape_cast %2 : vector<4x1x4x256xf32> to vector<4x4x256xf32>
    %4 = arith.maximumf %1, %3 : vector<4x4x256xf32>
    %5 = vector.extract_strided_slice %4 {offsets = [0, 0, 0], sizes = [4, 4, 128], strides = [1, 1, 1]} : vector<4x4x256xf32> to vector<4x4x128xf32>
    %6 = vector.extract_strided_slice %4 {offsets = [0, 0, 128], sizes = [4, 4, 128], strides = [1, 1, 1]} : vector<4x4x256xf32> to vector<4x4x128xf32>
    %7 = arith.maximumf %5, %6 : vector<4x4x128xf32>
    %c0_6 = arith.constant 0 : index
    %c0_7 = arith.constant 0 : index
    %c0_8 = arith.constant 0 : index
    %8 = vector.load %arg2[%c0_6, %c0_7, %c0_8] : memref<4x4x128xf32, #tpu.memory_space<vmem>>, vector<4x4x128xf32>
    tpu.vector_store %arg2[%c0_6, %c0_7, %c0_8], %7 {strides = array<i32>} : memref<4x4x128xf32, #tpu.memory_space<vmem>>, vector<4x4x128xf32>,
    return
  }
  func.func @transform_0(%arg0: i32) -> (i32, i32, i32, i32) {
    %c0_i32 = arith.constant 0 : i32
    %c0_i32_0 = arith.constant 0 : i32
    %c0_i32_1 = arith.constant 0 : i32
    %c0_i32_2 = arith.constant 0 : i32
    return %arg0, %c0_i32, %c0_i32_0, %c0_i32_1 : i32, i32, i32, i32
  }
  func.func @transform_1(%arg0: i32) -> (i32, i32, i32) {
    %c0_i32 = arith.constant 0 : i32
    %c0_i32_0 = arith.constant 0 : i32
    %c0_i32_1 = arith.constant 0 : i32
    return %arg0, %c0_i32, %c0_i32_0 : i32, i32, i32
  }
}

module attributes {stable_mosaic.version = 11 : i64} {
  func.func @_conv3x3_kernel(%arg0: i32, %arg1: memref<1x26x128xf32, #tpu.memory_space<vmem>>, %arg2: memref<9x128x128xf32, #tpu.memory_space<vmem>>, %arg3: memref<1x128xf32, #tpu.memory_space<vmem>>, %arg4: memref<16x1xf32, #tpu.memory_space<vmem>>, %arg5: memref<16x1xf32, #tpu.memory_space<vmem>>, %arg6: memref<1x16x128xf32, #tpu.memory_space<vmem>>) attributes {dimension_semantics = [#tpu.dimension_semantics<parallel>], iteration_bounds = array<i64: 2>, scalar_prefetch = 0 : i64, scratch_operands = 0 : i64, tpu.core_type = #tpu.core_type<tc>, window_params = [{transform_indices = @transform_0, window_bounds = array<i64: 1, 26, 128>}, {pipeline_mode = #tpu.pipeline_mode<synchronous>, transform_indices = @transform_1, window_bounds = array<i64: 9, 128, 128>}, {pipeline_mode = #tpu.pipeline_mode<synchronous>, transform_indices = @transform_2, window_bounds = array<i64: 1, 128>}, {pipeline_mode = #tpu.pipeline_mode<synchronous>, transform_indices = @transform_3, window_bounds = array<i64: 16, 1>}, {pipeline_mode = #tpu.pipeline_mode<synchronous>, transform_indices = @transform_4, window_bounds = array<i64: 16, 1>}, {transform_indices = @transform_5, window_bounds = array<i64: 1, 16, 128>}]} {
    %cst = arith.constant 0.000000e+00 : f32
    %0 = vector.broadcast %cst : f32 to vector<16x128xf32>
    %c0 = arith.constant 0 : index
    %c0_0 = arith.constant 0 : index
    %c0_1 = arith.constant 0 : index
    %1 = vector.load %arg1[%c0, %c0_0, %c0_1] : memref<1x26x128xf32, #tpu.memory_space<vmem>>, vector<1x16x128xf32>
    %2 = vector.shape_cast %1 : vector<1x16x128xf32> to vector<16x128xf32>
    %c0_2 = arith.constant 0 : index
    %c0_3 = arith.constant 0 : index
    %3 = vector.load %arg4[%c0_2, %c0_3] : memref<16x1xf32, #tpu.memory_space<vmem>>, vector<16x1xf32>
    %4 = vector.broadcast %3 : vector<16x1xf32> to vector<16x128xf32>
    %5 = arith.mulf %2, %4 : vector<16x128xf32>
    %c0_4 = arith.constant 0 : index
    %c0_5 = arith.constant 0 : index
    %c0_6 = arith.constant 0 : index
    %6 = vector.load %arg2[%c0_4, %c0_5, %c0_6] : memref<9x128x128xf32, #tpu.memory_space<vmem>>, vector<1x128x128xf32>
    %7 = vector.shape_cast %6 : vector<1x128x128xf32> to vector<128x128xf32>
    %cst_7 = arith.constant dense<0.000000e+00> : vector<16x128xf32>
    %8 = tpu.matmul %5, %7, %cst_7 {dimension_numbers = #tpu.dot_dimension_numbers<[1], [0], [0], [1], [0, 0, 1, 1], [], []>} : vector<16x128xf32>, vector<128x128xf32>, vector<16x128xf32> -> vector<16x128xf32>
    %9 = arith.addf %0, %8 : vector<16x128xf32>
    %c0_8 = arith.constant 0 : index
    %c1 = arith.constant 1 : index
    %c0_9 = arith.constant 0 : index
    %10 = vector.load %arg1[%c0_8, %c1, %c0_9] : memref<1x26x128xf32, #tpu.memory_space<vmem>>, vector<1x16x128xf32>
    %11 = vector.shape_cast %10 : vector<1x16x128xf32> to vector<16x128xf32>
    %c1_10 = arith.constant 1 : index
    %c0_11 = arith.constant 0 : index
    %c0_12 = arith.constant 0 : index
    %12 = vector.load %arg2[%c1_10, %c0_11, %c0_12] : memref<9x128x128xf32, #tpu.memory_space<vmem>>, vector<1x128x128xf32>
    %13 = vector.shape_cast %12 : vector<1x128x128xf32> to vector<128x128xf32>
    %cst_13 = arith.constant dense<0.000000e+00> : vector<16x128xf32>
    %14 = tpu.matmul %11, %13, %cst_13 {dimension_numbers = #tpu.dot_dimension_numbers<[1], [0], [0], [1], [0, 0, 1, 1], [], []>} : vector<16x128xf32>, vector<128x128xf32>, vector<16x128xf32> -> vector<16x128xf32>
    %15 = arith.addf %9, %14 : vector<16x128xf32>
    %c0_14 = arith.constant 0 : index
    %c2 = arith.constant 2 : index
    %c0_15 = arith.constant 0 : index
    %16 = vector.load %arg1[%c0_14, %c2, %c0_15] : memref<1x26x128xf32, #tpu.memory_space<vmem>>, vector<1x16x128xf32>
    %17 = vector.shape_cast %16 : vector<1x16x128xf32> to vector<16x128xf32>
    %c0_16 = arith.constant 0 : index
    %c0_17 = arith.constant 0 : index
    %18 = vector.load %arg5[%c0_16, %c0_17] : memref<16x1xf32, #tpu.memory_space<vmem>>, vector<16x1xf32>
    %19 = vector.broadcast %18 : vector<16x1xf32> to vector<16x128xf32>
    %20 = arith.mulf %17, %19 : vector<16x128xf32>
    %c2_18 = arith.constant 2 : index
    %c0_19 = arith.constant 0 : index
    %c0_20 = arith.constant 0 : index
    %21 = vector.load %arg2[%c2_18, %c0_19, %c0_20] : memref<9x128x128xf32, #tpu.memory_space<vmem>>, vector<1x128x128xf32>
    %22 = vector.shape_cast %21 : vector<1x128x128xf32> to vector<128x128xf32>
    %cst_21 = arith.constant dense<0.000000e+00> : vector<16x128xf32>
    %23 = tpu.matmul %20, %22, %cst_21 {dimension_numbers = #tpu.dot_dimension_numbers<[1], [0], [0], [1], [0, 0, 1, 1], [], []>} : vector<16x128xf32>, vector<128x128xf32>, vector<16x128xf32> -> vector<16x128xf32>
    %24 = arith.addf %15, %23 : vector<16x128xf32>
    %c0_22 = arith.constant 0 : index
    %c4 = arith.constant 4 : index
    %c0_23 = arith.constant 0 : index
    %25 = vector.load %arg1[%c0_22, %c4, %c0_23] : memref<1x26x128xf32, #tpu.memory_space<vmem>>, vector<1x16x128xf32>
    %26 = vector.shape_cast %25 : vector<1x16x128xf32> to vector<16x128xf32>
    %c0_24 = arith.constant 0 : index
    %c0_25 = arith.constant 0 : index
    %27 = vector.load %arg4[%c0_24, %c0_25] : memref<16x1xf32, #tpu.memory_space<vmem>>, vector<16x1xf32>
    %28 = vector.broadcast %27 : vector<16x1xf32> to vector<16x128xf32>
    %29 = arith.mulf %26, %28 : vector<16x128xf32>
    %c3 = arith.constant 3 : index
    %c0_26 = arith.constant 0 : index
    %c0_27 = arith.constant 0 : index
    %30 = vector.load %arg2[%c3, %c0_26, %c0_27] : memref<9x128x128xf32, #tpu.memory_space<vmem>>, vector<1x128x128xf32>
    %31 = vector.shape_cast %30 : vector<1x128x128xf32> to vector<128x128xf32>
    %cst_28 = arith.constant dense<0.000000e+00> : vector<16x128xf32>
    %32 = tpu.matmul %29, %31, %cst_28 {dimension_numbers = #tpu.dot_dimension_numbers<[1], [0], [0], [1], [0, 0, 1, 1], [], []>} : vector<16x128xf32>, vector<128x128xf32>, vector<16x128xf32> -> vector<16x128xf32>
    %33 = arith.addf %24, %32 : vector<16x128xf32>
    %c0_29 = arith.constant 0 : index
    %c5 = arith.constant 5 : index
    %c0_30 = arith.constant 0 : index
    %34 = vector.load %arg1[%c0_29, %c5, %c0_30] : memref<1x26x128xf32, #tpu.memory_space<vmem>>, vector<1x16x128xf32>
    %35 = vector.shape_cast %34 : vector<1x16x128xf32> to vector<16x128xf32>
    %c4_31 = arith.constant 4 : index
    %c0_32 = arith.constant 0 : index
    %c0_33 = arith.constant 0 : index
    %36 = vector.load %arg2[%c4_31, %c0_32, %c0_33] : memref<9x128x128xf32, #tpu.memory_space<vmem>>, vector<1x128x128xf32>
    %37 = vector.shape_cast %36 : vector<1x128x128xf32> to vector<128x128xf32>
    %cst_34 = arith.constant dense<0.000000e+00> : vector<16x128xf32>
    %38 = tpu.matmul %35, %37, %cst_34 {dimension_numbers = #tpu.dot_dimension_numbers<[1], [0], [0], [1], [0, 0, 1, 1], [], []>} : vector<16x128xf32>, vector<128x128xf32>, vector<16x128xf32> -> vector<16x128xf32>
    %39 = arith.addf %33, %38 : vector<16x128xf32>
    %c0_35 = arith.constant 0 : index
    %c6 = arith.constant 6 : index
    %c0_36 = arith.constant 0 : index
    %40 = vector.load %arg1[%c0_35, %c6, %c0_36] : memref<1x26x128xf32, #tpu.memory_space<vmem>>, vector<1x16x128xf32>
    %41 = vector.shape_cast %40 : vector<1x16x128xf32> to vector<16x128xf32>
    %c0_37 = arith.constant 0 : index
    %c0_38 = arith.constant 0 : index
    %42 = vector.load %arg5[%c0_37, %c0_38] : memref<16x1xf32, #tpu.memory_space<vmem>>, vector<16x1xf32>
    %43 = vector.broadcast %42 : vector<16x1xf32> to vector<16x128xf32>
    %44 = arith.mulf %41, %43 : vector<16x128xf32>
    %c5_39 = arith.constant 5 : index
    %c0_40 = arith.constant 0 : index
    %c0_41 = arith.constant 0 : index
    %45 = vector.load %arg2[%c5_39, %c0_40, %c0_41] : memref<9x128x128xf32, #tpu.memory_space<vmem>>, vector<1x128x128xf32>
    %46 = vector.shape_cast %45 : vector<1x128x128xf32> to vector<128x128xf32>
    %cst_42 = arith.constant dense<0.000000e+00> : vector<16x128xf32>
    %47 = tpu.matmul %44, %46, %cst_42 {dimension_numbers = #tpu.dot_dimension_numbers<[1], [0], [0], [1], [0, 0, 1, 1], [], []>} : vector<16x128xf32>, vector<128x128xf32>, vector<16x128xf32> -> vector<16x128xf32>
    %48 = arith.addf %39, %47 : vector<16x128xf32>
    %c0_43 = arith.constant 0 : index
    %c8 = arith.constant 8 : index
    %c0_44 = arith.constant 0 : index
    %49 = vector.load %arg1[%c0_43, %c8, %c0_44] : memref<1x26x128xf32, #tpu.memory_space<vmem>>, vector<1x16x128xf32>
    %50 = vector.shape_cast %49 : vector<1x16x128xf32> to vector<16x128xf32>
    %c0_45 = arith.constant 0 : index
    %c0_46 = arith.constant 0 : index
    %51 = vector.load %arg4[%c0_45, %c0_46] : memref<16x1xf32, #tpu.memory_space<vmem>>, vector<16x1xf32>
    %52 = vector.broadcast %51 : vector<16x1xf32> to vector<16x128xf32>
    %53 = arith.mulf %50, %52 : vector<16x128xf32>
    %c6_47 = arith.constant 6 : index
    %c0_48 = arith.constant 0 : index
    %c0_49 = arith.constant 0 : index
    %54 = vector.load %arg2[%c6_47, %c0_48, %c0_49] : memref<9x128x128xf32, #tpu.memory_space<vmem>>, vector<1x128x128xf32>
    %55 = vector.shape_cast %54 : vector<1x128x128xf32> to vector<128x128xf32>
    %cst_50 = arith.constant dense<0.000000e+00> : vector<16x128xf32>
    %56 = tpu.matmul %53, %55, %cst_50 {dimension_numbers = #tpu.dot_dimension_numbers<[1], [0], [0], [1], [0, 0, 1, 1], [], []>} : vector<16x128xf32>, vector<128x128xf32>, vector<16x128xf32> -> vector<16x128xf32>
    %57 = arith.addf %48, %56 : vector<16x128xf32>
    %c0_51 = arith.constant 0 : index
    %c9 = arith.constant 9 : index
    %c0_52 = arith.constant 0 : index
    %58 = vector.load %arg1[%c0_51, %c9, %c0_52] : memref<1x26x128xf32, #tpu.memory_space<vmem>>, vector<1x16x128xf32>
    %59 = vector.shape_cast %58 : vector<1x16x128xf32> to vector<16x128xf32>
    %c7 = arith.constant 7 : index
    %c0_53 = arith.constant 0 : index
    %c0_54 = arith.constant 0 : index
    %60 = vector.load %arg2[%c7, %c0_53, %c0_54] : memref<9x128x128xf32, #tpu.memory_space<vmem>>, vector<1x128x128xf32>
    %61 = vector.shape_cast %60 : vector<1x128x128xf32> to vector<128x128xf32>
    %cst_55 = arith.constant dense<0.000000e+00> : vector<16x128xf32>
    %62 = tpu.matmul %59, %61, %cst_55 {dimension_numbers = #tpu.dot_dimension_numbers<[1], [0], [0], [1], [0, 0, 1, 1], [], []>} : vector<16x128xf32>, vector<128x128xf32>, vector<16x128xf32> -> vector<16x128xf32>
    %63 = arith.addf %57, %62 : vector<16x128xf32>
    %c0_56 = arith.constant 0 : index
    %c10 = arith.constant 10 : index
    %c0_57 = arith.constant 0 : index
    %64 = vector.load %arg1[%c0_56, %c10, %c0_57] : memref<1x26x128xf32, #tpu.memory_space<vmem>>, vector<1x16x128xf32>
    %65 = vector.shape_cast %64 : vector<1x16x128xf32> to vector<16x128xf32>
    %c0_58 = arith.constant 0 : index
    %c0_59 = arith.constant 0 : index
    %66 = vector.load %arg5[%c0_58, %c0_59] : memref<16x1xf32, #tpu.memory_space<vmem>>, vector<16x1xf32>
    %67 = vector.broadcast %66 : vector<16x1xf32> to vector<16x128xf32>
    %68 = arith.mulf %65, %67 : vector<16x128xf32>
    %c8_60 = arith.constant 8 : index
    %c0_61 = arith.constant 0 : index
    %c0_62 = arith.constant 0 : index
    %69 = vector.load %arg2[%c8_60, %c0_61, %c0_62] : memref<9x128x128xf32, #tpu.memory_space<vmem>>, vector<1x128x128xf32>
    %70 = vector.shape_cast %69 : vector<1x128x128xf32> to vector<128x128xf32>
    %cst_63 = arith.constant dense<0.000000e+00> : vector<16x128xf32>
    %71 = tpu.matmul %68, %70, %cst_63 {dimension_numbers = #tpu.dot_dimension_numbers<[1], [0], [0], [1], [0, 0, 1, 1], [], []>} : vector<16x128xf32>, vector<128x128xf32>, vector<16x128xf32> -> vector<16x128xf32>
    %72 = arith.addf %63, %71 : vector<16x128xf32>
    %c0_64 = arith.constant 0 : index
    %c0_65 = arith.constant 0 : index
    %73 = vector.load %arg3[%c0_64, %c0_65] : memref<1x128xf32, #tpu.memory_space<vmem>>, vector<1x128xf32>
    %74 = vector.broadcast %73 : vector<1x128xf32> to vector<16x128xf32>
    %75 = arith.addf %72, %74 : vector<16x128xf32>
    %cst_66 = arith.constant 5.000000e-01 : f32
    %76 = vector.broadcast %cst_66 : f32 to vector<16x128xf32>
    %77 = arith.mulf %76, %75 : vector<16x128xf32>
    %cst_67 = arith.constant 0.707106769 : f32
    %78 = vector.broadcast %cst_67 : f32 to vector<16x128xf32>
    %79 = arith.mulf %75, %78 : vector<16x128xf32>
    %cst_68 = arith.constant -4.000000e+00 : f32
    %cst_69 = arith.constant 4.000000e+00 : f32
    %80 = vector.broadcast %cst_68 : f32 to vector<16x128xf32>
    %81 = arith.maximumf %80, %79 : vector<16x128xf32>
    %82 = vector.broadcast %cst_69 : f32 to vector<16x128xf32>
    %83 = arith.minimumf %82, %81 : vector<16x128xf32>
    %84 = arith.mulf %83, %83 : vector<16x128xf32>
    %cst_70 = arith.constant -2.72614237E-10 : f32
    %85 = vector.broadcast %cst_70 : f32 to vector<16x128xf32>
    %86 = arith.mulf %85, %84 : vector<16x128xf32>
    %cst_71 = arith.constant 2.77068146E-8 : f32
    %87 = vector.broadcast %cst_71 : f32 to vector<16x128xf32>
    %88 = arith.addf %86, %87 : vector<16x128xf32>
    %89 = arith.mulf %88, %84 : vector<16x128xf32>
    %cst_72 = arith.constant -2.10102394E-6 : f32
    %90 = vector.broadcast %cst_72 : f32 to vector<16x128xf32>
    %91 = arith.addf %89, %90 : vector<16x128xf32>
    %92 = arith.mulf %91, %84 : vector<16x128xf32>
    %cst_73 = arith.constant -5.69250624E-5 : f32
    %93 = vector.broadcast %cst_73 : f32 to vector<16x128xf32>
    %94 = arith.addf %92, %93 : vector<16x128xf32>
    %95 = arith.mulf %94, %84 : vector<16x128xf32>
    %cst_74 = arith.constant -7.34990637E-4 : f32
    %96 = vector.broadcast %cst_74 : f32 to vector<16x128xf32>
    %97 = arith.addf %95, %96 : vector<16x128xf32>
    %98 = arith.mulf %97, %84 : vector<16x128xf32>
    %cst_75 = arith.constant -2.954600e-03 : f32
    %99 = vector.broadcast %cst_75 : f32 to vector<16x128xf32>
    %100 = arith.addf %98, %99 : vector<16x128xf32>
    %101 = arith.mulf %100, %84 : vector<16x128xf32>
    %cst_76 = arith.constant -0.0160960332 : f32
    %102 = vector.broadcast %cst_76 : f32 to vector<16x128xf32>
    %103 = arith.addf %101, %102 : vector<16x128xf32>
    %104 = arith.mulf %103, %83 : vector<16x128xf32>
    %cst_77 = arith.constant -1.45660715E-5 : f32
    %105 = vector.broadcast %cst_77 : f32 to vector<16x128xf32>
    %106 = arith.mulf %105, %84 : vector<16x128xf32>
    %cst_78 = arith.constant -2.13374049E-4 : f32
    %107 = vector.broadcast %cst_78 : f32 to vector<16x128xf32>
    %108 = arith.addf %106, %107 : vector<16x128xf32>
    %109 = arith.mulf %108, %84 : vector<16x128xf32>
    %cst_79 = arith.constant -0.00168282702 : f32
    %110 = vector.broadcast %cst_79 : f32 to vector<16x128xf32>
    %111 = arith.addf %109, %110 : vector<16x128xf32>
    %112 = arith.mulf %111, %84 : vector<16x128xf32>
    %cst_80 = arith.constant -0.00737332925 : f32
    %113 = vector.broadcast %cst_80 : f32 to vector<16x128xf32>
    %114 = arith.addf %112, %113 : vector<16x128xf32>
    %115 = arith.mulf %114, %84 : vector<16x128xf32>
    %cst_81 = arith.constant -0.0142647391 : f32
    %116 = vector.broadcast %cst_81 : f32 to vector<16x128xf32>
    %117 = arith.addf %115, %116 : vector<16x128xf32>
    %118 = tpu.reciprocal %117 {approx = true} : vector<16x128xf32> -> vector<16x128xf32>
    %119 = arith.mulf %104, %118 : vector<16x128xf32>
    %cst_82 = arith.constant 1.000000e+00 : f32
    %120 = vector.broadcast %cst_82 : f32 to vector<16x128xf32>
    %121 = arith.addf %120, %119 : vector<16x128xf32>
    %122 = arith.mulf %77, %121 : vector<16x128xf32>
    %c0_83 = arith.constant 0 : index
    %c0_84 = arith.constant 0 : index
    %c0_85 = arith.constant 0 : index
    %123 = vector.load %arg6[%c0_83, %c0_84, %c0_85] : memref<1x16x128xf32, #tpu.memory_space<vmem>>, vector<1x16x128xf32>
    %124 = vector.shape_cast %123 : vector<1x16x128xf32> to vector<16x128xf32>
    %125 = vector.shape_cast %122 : vector<16x128xf32> to vector<1x16x128xf32>
    tpu.vector_store %arg6[%c0_83, %c0_84, %c0_85], %125 {strides = array<i32>} : memref<1x16x128xf32, #tpu.memory_space<vmem>>, vector<1x16x128xf32>,
    return
  }
  func.func @transform_0(%arg0: i32) -> (i32, i32, i32) {
    %c0_i32 = arith.constant 0 : i32
    %c0_i32_0 = arith.constant 0 : i32
    %c0_i32_1 = arith.constant 0 : i32
    return %arg0, %c0_i32, %c0_i32_0 : i32, i32, i32
  }
  func.func @transform_1(%arg0: i32) -> (i32, i32, i32) {
    %c0_i32 = arith.constant 0 : i32
    %c0_i32_0 = arith.constant 0 : i32
    %c0_i32_1 = arith.constant 0 : i32
    %c0_i32_2 = arith.constant 0 : i32
    return %c0_i32, %c0_i32_0, %c0_i32_1 : i32, i32, i32
  }
  func.func @transform_2(%arg0: i32) -> (i32, i32) {
    %c0_i32 = arith.constant 0 : i32
    %c0_i32_0 = arith.constant 0 : i32
    %c0_i32_1 = arith.constant 0 : i32
    return %c0_i32, %c0_i32_0 : i32, i32
  }
  func.func @transform_3(%arg0: i32) -> (i32, i32) {
    %c0_i32 = arith.constant 0 : i32
    %c0_i32_0 = arith.constant 0 : i32
    %c0_i32_1 = arith.constant 0 : i32
    return %c0_i32, %c0_i32_0 : i32, i32
  }
  func.func @transform_4(%arg0: i32) -> (i32, i32) {
    %c0_i32 = arith.constant 0 : i32
    %c0_i32_0 = arith.constant 0 : i32
    %c0_i32_1 = arith.constant 0 : i32
    return %c0_i32, %c0_i32_0 : i32, i32
  }
  func.func @transform_5(%arg0: i32) -> (i32, i32, i32) {
    %c0_i32 = arith.constant 0 : i32
    %c0_i32_0 = arith.constant 0 : i32
    %c0_i32_1 = arith.constant 0 : i32
    return %arg0, %c0_i32, %c0_i32_0 : i32, i32, i32
  }
}

module attributes {stable_mosaic.version = 11 : i64} {
  func.func @_fc_tail_kernel(%arg0: i32, %arg1: memref<2x2048xf32, #tpu.memory_space<vmem>>, %arg2: memref<2048x128xf32, #tpu.memory_space<vmem>>, %arg3: memref<1x128xf32, #tpu.memory_space<vmem>>, %arg4: memref<128x128xf32, #tpu.memory_space<vmem>>, %arg5: memref<1x128xf32, #tpu.memory_space<vmem>>, %arg6: memref<128x128xf32, #tpu.memory_space<vmem>>, %arg7: memref<1x128xf32, #tpu.memory_space<vmem>>, %arg8: memref<2x128xf32, #tpu.memory_space<vmem>>) attributes {dimension_semantics = [#tpu.dimension_semantics<arbitrary>], iteration_bounds = array<i64: 1>, scalar_prefetch = 0 : i64, scratch_operands = 0 : i64, tpu.core_type = #tpu.core_type<tc>, window_params = [{pipeline_mode = #tpu.pipeline_mode<synchronous>, transform_indices = @transform_0, window_bounds = array<i64: 2, 2048>}, {pipeline_mode = #tpu.pipeline_mode<synchronous>, transform_indices = @transform_1, window_bounds = array<i64: 2048, 128>}, {pipeline_mode = #tpu.pipeline_mode<synchronous>, transform_indices = @transform_2, window_bounds = array<i64: 1, 128>}, {pipeline_mode = #tpu.pipeline_mode<synchronous>, transform_indices = @transform_3, window_bounds = array<i64: 128, 128>}, {pipeline_mode = #tpu.pipeline_mode<synchronous>, transform_indices = @transform_4, window_bounds = array<i64: 1, 128>}, {pipeline_mode = #tpu.pipeline_mode<synchronous>, transform_indices = @transform_5, window_bounds = array<i64: 128, 128>}, {pipeline_mode = #tpu.pipeline_mode<synchronous>, transform_indices = @transform_6, window_bounds = array<i64: 1, 128>}, {pipeline_mode = #tpu.pipeline_mode<synchronous>, transform_indices = @transform_7, window_bounds = array<i64: 2, 128>}]} {
    %c0 = arith.constant 0 : index
    %c0_0 = arith.constant 0 : index
    %0 = vector.load %arg1[%c0, %c0_0] : memref<2x2048xf32, #tpu.memory_space<vmem>>, vector<2x2048xf32>
    %c0_1 = arith.constant 0 : index
    %c0_2 = arith.constant 0 : index
    %1 = vector.load %arg2[%c0_1, %c0_2] : memref<2048x128xf32, #tpu.memory_space<vmem>>, vector<2048x128xf32>
    %cst = arith.constant dense<0.000000e+00> : vector<2x128xf32>
    %2 = tpu.matmul %0, %1, %cst {dimension_numbers = #tpu.dot_dimension_numbers<[1], [0], [0], [1], [0, 0, 1, 1], [], []>} : vector<2x2048xf32>, vector<2048x128xf32>, vector<2x128xf32> -> vector<2x128xf32>
    %c0_3 = arith.constant 0 : index
    %c0_4 = arith.constant 0 : index
    %3 = vector.load %arg3[%c0_3, %c0_4] : memref<1x128xf32, #tpu.memory_space<vmem>>, vector<1x128xf32>
    %4 = vector.broadcast %3 : vector<1x128xf32> to vector<2x128xf32>
    %5 = arith.addf %2, %4 : vector<2x128xf32>
    %6 = arith.negf %5 : vector<2x128xf32>
    %7 = math.exp %6 : vector<2x128xf32>
    %cst_5 = arith.constant 1.000000e+00 : f32
    %8 = vector.broadcast %cst_5 : f32 to vector<2x128xf32>
    %9 = arith.addf %8, %7 : vector<2x128xf32>
    %10 = arith.divf %8, %9 : vector<2x128xf32>
    %c0_6 = arith.constant 0 : index
    %c0_7 = arith.constant 0 : index
    %11 = vector.load %arg4[%c0_6, %c0_7] : memref<128x128xf32, #tpu.memory_space<vmem>>, vector<128x128xf32>
    %cst_8 = arith.constant dense<0.000000e+00> : vector<2x128xf32>
    %12 = tpu.matmul %10, %11, %cst_8 {dimension_numbers = #tpu.dot_dimension_numbers<[1], [0], [0], [1], [0, 0, 1, 1], [], []>} : vector<2x128xf32>, vector<128x128xf32>, vector<2x128xf32> -> vector<2x128xf32>
    %c0_9 = arith.constant 0 : index
    %c0_10 = arith.constant 0 : index
    %13 = vector.load %arg5[%c0_9, %c0_10] : memref<1x128xf32, #tpu.memory_space<vmem>>, vector<1x128xf32>
    %14 = vector.broadcast %13 : vector<1x128xf32> to vector<2x128xf32>
    %15 = arith.addf %12, %14 : vector<2x128xf32>
    %cst_11 = arith.constant 0.000000e+00 : f32
    %16 = vector.broadcast %cst_11 : f32 to vector<2x128xf32>
    %17 = arith.maximumf %15, %16 : vector<2x128xf32>
    %c0_12 = arith.constant 0 : index
    %c0_13 = arith.constant 0 : index
    %18 = vector.load %arg6[%c0_12, %c0_13] : memref<128x128xf32, #tpu.memory_space<vmem>>, vector<128x128xf32>
    %cst_14 = arith.constant dense<0.000000e+00> : vector<2x128xf32>
    %19 = tpu.matmul %17, %18, %cst_14 {dimension_numbers = #tpu.dot_dimension_numbers<[1], [0], [0], [1], [0, 0, 1, 1], [], []>} : vector<2x128xf32>, vector<128x128xf32>, vector<2x128xf32> -> vector<2x128xf32>
    %c0_15 = arith.constant 0 : index
    %c0_16 = arith.constant 0 : index
    %20 = vector.load %arg7[%c0_15, %c0_16] : memref<1x128xf32, #tpu.memory_space<vmem>>, vector<1x128xf32>
    %21 = vector.broadcast %20 : vector<1x128xf32> to vector<2x128xf32>
    %22 = arith.addf %19, %21 : vector<2x128xf32>
    %c0_17 = arith.constant 0 : index
    %c0_18 = arith.constant 0 : index
    %23 = vector.load %arg8[%c0_17, %c0_18] : memref<2x128xf32, #tpu.memory_space<vmem>>, vector<2x128xf32>
    tpu.vector_store %arg8[%c0_17, %c0_18], %22 {strides = array<i32>} : memref<2x128xf32, #tpu.memory_space<vmem>>, vector<2x128xf32>,
    return
  }
  func.func @transform_0(%arg0: i32) -> (i32, i32) {
    %c0_i32 = arith.constant 0 : i32
    %c0_i32_0 = arith.constant 0 : i32
    %c0_i32_1 = arith.constant 0 : i32
    return %c0_i32, %c0_i32_0 : i32, i32
  }
  func.func @transform_1(%arg0: i32) -> (i32, i32) {
    %c0_i32 = arith.constant 0 : i32
    %c0_i32_0 = arith.constant 0 : i32
    %c0_i32_1 = arith.constant 0 : i32
    return %c0_i32, %c0_i32_0 : i32, i32
  }
  func.func @transform_2(%arg0: i32) -> (i32, i32) {
    %c0_i32 = arith.constant 0 : i32
    %c0_i32_0 = arith.constant 0 : i32
    %c0_i32_1 = arith.constant 0 : i32
    return %c0_i32, %c0_i32_0 : i32, i32
  }
  func.func @transform_3(%arg0: i32) -> (i32, i32) {
    %c0_i32 = arith.constant 0 : i32
    %c0_i32_0 = arith.constant 0 : i32
    %c0_i32_1 = arith.constant 0 : i32
    return %c0_i32, %c0_i32_0 : i32, i32
  }
  func.func @transform_4(%arg0: i32) -> (i32, i32) {
    %c0_i32 = arith.constant 0 : i32
    %c0_i32_0 = arith.constant 0 : i32
    %c0_i32_1 = arith.constant 0 : i32
    return %c0_i32, %c0_i32_0 : i32, i32
  }
  func.func @transform_5(%arg0: i32) -> (i32, i32) {
    %c0_i32 = arith.constant 0 : i32
    %c0_i32_0 = arith.constant 0 : i32
    %c0_i32_1 = arith.constant 0 : i32
    return %c0_i32, %c0_i32_0 : i32, i32
  }
  func.func @transform_6(%arg0: i32) -> (i32, i32) {
    %c0_i32 = arith.constant 0 : i32
    %c0_i32_0 = arith.constant 0 : i32
    %c0_i32_1 = arith.constant 0 : i32
    return %c0_i32, %c0_i32_0 : i32, i32
  }
  func.func @transform_7(%arg0: i32) -> (i32, i32) {
    %c0_i32 = arith.constant 0 : i32
    %c0_i32_0 = arith.constant 0 : i32
    %c0_i32_1 = arith.constant 0 : i32
    return %c0_i32, %c0_i32_0 : i32, i32
  }
}

</mosaic_0001>

<bundles_post_ra>
// kernel: random_attempt_forward.9
= control target key start
LH: loop header
LB: loop body
LE: loop exit
PB: predicated region body
PF: predicated region fallthrough
CT: control target
= control target key end

     0   :  { %s299_s6 = smov 0   ;;  %s360_s0 = inlined_call_operand.vmem [shape: f32[16,2,8,256], index: 0, kind: input, shape index: {}]   ;;  %s361_s1 = inlined_call_operand.vmem [shape: f32[16,8,128], index: 1, kind: output, shape index: {}]  }
   0x1 LB: > { %s244_s7 = sadd.s32 4294967295, %s287_s6   ;;  %p248_p0 = scmp.ge.s32.totalorder %s287_s6, 1  ;;  %s287_s6 = sphi %s299_s6, %s11_s6  }
   0x2   : > { %p89_p1 = scmp.lt.s32.totalorder %s287_s6, 3 }
   0x4   : > { %p90_p2 = pnand %p248_p0, %p89_p1 }
   0x5   : > { %s249_s8 = sshll.u32 (!%p90_p2), %s244_s7, 3 }
   0x6   : > { %93 = sbr.rel (%p90_p2) target bundleno = 32 (0x20), region = 24  ;;  %p111_p3 = scmp.lt.s32.totalorder (!%p90_p2), %s249_s8, 15 }
   0xd   : > { %s363_s8 = smov (!%p111_p3, %s249_s8), 15 }
   0xe   : > { %s272_s9 = sshll.u32 %s363_s8, 5  ;;  %s253_s13 = sshll.u32 %s363_s8, 3 }
   0xf   : > { %s310_s12 = scalar_lea.vmem %s360_s0, %s272_s9  ;;  %s324_s16 = scalar_lea.vmem %s361_s1, %s253_s13 }
  0x10   : > { %v123_v0 = vld [vmem:[%s310_s12] sm:$0xff]  ;;  %v124_v1 = vld [vmem:[%s310_s12 + $0x8] sm:$0xff]  ;;  %v254_v2 = vld [vmem:[%s310_s12 + $0x10] sm:$0xff] }
  0x11   : > { %v255_v3 = vld [vmem:[%s310_s12 + $0x18] sm:$0xff]  ;;  %v156_v4 = vmax.f32 %v123_v0, %v254_v2  ;;  %v125_v5 = vld [vmem:[%s310_s12 + $0x20] sm:$0xff]  ;;  %v126_v6 = vld [vmem:[%s310_s12 + $0x28] sm:$0xff] }
  0x12   : > { %v157_v7 = vmax.f32 %v124_v1, %v255_v3  ;;  %v256_v8 = vld [vmem:[%s310_s12 + $0x30] sm:$0xff]  ;;  %v257_v9 = vld [vmem:[%s310_s12 + $0x38] sm:$0xff]  ;;  %v127_v10 = vld [vmem:[%s310_s12 + $0x40] sm:$0xff] }
  0x13   : > { %v158_v11 = vmax.f32 %v125_v5, %v256_v8  ;;  %v159_v12 = vmax.f32 %v126_v6, %v257_v9  ;;  %v128_v13 = vld [vmem:[%s310_s12 + $0x48] sm:$0xff]  ;;  %v258_v14 = vld [vmem:[%s310_s12 + $0x50] sm:$0xff]  ;;  %v259_v15 = vld [vmem:[%s310_s12 + $0x58] sm:$0xff] }
  0x14   : > { %v172_v16 = vmax.f32 %v156_v4, %v157_v7  ;;  %v160_v17 = vmax.f32 %v127_v10, %v258_v14  ;;  %v161_v18 = vmax.f32 %v128_v13, %v259_v15  ;;  %v129_v19 = vld [vmem:[%s310_s12 + $0x60] sm:$0xff]  ;;  %v130_v20 = vld [vmem:[%s310_s12 + $0x68] sm:$0xff]  ;;  %v260_v21 = vld [vmem:[%s310_s12 + $0x70] sm:$0xff] }
  0x15   : > { %v173_v22 = vmax.f32 %v158_v11, %v159_v12  ;;  %v261_v23 = vld [vmem:[%s310_s12 + $0x78] sm:$0xff]  ;;  %v162_v24 = vmax.f32 %v129_v19, %v260_v21  ;;  %v131_v25 = vld [vmem:[%s310_s12 + $0x80] sm:$0xff]  ;;  %v132_v26 = vld [vmem:[%s310_s12 + $0x88] sm:$0xff] }
  0x16   : > { %180 = vst [vmem:[%s324_s16] sm:$0xff] %v172_v16  ;;  %v174_v27 = vmax.f32 %v160_v17, %v161_v18  ;;  %v163_v28 = vmax.f32 %v130_v20, %v261_v23  ;;  %v262_v29 = vld [vmem:[%s310_s12 + $0x90] sm:$0xff]  ;;  %v263_v30 = vld [vmem:[%s310_s12 + $0x98] sm:$0xff]  ;;  %v133_v31 = vld [vmem:[%s310_s12 + $0xa0] sm:$0xff] }
  0x17   : > { %181 = vst [vmem:[%s324_s16 + $0x8] sm:$0xff] %v173_v22  ;;  %v164_v32 = vmax.f32 %v131_v25, %v262_v29  ;;  %v165_v33 = vmax.f32 %v132_v26, %v263_v30  ;;  %v134_v34 = vld [vmem:[%s310_s12 + $0xa8] sm:$0xff]  ;;  %v264_v35 = vld [vmem:[%s310_s12 + $0xb0] sm:$0xff]  ;;  %v265_v36 = vld [vmem:[%s310_s12 + $0xb8] sm:$0xff] }
  0x18   : > { %182 = vst [vmem:[%s324_s16 + $0x10] sm:$0xff] %v174_v27  ;;  %v175_v37 = vmax.f32 %v162_v24, %v163_v28  ;;  %v166_v38 = vmax.f32 %v133_v31, %v264_v35  ;;  %v167_v39 = vmax.f32 %v134_v34, %v265_v36  ;;  %v135_v40 = vld [vmem:[%s310_s12 + $0xc0] sm:$0xff]  ;;  %v136_v41 = vld [vmem:[%s310_s12 + $0xc8] sm:$0xff]  ;;  %v266_v42 = vld [vmem:[%s310_s12 + $0xd0] sm:$0xff] }
  0x19   : > { %v176_v43 = vmax.f32 %v164_v32, %v165_v33  ;;  %v267_v44 = vld [vmem:[%s310_s12 + $0xd8] sm:$0xff]  ;;  %v168_v45 = vmax.f32 %v135_v40, %v266_v42  ;;  %v137_v46 = vld [vmem:[%s310_s12 + $0xe0] sm:$0xff]  ;;  %v138_v47 = vld [vmem:[%s310_s12 + $0xe8] sm:$0xff] }
  0x1a   : > { %183 = vst [vmem:[%s324_s16 + $0x18] sm:$0xff] %v175_v37  ;;  %v177_v48 = vmax.f32 %v166_v38, %v167_v39  ;;  %v169_v49 = vmax.f32 %v136_v41, %v267_v44  ;;  %v268_v50 = vld [vmem:[%s310_s12 + $0xf0] sm:$0xff]  ;;  %v269_v51 = vld [vmem:[%s310_s12 + $0xf8] sm:$0xff] }
  0x1b   : > { %184 = vst [vmem:[%s324_s16 + $0x20] sm:$0xff] %v176_v43  ;;  %v170_v52 = vmax.f32 %v137_v46, %v268_v50  ;;  %v171_v53 = vmax.f32 %v138_v47, %v269_v51 }
  0x1c   : > { %185 = vst [vmem:[%s324_s16 + $0x28] sm:$0xff] %v177_v48  ;;  %v178_v54 = vmax.f32 %v168_v45, %v169_v49 }
  0x1d   : > { %v179_v55 = vmax.f32 %v170_v52, %v171_v53 }
  0x1e   : > { %186 = vst [vmem:[%s324_s16 + $0x30] sm:$0xff] %v178_v54 }
  0x1f   : > { %187 = vst [vmem:[%s324_s16 + $0x38] sm:$0xff] %v179_v55 }
  0x20 PF: > { %s11_s6 = sadd.s32 1, %s287_s6  }
  0x21   : > { %p8_p4 = scmp.ge.s32.totalorder %s11_s6, 4  }
  0x23   :  { %10 = sbr.rel (!%p8_p4) target bundleno = 1 (0x1), region = 55 }

// kernel: random_attempt_forward.11
= control target key start
LH: loop header
LB: loop body
LE: loop exit
PB: predicated region body
PF: predicated region fallthrough
CT: control target
= control target key end

     0   :  { %s255_s6 = smov 0   ;;  %s272_s0 = inlined_call_operand.vmem [shape: f32[8,2,4,256], index: 0, kind: input, shape index: {}]   ;;  %s273_s1 = inlined_call_operand.vmem [shape: f32[8,4,128], index: 1, kind: output, shape index: {}]  }
   0x1 LB: > { %s212_s7 = sadd.s32 4294967295, %s243_s6   ;;  %p216_p0 = scmp.ge.s32.totalorder %s243_s6, 1  ;;  %s243_s6 = sphi %s255_s6, %s11_s6  }
   0x2   : > { %p89_p1 = scmp.lt.s32.totalorder %s243_s6, 3 }
   0x4   : > { %p90_p2 = pnand %p216_p0, %p89_p1 }
   0x5   : > { %s217_s8 = sshll.u32 (!%p90_p2), %s212_s7, 2 }
   0x6   : > { %93 = sbr.rel (%p90_p2) target bundleno = 26 (0x1a), region = 24  ;;  %p111_p3 = scmp.lt.s32.totalorder (!%p90_p2), %s217_s8, 7 }
   0xd   : > { %s275_s8 = smov (!%p111_p3, %s217_s8), 7 }
   0xe   : > { %s228_s9 = sshll.u32 %s275_s8, 4  ;;  %s221_s13 = sshll.u32 %s275_s8, 2 }
   0xf   : > { %s115_s12 = scalar_lea.vmem %s272_s0, %s228_s9  ;;  %s121_s16 = scalar_lea.vmem %s273_s1, %s221_s13 }
  0x10   : > { %v123_v0 = vld [vmem:[%s115_s12] sm:$0xff]  ;;  %v222_v1 = vld [vmem:[%s115_s12 + $0x8] sm:$0xff]  ;;  %v124_v2 = vld [vmem:[%s115_s12 + $0x10] sm:$0xff] }
  0x11   : > { %v132_v3 = vmax.f32 %v123_v0, %v222_v1  ;;  %v223_v4 = vld [vmem:[%s115_s12 + $0x18] sm:$0xff]  ;;  %v125_v5 = vld [vmem:[%s115_s12 + $0x20] sm:$0xff]  ;;  %v224_v6 = vld [vmem:[%s115_s12 + $0x28] sm:$0xff] }
  0x12   : > { %v133_v7 = vmax.f32 %v124_v2, %v223_v4  ;;  %v134_v8 = vmax.f32 %v125_v5, %v224_v6  ;;  %v126_v9 = vld [vmem:[%s115_s12 + $0x30] sm:$0xff]  ;;  %v225_v10 = vld [vmem:[%s115_s12 + $0x38] sm:$0xff] }
  0x13   : > { %v140_v11 = vrot.slane %v132_v3, 4  ;;  %v135_v12 = vmax.f32 %v126_v9, %v225_v10 }
  0x14   : > { %v141_v13 = vrot.slane %v133_v7, 4  ;;  %v142_v14 = vrot.slane %v134_v8, 4 }
  0x15   : > { %v148_v15 = vmax.f32 %v132_v3, %v140_v11  ;;  %v143_v16 = vrot.slane %v135_v12, 4 }
  0x16   : > { %v149_v17 = vmax.f32 %v133_v7, %v141_v13  ;;  %v150_v18 = vmax.f32 %v134_v8, %v142_v14 }
  0x17   : > { %152 = vst [vmem:[%s121_s16] sm:$0xf] %v148_v15  ;;  %v151_v19 = vmax.f32 %v135_v12, %v143_v16 }
  0x18   : > { %153 = vst [vmem:[%s121_s16 + $0x4] sm:$0xf] %v149_v17  ;;  %154 = vst [vmem:[%s121_s16 + $0x8] sm:$0xf] %v150_v18 }
  0x19   : > { %155 = vst [vmem:[%s121_s16 + $0xc] sm:$0xf] %v151_v19 }
  0x1a PF: > { %s11_s6 = sadd.s32 1, %s243_s6  }
  0x1b   : > { %p8_p4 = scmp.ge.s32.totalorder %s11_s6, 4  }
  0x1d   :  { %10 = sbr.rel (!%p8_p4) target bundleno = 1 (0x1), region = 55 }

// kernel: random_attempt_forward.7
= control target key start
LH: loop header
LB: loop body
LE: loop exit
PB: predicated region body
PF: predicated region fallthrough
CT: control target
= control target key end

     0   :  { %s5780_s18 = smov 0   ;;  %s7226_s0 = inlined_call_operand.vmem [shape: f32[2,290,3], index: 0, kind: input, shape index: {}]   ;;  %s7227_s1 = inlined_call_operand.vmem [shape: f32[9,3,128], index: 1, kind: input, shape index: {}]   ;;  %s7228_s2 = inlined_call_operand.vmem [shape: f32[1,128], index: 2, kind: input, shape index: {}]   ;;  %s7229_s3 = inlined_call_operand.vmem [shape: f32[256,1], index: 3, kind: input, shape index: {}]   ;;  %s7230_s4 = inlined_call_operand.vmem [shape: f32[256,1], index: 4, kind: input, shape index: {}]   ;;  %s7231_s5 = inlined_call_operand.vmem [shape: f32[2,256,128], index: 5, kind: output, shape index: {}]  }
   0x1 LB: > { %s4406_s19 = sadd.s32 4294967295, %s5747_s18   ;;  %p4410_p0 = scmp.ge.s32.totalorder %s5747_s18, 1  ;;  %s5747_s18 = sphi %s5780_s18, %s15_s18  }
   0x2   : > { %p187_p1 = scmp.lt.s32.totalorder %s5747_s18, 3 }
   0x4   : > { %p188_p2 = pnand %p4410_p0, %p187_p1 }
   0x6   : > { %191 = sbr.rel (%p188_p2) target bundleno = 650 (0x28a), region = 40 }
   0xd   : > { %v1200_v0 = vld [vmem:[%s7230_s4 + $0x10] sm:$0xff]  ;;  %v1198_v1 = vld [vmem:[%s7230_s4] sm:$0xff]  ;;  %v5749_v2 = vmov 0   ;;  %v1201_v3 = vld [vmem:[%s7230_s4 + $0x18] sm:$0xff]  ;;  %p215_p3 = scmp.lt.s32.totalorder %s4406_s19, 1  ;;  %vm613_vm0 = vcmask 1042432  }
   0xe   : > { %5739 = vset.pattern.permute.xlu1 %v5749_v2  ;;  %5738 = vset.pattern.permute.xlu0 %v5749_v2  ;;  %v1199_v4 = vld [vmem:[%s7230_s4 + $0x8] sm:$0xff]  ;;  %v1202_v6 = vld [vmem:[%s7230_s4 + $0x20] sm:$0xff]  ;;  %v1205_v7 = vld [vmem:[%s7230_s4 + $0x38] sm:$0xff]  ;;  %vm516_vm1 = vcmask 23552  }
   0xf   : > { %1242 = vperm.xlu1 %5739, %v1200_v0   ;;  %1232 = vperm.xlu0 %5738, %v1198_v1   ;;  %v1203_v5 = vld [vmem:[%s7230_s4 + $0x28] sm:$0xff]  ;;  %s7383_s19 = smov (!%p215_p3, %s4406_s19), 1  ;;  %v1204_v8 = vld [vmem:[%s7230_s4 + $0x30] sm:$0xff]  ;;  %v1206_v10 = vld [vmem:[%s7230_s4 + $0x40] sm:$0xff] }
  0x10   : > { %s5728_s11 = smul.u32 296, %s7383_s19  ;;  %v1207_v9 = vld [vmem:[%s7230_s4 + $0x48] sm:$0xff]  ;;  %v4414_v11 = vld [vmem:[%s7227_s1 + $0x4] sm:$0x7]  ;;  %v4549_v12 = vld [vmem:[%s7227_s1 + $0x10] sm:$0x7] }
  0x11   : > { %5020 = vmatprep.subr.msk.mxu1 %vm613_vm0, %v4414_v11  ;;  %v1209_v16 = vld [vmem:[%s7230_s4 + $0x58] sm:$0xff]  ;;  %v1208_v17 = vld [vmem:[%s7230_s4 + $0x50] sm:$0xff]  ;;  %5220 = vmatprep.subr.msk.mxu0 %vm613_vm0, %v4549_v12  ;;  %v1211_v20 = vld [vmem:[%s7230_s4 + $0x68] sm:$0xff]  ;;  %s4722_s15 = sshll.u32 %s7383_s19, 8 }
  0x12   : > { %s5824_s20 = scalar_lea.vmem %s7226_s0, %s5728_s11  ;;  %5021 = vmatpush3.msk.msra.mxu1 %vm613_vm0, %v4414_v11  ;;  %5221 = vmatpush3.msk.msra.mxu0 %vm613_vm0, %v4549_v12  ;;  %v1210_v21 = vld [vmem:[%s7230_s4 + $0x60] sm:$0xff]  ;;  %v1213_v24 = vld [vmem:[%s7230_s4 + $0x78] sm:$0xff]  ;;  %v1212_v25 = vld [vmem:[%s7230_s4 + $0x70] sm:$0xff]  ;;  %s7154_s21 = scalar_lea.vmem %s7231_s5, %s4722_s15 }
  0x13   : > { %1247 = vperm.xlu1 %5739, %v1201_v3   ;;  %1237 = vperm.xlu0 %5738, %v1199_v4   ;;  %v482_v13 = vld [vmem:[%s5824_s20 + $0x1] sm:$0xff]  ;;  %v2202_v14 = vld [vmem:[%s5824_s20 + $0x11] sm:$0xff]  ;;  %v483_v15 = vld [vmem:[%s5824_s20 + $0x9] sm:$0xff] }
  0x14   : > { %5022 = vmatprep.mubr.msk.f32.mxu1 %vm516_vm1, %v482_v13  ;;  %v2203_v18 = vld [vmem:[%s5824_s20 + $0x19] sm:$0xff]  ;;  %5222 = vmatprep.mubr.msk.f32.mxu0 %vm516_vm1, %v2202_v14  ;;  %v2204_v19 = vld [vmem:[%s5824_s20 + $0x21] sm:$0xff]  ;;  %v2205_v22 = vld [vmem:[%s5824_s20 + $0x29] sm:$0xff] }
  0x15   : > { %5023 = vmatmul.mubr.msk.f32.vlgmr.msra.gmra.mrb[0].mxu1 %vm516_vm1, %v483_v15  ;;  %5223 = vmatmul.mubr.msk.f32.vlgmr.msra.gmra.mrb[0].mxu0 %vm516_vm1, %v2203_v18  ;;  %v2206_v23 = vld [vmem:[%s5824_s20 + $0x31] sm:$0xff]  ;;  %v2207_v26 = vld [vmem:[%s5824_s20 + $0x39] sm:$0xff]  ;;  %v2208_v27 = vld [vmem:[%s5824_s20 + $0x41] sm:$0xff] }
  0x16   : > { %5025 = vmatprep.mubr.msk.f32.mxu1 %vm516_vm1, %v2202_v14  ;;  %5225 = vmatprep.mubr.msk.f32.mxu0 %vm516_vm1, %v2204_v19  ;;  %v481_v28 = vld [vmem:[%s7227_s1] sm:$0x7]  ;;  %v4583_v29 = vld [vmem:[%s7227_s1 + $0x14] sm:$0x7]  ;;  %v2209_v32 = vld [vmem:[%s5824_s20 + $0x49] sm:$0xff] }
  0x17   : > { %1257 = vperm.xlu1 %5739, %v1203_v5   ;;  %1252 = vperm.xlu0 %5738, %v1202_v6   ;;  %v1214_v30 = vld [vmem:[%s7230_s4 + $0x80] sm:$0xff]  ;;  %v2210_v33 = vld [vmem:[%s5824_s20 + $0x51] sm:$0xff]  ;;  %v1215_v34 = vld [vmem:[%s7230_s4 + $0x88] sm:$0xff] }
  0x18   : > { %v257_v31 = vld [vmem:[%s7229_s3] sm:$0xff]  ;;  %5070 = vmatprep.subr.msk.mxu1 %vm613_vm0, %v481_v28  ;;  %5270 = vmatprep.subr.msk.mxu0 %vm613_vm0, %v4583_v29  ;;  %v258_v35 = vld [vmem:[%s7229_s3 + $0x8] sm:$0xff]  ;;  %v1216_v38 = vld [vmem:[%s7230_s4 + $0x90] sm:$0xff] }
  0x19   : > { %5026 = vmatmul.mubr.msk.f32.gmra.mrb[2].mxu1 %vm516_vm1, %v2203_v18  ;;  %5226 = vmatmul.mubr.msk.f32.gmra.mrb[2].mxu0 %vm516_vm1, %v2205_v22  ;;  %v2211_v36 = vld [vmem:[%s5824_s20 + $0x59] sm:$0xff]  ;;  %v2212_v37 = vld [vmem:[%s5824_s20 + $0x61] sm:$0xff]  ;;  %v259_v39 = vld [vmem:[%s7229_s3 + $0x10] sm:$0xff] }
  0x1a   : > { %5028 = vmatprep.mubr.msk.f32.mxu1 %vm516_vm1, %v2204_v19  ;;  %5228 = vmatprep.mubr.msk.f32.mxu0 %vm516_vm1, %v2206_v23  ;;  %v2213_v40 = vld [vmem:[%s5824_s20 + $0x69] sm:$0xff]  ;;  %v2214_v41 = vld [vmem:[%s5824_s20 + $0x71] sm:$0xff]  ;;  %v2215_v45 = vld [vmem:[%s5824_s20 + $0x79] sm:$0xff] }
  0x1b   : > { %1267 = vperm.xlu1 %5739, %v1205_v7   ;;  %1262 = vperm.xlu0 %5738, %v1204_v8   ;;  %v5923_v42 = vld [vmem:[%s7227_s1 + $0x18] sm:$0x7]  ;;  %v2216_v46 = vld [vmem:[%s5824_s20 + $0x81] sm:$0xff]  ;;  %v2217_v49 = vld [vmem:[%s5824_s20 + $0x89] sm:$0xff] }
  0x1c   : > { %5071 = vmatpush3.msk.msra.mxu1 %vm613_vm0, %v481_v28  ;;  %5271 = vmatpush3.msk.msra.mxu0 %vm613_vm0, %v4583_v29  ;;  %v1217_v43 = vld [vmem:[%s7230_s4 + $0x98] sm:$0xff]  ;;  %v1218_v47 = vld [vmem:[%s7230_s4 + $0xa0] sm:$0xff]  ;;  %v1219_v50 = vld [vmem:[%s7230_s4 + $0xa8] sm:$0xff] }
  0x1d   : > { %5029 = vmatmul.mubr.msk.f32.gmra.mrb[4].mxu1 %vm516_vm1, %v2205_v22  ;;  %5229 = vmatmul.mubr.msk.f32.gmra.mrb[4].mxu0 %vm516_vm1, %v2207_v26  ;;  %v260_v44 = vld [vmem:[%s7229_s3 + $0x18] sm:$0xff]  ;;  %v261_v48 = vld [vmem:[%s7229_s3 + $0x20] sm:$0xff]  ;;  %v262_v51 = vld [vmem:[%s7229_s3 + $0x28] sm:$0xff] }
  0x1e   : > { %5031 = vmatprep.mubr.msk.f32.mxu1 %vm516_vm1, %v2206_v23  ;;  %5231 = vmatprep.mubr.msk.f32.mxu0 %vm516_vm1, %v2208_v27  ;;  %v500_v52 = vld [vmem:[%s5824_s20 + $0x91] sm:$0xff]  ;;  %v501_v53 = vld [vmem:[%s5824_s20 + $0x99] sm:$0xff]  ;;  %v502_v56 = vld [vmem:[%s5824_s20 + $0xa1] sm:$0xff] }
  0x1f   : > { %1277 = vperm.xlu1 %5739, %v1207_v9   ;;  %1272 = vperm.xlu0 %5738, %v1206_v10   ;;  %v1220_v54 = vld [vmem:[%s7230_s4 + $0xb0] sm:$0xff]  ;;  %v1221_v58 = vld [vmem:[%s7230_s4 + $0xb8] sm:$0xff]  ;;  %v1222_v62 = vld [vmem:[%s7230_s4 + $0xc0] sm:$0xff] }
  0x20   : > { %5320 = vmatprep.subr.msk.mxu0 %vm613_vm0, %v5923_v42  ;;  %v263_v55 = vld [vmem:[%s7229_s3 + $0x30] sm:$0xff]  ;;  %v264_v59 = vld [vmem:[%s7229_s3 + $0x38] sm:$0xff]  ;;  %v265_v63 = vld [vmem:[%s7229_s3 + $0x40] sm:$0xff] }
  0x21   : > { %5032 = vmatmul.mubr.msk.f32.gmra.mrb[6].mxu1 %vm516_vm1, %v2207_v26  ;;  %5232 = vmatmul.mubr.msk.f32.gmra.mrb[6].mxu0 %vm516_vm1, %v2209_v32  ;;  %v503_v57 = vld [vmem:[%s5824_s20 + $0xa9] sm:$0xff]  ;;  %v504_v60 = vld [vmem:[%s5824_s20 + $0xb1] sm:$0xff]  ;;  %v505_v61 = vld [vmem:[%s5824_s20 + $0xb9] sm:$0xff] }
  0x22   : > { %5034 = vmatprep.mubr.msk.f32.mxu1 %vm516_vm1, %v2208_v27  ;;  %5234 = vmatprep.mubr.msk.f32.mxu0 %vm516_vm1, %v2210_v33  ;;  %v506_v0 = vld [vmem:[%s5824_s20 + $0xc1] sm:$0xff]  ;;  %v507_v1 = vld [vmem:[%s5824_s20 + $0xc9] sm:$0xff]  ;;  %v508_v4 = vld [vmem:[%s5824_s20 + $0xd1] sm:$0xff] }
  0x23   : > { %1287 = vperm.xlu1 %5739, %v1209_v16   ;;  %1282 = vperm.xlu0 %5738, %v1208_v17   ;;  %v1223_v2 = vld [vmem:[%s7230_s4 + $0xc8] sm:$0xff]  ;;  %v509_v6 = vld [vmem:[%s5824_s20 + $0xd9] sm:$0xff]  ;;  %v1224_v7 = vld [vmem:[%s7230_s4 + $0xd0] sm:$0xff] }
  0x24   : > { %v266_v3 = vld [vmem:[%s7229_s3 + $0x48] sm:$0xff]  ;;  %v267_v8 = vld [vmem:[%s7229_s3 + $0x50] sm:$0xff]  ;;  %v1225_v11 = vld [vmem:[%s7230_s4 + $0xd8] sm:$0xff] }
  0x25   : > { %5035 = vmatmul.mubr.msk.f32.gmra.mrb[8].mxu1 %vm516_vm1, %v2209_v32  ;;  %5235 = vmatmul.mubr.msk.f32.gmra.mrb[8].mxu0 %vm516_vm1, %v2211_v36  ;;  %v6002_v5 = vld [vmem:[%s7227_s1 + $0x8] sm:$0x7]  ;;  %v268_v12 = vld [vmem:[%s7229_s3 + $0x58] sm:$0xff]  ;;  %v1226_v15 = vld [vmem:[%s7230_s4 + $0xe0] sm:$0xff] }
  0x26   : > { %5037 = vmatprep.mubr.msk.f32.mxu1 %vm516_vm1, %v2210_v33  ;;  %5237 = vmatprep.mubr.msk.f32.mxu0 %vm516_vm1, %v2212_v37  ;;  %v510_v9 = vld [vmem:[%s5824_s20 + $0xe1] sm:$0xff]  ;;  %v511_v10 = vld [vmem:[%s5824_s20 + $0xe9] sm:$0xff]  ;;  %v512_v13 = vld [vmem:[%s5824_s20 + $0xf1] sm:$0xff] }
  0x27   : > { %1297 = vperm.xlu1 %5739, %v1211_v20   ;;  %1292 = vperm.xlu0 %5738, %v1210_v21   ;;  %v513_v14 = vld [vmem:[%s5824_s20 + $0xf9] sm:$0xff]  ;;  %v1227_v17 = vld [vmem:[%s7230_s4 + $0xe8] sm:$0xff]  ;;  %v1228_v19 = vld [vmem:[%s7230_s4 + $0xf0] sm:$0xff] }
  0x28   : > { %5120 = vmatprep.subr.msk.mxu1 %vm613_vm0, %v6002_v5  ;;  %v269_v16 = vld [vmem:[%s7229_s3 + $0x60] sm:$0xff]  ;;  %v270_v18 = vld [vmem:[%s7229_s3 + $0x68] sm:$0xff]  ;;  %v271_v20 = vld [vmem:[%s7229_s3 + $0x70] sm:$0xff] }
  0x29   : > { %5038 = vmatmul.mubr.msk.f32.gmra.mrb[10].mxu1 %vm516_vm1, %v2211_v36  ;;  %5238 = vmatmul.mubr.msk.f32.gmra.mrb[10].mxu0 %vm516_vm1, %v2213_v40  ;;  %v1229_v21 = vld [vmem:[%s7230_s4 + $0xf8] sm:$0xff]  ;;  %v274_v23 = vld [vmem:[%s7229_s3 + $0x88] sm:$0xff]  ;;  %v275_v26 = vld [vmem:[%s7229_s3 + $0x90] sm:$0xff] }
  0x2a   : > { %5040 = vmatprep.mubr.msk.f32.mxu1 %vm516_vm1, %v2212_v37  ;;  %5240 = vmatprep.mubr.msk.f32.mxu0 %vm516_vm1, %v2214_v41  ;;  %v272_v22 = vld [vmem:[%s7229_s3 + $0x78] sm:$0xff]  ;;  %v278_v27 = vld [vmem:[%s7229_s3 + $0xa8] sm:$0xff]  ;;  %v277_v28 = vld [vmem:[%s7229_s3 + $0xa0] sm:$0xff] }
  0x2b   : > { %1307 = vperm.xlu1 %5739, %v1213_v24   ;;  %1302 = vperm.xlu0 %5738, %v1212_v25   ;;  %v273_v24 = vld [vmem:[%s7229_s3 + $0x80] sm:$0xff]  ;;  %v276_v25 = vld [vmem:[%s7229_s3 + $0x98] sm:$0xff] }
  0x2c   : > { %v280_v29 = vld [vmem:[%s7229_s3 + $0xb8] sm:$0xff]  ;;  %v281_v32 = vld [vmem:[%s7229_s3 + $0xc0] sm:$0xff] }
  0x2d   : > { %5041 = vmatmul.mubr.msk.f32.gmra.mrb[12].mxu1 %vm516_vm1, %v2213_v40  ;;  %5241 = vmatmul.mubr.msk.f32.gmra.mrb[12].mxu0 %vm516_vm1, %v2215_v45  ;;  %v284_v33 = vld [vmem:[%s7229_s3 + $0xd8] sm:$0xff]  ;;  %v285_v36 = vld [vmem:[%s7229_s3 + $0xe0] sm:$0xff] }
  0x2e   : > { %5043 = vmatprep.mubr.msk.f32.mxu1 %vm516_vm1, %v2214_v41  ;;  %5243 = vmatprep.mubr.msk.f32.mxu0 %vm516_vm1, %v2216_v46  ;;  %v288_v37 = vld [vmem:[%s7229_s3 + $0xf8] sm:$0xff]  ;;  %v2594_v41 = vld [vmem:[%s5824_s20 + $0x22] sm:$0xff] }
  0x2f   : > { %1312 = vperm.xlu1 %5739, %v1214_v30   ;;  %291 = vperm.xlu0 %5738, %v257_v31   ;;  %v279_v30 = vld [vmem:[%s7229_s3 + $0xb0] sm:$0xff]  ;;  %v282_v31 = vld [vmem:[%s7229_s3 + $0xc8] sm:$0xff] }
  0x30   : > { %v3828_v40 = vld [vmem:[%s5824_s20 + $0x32] sm:$0xff] }
  0x31   : > { %5044 = vmatmul.mubr.msk.f32.gmra.mrb[14].mxu1 %vm516_vm1, %v2215_v45  ;;  %5244 = vmatmul.mubr.msk.f32.gmra.mrb[14].mxu0 %vm516_vm1, %v2217_v49 }
  0x32   : > { %5046 = vmatprep.mubr.msk.f32.mxu1 %vm516_vm1, %v2216_v46 }
  0x33   : > { %1317 = vperm.xlu1 %5739, %v1215_v34   ;;  %296 = vperm.xlu0 %5738, %v258_v35   ;;  %v283_v34 = vld [vmem:[%s7229_s3 + $0xd0] sm:$0xff]  ;;  %v286_v35 = vld [vmem:[%s7229_s3 + $0xe8] sm:$0xff] }
  0x35   : > { %5047 = vmatmul.mubr.msk.f32.gmra.mrb[16].mxu1 %vm516_vm1, %v2217_v49  ;;  %v1169_v49 = vld [vmem:[%s5824_s20 + $0x1a] sm:$0xff] }
  0x36   : > { %5049 = vmatprep.mubr.msk.f32.mxu1 %vm516_vm1, %v500_v52 }
  0x37   : > { %1322 = vperm.xlu1 %5739, %v1216_v38   ;;  %301 = vperm.xlu0 %5738, %v259_v39   ;;  %v287_v38 = vld [vmem:[%s7229_s3 + $0xf0] sm:$0xff] }
  0x38   : > { %v1168_v39 = vld [vmem:[%s5824_s20 + $0x12] sm:$0xff] }
  0x39   : > { %5050 = vmatmul.mubr.msk.f32.gmra.mrb[18].mxu1 %vm516_vm1, %v501_v53 }
  0x3a   : > { %5052 = vmatprep.mubr.msk.f32.mxu1 %vm516_vm1, %v502_v56 }
  0x3b   : > { %1327 = vperm.xlu1 %5739, %v1217_v43   ;;  %306 = vperm.xlu0 %5738, %v260_v44  }
  0x3d   : > { %5053 = vmatmul.mubr.msk.f32.gmra.mrb[20].mxu1 %vm516_vm1, %v503_v57 }
  0x3e   : > { %5055 = vmatprep.mubr.msk.f32.mxu1 %vm516_vm1, %v504_v60  ;;  %v3830_v60 = vld [vmem:[%s5824_s20 + $0x42] sm:$0xff] }
  0x3f   : > { %1332 = vperm.xlu1 %5739, %v1218_v47   ;;  %311 = vperm.xlu0 %5738, %v261_v48  }
  0x41   : > { %5056 = vmatmul.mubr.msk.f32.gmra.mrb[22].mxu1 %vm516_vm1, %v505_v61 }
  0x42   : > { %5058 = vmatprep.mubr.msk.f32.mxu1 %vm516_vm1, %v506_v0 }
  0x43   : > { %1337 = vperm.xlu1 %5739, %v1219_v50   ;;  %316 = vperm.xlu0 %5738, %v262_v51   ;;  %v3829_v50 = vld [vmem:[%s5824_s20 + $0x3a] sm:$0xff]  ;;  %v2595_v51 = vld [vmem:[%s5824_s20 + $0x2a] sm:$0xff] }
  0x45   : > { %5059 = vmatmul.mubr.msk.f32.gmra.mrb[24].mxu1 %vm516_vm1, %v507_v1 }
  0x46   : > { %5061 = vmatprep.mubr.msk.f32.mxu1 %vm516_vm1, %v508_v4 }
  0x47   : > { %1342 = vperm.xlu1 %5739, %v1220_v54   ;;  %321 = vperm.xlu0 %5738, %v263_v55  }
  0x49   : > { %5062 = vmatmul.mubr.msk.f32.gmra.mrb[26].mxu1 %vm516_vm1, %v509_v6 }
  0x4a   : > { %5064 = vmatprep.mubr.msk.f32.mxu1 %vm516_vm1, %v510_v9 }
  0x4b   : > { %1347 = vperm.xlu1 %5739, %v1221_v58   ;;  %326 = vperm.xlu0 %5738, %v264_v59   ;;  %v3831_v58 = vld [vmem:[%s5824_s20 + $0x4a] sm:$0xff] }
  0x4d   : > { %5065 = vmatmul.mubr.msk.f32.gmra.mrb[28].mxu1 %vm516_vm1, %v511_v10 }
  0x4e   : > { %5067 = vmatprep.mubr.msk.f32.mxu1 %vm516_vm1, %v512_v13 }
  0x4f   : > { %1352 = vperm.xlu1 %5739, %v1222_v62   ;;  %331 = vperm.xlu0 %5738, %v265_v63   ;;  %v6135_v63 = vld [vmem:[%s7227_s1 + $0x1c] sm:$0x7] }
  0x51   : > { %5068 = vmatmul.mubr.msk.f32.gmra.mrb[30].mxu1 %vm516_vm1, %v513_v14 }
  0x53   : > { %1357 = vperm.xlu1 %5739, %v1223_v2   ;;  %336 = vperm.xlu0 %5738, %v266_v3  }
  0x57   : > { %1362 = vperm.xlu1 %5739, %v1224_v7   ;;  %341 = vperm.xlu0 %5738, %v267_v8   ;;  %v3833_v7 = vld [vmem:[%s5824_s20 + $0x5a] sm:$0xff]  ;;  %v3832_v8 = vld [vmem:[%s5824_s20 + $0x52] sm:$0xff] }
  0x5b   : > { %1367 = vperm.xlu1 %5739, %v1225_v11   ;;  %346 = vperm.xlu0 %5738, %v268_v12  }
  0x5f   : > { %1372 = vperm.xlu1 %5739, %v1226_v15   ;;  %351 = vperm.xlu0 %5738, %v269_v16   ;;  %v3835_v16 = vld [vmem:[%s5824_s20 + $0x6a] sm:$0xff] }
  0x63   : > { %1377 = vperm.xlu1 %5739, %v1227_v17   ;;  %356 = vperm.xlu0 %5738, %v270_v18   ;;  %v3834_v17 = vld [vmem:[%s5824_s20 + $0x62] sm:$0xff] }
  0x67   : > { %1382 = vperm.xlu1 %5739, %v1228_v19   ;;  %361 = vperm.xlu0 %5738, %v271_v20  }
  0x6b   : > { %1387 = vperm.xlu1 %5739, %v1229_v21   ;;  %366 = vperm.xlu0 %5738, %v272_v22  }
  0x6f   : > { %376 = vperm.xlu1 %5739, %v274_v23   ;;  %371 = vperm.xlu0 %5738, %v273_v24  }
  0x73   : > { %386 = vperm.xlu1 %5739, %v276_v25   ;;  %381 = vperm.xlu0 %5738, %v275_v26   ;;  %v3837_v26 = vld [vmem:[%s5824_s20 + $0x7a] sm:$0xff] }
  0x77   : > { %396 = vperm.xlu1 %5739, %v278_v27   ;;  %391 = vperm.xlu0 %5738, %v277_v28   ;;  %v3836_v27 = vld [vmem:[%s5824_s20 + $0x72] sm:$0xff] }
  0x7b   : > { %406 = vperm.xlu1 %5739, %v280_v29   ;;  %401 = vperm.xlu0 %5738, %v279_v30  }
  0x7f   : > { %416 = vperm.xlu1 %5739, %v282_v31   ;;  %411 = vperm.xlu0 %5738, %v281_v32  }
  0x83   : > { %426 = vperm.xlu1 %5739, %v284_v33   ;;  %421 = vperm.xlu0 %5738, %v283_v34  }
  0x87   : > { %436 = vperm.xlu1 %5739, %v286_v35   ;;  %431 = vperm.xlu0 %5738, %v285_v36   ;;  %v3839_v36 = vld [vmem:[%s5824_s20 + $0x8a] sm:$0xff] }
  0x8b   : > { %446 = vperm.xlu1 %5739, %v288_v37   ;;  %441 = vperm.xlu0 %5738, %v287_v38   ;;  %v3838_v37 = vld [vmem:[%s5824_s20 + $0x82] sm:$0xff] }
  0x8e   : > { %v1243_v43 = vpop.permute.xlu1 %1242  ;;  %v6105_v44 = vpop.permute.xlu0 %1232 }
  0x8f   : > { %v6107_v45 = vmul.f32 %v1243_v43, %v1168_v39  ;;  %v6109_v46 = vmul.f32 %v3828_v40, %v1243_v43  ;;  %v2624_v47 = vmul.f32 %v6105_v44, %v1168_v39  ;;  %v6113_v48 = vmul.f32 %v2594_v41, %v6105_v44 }
  0x90   : > { %v2626_v59 = vmul.f32 %v2594_v41, %v1243_v43 }
  0x91   : > { %7234 = vst [vmem:[#allocation2_spill] sm:$0xff] %v6109_v46  ;;  %7235 = vst [vmem:[#allocation3_spill] sm:$0xff] %v6113_v48  ;;  %5272 = vmatprep.mubr.msk.f32.mxu0 %vm516_vm1, %v2624_v47  ;;  %v6380_v48 = vld [vmem:[%s5824_s20 + $0x58] sm:$0xff] }
  0x92   : > { %v1248_v52 = vpop.permute.xlu1 %1247  ;;  %v6119_v53 = vpop.permute.xlu0 %1237 }
  0x93   : > { %v6121_v54 = vmul.f32 %v1248_v52, %v1169_v49  ;;  %v6123_v55 = vmul.f32 %v3829_v50, %v1248_v52  ;;  %v2625_v56 = vmul.f32 %v6119_v53, %v1169_v49  ;;  %v6127_v57 = vmul.f32 %v2595_v51, %v6119_v53 }
  0x94   : > { %v2627_v3 = vmul.f32 %v2595_v51, %v1248_v52  ;;  %v3840_v52 = vld [vmem:[%s5824_s20 + $0x92] sm:$0xff] }
  0x95   : > { %7236 = vst [vmem:[#allocation4_spill] sm:$0xff] %v6123_v55  ;;  %7237 = vst [vmem:[#allocation5_spill] sm:$0xff] %v6127_v57  ;;  %5273 = vmatmul.mubr.msk.f32.vlgmr.msra.gmra.mrb[0].mxu0 %vm516_vm1, %v2625_v56 }
  0x96   : > { %v1258_v61 = vpop.permute.xlu1 %1257  ;;  %v1253_v62 = vpop.permute.xlu0 %1252  ;;  %5275 = vmatprep.mubr.msk.f32.mxu0 %vm516_vm1, %v2626_v59  ;;  %5321 = vmatpush3.msk.msra.mxu0 %vm613_vm0, %v5923_v42 }
  0x97   : > { %v6137_v0 = vmul.f32 %v2595_v51, %v1258_v61  ;;  %v6139_v1 = vmul.f32 %v3831_v58, %v1258_v61  ;;  %v6141_v2 = vmul.f32 %v2594_v41, %v1253_v62  ;;  %v2628_v4 = vmul.f32 %v3828_v40, %v1253_v62  ;;  %5370 = vmatprep.subr.msk.mxu0 %vm613_vm0, %v6135_v63  ;;  %v3841_v51 = vld [vmem:[%s5824_s20 + $0x9a] sm:$0xff] }
  0x98   : > { %v6144_v6 = vmul.f32 %v3830_v60, %v1253_v62  ;;  %v2629_v14 = vmul.f32 %v3829_v50, %v1258_v61 }
  0x99   : > { %7238 = vst [vmem:[#allocation6_spill] sm:$0xff] %v6139_v1  ;;  %5276 = vmatmul.mubr.msk.f32.gmra.mrb[2].mxu0 %vm516_vm1, %v2627_v3 }
  0x9a   : > { %7239 = vst [vmem:[#allocation7_spill] sm:$0xff] %v6144_v6  ;;  %v1268_v9 = vpop.permute.xlu1 %1267  ;;  %v1263_v10 = vpop.permute.xlu0 %1262  ;;  %5278 = vmatprep.mubr.msk.f32.mxu0 %vm516_vm1, %v2628_v4  ;;  %v6362_v6 = vld [vmem:[%s5824_s20 + $0x50] sm:$0xff] }
  0x9b   : > { %v6153_v11 = vmul.f32 %v3829_v50, %v1268_v9  ;;  %v6155_v12 = vmul.f32 %v3833_v7, %v1268_v9  ;;  %v6157_v13 = vmul.f32 %v3828_v40, %v1263_v10  ;;  %v2630_v42 = vmul.f32 %v3830_v60, %v1263_v10 }
  0x9c   : > { %v6160_v15 = vmul.f32 %v3832_v8, %v1263_v10  ;;  %v2631_v23 = vmul.f32 %v3831_v58, %v1268_v9  ;;  %v1780_v9 = vld [vmem:[%s5824_s20 + $0x10] sm:$0xff] }
  0x9d   : > { %7240 = vst [vmem:[#allocation8_spill] sm:$0xff] %v6155_v12  ;;  %5279 = vmatmul.mubr.msk.f32.gmra.mrb[4].mxu0 %vm516_vm1, %v2629_v14 }
  0x9e   : > { %7241 = vst [vmem:[#allocation9_spill] sm:$0xff] %v6160_v15  ;;  %v1278_v18 = vpop.permute.xlu1 %1277  ;;  %v1273_v19 = vpop.permute.xlu0 %1272  ;;  %5281 = vmatprep.mubr.msk.f32.mxu0 %vm516_vm1, %v2630_v42 }
  0x9f   : > { %v6165_v20 = vmul.f32 %v3831_v58, %v1278_v18  ;;  %v6167_v21 = vmul.f32 %v3835_v16, %v1278_v18  ;;  %v6169_v22 = vmul.f32 %v3830_v60, %v1273_v19  ;;  %v2632_v24 = vmul.f32 %v3832_v8, %v1273_v19 }
  0xa0   : > { %v6172_v25 = vmul.f32 %v3834_v17, %v1273_v19  ;;  %v2633_v33 = vmul.f32 %v3833_v7, %v1278_v18 }
  0xa1   : > { %7242 = vst [vmem:[#allocation10_spill] sm:$0xff] %v6167_v21  ;;  %5282 = vmatmul.mubr.msk.f32.gmra.mrb[6].mxu0 %vm516_vm1, %v2631_v23 }
  0xa2   : > { %7243 = vst [vmem:[#allocation11_spill] sm:$0xff] %v6172_v25  ;;  %v1288_v28 = vpop.permute.xlu1 %1287  ;;  %v1283_v29 = vpop.permute.xlu0 %1282  ;;  %5284 = vmatprep.mubr.msk.f32.mxu0 %vm516_vm1, %v2632_v24  ;;  %v3843_v24 = vld [vmem:[%s5824_s20 + $0xaa] sm:$0xff] }
  0xa3   : > { %v6177_v30 = vmul.f32 %v3833_v7, %v1288_v28  ;;  %v6179_v31 = vmul.f32 %v3837_v26, %v1288_v28  ;;  %v6181_v32 = vmul.f32 %v3832_v8, %v1283_v29  ;;  %v2634_v34 = vmul.f32 %v3834_v17, %v1283_v29  ;;  %v3842_v7 = vld [vmem:[%s5824_s20 + $0xa2] sm:$0xff] }
  0xa4   : > { %v6184_v35 = vmul.f32 %v3836_v27, %v1283_v29  ;;  %v2635_v47 = vmul.f32 %v3835_v16, %v1288_v28  ;;  %v225_v8 = vld [vmem:[%s5824_s20] sm:$0xff]  ;;  %v6344_v25 = vld [vmem:[%s5824_s20 + $0x48] sm:$0xff] }
  0xa5   : > { %7244 = vst [vmem:[#allocation12_spill] sm:$0xff] %v6179_v31  ;;  %5285 = vmatmul.mubr.msk.f32.gmra.mrb[8].mxu0 %vm516_vm1, %v2633_v33 }
  0xa6   : > { %7245 = vst [vmem:[#allocation13_spill] sm:$0xff] %v6184_v35  ;;  %v1298_v38 = vpop.permute.xlu1 %1297  ;;  %v1293_v39 = vpop.permute.xlu0 %1292  ;;  %5287 = vmatprep.mubr.msk.f32.mxu0 %vm516_vm1, %v2634_v34 }
  0xa7   : > { %v6189_v40 = vmul.f32 %v3835_v16, %v1298_v38  ;;  %v6191_v41 = vmul.f32 %v3839_v36, %v1298_v38  ;;  %v6193_v43 = vmul.f32 %v3834_v17, %v1293_v39  ;;  %v2636_v49 = vmul.f32 %v3836_v27, %v1293_v39 }
  0xa8   : > { %v6196_v50 = vmul.f32 %v3838_v37, %v1293_v39  ;;  %v2637_v62 = vmul.f32 %v3837_v26, %v1298_v38 }
  0xa9   : > { %7246 = vst [vmem:[#allocation14_spill] sm:$0xff] %v6191_v41  ;;  %5288 = vmatmul.mubr.msk.f32.gmra.mrb[10].mxu0 %vm516_vm1, %v2635_v47  ;;  %v3844_v47 = vld [vmem:[%s5824_s20 + $0xb2] sm:$0xff] }
  0xaa   : > { %7247 = vst [vmem:[#allocation15_spill] sm:$0xff] %v6196_v50  ;;  %v1308_v56 = vpop.permute.xlu1 %1307  ;;  %v1303_v58 = vpop.permute.xlu0 %1302  ;;  %5290 = vmatprep.mubr.msk.f32.mxu0 %vm516_vm1, %v2636_v49  ;;  %v6245_v49 = vld [vmem:[%s7227_s1 + $0xc] sm:$0x7]  ;;  %v6326_v50 = vld [vmem:[%s5824_s20 + $0x40] sm:$0xff] }
  0xab   : > { %v6201_v59 = vmul.f32 %v3837_v26, %v1308_v56  ;;  %v6203_v60 = vmul.f32 %v3841_v51, %v1308_v56  ;;  %v6205_v61 = vmul.f32 %v3836_v27, %v1303_v58  ;;  %v2638_v3 = vmul.f32 %v3838_v37, %v1303_v58  ;;  %v226_v26 = vld [vmem:[%s5824_s20 + $0x8] sm:$0xff]  ;;  %v1781_v27 = vld [vmem:[%s5824_s20 + $0x18] sm:$0xff] }
  0xac   : > { %v6208_v4 = vmul.f32 %v3840_v52, %v1303_v58  ;;  %v2639_v19 = vmul.f32 %v3839_v36, %v1308_v56  ;;  %v6254_v58 = vld [vmem:[%s5824_s20 + $0x20] sm:$0xff] }
  0xad   : > { %7248 = vst [vmem:[#allocation16_spill] sm:$0xff] %v6203_v60  ;;  %5291 = vmatmul.mubr.msk.f32.gmra.mrb[12].mxu0 %vm516_vm1, %v2637_v62 }
  0xae   : > { %7249 = vst [vmem:[#allocation17_spill] sm:$0xff] %v6208_v4  ;;  %v1313_v10 = vpop.permute.xlu1 %1312  ;;  %v6214_v14 = vpop.permute.xlu0 %291  ;;  %5293 = vmatprep.mubr.msk.f32.mxu0 %vm516_vm1, %v2638_v3 }
  0xaf   : > { %v6216_v42 = vmul.f32 %v3838_v37, %v1313_v10  ;;  %v2640_v16 = vmul.f32 %v3840_v52, %v1313_v10  ;;  %v6218_v17 = vmul.f32 %v3842_v7, %v1313_v10  ;;  %v449_v18 = vmul.f32 %v6214_v14, %v225_v8 }
  0xb0   : > { %v6223_v23 = vmul.f32 %v1780_v9, %v6214_v14 }
  0xb1   : > { %7250 = vst [vmem:[#allocation18_spill] sm:$0xff] %v6218_v17  ;;  %5072 = vmatprep.mubr.msk.f32.mxu1 %vm516_vm1, %v449_v18  ;;  %5294 = vmatmul.mubr.msk.f32.gmra.mrb[14].mxu0 %vm516_vm1, %v2639_v19  ;;  %v3845_v18 = vld [vmem:[%s5824_s20 + $0xba] sm:$0xff]  ;;  %v6273_v19 = vld [vmem:[%s5824_s20 + $0x28] sm:$0xff] }
  0xb2   : > { %7251 = vst [vmem:[#allocation19_spill] sm:$0xff] %v6223_v23  ;;  %v1318_v28 = vpop.permute.xlu1 %1317  ;;  %v6230_v29 = vpop.permute.xlu0 %296  ;;  %5296 = vmatprep.mubr.msk.f32.mxu0 %vm516_vm1, %v2640_v16  ;;  %v6308_v17 = vld [vmem:[%s5824_s20 + $0x38] sm:$0xff] }
  0xb3   : > { %v6232_v33 = vmul.f32 %v3839_v36, %v1318_v28  ;;  %v2641_v34 = vmul.f32 %v3841_v51, %v1318_v28  ;;  %v6234_v37 = vmul.f32 %v3843_v24, %v1318_v28  ;;  %v450_v38 = vmul.f32 %v6230_v29, %v226_v26 }
  0xb4   : > { %v6239_v39 = vmul.f32 %v1781_v27, %v6230_v29 }
  0xb5   : > { %7252 = vst [vmem:[#allocation20_spill] sm:$0xff] %v6234_v37  ;;  %5073 = vmatmul.mubr.msk.f32.vlgmr.msra.gmra.mrb[0].mxu1 %vm516_vm1, %v450_v38  ;;  %5297 = vmatmul.mubr.msk.f32.gmra.mrb[16].mxu0 %vm516_vm1, %v2641_v34 }
  0xb6   : > { %7253 = vst [vmem:[#allocation21_spill] sm:$0xff] %v6239_v39  ;;  %v1323_v36 = vpop.permute.xlu1 %1322  ;;  %v6249_v56 = vpop.permute.xlu0 %301  ;;  %5121 = vmatpush3.msk.msra.mxu1 %vm613_vm0, %v6002_v5 }
  0xb7   : > { %v6256_v62 = vmul.f32 %v3840_v52, %v1323_v36  ;;  %v2642_v3 = vmul.f32 %v3842_v7, %v1323_v36  ;;  %v6258_v8 = vmul.f32 %v3844_v47, %v1323_v36  ;;  %v451_v10 = vmul.f32 %v1780_v9, %v6249_v56  ;;  %5170 = vmatprep.subr.msk.mxu1 %vm613_vm0, %v6245_v49  ;;  %v3846_v36 = vld [vmem:[%s5824_s20 + $0xc2] sm:$0xff] }
  0xb8   : > { %v6265_v16 = vmul.f32 %v6254_v58, %v6249_v56 }
  0xb9   : > { %7254 = vst [vmem:[#allocation22_spill] sm:$0xff] %v6258_v8  ;;  %5075 = vmatprep.mubr.msk.f32.mxu1 %vm516_vm1, %v451_v10  ;;  %5299 = vmatprep.mubr.msk.f32.mxu0 %vm516_vm1, %v2642_v3 }
  0xba   : > { %7255 = vst [vmem:[#allocation23_spill] sm:$0xff] %v6265_v16  ;;  %v1328_v5 = vpop.permute.xlu1 %1327  ;;  %v6270_v52 = vpop.permute.xlu0 %306  ;;  %v6416_v16 = vld [vmem:[%s5824_s20 + $0x68] sm:$0xff] }
  0xbb   : > { %v6275_v26 = vmul.f32 %v3841_v51, %v1328_v5  ;;  %v2643_v9 = vmul.f32 %v3843_v24, %v1328_v5  ;;  %v6277_v28 = vmul.f32 %v3845_v18, %v1328_v5  ;;  %v452_v34 = vmul.f32 %v1781_v27, %v6270_v52  ;;  %v6290_v51 = vld [vmem:[%s5824_s20 + $0x30] sm:$0xff] }
  0xbc   : > { %v6282_v38 = vmul.f32 %v6273_v19, %v6270_v52 }
  0xbd   : > { %7256 = vst [vmem:[#allocation24_spill] sm:$0xff] %v6277_v28  ;;  %5076 = vmatmul.mubr.msk.f32.gmra.mrb[2].mxu1 %vm516_vm1, %v452_v34  ;;  %5300 = vmatmul.mubr.msk.f32.gmra.mrb[18].mxu0 %vm516_vm1, %v2643_v9  ;;  %v3847_v34 = vld [vmem:[%s5824_s20 + $0xca] sm:$0xff] }
  0xbe   : > { %7257 = vst [vmem:[#allocation25_spill] sm:$0xff] %v6282_v38  ;;  %v1333_v3 = vpop.permute.xlu1 %1332  ;;  %v6287_v10 = vpop.permute.xlu0 %311 }
  0xbf   : > { %v6292_v8 = vmul.f32 %v3842_v7, %v1333_v3  ;;  %v2644_v5 = vmul.f32 %v3844_v47, %v1333_v3  ;;  %v6294_v27 = vmul.f32 %v3846_v36, %v1333_v3  ;;  %v453_v28 = vmul.f32 %v6254_v58, %v6287_v10 }
  0xc0   : > { %v6300_v37 = vmul.f32 %v6290_v51, %v6287_v10 }
  0xc1   : > { %7258 = vst [vmem:[#allocation26_spill] sm:$0xff] %v6292_v8  ;;  %7259 = vst [vmem:[#allocation27_spill] sm:$0xff] %v6294_v27  ;;  %5078 = vmatprep.mubr.msk.f32.mxu1 %vm516_vm1, %v453_v28  ;;  %5302 = vmatprep.mubr.msk.f32.mxu0 %vm516_vm1, %v2644_v5  ;;  %v3848_v28 = vld [vmem:[%s5824_s20 + $0xd2] sm:$0xff]  ;;  %v1167_v8 = vld [vmem:[%s5824_s20 + $0xa] sm:$0xff] }
  0xc2   : > { %7260 = vst [vmem:[#allocation28_spill] sm:$0xff] %v6300_v37  ;;  %v1338_v9 = vpop.permute.xlu1 %1337  ;;  %v6305_v7 = vpop.permute.xlu0 %316 }
  0xc3   : > { %v6310_v3 = vmul.f32 %v3843_v24, %v1338_v9  ;;  %v2645_v27 = vmul.f32 %v3845_v18, %v1338_v9  ;;  %v6312_v60 = vmul.f32 %v3847_v34, %v1338_v9  ;;  %v454_v4 = vmul.f32 %v6273_v19, %v6305_v7 }
  0xc4   : > { %v6318_v41 = vmul.f32 %v6308_v17, %v6305_v7 }
  0xc5   : > { %7261 = vst [vmem:[#allocation29_spill] sm:$0xff] %v6310_v3  ;;  %7262 = vst [vmem:[#allocation30_spill] sm:$0xff] %v6312_v60  ;;  %5079 = vmatmul.mubr.msk.f32.gmra.mrb[4].mxu1 %vm516_vm1, %v454_v4  ;;  %5303 = vmatmul.mubr.msk.f32.gmra.mrb[20].mxu0 %vm516_vm1, %v2645_v27  ;;  %v3849_v4 = vld [vmem:[%s5824_s20 + $0xda] sm:$0xff] }
  0xc6   : > { %7263 = vst [vmem:[#allocation31_spill] sm:$0xff] %v6318_v41  ;;  %v1343_v5 = vpop.permute.xlu1 %1342  ;;  %v6323_v24 = vpop.permute.xlu0 %321  ;;  %v6398_v41 = vld [vmem:[%s5824_s20 + $0x60] sm:$0xff] }
  0xc7   : > { %v6328_v9 = vmul.f32 %v3844_v47, %v1343_v5  ;;  %v2646_v60 = vmul.f32 %v3846_v36, %v1343_v5  ;;  %v6330_v31 = vmul.f32 %v3848_v28, %v1343_v5  ;;  %v455_v35 = vmul.f32 %v6290_v51, %v6323_v24 }
  0xc8   : > { %v6336_v21 = vmul.f32 %v6326_v50, %v6323_v24 }
  0xc9   : > { %7264 = vst [vmem:[#allocation32_spill] sm:$0xff] %v6328_v9  ;;  %7265 = vst [vmem:[#allocation33_spill] sm:$0xff] %v6330_v31  ;;  %5081 = vmatprep.mubr.msk.f32.mxu1 %vm516_vm1, %v455_v35  ;;  %5305 = vmatprep.mubr.msk.f32.mxu0 %vm516_vm1, %v2646_v60  ;;  %v3850_v35 = vld [vmem:[%s5824_s20 + $0xe2] sm:$0xff] }
  0xca   : > { %7266 = vst [vmem:[#allocation34_spill] sm:$0xff] %v6336_v21  ;;  %v1348_v27 = vpop.permute.xlu1 %1347  ;;  %v6341_v47 = vpop.permute.xlu0 %326 }
  0xcb   : > { %v6346_v5 = vmul.f32 %v3845_v18, %v1348_v27  ;;  %v2647_v31 = vmul.f32 %v3847_v34, %v1348_v27  ;;  %v6348_v12 = vmul.f32 %v3849_v4, %v1348_v27  ;;  %v456_v15 = vmul.f32 %v6308_v17, %v6341_v47 }
  0xcc   : > { %v6354_v1 = vmul.f32 %v6344_v25, %v6341_v47 }
  0xcd   : > { %7267 = vst [vmem:[#allocation35_spill] sm:$0xff] %v6346_v5  ;;  %7268 = vst [vmem:[#allocation36_spill] sm:$0xff] %v6348_v12  ;;  %5082 = vmatmul.mubr.msk.f32.gmra.mrb[6].mxu1 %vm516_vm1, %v456_v15  ;;  %5306 = vmatmul.mubr.msk.f32.gmra.mrb[22].mxu0 %vm516_vm1, %v2647_v31  ;;  %v3851_v15 = vld [vmem:[%s5824_s20 + $0xea] sm:$0xff] }
  0xce   : > { %7269 = vst [vmem:[#allocation37_spill] sm:$0xff] %v6354_v1  ;;  %v1353_v60 = vpop.permute.xlu1 %1352  ;;  %v6359_v18 = vpop.permute.xlu0 %331 }
  0xcf   : > { %v6364_v27 = vmul.f32 %v3846_v36, %v1353_v60  ;;  %v2648_v12 = vmul.f32 %v3848_v28, %v1353_v60  ;;  %v6366_v55 = vmul.f32 %v3850_v35, %v1353_v60  ;;  %v457_v46 = vmul.f32 %v6326_v50, %v6359_v18 }
  0xd0   : > { %v6372_v57 = vmul.f32 %v6362_v6, %v6359_v18 }
  0xd1   : > { %7270 = vst [vmem:[#allocation38_spill] sm:$0xff] %v6364_v27  ;;  %7271 = vst [vmem:[#allocation39_spill] sm:$0xff] %v6366_v55  ;;  %5084 = vmatprep.mubr.msk.f32.mxu1 %vm516_vm1, %v457_v46  ;;  %5308 = vmatprep.mubr.msk.f32.mxu0 %vm516_vm1, %v2648_v12  ;;  %v3852_v46 = vld [vmem:[%s5824_s20 + $0xf2] sm:$0xff] }
  0xd2   : > { %7272 = vst [vmem:[#allocation40_spill] sm:$0xff] %v6372_v57  ;;  %v1358_v31 = vpop.permute.xlu1 %1357  ;;  %v6377_v36 = vpop.permute.xlu0 %336 }
  0xd3   : > { %v6382_v60 = vmul.f32 %v3847_v34, %v1358_v31  ;;  %v2649_v55 = vmul.f32 %v3849_v4, %v1358_v31  ;;  %v6384_v1 = vmul.f32 %v3851_v15, %v1358_v31  ;;  %v458_v57 = vmul.f32 %v6344_v25, %v6377_v36 }
  0xd4   : > { %v6390_v21 = vmul.f32 %v6380_v48, %v6377_v36 }
  0xd5   : > { %7273 = vst [vmem:[#allocation41_spill] sm:$0xff] %v6382_v60  ;;  %7274 = vst [vmem:[#allocation42_spill] sm:$0xff] %v6384_v1  ;;  %5085 = vmatmul.mubr.msk.f32.gmra.mrb[8].mxu1 %vm516_vm1, %v458_v57  ;;  %5309 = vmatmul.mubr.msk.f32.gmra.mrb[24].mxu0 %vm516_vm1, %v2649_v55  ;;  %v3853_v57 = vld [vmem:[%s5824_s20 + $0xfa] sm:$0xff] }
  0xd6   : > { %7275 = vst [vmem:[#allocation43_spill] sm:$0xff] %v6390_v21  ;;  %v1363_v12 = vpop.permute.xlu1 %1362  ;;  %v6395_v34 = vpop.permute.xlu0 %341 }
  0xd7   : > { %v6400_v31 = vmul.f32 %v3848_v28, %v1363_v12  ;;  %v2650_v1 = vmul.f32 %v3850_v35, %v1363_v12  ;;  %v6402_v37 = vmul.f32 %v3852_v46, %v1363_v12  ;;  %v459_v21 = vmul.f32 %v6362_v6, %v6395_v34 }
  0xd8   : > { %v6408_v38 = vmul.f32 %v6398_v41, %v6395_v34 }
  0xd9   : > { %7276 = vst [vmem:[#allocation44_spill] sm:$0xff] %v6400_v31  ;;  %7277 = vst [vmem:[#allocation45_spill] sm:$0xff] %v6402_v37  ;;  %5087 = vmatprep.mubr.msk.f32.mxu1 %vm516_vm1, %v459_v21  ;;  %5311 = vmatprep.mubr.msk.f32.mxu0 %vm516_vm1, %v2650_v1  ;;  %v3854_v21 = vld [vmem:[%s5824_s20 + $0x102] sm:$0xff] }
  0xda   : > { %7278 = vst [vmem:[#allocation46_spill] sm:$0xff] %v6408_v38  ;;  %v1368_v55 = vpop.permute.xlu1 %1367  ;;  %v6413_v28 = vpop.permute.xlu0 %346 }
  0xdb   : > { %v6418_v12 = vmul.f32 %v3849_v4, %v1368_v55  ;;  %v2651_v37 = vmul.f32 %v3851_v15, %v1368_v55  ;;  %v6420_v39 = vmul.f32 %v3853_v57, %v1368_v55  ;;  %v460_v38 = vmul.f32 %v6380_v48, %v6413_v28 }
  0xdc   : > { %v6426_v23 = vmul.f32 %v6416_v16, %v6413_v28 }
  0xdd   : > { %7279 = vst [vmem:[#allocation47_spill] sm:$0xff] %v6418_v12  ;;  %7280 = vst [vmem:[#allocation48_spill] sm:$0xff] %v6420_v39  ;;  %5088 = vmatmul.mubr.msk.f32.gmra.mrb[10].mxu1 %vm516_vm1, %v460_v38  ;;  %5312 = vmatmul.mubr.msk.f32.gmra.mrb[26].mxu0 %vm516_vm1, %v2651_v37  ;;  %v6434_v12 = vld [vmem:[%s5824_s20 + $0x70] sm:$0xff] }
  0xde   : > { %7281 = vst [vmem:[#allocation49_spill] sm:$0xff] %v6426_v23  ;;  %v1373_v1 = vpop.permute.xlu1 %1372  ;;  %v6431_v4 = vpop.permute.xlu0 %351  ;;  %v3855_v38 = vld [vmem:[%s5824_s20 + $0x10a] sm:$0xff] }
  0xdf   : > { %v6436_v55 = vmul.f32 %v3850_v35, %v1373_v1  ;;  %v2652_v39 = vmul.f32 %v3852_v46, %v1373_v1  ;;  %v6438_v31 = vmul.f32 %v3854_v21, %v1373_v1  ;;  %v461_v60 = vmul.f32 %v6398_v41, %v6431_v4  ;;  %v6452_v35 = vld [vmem:[%s5824_s20 + $0x78] sm:$0xff] }
  0xe0   : > { %v6444_v23 = vmul.f32 %v6434_v12, %v6431_v4 }
  0xe1   : > { %7282 = vst [vmem:[#allocation50_spill] sm:$0xff] %v6436_v55  ;;  %7283 = vst [vmem:[#allocation51_spill] sm:$0xff] %v6438_v31  ;;  %5090 = vmatprep.mubr.msk.f32.mxu1 %vm516_vm1, %v461_v60  ;;  %5314 = vmatprep.mubr.msk.f32.mxu0 %vm516_vm1, %v2652_v39 }
  0xe2   : > { %7284 = vst [vmem:[#allocation52_spill] sm:$0xff] %v6444_v23  ;;  %v1378_v37 = vpop.permute.xlu1 %1377  ;;  %v6449_v27 = vpop.permute.xlu0 %356 }
  0xe3   : > { %v6454_v1 = vmul.f32 %v3851_v15, %v1378_v37  ;;  %v2653_v31 = vmul.f32 %v3853_v57, %v1378_v37  ;;  %v6456_v55 = vmul.f32 %v3855_v38, %v1378_v37  ;;  %v462_v23 = vmul.f32 %v6416_v16, %v6449_v27  ;;  %v6471_v15 = vld [vmem:[%s5824_s20 + $0x80] sm:$0xff] }
  0xe4   : > { %v6462_v5 = vmul.f32 %v6452_v35, %v6449_v27 }
  0xe5   : > { %7285 = vst [vmem:[#allocation53_spill] sm:$0xff] %v6454_v1  ;;  %7286 = vst [vmem:[#allocation54_spill] sm:$0xff] %v6456_v55  ;;  %5091 = vmatmul.mubr.msk.f32.gmra.mrb[12].mxu1 %vm516_vm1, %v462_v23  ;;  %5315 = vmatmul.mubr.msk.f32.gmra.mrb[28].mxu0 %vm516_vm1, %v2653_v31 }
  0xe6   : > { %7287 = vst [vmem:[#allocation55_spill] sm:$0xff] %v6462_v5  ;;  %v6466_v39 = vpop.permute.xlu1 %1382  ;;  %v6468_v60 = vpop.permute.xlu0 %361 }
  0xe7   : > { %7288 = vst [vmem:[#allocation56_spill] sm:$0xff] %v6466_v39  ;;  %v6474_v37 = vmul.f32 %v3852_v46, %v6466_v39  ;;  %v2654_v55 = vmul.f32 %v3854_v21, %v6466_v39  ;;  %v463_v1 = vmul.f32 %v6434_v12, %v6468_v60  ;;  %v6481_v23 = vmul.f32 %v6471_v15, %v6468_v60  ;;  %v6490_v46 = vld [vmem:[%s5824_s20 + $0x88] sm:$0xff] }
  0xe9   : > { %7289 = vst [vmem:[#allocation57_spill] sm:$0xff] %v6474_v37  ;;  %7290 = vst [vmem:[#allocation58_spill] sm:$0xff] %v6481_v23  ;;  %5093 = vmatprep.mubr.msk.f32.mxu1 %vm516_vm1, %v463_v1  ;;  %5317 = vmatprep.mubr.msk.f32.mxu0 %vm516_vm1, %v2654_v55  ;;  %v3046_v1 = vmul.f32 %v6254_v58, %v6214_v14  ;;  %v6507_v23 = vld [vmem:[%s5824_s20 + $0x98] sm:$0xff]  ;;  %v3047_v14 = vmul.f32 %v6273_v19, %v6230_v29  ;;  %v6517_v58 = vld [vmem:[%s5824_s20 + $0x90] sm:$0xff] }
  0xea   : > { %v6485_v31 = vpop.permute.xlu1 %1387  ;;  %v6487_v5 = vpop.permute.xlu0 %366  ;;  %v6538_v29 = vld [vmem:[%s7227_s1 + $0x20] sm:$0x7]  ;;  %v6541_v19 = vld [vmem:[%s5824_s20 + $0xa8] sm:$0xff] }
  0xeb   : > { %7291 = vst [vmem:[#allocation59_spill] sm:$0xff] %v6485_v31  ;;  %v6493_v21 = vmul.f32 %v3853_v57, %v6485_v31  ;;  %v2655_v39 = vmul.f32 %v3855_v38, %v6485_v31  ;;  %v464_v37 = vmul.f32 %v6452_v35, %v6487_v5  ;;  %v6502_v55 = vmul.f32 %v6490_v46, %v6487_v5 }
  0xed   : > { %7292 = vst [vmem:[#allocation60_spill] sm:$0xff] %v6493_v21  ;;  %7293 = vst [vmem:[#allocation61_spill] sm:$0xff] %v6502_v55  ;;  %5094 = vmatmul.mubr.msk.f32.gmra.mrb[14].mxu1 %vm516_vm1, %v464_v37  ;;  %5318 = vmatmul.mubr.msk.f32.gmra.mrb[30].mxu0 %vm516_vm1, %v2655_v39  ;;  %v3048_v55 = vmul.f32 %v6290_v51, %v6249_v56  ;;  %v3049_v56 = vmul.f32 %v6308_v17, %v6270_v52  ;;  %v6552_v51 = vld [vmem:[%s5824_s20 + $0xa0] sm:$0xff]  ;;  %v6575_v52 = vld [vmem:[%s5824_s20 + $0xb8] sm:$0xff] }
  0xee   : > { %v6509_v57 = vpop.permute.xlu1 %376  ;;  %v6511_v38 = vpop.permute.xlu0 %371  ;;  %5322 = vmatprep.mubr.msk.f32.mxu0 %vm516_vm1, %v3046_v1 }
  0xef   : > { %v466_v37 = vmul.f32 %v6490_v46, %v6509_v57  ;;  %v6523_v39 = vmul.f32 %v6507_v23, %v6509_v57  ;;  %v465_v31 = vmul.f32 %v6471_v15, %v6511_v38  ;;  %v6531_v1 = vmul.f32 %v6517_v58, %v6511_v38 }
  0xf1   : > { %7294 = vst [vmem:[#allocation62_spill] sm:$0xff] %v6523_v39  ;;  %7295 = vst [vmem:[#allocation63_spill] sm:$0xff] %v6531_v1  ;;  %5096 = vmatprep.mubr.msk.f32.mxu1 %vm516_vm1, %v465_v31  ;;  %5323 = vmatmul.mubr.msk.f32.vlgmr.msra.gmra.mrb[0].mxu0 %vm516_vm1, %v3047_v14 }
  0xf2   : > { %v6543_v39 = vpop.permute.xlu1 %386  ;;  %v6545_v21 = vpop.permute.xlu0 %381  ;;  %5097 = vmatmul.mubr.msk.f32.gmra.mrb[16].mxu1 %vm516_vm1, %v466_v37  ;;  %5325 = vmatprep.mubr.msk.f32.mxu0 %vm516_vm1, %v3048_v55  ;;  %v3050_v55 = vmul.f32 %v6326_v50, %v6287_v10  ;;  %v3051_v50 = vmul.f32 %v6344_v25, %v6305_v7  ;;  %v6586_v10 = vld [vmem:[%s5824_s20 + $0xb0] sm:$0xff]  ;;  %v6605_v25 = vld [vmem:[%s5824_s20 + $0xc8] sm:$0xff] }
  0xf3   : > { %v468_v31 = vmul.f32 %v6507_v23, %v6543_v39  ;;  %v6558_v14 = vmul.f32 %v6541_v19, %v6543_v39  ;;  %v467_v1 = vmul.f32 %v6517_v58, %v6545_v21  ;;  %5371 = vmatpush3.msk.msra.mxu0 %vm613_vm0, %v6135_v63  ;;  %v6568_v17 = vmul.f32 %v6552_v51, %v6545_v21 }
  0xf4   : > { %5420 = vmatprep.subr.msk.mxu0 %vm613_vm0, %v6538_v29 }
  0xf5   : > { %7296 = vst [vmem:[#allocation64_spill] sm:$0xff] %v6558_v14  ;;  %7297 = vst [vmem:[#allocation65_spill] sm:$0xff] %v6568_v17  ;;  %5099 = vmatprep.mubr.msk.f32.mxu1 %vm516_vm1, %v467_v1  ;;  %5326 = vmatmul.mubr.msk.f32.gmra.mrb[2].mxu0 %vm516_vm1, %v3049_v56 }
  0xf6   : > { %v6577_v37 = vpop.permute.xlu1 %396  ;;  %v6579_v63 = vpop.permute.xlu0 %391  ;;  %5100 = vmatmul.mubr.msk.f32.gmra.mrb[18].mxu1 %vm516_vm1, %v468_v31  ;;  %5328 = vmatprep.mubr.msk.f32.mxu0 %vm516_vm1, %v3050_v55  ;;  %v3052_v31 = vmul.f32 %v6362_v6, %v6323_v24  ;;  %v3053_v6 = vmul.f32 %v6380_v48, %v6341_v47  ;;  %v6616_v24 = vld [vmem:[%s5824_s20 + $0xc0] sm:$0xff]  ;;  %v6635_v48 = vld [vmem:[%s5824_s20 + $0xd8] sm:$0xff] }
  0xf7   : > { %v470_v1 = vmul.f32 %v6541_v19, %v6577_v37  ;;  %v6592_v56 = vmul.f32 %v6575_v52, %v6577_v37  ;;  %v469_v14 = vmul.f32 %v6552_v51, %v6579_v63  ;;  %v6600_v55 = vmul.f32 %v6586_v10, %v6579_v63 }
  0xf9   : > { %7298 = vst [vmem:[#allocation66_spill] sm:$0xff] %v6592_v56  ;;  %7299 = vst [vmem:[#allocation67_spill] sm:$0xff] %v6600_v55  ;;  %5102 = vmatprep.mubr.msk.f32.mxu1 %vm516_vm1, %v469_v14  ;;  %5329 = vmatmul.mubr.msk.f32.gmra.mrb[4].mxu0 %vm516_vm1, %v3051_v50 }
  0xfa   : > { %v6607_v7 = vpop.permute.xlu1 %406  ;;  %v6609_v56 = vpop.permute.xlu0 %401  ;;  %5103 = vmatmul.mubr.msk.f32.gmra.mrb[20].mxu1 %vm516_vm1, %v470_v1  ;;  %5331 = vmatprep.mubr.msk.f32.mxu0 %vm516_vm1, %v3052_v31  ;;  %v3054_v1 = vmul.f32 %v6398_v41, %v6359_v18  ;;  %v3055_v41 = vmul.f32 %v6416_v16, %v6377_v36  ;;  %v6646_v18 = vld [vmem:[%s5824_s20 + $0xd0] sm:$0xff]  ;;  %v6665_v16 = vld [vmem:[%s5824_s20 + $0xe8] sm:$0xff] }
  0xfb   : > { %v472_v14 = vmul.f32 %v6575_v52, %v6607_v7  ;;  %v6622_v50 = vmul.f32 %v6605_v25, %v6607_v7  ;;  %v471_v55 = vmul.f32 %v6586_v10, %v6609_v56  ;;  %v6630_v31 = vmul.f32 %v6616_v24, %v6609_v56 }
  0xfd   : > { %7300 = vst [vmem:[#allocation68_spill] sm:$0xff] %v6622_v50  ;;  %7301 = vst [vmem:[#allocation69_spill] sm:$0xff] %v6630_v31  ;;  %5105 = vmatprep.mubr.msk.f32.mxu1 %vm516_vm1, %v471_v55  ;;  %5332 = vmatmul.mubr.msk.f32.gmra.mrb[6].mxu0 %vm516_vm1, %v3053_v6 }
  0xfe   : > { %v6637_v47 = vpop.permute.xlu1 %416  ;;  %v6639_v50 = vpop.permute.xlu0 %411  ;;  %5106 = vmatmul.mubr.msk.f32.gmra.mrb[22].mxu1 %vm516_vm1, %v472_v14  ;;  %5334 = vmatprep.mubr.msk.f32.mxu0 %vm516_vm1, %v3054_v1  ;;  %v3056_v14 = vmul.f32 %v6434_v12, %v6395_v34  ;;  %v3057_v34 = vmul.f32 %v6452_v35, %v6413_v28  ;;  %v6676_v12 = vld [vmem:[%s5824_s20 + $0xe0] sm:$0xff]  ;;  %v6695_v28 = vld [vmem:[%s5824_s20 + $0xf8] sm:$0xff] }
  0xff   : > { %v474_v55 = vmul.f32 %v6605_v25, %v6637_v47  ;;  %v6652_v6 = vmul.f32 %v6635_v48, %v6637_v47  ;;  %v473_v31 = vmul.f32 %v6616_v24, %v6639_v50  ;;  %v6660_v1 = vmul.f32 %v6646_v18, %v6639_v50 }
 0x101   : > { %7302 = vst [vmem:[#allocation70_spill] sm:$0xff] %v6652_v6  ;;  %7303 = vst [vmem:[#allocation71_spill] sm:$0xff] %v6660_v1  ;;  %5108 = vmatprep.mubr.msk.f32.mxu1 %vm516_vm1, %v473_v31  ;;  %5335 = vmatmul.mubr.msk.f32.gmra.mrb[8].mxu0 %vm516_vm1, %v3055_v41 }
 0x102   : > { %v6667_v36 = vpop.permute.xlu1 %426  ;;  %v6669_v6 = vpop.permute.xlu0 %421  ;;  %5109 = vmatmul.mubr.msk.f32.gmra.mrb[24].mxu1 %vm516_vm1, %v474_v55  ;;  %5337 = vmatprep.mubr.msk.f32.mxu0 %vm516_vm1, %v3056_v14  ;;  %v3058_v55 = vmul.f32 %v6471_v15, %v6431_v4  ;;  %v3059_v4 = vmul.f32 %v6490_v46, %v6449_v27  ;;  %v3040_v15 = vld [vmem:[%s5824_s20 + $0xf0] sm:$0xff]  ;;  %v1166_v27 = vld [vmem:[%s5824_s20 + $0x2] sm:$0xff] }
 0x103   : > { %v476_v31 = vmul.f32 %v6635_v48, %v6667_v36  ;;  %v6682_v41 = vmul.f32 %v6665_v16, %v6667_v36  ;;  %v475_v1 = vmul.f32 %v6646_v18, %v6669_v6  ;;  %v6690_v14 = vmul.f32 %v6676_v12, %v6669_v6  ;;  %v3043_v46 = vld [vmem:[%s5824_s20 + $0x108] sm:$0xff] }
 0x105   : > { %7304 = vst [vmem:[#allocation72_spill] sm:$0xff] %v6682_v41  ;;  %7305 = vst [vmem:[#allocation73_spill] sm:$0xff] %v6690_v14  ;;  %5111 = vmatprep.mubr.msk.f32.mxu1 %vm516_vm1, %v475_v1  ;;  %5338 = vmatmul.mubr.msk.f32.gmra.mrb[10].mxu0 %vm516_vm1, %v3057_v34 }
 0x106   : > { %v6697_v35 = vpop.permute.xlu1 %436  ;;  %v6699_v41 = vpop.permute.xlu0 %431  ;;  %5112 = vmatmul.mubr.msk.f32.gmra.mrb[26].mxu1 %vm516_vm1, %v476_v31  ;;  %5340 = vmatprep.mubr.msk.f32.mxu0 %vm516_vm1, %v3058_v55  ;;  %v3060_v31 = vmul.f32 %v6517_v58, %v6468_v60  ;;  %v3061_v60 = vmul.f32 %v6507_v23, %v6487_v5  ;;  %v3042_v58 = vld [vmem:[%s5824_s20 + $0x100] sm:$0xff]  ;;  %v3063_v5 = vmul.f32 %v6541_v19, %v6509_v57  ;;  %v3044_v57 = vld [vmem:[%s5824_s20 + $0x110] sm:$0xff] }
 0x107   : > { %v478_v1 = vmul.f32 %v6665_v16, %v6697_v35  ;;  %v6710_v34 = vmul.f32 %v6695_v28, %v6697_v35  ;;  %v477_v14 = vmul.f32 %v6676_v12, %v6699_v41  ;;  %v6717_v55 = vmul.f32 %v3040_v15, %v6699_v41  ;;  %v7310_v19 = vld [vmem:[#allocation32_spill] sm:$0xff] }
 0x108   : > { %v1391_v23 = vmul.f32 %v6119_v53, %v1167_v8  ;;  %v3066_v53 = vmul.f32 %v6616_v24, %v6579_v63  ;;  %v6765_v8 = vld [vmem:[%s7227_s1 + $0x10] sm:$0x7]  ;;  %v7313_v63 = vld [vmem:[#allocation41_spill] sm:$0xff] }
 0x109   : > { %7306 = vst [vmem:[#allocation74_spill] sm:$0xff] %v6710_v34  ;;  %7307 = vst [vmem:[#allocation75_spill] sm:$0xff] %v6717_v55  ;;  %5114 = vmatprep.mubr.msk.f32.mxu1 %vm516_vm1, %v477_v14  ;;  %5341 = vmatmul.mubr.msk.f32.gmra.mrb[12].mxu0 %vm516_vm1, %v3059_v4  ;;  %v3062_v55 = vmul.f32 %v6552_v51, %v6511_v38  ;;  %v3064_v38 = vmul.f32 %v6586_v10, %v6545_v21  ;;  %v7311_v51 = vld [vmem:[#allocation35_spill] sm:$0xff]  ;;  %v3447_v10 = vld [vmem:[%s5824_s20 + $0x79] sm:$0xff] }
 0x10a   : > { %v6723_v17 = vpop.permute.xlu1 %446  ;;  %v442_v9 = vpop.permute.xlu0 %441  ;;  %5115 = vmatmul.mubr.msk.f32.gmra.mrb[28].mxu1 %vm516_vm1, %v478_v1  ;;  %5343 = vmatprep.mubr.msk.f32.mxu0 %vm516_vm1, %v3060_v31  ;;  %v1390_v1 = vmul.f32 %v6105_v44, %v1166_v27  ;;  %v3065_v44 = vmul.f32 %v6575_v52, %v6543_v39  ;;  %v3072_v21 = vmul.f32 %v3040_v15, %v6669_v6  ;;  %v7312_v52 = vld [vmem:[#allocation38_spill] sm:$0xff]  ;;  %v3449_v24 = vld [vmem:[%s5824_s20 + $0x89] sm:$0xff]  ;;  %v7318_v6 = vld [vmem:[#allocation57_spill] sm:$0xff] }
 0x10b   : > { %v480_v34 = vmul.f32 %v6695_v28, %v6723_v17  ;;  %v6733_v14 = vmul.f32 %v3043_v46, %v6723_v17  ;;  %v479_v4 = vmul.f32 %v3040_v15, %v442_v9  ;;  %v6737_v3 = vmul.f32 %v3042_v58, %v442_v9  ;;  %v6918_v15 = vld [vmem:[%s5824_s20 + $0xb9] sm:$0xff]  ;;  %v6925_v31 = vld [vmem:[%s5824_s20 + $0xc1] sm:$0xff]  ;;  %v6934_v27 = vld [vmem:[%s5824_s20 + $0xc9] sm:$0xff] }
 0x10c   : > { %v3076_v39 = vmul.f32 %v3044_v57, %v442_v9  ;;  %v3442_v9 = vld [vmem:[%s5824_s20 + $0x51] sm:$0xff]  ;;  %v3467_v57 = vld [vmem:[%s5824_s20 + $0x119] sm:$0xff] }
 0x10d   : > { %5117 = vmatprep.mubr.msk.f32.mxu1 %vm516_vm1, %v479_v4  ;;  %5344 = vmatmul.mubr.msk.f32.gmra.mrb[14].mxu0 %vm516_vm1, %v3061_v60  ;;  %v6939_v60 = vld [vmem:[%s5824_s20 + $0xd1] sm:$0xff]  ;;  %v6948_v4 = vld [vmem:[%s5824_s20 + $0xd9] sm:$0xff] }
 0x10e   : > { %5118 = vmatmul.mubr.msk.f32.gmra.mrb[30].mxu1 %vm516_vm1, %v480_v34  ;;  %5346 = vmatprep.mubr.msk.f32.mxu0 %vm516_vm1, %v3062_v55  ;;  %v7322_v34 = vld [vmem:[#allocation23_spill] sm:$0xff]  ;;  %v7323_v55 = vld [vmem:[#allocation25_spill] sm:$0xff] }
 0x10f   : > { %5122 = vmatprep.mubr.msk.f32.mxu1 %vm516_vm1, %v1390_v1  ;;  %v7326_v1 = vld [vmem:[#allocation34_spill] sm:$0xff] }
 0x111   : > { %5347 = vmatmul.mubr.msk.f32.gmra.mrb[16].mxu0 %vm516_vm1, %v3063_v5  ;;  %v6953_v5 = vld [vmem:[%s5824_s20 + $0xe1] sm:$0xff] }
 0x112   : > { %5123 = vmatmul.mubr.msk.f32.vlgmr.msra.gmra.mrb[0].mxu1 %vm516_vm1, %v1391_v23  ;;  %5349 = vmatprep.mubr.msk.f32.mxu0 %vm516_vm1, %v3064_v38  ;;  %v7327_v23 = vld [vmem:[#allocation37_spill] sm:$0xff]  ;;  %v6962_v38 = vld [vmem:[%s5824_s20 + $0xe9] sm:$0xff] }
 0x113   : > { %5171 = vmatpush3.msk.msra.mxu1 %vm613_vm0, %v6245_v49  ;;  %5125 = vmatprep.mubr.msk.f32.mxu1 %vm516_vm1, %v6107_v45  ;;  %v3067_v45 = vmul.f32 %v6605_v25, %v6577_v37  ;;  %v3068_v49 = vmul.f32 %v6646_v18, %v6609_v56  ;;  %v3446_v37 = vld [vmem:[%s5824_s20 + $0x71] sm:$0xff]  ;;  %v3448_v25 = vld [vmem:[%s5824_s20 + $0x81] sm:$0xff]  ;;  %v6890_v18 = vld [vmem:[%s5824_s20 + $0x99] sm:$0xff] }
 0x114   : > { %5470 = vmatprep.subr.msk.mxu1 %vm613_vm0, %v6765_v8  ;;  %v7314_v56 = vld [vmem:[#allocation44_spill] sm:$0xff] }
 0x115   : > { %5350 = vmatmul.mubr.msk.f32.gmra.mrb[18].mxu0 %vm516_vm1, %v3065_v44  ;;  %v7328_v44 = vld [vmem:[#allocation40_spill] sm:$0xff] }
 0x116   : > { %5126 = vmatmul.mubr.msk.f32.gmra.mrb[2].mxu1 %vm516_vm1, %v6121_v54  ;;  %5352 = vmatprep.mubr.msk.f32.mxu0 %vm516_vm1, %v3066_v53  ;;  %v3069_v54 = vmul.f32 %v6635_v48, %v6607_v7  ;;  %v7315_v7 = vld [vmem:[#allocation47_spill] sm:$0xff]  ;;  %v6882_v48 = vld [vmem:[%s5824_s20 + $0x91] sm:$0xff] }
 0x117   : > { %5128 = vmatprep.mubr.msk.f32.mxu1 %vm516_vm1, %v6141_v2  ;;  %v3070_v2 = vmul.f32 %v6676_v12, %v6639_v50  ;;  %v7316_v50 = vld [vmem:[#allocation50_spill] sm:$0xff]  ;;  %v6904_v12 = vld [vmem:[%s5824_s20 + $0xa9] sm:$0xff]  ;;  %v6967_v53 = vld [vmem:[%s5824_s20 + $0xf1] sm:$0xff] }
 0x119   : > { %5353 = vmatmul.mubr.msk.f32.gmra.mrb[20].mxu0 %vm516_vm1, %v3067_v45  ;;  %v6976_v45 = vld [vmem:[%s5824_s20 + $0xf9] sm:$0xff] }
 0x11a   : > { %5129 = vmatmul.mubr.msk.f32.gmra.mrb[4].mxu1 %vm516_vm1, %v6137_v0  ;;  %5355 = vmatprep.mubr.msk.f32.mxu0 %vm516_vm1, %v3068_v49  ;;  %v3071_v0 = vmul.f32 %v6665_v16, %v6637_v47  ;;  %v7317_v47 = vld [vmem:[#allocation53_spill] sm:$0xff]  ;;  %v6895_v16 = vld [vmem:[%s5824_s20 + $0xa1] sm:$0xff] }
 0x11b   : > { %5131 = vmatprep.mubr.msk.f32.mxu1 %vm516_vm1, %v6157_v13  ;;  %v3074_v13 = vmul.f32 %v3042_v58, %v6699_v41  ;;  %v7320_v41 = vld [vmem:[#allocation19_spill] sm:$0xff]  ;;  %v7330_v49 = vld [vmem:[#allocation46_spill] sm:$0xff] }
 0x11c   : > { %v7325_v58 = vld [vmem:[#allocation31_spill] sm:$0xff] }
 0x11d   : > { %5356 = vmatmul.mubr.msk.f32.gmra.mrb[22].mxu0 %vm516_vm1, %v3069_v54  ;;  %v6981_v54 = vld [vmem:[%s5824_s20 + $0x101] sm:$0xff] }
 0x11e   : > { %5132 = vmatmul.mubr.msk.f32.gmra.mrb[6].mxu1 %vm516_vm1, %v6153_v11  ;;  %5358 = vmatprep.mubr.msk.f32.mxu0 %vm516_vm1, %v3070_v2  ;;  %v3073_v11 = vmul.f32 %v6695_v28, %v6667_v36  ;;  %v7319_v36 = vld [vmem:[#allocation60_spill] sm:$0xff]  ;;  %v7331_v2 = vld [vmem:[#allocation49_spill] sm:$0xff] }
 0x11f   : > { %5134 = vmatprep.mubr.msk.f32.mxu1 %vm516_vm1, %v6169_v22  ;;  %v3045_v22 = vld [vmem:[%s5824_s20 + $0x118] sm:$0xff] }
 0x120   : > { %v6909_v28 = vld [vmem:[%s5824_s20 + $0xb1] sm:$0xff] }
 0x121   : > { %5359 = vmatmul.mubr.msk.f32.gmra.mrb[24].mxu0 %vm516_vm1, %v3071_v0  ;;  %v6990_v0 = vld [vmem:[%s5824_s20 + $0x109] sm:$0xff] }
 0x122   : > { %5135 = vmatmul.mubr.msk.f32.gmra.mrb[8].mxu1 %vm516_vm1, %v6165_v20  ;;  %5361 = vmatprep.mubr.msk.f32.mxu0 %vm516_vm1, %v3072_v21  ;;  %v3075_v20 = vmul.f32 %v3043_v46, %v6697_v35  ;;  %v7321_v35 = vld [vmem:[#allocation21_spill] sm:$0xff]  ;;  %v7324_v46 = vld [vmem:[#allocation28_spill] sm:$0xff] }
 0x123   : > { %5137 = vmatprep.mubr.msk.f32.mxu1 %vm516_vm1, %v6181_v32  ;;  %v3436_v32 = vld [vmem:[%s5824_s20 + $0x21] sm:$0xff]  ;;  %v7332_v21 = vld [vmem:[#allocation52_spill] sm:$0xff] }
 0x125   : > { %5362 = vmatmul.mubr.msk.f32.gmra.mrb[26].mxu0 %vm516_vm1, %v3073_v11  ;;  %v3466_v11 = vld [vmem:[%s5824_s20 + $0x111] sm:$0xff] }
 0x126   : > { %5138 = vmatmul.mubr.msk.f32.gmra.mrb[10].mxu1 %vm516_vm1, %v6177_v30  ;;  %5364 = vmatprep.mubr.msk.f32.mxu0 %vm516_vm1, %v3074_v13  ;;  %v3077_v30 = vmul.f32 %v3045_v22, %v6723_v17  ;;  %v3445_v17 = vld [vmem:[%s5824_s20 + $0x69] sm:$0xff]  ;;  %v7335_v22 = vld [vmem:[#allocation61_spill] sm:$0xff] }
 0x127   : > { %5140 = vmatprep.mubr.msk.f32.mxu1 %vm516_vm1, %v6193_v43  ;;  %v3437_v43 = vld [vmem:[%s5824_s20 + $0x29] sm:$0xff] }
 0x128   : > { %v7333_v13 = vld [vmem:[#allocation55_spill] sm:$0xff] }
 0x129   : > { %5365 = vmatmul.mubr.msk.f32.gmra.mrb[28].mxu0 %vm516_vm1, %v3075_v20  ;;  %v7334_v20 = vld [vmem:[#allocation58_spill] sm:$0xff] }
 0x12a   : > { %5141 = vmatmul.mubr.msk.f32.gmra.mrb[12].mxu1 %vm516_vm1, %v6189_v40  ;;  %5367 = vmatprep.mubr.msk.f32.mxu0 %vm516_vm1, %v3076_v39  ;;  %v3438_v40 = vld [vmem:[%s5824_s20 + $0x31] sm:$0xff]  ;;  %v7336_v39 = vld [vmem:[#allocation3_spill] sm:$0xff] }
 0x12b   : > { %5143 = vmatprep.mubr.msk.f32.mxu1 %vm516_vm1, %v6205_v61  ;;  %v3439_v61 = vld [vmem:[%s5824_s20 + $0x39] sm:$0xff] }
 0x12d   : > { %5368 = vmatmul.mubr.msk.f32.gmra.mrb[30].mxu0 %vm516_vm1, %v3077_v30  ;;  %v7337_v30 = vld [vmem:[#allocation63_spill] sm:$0xff] }
 0x12e   : > { %5144 = vmatmul.mubr.msk.f32.gmra.mrb[14].mxu1 %vm516_vm1, %v6201_v59  ;;  %5372 = vmatprep.mubr.msk.f32.mxu0 %vm516_vm1, %v3436_v32  ;;  %v3440_v59 = vld [vmem:[%s5824_s20 + $0x41] sm:$0xff]  ;;  %v7338_v32 = vld [vmem:[#allocation5_spill] sm:$0xff] }
 0x12f   : > { %5146 = vmatprep.mubr.msk.f32.mxu1 %vm516_vm1, %v6216_v42  ;;  %v3441_v42 = vld [vmem:[%s5824_s20 + $0x49] sm:$0xff] }
 0x131   : > { %5373 = vmatmul.mubr.msk.f32.vlgmr.msra.gmra.mrb[0].mxu0 %vm516_vm1, %v3437_v43  ;;  %v7339_v43 = vld [vmem:[#allocation62_spill] sm:$0xff] }
 0x132   : > { %5147 = vmatmul.mubr.msk.f32.gmra.mrb[16].mxu1 %vm516_vm1, %v6232_v33  ;;  %5421 = vmatpush3.msk.msra.mxu0 %vm613_vm0, %v6538_v29  ;;  %v7308_v33 = vld [vmem:[#allocation26_spill] sm:$0xff] }
 0x133   : > { %5149 = vmatprep.mubr.msk.f32.mxu1 %vm516_vm1, %v6256_v62  ;;  %5375 = vmatprep.mubr.msk.f32.mxu0 %vm516_vm1, %v3438_v40  ;;  %v7309_v62 = vld [vmem:[#allocation29_spill] sm:$0xff]  ;;  %v7340_v40 = vld [vmem:[#allocation2_spill] sm:$0xff] }
 0x134   : > { %v3443_v29 = vld [vmem:[%s5824_s20 + $0x59] sm:$0xff] }
 0x135   : > { %5376 = vmatmul.mubr.msk.f32.gmra.mrb[2].mxu0 %vm516_vm1, %v3439_v61  ;;  %v7341_v61 = vld [vmem:[#allocation65_spill] sm:$0xff] }
 0x136   : > { %5150 = vmatmul.mubr.msk.f32.gmra.mrb[18].mxu1 %vm516_vm1, %v6275_v26  ;;  %5378 = vmatprep.mubr.msk.f32.mxu0 %vm516_vm1, %v3440_v59  ;;  %v3444_v26 = vld [vmem:[%s5824_s20 + $0x61] sm:$0xff]  ;;  %v7342_v59 = vld [vmem:[#allocation4_spill] sm:$0xff] }
 0x137   : > { %5152 = vmatprep.mubr.msk.f32.mxu1 %vm516_vm1, %v7308_v33  ;;  %v7344_v33 = vld [vmem:[#allocation7_spill] sm:$0xff] }
 0x139   : > { %5379 = vmatmul.mubr.msk.f32.gmra.mrb[4].mxu0 %vm516_vm1, %v3441_v42  ;;  %v7343_v42 = vld [vmem:[#allocation64_spill] sm:$0xff] }
 0x13a   : > { %5153 = vmatmul.mubr.msk.f32.gmra.mrb[20].mxu1 %vm516_vm1, %v7309_v62  ;;  %5381 = vmatprep.mubr.msk.f32.mxu0 %vm516_vm1, %v3442_v9  ;;  %v7345_v9 = vld [vmem:[#allocation67_spill] sm:$0xff]  ;;  %v7346_v62 = vld [vmem:[#allocation6_spill] sm:$0xff] }
 0x13b   : > { %5155 = vmatprep.mubr.msk.f32.mxu1 %vm516_vm1, %v7310_v19  ;;  %v7348_v19 = vld [vmem:[#allocation9_spill] sm:$0xff] }
 0x13d   : > { %5382 = vmatmul.mubr.msk.f32.gmra.mrb[6].mxu0 %vm516_vm1, %v3443_v29  ;;  %v7347_v29 = vld [vmem:[#allocation66_spill] sm:$0xff] }
 0x13e   : > { %5156 = vmatmul.mubr.msk.f32.gmra.mrb[22].mxu1 %vm516_vm1, %v7311_v51  ;;  %5384 = vmatprep.mubr.msk.f32.mxu0 %vm516_vm1, %v3444_v26  ;;  %v7349_v26 = vld [vmem:[#allocation69_spill] sm:$0xff]  ;;  %v7350_v51 = vld [vmem:[#allocation8_spill] sm:$0xff] }
 0x13f   : > { %5158 = vmatprep.mubr.msk.f32.mxu1 %vm516_vm1, %v7312_v52  ;;  %v7352_v52 = vld [vmem:[#allocation11_spill] sm:$0xff] }
 0x141   : > { %5385 = vmatmul.mubr.msk.f32.gmra.mrb[8].mxu0 %vm516_vm1, %v3445_v17  ;;  %v7351_v17 = vld [vmem:[#allocation68_spill] sm:$0xff] }
 0x142   : > { %5159 = vmatmul.mubr.msk.f32.gmra.mrb[24].mxu1 %vm516_vm1, %v7313_v63  ;;  %5387 = vmatprep.mubr.msk.f32.mxu0 %vm516_vm1, %v3446_v37  ;;  %v7353_v37 = vld [vmem:[#allocation71_spill] sm:$0xff]  ;;  %v7354_v63 = vld [vmem:[#allocation10_spill] sm:$0xff] }
 0x143   : > { %5161 = vmatprep.mubr.msk.f32.mxu1 %vm516_vm1, %v7314_v56  ;;  %v7356_v56 = vld [vmem:[#allocation13_spill] sm:$0xff] }
 0x145   : > { %5388 = vmatmul.mubr.msk.f32.gmra.mrb[10].mxu0 %vm516_vm1, %v3447_v10  ;;  %v7355_v10 = vld [vmem:[#allocation70_spill] sm:$0xff] }
 0x146   : > { %5162 = vmatmul.mubr.msk.f32.gmra.mrb[26].mxu1 %vm516_vm1, %v7315_v7  ;;  %5390 = vmatprep.mubr.msk.f32.mxu0 %vm516_vm1, %v3448_v25  ;;  %v7357_v25 = vld [vmem:[#allocation73_spill] sm:$0xff]  ;;  %v7358_v7 = vld [vmem:[#allocation12_spill] sm:$0xff] }
 0x147   : > { %5164 = vmatprep.mubr.msk.f32.mxu1 %vm516_vm1, %v7316_v50  ;;  %v7360_v50 = vld [vmem:[#allocation15_spill] sm:$0xff] }
 0x149   : > { %5391 = vmatmul.mubr.msk.f32.gmra.mrb[12].mxu0 %vm516_vm1, %v3449_v24  ;;  %v7359_v24 = vld [vmem:[#allocation72_spill] sm:$0xff] }
 0x14a   : > { %5165 = vmatmul.mubr.msk.f32.gmra.mrb[28].mxu1 %vm516_vm1, %v7317_v47  ;;  %5393 = vmatprep.mubr.msk.f32.mxu0 %vm516_vm1, %v6882_v48  ;;  %v7361_v47 = vld [vmem:[#allocation75_spill] sm:$0xff] }
 0x14b   : > { %5167 = vmatprep.mubr.msk.f32.mxu1 %vm516_vm1, %v7318_v6  ;;  %v7362_v6 = vld [vmem:[#allocation14_spill] sm:$0xff] }
 0x14d   : > { %5394 = vmatmul.mubr.msk.f32.gmra.mrb[14].mxu0 %vm516_vm1, %v6890_v18 }
 0x14e   : > { %5168 = vmatmul.mubr.msk.f32.gmra.mrb[30].mxu1 %vm516_vm1, %v7319_v36  ;;  %5396 = vmatprep.mubr.msk.f32.mxu0 %vm516_vm1, %v6895_v16  ;;  %v7363_v36 = vld [vmem:[#allocation74_spill] sm:$0xff] }
 0x14f   : > { %5172 = vmatprep.mubr.msk.f32.mxu1 %vm516_vm1, %v7320_v41  ;;  %v7364_v41 = vld [vmem:[#allocation17_spill] sm:$0xff] }
 0x151   : > { %5397 = vmatmul.mubr.msk.f32.gmra.mrb[16].mxu0 %vm516_vm1, %v6904_v12 }
 0x152   : > { %5173 = vmatmul.mubr.msk.f32.vlgmr.msra.gmra.mrb[0].mxu1 %vm516_vm1, %v7321_v35  ;;  %5399 = vmatprep.mubr.msk.f32.mxu0 %vm516_vm1, %v6909_v28  ;;  %v7365_v35 = vld [vmem:[#allocation16_spill] sm:$0xff] }
 0x153   : > { %5471 = vmatpush3.msk.msra.mxu1 %vm613_vm0, %v6765_v8  ;;  %5175 = vmatprep.mubr.msk.f32.mxu1 %vm516_vm1, %v7322_v34  ;;  %v7329_v8 = vld [vmem:[#allocation43_spill] sm:$0xff]  ;;  %v7366_v34 = vld [vmem:[#allocation18_spill] sm:$0xff] }
 0x155   : > { %5400 = vmatmul.mubr.msk.f32.gmra.mrb[18].mxu0 %vm516_vm1, %v6918_v15 }
 0x156   : > { %5176 = vmatmul.mubr.msk.f32.gmra.mrb[2].mxu1 %vm516_vm1, %v7323_v55  ;;  %5402 = vmatprep.mubr.msk.f32.mxu0 %vm516_vm1, %v6925_v31  ;;  %v7367_v55 = vld [vmem:[#allocation20_spill] sm:$0xff] }
 0x157   : > { %5178 = vmatprep.mubr.msk.f32.mxu1 %vm516_vm1, %v7324_v46  ;;  %v7368_v46 = vld [vmem:[#allocation22_spill] sm:$0xff] }
 0x159   : > { %5403 = vmatmul.mubr.msk.f32.gmra.mrb[20].mxu0 %vm516_vm1, %v6934_v27 }
 0x15a   : > { %5179 = vmatmul.mubr.msk.f32.gmra.mrb[4].mxu1 %vm516_vm1, %v7325_v58  ;;  %5405 = vmatprep.mubr.msk.f32.mxu0 %vm516_vm1, %v6939_v60  ;;  %v7379_v58 = vld [vmem:[#allocation56_spill] sm:$0xff] }
 0x15b   : > { %5181 = vmatprep.mubr.msk.f32.mxu1 %vm516_vm1, %v7326_v1  ;;  %v3857_v1 = vld [vmem:[%s5824_s20 + $0x11a] sm:$0xff] }
 0x15d   : > { %5406 = vmatmul.mubr.msk.f32.gmra.mrb[22].mxu0 %vm516_vm1, %v6948_v4 }
 0x15e   : > { %5182 = vmatmul.mubr.msk.f32.gmra.mrb[6].mxu1 %vm516_vm1, %v7327_v23  ;;  %5408 = vmatprep.mubr.msk.f32.mxu0 %vm516_vm1, %v6953_v5  ;;  %v7380_v23 = vld [vmem:[#allocation54_spill] sm:$0xff] }
 0x15f   : > { %5184 = vmatprep.mubr.msk.f32.mxu1 %vm516_vm1, %v7328_v44 }
 0x161   : > { %5409 = vmatmul.mubr.msk.f32.gmra.mrb[24].mxu0 %vm516_vm1, %v6962_v38 }
 0x162   : > { %5185 = vmatmul.mubr.msk.f32.gmra.mrb[8].mxu1 %vm516_vm1, %v7329_v8  ;;  %5411 = vmatprep.mubr.msk.f32.mxu0 %vm516_vm1, %v6967_v53 }
 0x163   : > { %5187 = vmatprep.mubr.msk.f32.mxu1 %vm516_vm1, %v7330_v49 }
 0x165   : > { %5412 = vmatmul.mubr.msk.f32.gmra.mrb[26].mxu0 %vm516_vm1, %v6976_v45 }
 0x166   : > { %5188 = vmatmul.mubr.msk.f32.gmra.mrb[10].mxu1 %vm516_vm1, %v7331_v2  ;;  %5414 = vmatprep.mubr.msk.f32.mxu0 %vm516_vm1, %v6981_v54 }
 0x167   : > { %5190 = vmatprep.mubr.msk.f32.mxu1 %vm516_vm1, %v7332_v21 }
 0x169   : > { %5415 = vmatmul.mubr.msk.f32.gmra.mrb[28].mxu0 %vm516_vm1, %v6990_v0 }
 0x16a   : > { %5191 = vmatmul.mubr.msk.f32.gmra.mrb[12].mxu1 %vm516_vm1, %v7333_v13  ;;  %5417 = vmatprep.mubr.msk.f32.mxu0 %vm516_vm1, %v3466_v11 }
 0x16b   : > { %5193 = vmatprep.mubr.msk.f32.mxu1 %vm516_vm1, %v7334_v20 }
 0x16d   : > { %5418 = vmatmul.mubr.msk.f32.gmra.mrb[30].mxu0 %vm516_vm1, %v3467_v57 }
 0x16e   : > { %5194 = vmatmul.mubr.msk.f32.gmra.mrb[14].mxu1 %vm516_vm1, %v7335_v22  ;;  %5422 = vmatprep.mubr.msk.f32.mxu0 %vm516_vm1, %v7336_v39 }
 0x16f   : > { %5196 = vmatprep.mubr.msk.f32.mxu1 %vm516_vm1, %v7337_v30 }
 0x171   : > { %5423 = vmatmul.mubr.msk.f32.vlgmr.msra.gmra.mrb[0].mxu0 %vm516_vm1, %v7338_v32 }
 0x172   : > { %5197 = vmatmul.mubr.msk.f32.gmra.mrb[16].mxu1 %vm516_vm1, %v7339_v43  ;;  %5425 = vmatprep.mubr.msk.f32.mxu0 %vm516_vm1, %v7340_v40  ;;  %v7147_v43 = vld [vmem:[%s7228_s2] ss:$0 sm:$0xff] }
 0x173   : > { %5199 = vmatprep.mubr.msk.f32.mxu1 %vm516_vm1, %v7341_v61 }
 0x175   : > { %5426 = vmatmul.mubr.msk.f32.gmra.mrb[2].mxu0 %vm516_vm1, %v7342_v59 }
 0x176   : > { %5200 = vmatmul.mubr.msk.f32.gmra.mrb[18].mxu1 %vm516_vm1, %v7343_v42  ;;  %5428 = vmatprep.mubr.msk.f32.mxu0 %vm516_vm1, %v7344_v33 }
 0x177   : > { %5202 = vmatprep.mubr.msk.f32.mxu1 %vm516_vm1, %v7345_v9 }
 0x179   : > { %5429 = vmatmul.mubr.msk.f32.gmra.mrb[4].mxu0 %vm516_vm1, %v7346_v62 }
 0x17a   : > { %5203 = vmatmul.mubr.msk.f32.gmra.mrb[20].mxu1 %vm516_vm1, %v7347_v29  ;;  %5431 = vmatprep.mubr.msk.f32.mxu0 %vm516_vm1, %v7348_v19 }
 0x17b   : > { %5205 = vmatprep.mubr.msk.f32.mxu1 %vm516_vm1, %v7349_v26 }
 0x17d   : > { %5432 = vmatmul.mubr.msk.f32.gmra.mrb[6].mxu0 %vm516_vm1, %v7350_v51 }
 0x17e   : > { %5206 = vmatmul.mubr.msk.f32.gmra.mrb[22].mxu1 %vm516_vm1, %v7351_v17  ;;  %5434 = vmatprep.mubr.msk.f32.mxu0 %vm516_vm1, %v7352_v52 }
 0x17f   : > { %5208 = vmatprep.mubr.msk.f32.mxu1 %vm516_vm1, %v7353_v37 }
 0x181   : > { %5435 = vmatmul.mubr.msk.f32.gmra.mrb[8].mxu0 %vm516_vm1, %v7354_v63 }
 0x182   : > { %5209 = vmatmul.mubr.msk.f32.gmra.mrb[24].mxu1 %vm516_vm1, %v7355_v10  ;;  %5437 = vmatprep.mubr.msk.f32.mxu0 %vm516_vm1, %v7356_v56 }
 0x183   : > { %5211 = vmatprep.mubr.msk.f32.mxu1 %vm516_vm1, %v7357_v25 }
 0x185   : > { %5438 = vmatmul.mubr.msk.f32.gmra.mrb[10].mxu0 %vm516_vm1, %v7358_v7 }
 0x186   : > { %5212 = vmatmul.mubr.msk.f32.gmra.mrb[26].mxu1 %vm516_vm1, %v7359_v24  ;;  %5440 = vmatprep.mubr.msk.f32.mxu0 %vm516_vm1, %v7360_v50 }
 0x187   : > { %5214 = vmatprep.mubr.msk.f32.mxu1 %vm516_vm1, %v7361_v47 }
 0x189   : > { %5441 = vmatmul.mubr.msk.f32.gmra.mrb[12].mxu0 %vm516_vm1, %v7362_v6 }
 0x18a   : > { %5215 = vmatmul.mubr.msk.f32.gmra.mrb[28].mxu1 %vm516_vm1, %v7363_v36  ;;  %5443 = vmatprep.mubr.msk.f32.mxu0 %vm516_vm1, %v7364_v41 }
 0x18b   : > { %5217 = vmatprep.mubr.msk.f32.mxu1 %vm516_vm1, %v6737_v3  ;;  %v7369_v3 = vld [vmem:[#allocation24_spill] sm:$0xff] }
 0x18d   : > { %5444 = vmatmul.mubr.msk.f32.gmra.mrb[14].mxu0 %vm516_vm1, %v7365_v35 }
 0x18e   : > { %5218 = vmatmul.mubr.msk.f32.gmra.mrb[30].mxu1 %vm516_vm1, %v6733_v14  ;;  %5446 = vmatprep.mubr.msk.f32.mxu0 %vm516_vm1, %v7366_v34  ;;  %v7370_v14 = vld [vmem:[#allocation27_spill] sm:$0xff] }
 0x18f   : > { %5246 = vmatprep.mubr.msk.f32.mxu1 %vm516_vm1, %v6882_v48  ;;  %v7371_v48 = vld [vmem:[#allocation30_spill] sm:$0xff] }
 0x191   : > { %5447 = vmatmul.mubr.msk.f32.gmra.mrb[16].mxu0 %vm516_vm1, %v7367_v55 }
 0x192   : > { %5247 = vmatmul.mubr.msk.f32.vlgmr.msra.gmra.mrb[16].mxu1 %vm516_vm1, %v6890_v18  ;;  %5449 = vmatprep.mubr.msk.f32.mxu0 %vm516_vm1, %v7368_v46  ;;  %v7372_v18 = vld [vmem:[#allocation33_spill] sm:$0xff] }
 0x193   : > { %5249 = vmatprep.mubr.msk.f32.mxu1 %vm516_vm1, %v6895_v16  ;;  %v7373_v16 = vld [vmem:[#allocation36_spill] sm:$0xff] }
 0x195   : > { %5450 = vmatmul.mubr.msk.f32.gmra.mrb[18].mxu0 %vm516_vm1, %v7369_v3 }
 0x196   : > { %5250 = vmatmul.mubr.msk.f32.gmra.mrb[18].mxu1 %vm516_vm1, %v6904_v12  ;;  %5452 = vmatprep.mubr.msk.f32.mxu0 %vm516_vm1, %v7370_v14  ;;  %v7374_v12 = vld [vmem:[#allocation39_spill] sm:$0xff] }
 0x197   : > { %5252 = vmatprep.mubr.msk.f32.mxu1 %vm516_vm1, %v6909_v28  ;;  %v7375_v28 = vld [vmem:[#allocation42_spill] sm:$0xff] }
 0x199   : > { %5453 = vmatmul.mubr.msk.f32.gmra.mrb[20].mxu0 %vm516_vm1, %v7371_v48 }
 0x19a   : > { %5253 = vmatmul.mubr.msk.f32.gmra.mrb[20].mxu1 %vm516_vm1, %v6918_v15  ;;  %5455 = vmatprep.mubr.msk.f32.mxu0 %vm516_vm1, %v7372_v18  ;;  %v7376_v15 = vld [vmem:[#allocation45_spill] sm:$0xff] }
 0x19b   : > { %5255 = vmatprep.mubr.msk.f32.mxu1 %vm516_vm1, %v6925_v31  ;;  %v3856_v31 = vld [vmem:[%s5824_s20 + $0x112] sm:$0xff] }
 0x19d   : > { %5456 = vmatmul.mubr.msk.f32.gmra.mrb[22].mxu0 %vm516_vm1, %v7373_v16 }
 0x19e   : > { %5256 = vmatmul.mubr.msk.f32.gmra.mrb[22].mxu1 %vm516_vm1, %v6934_v27  ;;  %5458 = vmatprep.mubr.msk.f32.mxu0 %vm516_vm1, %v7374_v12  ;;  %v7377_v27 = vld [vmem:[#allocation48_spill] sm:$0xff] }
 0x19f   : > { %5258 = vmatprep.mubr.msk.f32.mxu1 %vm516_vm1, %v6939_v60  ;;  %v7378_v60 = vld [vmem:[#allocation51_spill] sm:$0xff] }
 0x1a1   : > { %5459 = vmatmul.mubr.msk.f32.gmra.mrb[24].mxu0 %vm516_vm1, %v7375_v28 }
 0x1a2   : > { %5259 = vmatmul.mubr.msk.f32.gmra.mrb[24].mxu1 %vm516_vm1, %v6948_v4  ;;  %5461 = vmatprep.mubr.msk.f32.mxu0 %vm516_vm1, %v7376_v15  ;;  %v3888_v4 = vmul.f32 %v3856_v31, %v7379_v58 }
 0x1a3   : > { %5261 = vmatprep.mubr.msk.f32.mxu1 %vm516_vm1, %v6953_v5  ;;  %v7381_v5 = vld [vmem:[#allocation59_spill] sm:$0xff] }
 0x1a4   : > { %v3889_v44 = vmul.f32 %v3857_v1, %v7381_v5 }
 0x1a5   : > { %5462 = vmatmul.mubr.msk.f32.gmra.mrb[26].mxu0 %vm516_vm1, %v7377_v27 }
 0x1a6   : > { %5262 = vmatmul.mubr.msk.f32.gmra.mrb[26].mxu1 %vm516_vm1, %v6962_v38  ;;  %5464 = vmatprep.mubr.msk.f32.mxu0 %vm516_vm1, %v7378_v60 }
 0x1a7   : > { %5264 = vmatprep.mubr.msk.f32.mxu1 %vm516_vm1, %v6967_v53 }
 0x1a9   : > { %5465 = vmatmul.mubr.msk.f32.gmra.mrb[28].mxu0 %vm516_vm1, %v7380_v23 }
 0x1aa   : > { %5265 = vmatmul.mubr.msk.f32.gmra.mrb[28].mxu1 %vm516_vm1, %v6976_v45  ;;  %5467 = vmatprep.mubr.msk.f32.mxu0 %vm516_vm1, %v3888_v4 }
 0x1ab   : > { %5267 = vmatprep.mubr.msk.f32.mxu1 %vm516_vm1, %v6981_v54 }
 0x1ad   : > { %5468 = vmatmul.mubr.msk.f32.gmra.mrb[30].mxu0 %vm516_vm1, %v3889_v44 }
 0x1ae   : > { %5268 = vmatmul.mubr.msk.f32.gmra.mrb[30].mxu1 %vm516_vm1, %v6990_v0 }
 0x225   : > { %v5174_v38 = vpop.f32.mrb[0].mxu1 }
 0x226   : > { %v2011_v53 = vpop.f32.mrb[1].mxu1 }
 0x229   : > { %v5177_v8 = vpop.f32.mrb[2].mxu1 }
 0x22a   : > { %v2021_v49 = vpop.f32.mrb[3].mxu1 }
 0x22d   : > { %v5180_v2 = vpop.f32.mrb[4].mxu1 }
 0x22e   : > { %v2031_v21 = vpop.f32.mrb[5].mxu1 }
 0x231   : > { %v5183_v45 = vpop.f32.mrb[6].mxu1 }
 0x232   : > { %v2041_v11 = vpop.f32.mrb[7].mxu1 }
 0x235   : > { %v5186_v13 = vpop.f32.mrb[8].mxu1 }
 0x236   : > { %v2051_v57 = vpop.f32.mrb[9].mxu1 }
 0x239   : > { %v5189_v20 = vpop.f32.mrb[10].mxu1 }
 0x23a   : > { %v2061_v22 = vpop.f32.mrb[11].mxu1 }
 0x23d   : > { %v7136_v39 = vpop.f32.mrb[12].mxu1 }
 0x23e   : > { %v7138_v54 = vpop.f32.mrb[13].mxu1 }
 0x241   : > { %v7140_v30 = vpop.f32.mrb[14].mxu1 }
 0x242   : > { %v7142_v0 = vpop.f32.mrb[15].mxu1 }
 0x244   : > { %v5424_v32 = vpop.f32.mrb[0].mxu0 }
 0x245   : > { %v5472_v40 = vadd.f32 %v5424_v32, %v5174_v38  ;;  %v4057_v61 = vpop.f32.mrb[1].mxu0 }
 0x246   : > { %v5473_v59 = vadd.f32 %v4057_v61, %v2011_v53 }
 0x247   : > { %v4256_v42 = vadd.f32 %v5472_v40, %v7147_v43 }
 0x248   : > { %v4255_v33 = vadd.f32 %v5473_v59, %v7147_v43  ;;  %v5427_v9 = vpop.f32.mrb[2].mxu0 }
 0x249   : > { %v4288_v62 = vmax.f32 %v4256_v42, 0.0  ;;  %v5474_v29 = vadd.f32 %v5427_v9, %v5177_v8  ;;  %v4067_v19 = vpop.f32.mrb[3].mxu0 }
 0x24a   : > { %v4287_v26 = vmax.f32 %v4255_v33, 0.0  ;;  %v5475_v51 = vadd.f32 %v4067_v19, %v2021_v49 }
 0x24b   : > { %4320 = vst [vmem:[%s7154_s21 + $0x8] sm:$0xff] %v4288_v62  ;;  %v4258_v17 = vadd.f32 %v5474_v29, %v7147_v43 }
 0x24c   : > { %4319 = vst [vmem:[%s7154_s21] sm:$0xff] %v4287_v26  ;;  %v4257_v52 = vadd.f32 %v5475_v51, %v7147_v43  ;;  %v5430_v37 = vpop.f32.mrb[4].mxu0 }
 0x24d   : > { %v4290_v63 = vmax.f32 %v4258_v17, 0.0  ;;  %v5476_v10 = vadd.f32 %v5430_v37, %v5180_v2  ;;  %v4077_v56 = vpop.f32.mrb[5].mxu0 }
 0x24e   : > { %v4289_v25 = vmax.f32 %v4257_v52, 0.0  ;;  %v5477_v7 = vadd.f32 %v4077_v56, %v2031_v21 }
 0x24f   : > { %4322 = vst [vmem:[%s7154_s21 + $0x18] sm:$0xff] %v4290_v63  ;;  %v4260_v24 = vadd.f32 %v5476_v10, %v7147_v43 }
 0x250   : > { %4321 = vst [vmem:[%s7154_s21 + $0x10] sm:$0xff] %v4289_v25  ;;  %v4259_v50 = vadd.f32 %v5477_v7, %v7147_v43  ;;  %v5433_v47 = vpop.f32.mrb[6].mxu0 }
 0x251   : > { %v4292_v6 = vmax.f32 %v4260_v24, 0.0  ;;  %v5478_v36 = vadd.f32 %v5433_v47, %v5183_v45  ;;  %v4087_v41 = vpop.f32.mrb[7].mxu0 }
 0x252   : > { %v4291_v35 = vmax.f32 %v4259_v50, 0.0  ;;  %v5479_v34 = vadd.f32 %v4087_v41, %v2041_v11 }
 0x253   : > { %4324 = vst [vmem:[%s7154_s21 + $0x28] sm:$0xff] %v4292_v6  ;;  %v4262_v55 = vadd.f32 %v5478_v36, %v7147_v43 }
 0x254   : > { %4323 = vst [vmem:[%s7154_s21 + $0x20] sm:$0xff] %v4291_v35  ;;  %v4261_v46 = vadd.f32 %v5479_v34, %v7147_v43  ;;  %v5436_v3 = vpop.f32.mrb[8].mxu0 }
 0x255   : > { %v4294_v14 = vmax.f32 %v4262_v55, 0.0  ;;  %v5480_v48 = vadd.f32 %v5436_v3, %v5186_v13  ;;  %v4097_v18 = vpop.f32.mrb[9].mxu0 }
 0x256   : > { %v4293_v16 = vmax.f32 %v4261_v46, 0.0  ;;  %v5481_v12 = vadd.f32 %v4097_v18, %v2051_v57 }
 0x257   : > { %4326 = vst [vmem:[%s7154_s21 + $0x38] sm:$0xff] %v4294_v14  ;;  %v4264_v28 = vadd.f32 %v5480_v48, %v7147_v43 }
 0x258   : > { %4325 = vst [vmem:[%s7154_s21 + $0x30] sm:$0xff] %v4293_v16  ;;  %v4263_v15 = vadd.f32 %v5481_v12, %v7147_v43  ;;  %v5439_v31 = vpop.f32.mrb[10].mxu0 }
 0x259   : > { %v4296_v27 = vmax.f32 %v4264_v28, 0.0  ;;  %v5482_v60 = vadd.f32 %v5439_v31, %v5189_v20  ;;  %v4107_v58 = vpop.f32.mrb[11].mxu0 }
 0x25a   : > { %v4295_v4 = vmax.f32 %v4263_v15, 0.0  ;;  %v5483_v1 = vadd.f32 %v4107_v58, %v2061_v22 }
 0x25b   : > { %4328 = vst [vmem:[%s7154_s21 + $0x48] sm:$0xff] %v4296_v27  ;;  %v4266_v23 = vadd.f32 %v5482_v60, %v7147_v43 }
 0x25c   : > { %4327 = vst [vmem:[%s7154_s21 + $0x40] sm:$0xff] %v4295_v4  ;;  %v4265_v5 = vadd.f32 %v5483_v1, %v7147_v43  ;;  %v5442_v44 = vpop.f32.mrb[12].mxu0 }
 0x25d   : > { %v4298_v38 = vmax.f32 %v4266_v23, 0.0  ;;  %v5484_v53 = vadd.f32 %v5442_v44, %v7136_v39  ;;  %v4117_v8 = vpop.f32.mrb[13].mxu0 }
 0x25e   : > { %v4297_v49 = vmax.f32 %v4265_v5, 0.0  ;;  %v5485_v2 = vadd.f32 %v4117_v8, %v7138_v54 }
 0x25f   : > { %4330 = vst [vmem:[%s7154_s21 + $0x58] sm:$0xff] %v4298_v38  ;;  %v4268_v21 = vadd.f32 %v5484_v53, %v7147_v43 }
 0x260   : > { %4329 = vst [vmem:[%s7154_s21 + $0x50] sm:$0xff] %v4297_v49  ;;  %v4267_v45 = vadd.f32 %v5485_v2, %v7147_v43  ;;  %v5445_v11 = vpop.f32.mrb[14].mxu0 }
 0x261   : > { %v4300_v13 = vmax.f32 %v4268_v21, 0.0  ;;  %v5486_v57 = vadd.f32 %v5445_v11, %v7140_v30  ;;  %v4127_v20 = vpop.f32.mrb[15].mxu0 }
 0x262   : > { %v4299_v22 = vmax.f32 %v4267_v45, 0.0  ;;  %v5487_v39 = vadd.f32 %v4127_v20, %v7142_v0 }
 0x263   : > { %4332 = vst [vmem:[%s7154_s21 + $0x68] sm:$0xff] %v4300_v13  ;;  %v4270_v32 = vadd.f32 %v5486_v57, %v7147_v43 }
 0x264   : > { %4331 = vst [vmem:[%s7154_s21 + $0x60] sm:$0xff] %v4299_v22  ;;  %v4269_v54 = vadd.f32 %v5487_v39, %v7147_v43  ;;  %v5448_v40 = vpop.f32.mrb[16].mxu0 }
 0x265   : > { %v4302_v61 = vmax.f32 %v4270_v32, 0.0  ;;  %v5248_v59 = vpop.f32.mrb[16].mxu1  ;;  %v4137_v42 = vpop.f32.mrb[17].mxu0 }
 0x266   : > { %v4301_v33 = vmax.f32 %v4269_v54, 0.0  ;;  %v5488_v9 = vadd.f32 %v5448_v40, %v5248_v59  ;;  %v2481_v62 = vpop.f32.mrb[17].mxu1 }
 0x267   : > { %4334 = vst [vmem:[%s7154_s21 + $0x78] sm:$0xff] %v4302_v61  ;;  %v5489_v30 = vadd.f32 %v4137_v42, %v2481_v62 }
 0x268   : > { %4333 = vst [vmem:[%s7154_s21 + $0x70] sm:$0xff] %v4301_v33  ;;  %v4272_v0 = vadd.f32 %v5488_v9, %v7147_v43  ;;  %v5451_v29 = vpop.f32.mrb[18].mxu0 }
 0x269   : > { %v4271_v19 = vadd.f32 %v5489_v30, %v7147_v43  ;;  %v5251_v26 = vpop.f32.mrb[18].mxu1  ;;  %v4147_v51 = vpop.f32.mrb[19].mxu0 }
 0x26a   : > { %v4304_v17 = vmax.f32 %v4272_v0, 0.0  ;;  %v5490_v52 = vadd.f32 %v5451_v29, %v5251_v26  ;;  %v2491_v37 = vpop.f32.mrb[19].mxu1 }
 0x26b   : > { %v4303_v63 = vmax.f32 %v4271_v19, 0.0  ;;  %v5491_v10 = vadd.f32 %v4147_v51, %v2491_v37 }
 0x26c   : > { %4336 = vst [vmem:[%s7154_s21 + $0x88] sm:$0xff] %v4304_v17  ;;  %v4274_v56 = vadd.f32 %v5490_v52, %v7147_v43  ;;  %v5454_v25 = vpop.f32.mrb[20].mxu0 }
 0x26d   : > { %4335 = vst [vmem:[%s7154_s21 + $0x80] sm:$0xff] %v4303_v63  ;;  %v4273_v7 = vadd.f32 %v5491_v10, %v7147_v43  ;;  %v5254_v24 = vpop.f32.mrb[20].mxu1  ;;  %v4157_v50 = vpop.f32.mrb[21].mxu0 }
 0x26e   : > { %v4306_v47 = vmax.f32 %v4274_v56, 0.0  ;;  %v5492_v6 = vadd.f32 %v5454_v25, %v5254_v24  ;;  %v2501_v36 = vpop.f32.mrb[21].mxu1 }
 0x26f   : > { %v4305_v41 = vmax.f32 %v4273_v7, 0.0  ;;  %v5493_v35 = vadd.f32 %v4157_v50, %v2501_v36 }
 0x270   : > { %4338 = vst [vmem:[%s7154_s21 + $0x98] sm:$0xff] %v4306_v47  ;;  %v4276_v34 = vadd.f32 %v5492_v6, %v7147_v43  ;;  %v5457_v55 = vpop.f32.mrb[22].mxu0 }
 0x271   : > { %4337 = vst [vmem:[%s7154_s21 + $0x90] sm:$0xff] %v4305_v41  ;;  %v4275_v46 = vadd.f32 %v5493_v35, %v7147_v43  ;;  %v5257_v3 = vpop.f32.mrb[22].mxu1  ;;  %v4167_v14 = vpop.f32.mrb[23].mxu0 }
 0x272   : > { %v4308_v48 = vmax.f32 %v4276_v34, 0.0  ;;  %v5494_v18 = vadd.f32 %v5457_v55, %v5257_v3  ;;  %v2511_v16 = vpop.f32.mrb[23].mxu1 }
 0x273   : > { %v4307_v12 = vmax.f32 %v4275_v46, 0.0  ;;  %v5495_v28 = vadd.f32 %v4167_v14, %v2511_v16 }
 0x274   : > { %4340 = vst [vmem:[%s7154_s21 + $0xa8] sm:$0xff] %v4308_v48  ;;  %v4278_v15 = vadd.f32 %v5494_v18, %v7147_v43  ;;  %v5460_v31 = vpop.f32.mrb[24].mxu0 }
 0x275   : > { %4339 = vst [vmem:[%s7154_s21 + $0xa0] sm:$0xff] %v4307_v12  ;;  %v4277_v27 = vadd.f32 %v5495_v28, %v7147_v43  ;;  %v5260_v60 = vpop.f32.mrb[24].mxu1  ;;  %v4177_v58 = vpop.f32.mrb[25].mxu0 }
 0x276   : > { %v4310_v4 = vmax.f32 %v4278_v15, 0.0  ;;  %v5496_v1 = vadd.f32 %v5460_v31, %v5260_v60  ;;  %v2521_v23 = vpop.f32.mrb[25].mxu1 }
 0x277   : > { %v4309_v5 = vmax.f32 %v4277_v27, 0.0  ;;  %v5497_v44 = vadd.f32 %v4177_v58, %v2521_v23 }
 0x278   : > { %4342 = vst [vmem:[%s7154_s21 + $0xb8] sm:$0xff] %v4310_v4  ;;  %v4280_v38 = vadd.f32 %v5496_v1, %v7147_v43  ;;  %v5463_v53 = vpop.f32.mrb[26].mxu0 }
 0x279   : > { %4341 = vst [vmem:[%s7154_s21 + $0xb0] sm:$0xff] %v4309_v5  ;;  %v4279_v8 = vadd.f32 %v5497_v44, %v7147_v43  ;;  %v5263_v49 = vpop.f32.mrb[26].mxu1  ;;  %v4187_v2 = vpop.f32.mrb[27].mxu0 }
 0x27a   : > { %v4312_v21 = vmax.f32 %v4280_v38, 0.0  ;;  %v5498_v45 = vadd.f32 %v5463_v53, %v5263_v49  ;;  %v2531_v11 = vpop.f32.mrb[27].mxu1 }
 0x27b   : > { %v4311_v13 = vmax.f32 %v4279_v8, 0.0  ;;  %v5499_v57 = vadd.f32 %v4187_v2, %v2531_v11 }
 0x27c   : > { %4344 = vst [vmem:[%s7154_s21 + $0xc8] sm:$0xff] %v4312_v21  ;;  %v4282_v20 = vadd.f32 %v5498_v45, %v7147_v43  ;;  %v5466_v22 = vpop.f32.mrb[28].mxu0 }
 0x27d   : > { %4343 = vst [vmem:[%s7154_s21 + $0xc0] sm:$0xff] %v4311_v13  ;;  %v4281_v39 = vadd.f32 %v5499_v57, %v7147_v43  ;;  %v5266_v32 = vpop.f32.mrb[28].mxu1  ;;  %v4197_v54 = vpop.f32.mrb[29].mxu0 }
 0x27e   : > { %v4314_v40 = vmax.f32 %v4282_v20, 0.0  ;;  %v5500_v61 = vadd.f32 %v5466_v22, %v5266_v32  ;;  %v2541_v59 = vpop.f32.mrb[29].mxu1 }
 0x27f   : > { %v4313_v42 = vmax.f32 %v4281_v39, 0.0  ;;  %v5501_v33 = vadd.f32 %v4197_v54, %v2541_v59 }
 0x280   : > { %4346 = vst [vmem:[%s7154_s21 + $0xd8] sm:$0xff] %v4314_v40  ;;  %v4284_v9 = vadd.f32 %v5500_v61, %v7147_v43  ;;  %v5469_v62 = vpop.f32.mrb[30].mxu0 }
 0x281   : > { %4345 = vst [vmem:[%s7154_s21 + $0xd0] sm:$0xff] %v4313_v42  ;;  %v4283_v30 = vadd.f32 %v5501_v33, %v7147_v43  ;;  %v5269_v0 = vpop.f32.mrb[30].mxu1  ;;  %v4207_v29 = vpop.f32.mrb[31].mxu0 }
 0x282   : > { %v4316_v19 = vmax.f32 %v4284_v9, 0.0  ;;  %v5502_v26 = vadd.f32 %v5469_v62, %v5269_v0  ;;  %v2551_v51 = vpop.f32.mrb[31].mxu1 }
 0x283   : > { %v4315_v17 = vmax.f32 %v4283_v30, 0.0  ;;  %v5503_v52 = vadd.f32 %v4207_v29, %v2551_v51 }
 0x284   : > { %4348 = vst [vmem:[%s7154_s21 + $0xe8] sm:$0xff] %v4316_v19  ;;  %v4286_v37 = vadd.f32 %v5502_v26, %v7147_v43 }
 0x285   : > { %4347 = vst [vmem:[%s7154_s21 + $0xe0] sm:$0xff] %v4315_v17  ;;  %v4285_v63 = vadd.f32 %v5503_v52, %v7147_v43 }
 0x286   : > { %v4318_v10 = vmax.f32 %v4286_v37, 0.0 }
 0x287   : > { %v4317_v56 = vmax.f32 %v4285_v63, 0.0 }
 0x288   : > { %4350 = vst [vmem:[%s7154_s21 + $0xf8] sm:$0xff] %v4318_v10 }
 0x289   : > { %4349 = vst [vmem:[%s7154_s21 + $0xf0] sm:$0xff] %v4317_v56 }
 0x28a PF: > { %s15_s18 = sadd.s32 1, %s5747_s18  }
 0x28b   : > { %p12_p4 = scmp.ge.s32.totalorder %s15_s18, 4  }
 0x28d   :  { %14 = sbr.rel (!%p12_p4) target bundleno = 1 (0x1), region = 78 }

// kernel: random_attempt_forward.10
= control target key start
LH: loop header
LB: loop body
LE: loop exit
PB: predicated region body
PF: predicated region fallthrough
CT: control target
= control target key end

     0   :  { %s2851_s18 = smov 0   ;;  %s3605_s0 = inlined_call_operand.vmem [shape: f32[2,82,128], index: 0, kind: input, shape index: {}]   ;;  %s3606_s1 = inlined_call_operand.vmem [shape: f32[9,128,128], index: 1, kind: input, shape index: {}]   ;;  %s3607_s2 = inlined_call_operand.vmem [shape: f32[1,128], index: 2, kind: input, shape index: {}]   ;;  %s3608_s3 = inlined_call_operand.vmem [shape: f32[64,1], index: 3, kind: input, shape index: {}]   ;;  %s3609_s4 = inlined_call_operand.vmem [shape: f32[64,1], index: 4, kind: input, shape index: {}]   ;;  %s3610_s5 = inlined_call_operand.vmem [shape: f32[2,64,128], index: 5, kind: output, shape index: {}]  }
   0x1 LB: > { %s1680_s19 = sadd.s32 4294967295, %s2818_s18   ;;  %p1684_p0 = scmp.ge.s32.totalorder %s2818_s18, 1  ;;  %s2818_s18 = sphi %s2851_s18, %s15_s18  }
   0x2   : > { %p187_p1 = scmp.lt.s32.totalorder %s2818_s18, 3 }
   0x4   : > { %p188_p2 = pnand %p1684_p0, %p187_p1 }
   0x5   : > { %v234_v0 = vld [vmem:[%s3608_s3 + $0x8] sm:$0xff] (!%p188_p2)  ;;  %v233_v1 = vld [vmem:[%s3608_s3] sm:$0xff] (!%p188_p2)  ;;  %p215_p3 = scmp.lt.s32.totalorder (!%p188_p2), %s1680_s19, 1  ;;  %v2820_v2 = vmov (!%p188_p2), 0   ;;  %v550_v5 = vld [vmem:[%s3609_s4 + $0x10] sm:$0xff] (!%p188_p2) }
   0x6   : > { %191 = sbr.rel (%p188_p2) target bundleno = 464 (0x1d0), region = 40  ;;  %2811 = vset.pattern.permute.xlu1 (!%p188_p2), %v2820_v2  ;;  %2810 = vset.pattern.permute.xlu0 (!%p188_p2), %v2820_v2  ;;  %v549_v3 = vld [vmem:[%s3609_s4 + $0x8] sm:$0xff] (!%p188_p2)  ;;  %v548_v4 = vld [vmem:[%s3609_s4] sm:$0xff] (!%p188_p2)  ;;  %v1690_v9 = vld [vmem:[%s3606_s1 + $0x90] sm:$0xff] (!%p188_p2) }
   0x7   : > { %248 = vperm.xlu1 (!%p188_p2), %2811, %v234_v0   ;;  %243 = vperm.xlu0 (!%p188_p2), %2810, %v233_v1   ;;  %v1688_v6 = vld [vmem:[%s3606_s1 + $0x80] sm:$0xff] (!%p188_p2)  ;;  %v1689_v7 = vld [vmem:[%s3606_s1 + $0x88] sm:$0xff] (!%p188_p2)  ;;  %v1691_v10 = vld [vmem:[%s3606_s1 + $0x98] sm:$0xff] (!%p188_p2) }
   0x8   : > { %v2432_v8 = vpack.c.bf16 (!%p188_p2), %v1689_v7, %v1688_v6  ;;  %v1736_v11 = vld [vmem:[%s3606_s1 + $0x200] sm:$0xff] (!%p188_p2)  ;;  %v235_v12 = vld [vmem:[%s3608_s3 + $0x10] sm:$0xff] (!%p188_p2)  ;;  %v2436_v13 = vpack.c.bf16 (!%p188_p2), %v1691_v10, %v1690_v9  ;;  %v1737_v14 = vld [vmem:[%s3606_s1 + $0x208] sm:$0xff] (!%p188_p2) }
   0x9   : > { %v1692_v15 = vld [vmem:[%s3606_s1 + $0xa0] sm:$0xff] (!%p188_p2)  ;;  %v2560_v16 = vpack.c.bf16 (!%p188_p2), %v1737_v14, %v1736_v11  ;;  %v1693_v17 = vld [vmem:[%s3606_s1 + $0xa8] sm:$0xff] (!%p188_p2)  ;;  %v1738_v18 = vld [vmem:[%s3606_s1 + $0x210] sm:$0xff] (!%p188_p2) }
   0xa   : > { %2433 = vmatprep.subr.bf16.mxu1 (!%p188_p2), %v2432_v8  ;;  %v1739_v19 = vld [vmem:[%s3606_s1 + $0x218] sm:$0xff] (!%p188_p2)  ;;  %v1740_v21 = vld [vmem:[%s3606_s1 + $0x220] sm:$0xff] (!%p188_p2)  ;;  %v1741_v22 = vld [vmem:[%s3606_s1 + $0x228] sm:$0xff] (!%p188_p2)  ;;  %v2440_v25 = vpack.c.bf16 (!%p188_p2), %v1693_v17, %v1692_v15 }
   0xb   : > { %563 = vperm.xlu1 (!%p188_p2), %2811, %v549_v3   ;;  %558 = vperm.xlu0 (!%p188_p2), %2810, %v548_v4   ;;  %v2564_v20 = vpack.c.bf16 (!%p188_p2), %v1739_v19, %v1738_v18  ;;  %v551_v23 = vld [vmem:[%s3609_s4 + $0x18] sm:$0xff] (!%p188_p2)  ;;  %v1694_v26 = vld [vmem:[%s3606_s1 + $0xb0] sm:$0xff] (!%p188_p2)  ;;  %v2568_v28 = vpack.c.bf16 (!%p188_p2), %v1741_v22, %v1740_v21  ;;  %v552_v31 = vld [vmem:[%s3609_s4 + $0x20] sm:$0xff] (!%p188_p2) }
   0xc   : > { %2435 = vmatpush3.bf16.msra.mxu1 (!%p188_p2), %v2432_v8  ;;  %v236_v24 = vld [vmem:[%s3608_s3 + $0x18] sm:$0xff] (!%p188_p2)  ;;  %2561 = vmatprep.subr.bf16.mxu0 (!%p188_p2), %v2560_v16  ;;  %v1742_v29 = vld [vmem:[%s3606_s1 + $0x230] sm:$0xff] (!%p188_p2)  ;;  %v237_v32 = vld [vmem:[%s3608_s3 + $0x20] sm:$0xff] (!%p188_p2) }
   0xd   : > { %s3612_s19 = smov (!%p215_p3, %s1680_s19), 1  ;;  %2437 = vmatprep.subr.bf16.mxu1 %v2436_v13  ;;  %2563 = vmatpush3.bf16.msra.mxu0 %v2560_v16  ;;  %v1695_v27 = vld [vmem:[%s3606_s1 + $0xb8] sm:$0xff]  ;;  %v1696_v35 = vld [vmem:[%s3606_s1 + $0xc0] sm:$0xff]  ;;  %v1697_v36 = vld [vmem:[%s3606_s1 + $0xc8] sm:$0xff] }
   0xe   : > { %s2800_s29 = smul.u32 88, %s3612_s19  ;;  %2565 = vmatprep.subr.bf16.mxu0 %v2564_v20  ;;  %v1743_v30 = vld [vmem:[%s3606_s1 + $0x238] sm:$0xff]  ;;  %v2444_v33 = vpack.c.bf16 %v1695_v27, %v1694_v26  ;;  %v1744_v38 = vld [vmem:[%s3606_s1 + $0x240] sm:$0xff]  ;;  %v1745_v39 = vld [vmem:[%s3606_s1 + $0x248] sm:$0xff]  ;;  %v2448_v43 = vpack.c.bf16 %v1697_v36, %v1696_v35  ;;  %s1819_s10 = sshll.u32 %s3612_s19, 6 }
   0xf   : > { %568 = vperm.xlu1 %2811, %v550_v5   ;;  %253 = vperm.xlu0 %2810, %v235_v12   ;;  %v2572_v37 = vpack.c.bf16 %v1743_v30, %v1742_v29  ;;  %v553_v41 = vld [vmem:[%s3609_s4 + $0x28] sm:$0xff]  ;;  %v1698_v44 = vld [vmem:[%s3606_s1 + $0xd0] sm:$0xff]  ;;  %v1699_v45 = vld [vmem:[%s3606_s1 + $0xd8] sm:$0xff]  ;;  %v2576_v46 = vpack.c.bf16 %v1745_v39, %v1744_v38  ;;  %s3592_s13 = scalar_lea.vmem %s3610_s5, %s1819_s10 }
  0x10   : > { %s2931_s21 = scalar_lea.vmem %s3605_s0, %s2800_s29  ;;  %2439 = vmatpush3.bf16.msra.mxu1 %v2436_v13  ;;  %v238_v42 = vld [vmem:[%s3608_s3 + $0x28] sm:$0xff]  ;;  %v1746_v47 = vld [vmem:[%s3606_s1 + $0x250] sm:$0xff]  ;;  %v1747_v48 = vld [vmem:[%s3606_s1 + $0x258] sm:$0xff]  ;;  %v2452_v51 = vpack.c.bf16 %v1699_v45, %v1698_v44 }
  0x11   : > { %2441 = vmatprep.subr.bf16.mxu1 %v2440_v25  ;;  %v305_v34 = vld [vmem:[%s2931_s21 + $0x1] sm:$0xff]  ;;  %2567 = vmatpush3.bf16.msra.mxu0 %v2564_v20  ;;  %v2959_v40 = vld [vmem:[%s2931_s21 + $0x9] sm:$0xff]  ;;  %v2580_v54 = vpack.c.bf16 %v1747_v48, %v1746_v47  ;;  %v555_v55 = vld [vmem:[%s3609_s4 + $0x38] sm:$0xff] }
  0x12   : > { %2068 = vmatprep.mubr.f32.mxu1 %v305_v34  ;;  %2569 = vmatprep.subr.bf16.mxu0 %v2568_v28  ;;  %v554_v49 = vld [vmem:[%s3609_s4 + $0x30] sm:$0xff]  ;;  %v1700_v52 = vld [vmem:[%s3606_s1 + $0xe0] sm:$0xff]  ;;  %v1701_v53 = vld [vmem:[%s3606_s1 + $0xe8] sm:$0xff] }
  0x13   : > { %573 = vperm.xlu1 %2811, %v551_v23   ;;  %258 = vperm.xlu0 %2810, %v236_v24   ;;  %v239_v50 = vld [vmem:[%s3608_s3 + $0x30] sm:$0xff]  ;;  %v1748_v56 = vld [vmem:[%s3606_s1 + $0x260] sm:$0xff]  ;;  %v1749_v57 = vld [vmem:[%s3606_s1 + $0x268] sm:$0xff]  ;;  %v2456_v59 = vpack.c.bf16 %v1701_v53, %v1700_v52 }
  0x14   : > { %2443 = vmatpush3.bf16.msra.mxu1 %v2440_v25  ;;  %2244 = vmatprep.mubr.f32.mxu0 %v2959_v40  ;;  %v240_v58 = vld [vmem:[%s3608_s3 + $0x38] sm:$0xff]  ;;  %v1702_v60 = vld [vmem:[%s3606_s1 + $0xf0] sm:$0xff]  ;;  %v2584_v62 = vpack.c.bf16 %v1749_v57, %v1748_v56  ;;  %v289_v2 = vld [vmem:[%s3606_s1] sm:$0xff] }
  0x15   : > { %2445 = vmatprep.subr.bf16.mxu1 %v2444_v33  ;;  %2571 = vmatpush3.bf16.msra.mxu0 %v2568_v28  ;;  %v1703_v61 = vld [vmem:[%s3606_s1 + $0xf8] sm:$0xff]  ;;  %v1750_v0 = vld [vmem:[%s3606_s1 + $0x270] sm:$0xff]  ;;  %v290_v3 = vld [vmem:[%s3606_s1 + $0x8] sm:$0xff] }
  0x16   : > { %2573 = vmatprep.subr.bf16.mxu0 %v2572_v37  ;;  %v2460_v63 = vpack.c.bf16 %v1703_v61, %v1702_v60  ;;  %v1751_v1 = vld [vmem:[%s3606_s1 + $0x278] sm:$0xff]  ;;  %v2464_v5 = vpack.c.bf16 %v290_v3, %v289_v2  ;;  %v1752_v6 = vld [vmem:[%s3606_s1 + $0x280] sm:$0xff]  ;;  %v1753_v7 = vld [vmem:[%s3606_s1 + $0x288] sm:$0xff] }
  0x17   : > { %578 = vperm.xlu1 %2811, %v552_v31   ;;  %263 = vperm.xlu0 %2810, %v237_v32   ;;  %v2588_v4 = vpack.c.bf16 %v1751_v1, %v1750_v0  ;;  %v291_v8 = vld [vmem:[%s3606_s1 + $0x10] sm:$0xff]  ;;  %v292_v9 = vld [vmem:[%s3606_s1 + $0x18] sm:$0xff]  ;;  %v2592_v10 = vpack.c.bf16 %v1753_v7, %v1752_v6  ;;  %v293_v14 = vld [vmem:[%s3606_s1 + $0x20] sm:$0xff] }
  0x18   : > { %2447 = vmatpush3.bf16.msra.mxu1 %v2444_v33  ;;  %v2468_v11 = vpack.c.bf16 %v292_v9, %v291_v8  ;;  %v1754_v12 = vld [vmem:[%s3606_s1 + $0x290] sm:$0xff]  ;;  %v1755_v13 = vld [vmem:[%s3606_s1 + $0x298] sm:$0xff]  ;;  %v294_v15 = vld [vmem:[%s3606_s1 + $0x28] sm:$0xff] }
  0x19   : > { %2449 = vmatprep.subr.bf16.mxu1 %v2448_v43  ;;  %2575 = vmatpush3.bf16.msra.mxu0 %v2572_v37  ;;  %v3048_v16 = vld [vmem:[%s2931_s21 + $0x11] sm:$0xff]  ;;  %v2596_v17 = vpack.c.bf16 %v1755_v13, %v1754_v12  ;;  %v3051_v18 = vld [vmem:[%s2931_s21 + $0x19] sm:$0xff]  ;;  %v2472_v19 = vpack.c.bf16 %v294_v15, %v293_v14  ;;  %v1757_v21 = vld [vmem:[%s3606_s1 + $0x2a8] sm:$0xff] }
  0x1a   : > { %2577 = vmatprep.subr.bf16.mxu0 %v2576_v46  ;;  %v1756_v20 = vld [vmem:[%s3606_s1 + $0x2a0] sm:$0xff]  ;;  %v295_v22 = vld [vmem:[%s3606_s1 + $0x30] sm:$0xff]  ;;  %v296_v23 = vld [vmem:[%s3606_s1 + $0x38] sm:$0xff] }
  0x1b   : > { %583 = vperm.xlu1 %2811, %v553_v41   ;;  %268 = vperm.xlu0 %2810, %v238_v42   ;;  %v3068_v24 = vld [vmem:[%s2931_s21 + $0x21] sm:$0xff]  ;;  %v2600_v25 = vpack.c.bf16 %v1757_v21, %v1756_v20  ;;  %v3072_v26 = vld [vmem:[%s2931_s21 + $0x29] sm:$0xff]  ;;  %v2476_v27 = vpack.c.bf16 %v296_v23, %v295_v22  ;;  %v1759_v29 = vld [vmem:[%s3606_s1 + $0x2b8] sm:$0xff] }
  0x1c   : > { %2451 = vmatpush3.bf16.msra.mxu1 %v2448_v43  ;;  %v1758_v28 = vld [vmem:[%s3606_s1 + $0x2b0] sm:$0xff]  ;;  %v297_v30 = vld [vmem:[%s3606_s1 + $0x40] sm:$0xff]  ;;  %v298_v31 = vld [vmem:[%s3606_s1 + $0x48] sm:$0xff] }
  0x1d   : > { %2453 = vmatprep.subr.bf16.mxu1 %v2452_v51  ;;  %2579 = vmatpush3.bf16.msra.mxu0 %v2576_v46  ;;  %v3090_v32 = vld [vmem:[%s2931_s21 + $0x31] sm:$0xff]  ;;  %v2604_v33 = vpack.c.bf16 %v1759_v29, %v1758_v28  ;;  %v3093_v34 = vld [vmem:[%s2931_s21 + $0x39] sm:$0xff]  ;;  %v2480_v35 = vpack.c.bf16 %v298_v31, %v297_v30  ;;  %v1761_v37 = vld [vmem:[%s3606_s1 + $0x2c8] sm:$0xff] }
  0x1e   : > { %2581 = vmatprep.subr.bf16.mxu0 %v2580_v54  ;;  %v1760_v36 = vld [vmem:[%s3606_s1 + $0x2c0] sm:$0xff]  ;;  %v299_v38 = vld [vmem:[%s3606_s1 + $0x50] sm:$0xff]  ;;  %v300_v39 = vld [vmem:[%s3606_s1 + $0x58] sm:$0xff] }
  0x1f   : > { %588 = vperm.xlu1 %2811, %v554_v49   ;;  %273 = vperm.xlu0 %2810, %v239_v50   ;;  %v2484_v41 = vpack.c.bf16 %v300_v39, %v299_v38  ;;  %v1762_v42 = vld [vmem:[%s3606_s1 + $0x2d0] sm:$0xff]  ;;  %v1763_v43 = vld [vmem:[%s3606_s1 + $0x2d8] sm:$0xff]  ;;  %v301_v44 = vld [vmem:[%s3606_s1 + $0x60] sm:$0xff] }
  0x20   : > { %2455 = vmatpush3.bf16.msra.mxu1 %v2452_v51  ;;  %v302_v45 = vld [vmem:[%s3606_s1 + $0x68] sm:$0xff]  ;;  %v2612_v47 = vpack.c.bf16 %v1763_v43, %v1762_v42  ;;  %v1764_v49 = vld [vmem:[%s3606_s1 + $0x2e0] sm:$0xff]  ;;  %v303_v51 = vld [vmem:[%s3606_s1 + $0x70] sm:$0xff] }
  0x21   : > { %2457 = vmatprep.subr.bf16.mxu1 %v2456_v59  ;;  %2583 = vmatpush3.bf16.msra.mxu0 %v2580_v54  ;;  %v3126_v46 = vld [vmem:[%s2931_s21 + $0x41] sm:$0xff]  ;;  %v2488_v48 = vpack.c.bf16 %v302_v45, %v301_v44  ;;  %v304_v52 = vld [vmem:[%s3606_s1 + $0x78] sm:$0xff]  ;;  %v1706_v2 = vld [vmem:[%s3606_s1 + $0x110] sm:$0xff] }
  0x22   : > { %2585 = vmatprep.subr.bf16.mxu0 %v2584_v62  ;;  %v1765_v50 = vld [vmem:[%s3606_s1 + $0x2e8] sm:$0xff]  ;;  %v2492_v54 = vpack.c.bf16 %v304_v52, %v303_v51  ;;  %v1767_v56 = vld [vmem:[%s3606_s1 + $0x2f8] sm:$0xff]  ;;  %v1704_v57 = vld [vmem:[%s3606_s1 + $0x100] sm:$0xff] }
  0x23   : > { %593 = vperm.xlu1 %2811, %v555_v55   ;;  %278 = vperm.xlu0 %2810, %v240_v58   ;;  %v2616_v53 = vpack.c.bf16 %v1765_v50, %v1764_v49  ;;  %v1766_v55 = vld [vmem:[%s3606_s1 + $0x2f0] sm:$0xff]  ;;  %v1705_v58 = vld [vmem:[%s3606_s1 + $0x108] sm:$0xff]  ;;  %v1768_v61 = vld [vmem:[%s3606_s1 + $0x300] sm:$0xff] }
  0x24   : > { %2459 = vmatpush3.bf16.msra.mxu1 %v2456_v59  ;;  %v2620_v59 = vpack.c.bf16 %v1767_v56, %v1766_v55  ;;  %v2496_v60 = vpack.c.bf16 %v1705_v58, %v1704_v57  ;;  %v3160_v0 = vld [vmem:[%s2931_s21 + $0x8] sm:$0xff]  ;;  %v225_v1 = vld [vmem:[%s2931_s21] sm:$0xff]  ;;  %v1707_v3 = vld [vmem:[%s3606_s1 + $0x118] sm:$0xff] }
  0x25   : > { %2461 = vmatprep.subr.bf16.mxu1 %v2460_v63  ;;  %2587 = vmatpush3.bf16.msra.mxu0 %v2584_v62  ;;  %v1769_v62 = vld [vmem:[%s3606_s1 + $0x308] sm:$0xff]  ;;  %v3180_v9 = vld [vmem:[%s2931_s21 + $0x1a] sm:$0xff]  ;;  %v1710_v28 = vld [vmem:[%s3606_s1 + $0x130] sm:$0xff] }
  0x26   : > { %2589 = vmatprep.subr.bf16.mxu0 %v2588_v4  ;;  %v3177_v8 = vld [vmem:[%s2931_s21 + $0xa] sm:$0xff]  ;;  %v1708_v12 = vld [vmem:[%s3606_s1 + $0x120] sm:$0xff]  ;;  %v1771_v20 = vld [vmem:[%s3606_s1 + $0x318] sm:$0xff] }
  0x27   : > { %v1709_v13 = vld [vmem:[%s3606_s1 + $0x128] sm:$0xff]  ;;  %v1711_v29 = vld [vmem:[%s3606_s1 + $0x138] sm:$0xff]  ;;  %v3223_v30 = vld [vmem:[%s2931_s21 + $0x10] sm:$0xff] }
  0x28   : > { %2463 = vmatpush3.bf16.msra.mxu1 %v2460_v63  ;;  %v2624_v63 = vpack.c.bf16 %v1769_v62, %v1768_v61  ;;  %v1772_v39 = vld [vmem:[%s3606_s1 + $0x320] sm:$0xff]  ;;  %v2508_v42 = vpack.c.bf16 %v1711_v29, %v1710_v28  ;;  %v1713_v44 = vld [vmem:[%s3606_s1 + $0x148] sm:$0xff]  ;;  %v3253_v45 = vld [vmem:[%s2931_s21 + $0x18] sm:$0xff] }
  0x29   : > { %2465 = vmatprep.subr.bf16.mxu1 %v2464_v5  ;;  %2591 = vmatpush3.bf16.msra.mxu0 %v2588_v4  ;;  %v1712_v43 = vld [vmem:[%s3606_s1 + $0x140] sm:$0xff]  ;;  %v1714_v56 = vld [vmem:[%s3606_s1 + $0x150] sm:$0xff]  ;;  %v1715_v57 = vld [vmem:[%s3606_s1 + $0x158] sm:$0xff] }
  0x2a   : > { %2593 = vmatprep.subr.bf16.mxu0 %v2592_v10  ;;  %v2512_v55 = vpack.c.bf16 %v1713_v44, %v1712_v43  ;;  %v3280_v58 = vld [vmem:[%s2931_s21 + $0x20] sm:$0xff]  ;;  %v1778_v29 = vld [vmem:[%s3606_s1 + $0x350] sm:$0xff] }
  0x2b   : > { %2069 = vmatmul.mubr.f32.vlgmr.msra.gmra.mrb[0].mxu1 %v2959_v40  ;;  %v2608_v40 = vpack.c.bf16 %v1761_v37, %v1760_v36 }
  0x2c   : > { %2467 = vmatpush3.bf16.msra.mxu1 %v2464_v5  ;;  %2071 = vmatprep.mubr.f32.mxu1 %v3048_v16 }
  0x2d   : > { %2469 = vmatprep.subr.bf16.mxu1 %v2468_v11  ;;  %2245 = vmatmul.mubr.f32.vlgmr.msra.gmra.mrb[0].mxu0 %v3048_v16 }
  0x2e   : > { %2595 = vmatpush3.bf16.msra.mxu0 %v2592_v10  ;;  %2247 = vmatprep.mubr.f32.mxu0 %v3051_v18  ;;  %v2500_v10 = vpack.c.bf16 %v1707_v3, %v1706_v2  ;;  %v1777_v2 = vld [vmem:[%s3606_s1 + $0x348] sm:$0xff]  ;;  %v3297_v3 = vld [vmem:[%s2931_s21 + $0x3a] sm:$0xff] }
  0x2f   : > { %2072 = vmatmul.mubr.f32.gmra.mrb[2].mxu1 %v3051_v18  ;;  %2597 = vmatprep.subr.bf16.mxu0 %v2596_v17 }
  0x30   : > { %2471 = vmatpush3.bf16.msra.mxu1 %v2468_v11  ;;  %2074 = vmatprep.mubr.f32.mxu1 %v3068_v24  ;;  %v3183_v11 = vld [vmem:[%s2931_s21 + $0x12] sm:$0xff] }
  0x31   : > { %2473 = vmatprep.subr.bf16.mxu1 %v2472_v19  ;;  %2248 = vmatmul.mubr.f32.gmra.mrb[2].mxu0 %v3068_v24 }
  0x32   : > { %2599 = vmatpush3.bf16.msra.mxu0 %v2596_v17  ;;  %2250 = vmatprep.mubr.f32.mxu0 %v3072_v26 }
  0x33   : > { %2075 = vmatmul.mubr.f32.gmra.mrb[4].mxu1 %v3072_v26  ;;  %2601 = vmatprep.subr.bf16.mxu0 %v2600_v25 }
  0x34   : > { %2475 = vmatpush3.bf16.msra.mxu1 %v2472_v19  ;;  %2077 = vmatprep.mubr.f32.mxu1 %v3090_v32  ;;  %v1770_v19 = vld [vmem:[%s3606_s1 + $0x310] sm:$0xff] }
  0x35   : > { %2477 = vmatprep.subr.bf16.mxu1 %v2476_v27  ;;  %2251 = vmatmul.mubr.f32.gmra.mrb[4].mxu0 %v3090_v32 }
  0x36   : > { %2603 = vmatpush3.bf16.msra.mxu0 %v2600_v25  ;;  %2253 = vmatprep.mubr.f32.mxu0 %v3093_v34  ;;  %v3214_v25 = vld [vmem:[%s2931_s21 + $0x22] sm:$0xff] }
  0x37   : > { %2078 = vmatmul.mubr.f32.gmra.mrb[6].mxu1 %v3093_v34  ;;  %2605 = vmatprep.subr.bf16.mxu0 %v2604_v33 }
  0x38   : > { %2479 = vmatpush3.bf16.msra.mxu1 %v2476_v27  ;;  %v2504_v27 = vpack.c.bf16 %v1709_v13, %v1708_v12  ;;  %v3306_v12 = vld [vmem:[%s2931_s21 + $0x28] sm:$0xff]  ;;  %v3309_v13 = vld [vmem:[%s2931_s21 + $0x32] sm:$0xff] }
  0x39   : > { %2481 = vmatprep.subr.bf16.mxu1 %v2480_v35  ;;  %2254 = vmatmul.mubr.f32.gmra.mrb[6].mxu0 %v3126_v46 }
  0x3a   : > { %2607 = vmatpush3.bf16.msra.mxu0 %v2604_v33 }
  0x3b   : > { %2609 = vmatprep.subr.bf16.mxu0 %v2608_v40 }
  0x3c   : > { %2483 = vmatpush3.bf16.msra.mxu1 %v2480_v35  ;;  %v2628_v35 = vpack.c.bf16 %v1771_v20, %v1770_v19 }
  0x3d   : > { %2485 = vmatprep.subr.bf16.mxu1 %v2484_v41 }
  0x3e   : > { %2611 = vmatpush3.bf16.msra.mxu0 %v2608_v40  ;;  %v1773_v40 = vld [vmem:[%s3606_s1 + $0x328] sm:$0xff] }
  0x3f   : > { %2613 = vmatprep.subr.bf16.mxu0 %v2612_v47  ;;  %v2632_v49 = vpack.c.bf16 %v1773_v40, %v1772_v39  ;;  %v1718_v39 = vld [vmem:[%s3606_s1 + $0x170] sm:$0xff]  ;;  %v1719_v40 = vld [vmem:[%s3606_s1 + $0x178] sm:$0xff] }
  0x40   : > { %2487 = vmatpush3.bf16.msra.mxu1 %v2484_v41  ;;  %v3244_v41 = vld [vmem:[%s2931_s21 + $0x2a] sm:$0xff] }
  0x41   : > { %2489 = vmatprep.subr.bf16.mxu1 %v2488_v48 }
  0x42   : > { %2615 = vmatpush3.bf16.msra.mxu0 %v2612_v47 }
  0x43   : > { %2617 = vmatprep.subr.bf16.mxu0 %v2616_v53 }
  0x44   : > { %2491 = vmatpush3.bf16.msra.mxu1 %v2488_v48 }
  0x45   : > { %2493 = vmatprep.subr.bf16.mxu1 %v2492_v54 }
  0x46   : > { %2619 = vmatpush3.bf16.msra.mxu0 %v2616_v53  ;;  %v1774_v53 = vld [vmem:[%s3606_s1 + $0x330] sm:$0xff] }
  0x47   : > { %2621 = vmatprep.subr.bf16.mxu0 %v2620_v59 }
  0x48   : > { %2495 = vmatpush3.bf16.msra.mxu1 %v2492_v54  ;;  %v1775_v54 = vld [vmem:[%s3606_s1 + $0x338] sm:$0xff] }
  0x49   : > { %2497 = vmatprep.subr.bf16.mxu1 %v2496_v60  ;;  %v2636_v61 = vpack.c.bf16 %v1775_v54, %v1774_v53  ;;  %v1780_v54 = vld [vmem:[%s3606_s1 + $0x360] sm:$0xff] }
  0x4a   : > { %2623 = vmatpush3.bf16.msra.mxu0 %v2620_v59 }
  0x4b   : > { %2625 = vmatprep.subr.bf16.mxu0 %v2624_v63 }
  0x86   : > { %v3169_v4 = vpop.permute.xlu1 %248  ;;  %v3171_v5 = vpop.permute.xlu0 %243 }
  0x87   : > { %v282_v6 = vmul.f32 %v3169_v4, %v3160_v0  ;;  %v281_v7 = vmul.f32 %v3171_v5, %v225_v1  ;;  %v1776_v1 = vld [vmem:[%s3606_s1 + $0x340] sm:$0xff] }
  0x89   : > { %2112 = vmatprep.mubr.f32.mxu1 %v281_v7  ;;  %v1716_v7 = vld [vmem:[%s3606_s1 + $0x160] sm:$0xff] }
  0x8a   : > { %v3191_v14 = vpop.permute.xlu1 %563  ;;  %v3193_v15 = vpop.permute.xlu0 %558  ;;  %2113 = vmatmul.mubr.f32.vlgmr.msra.gmra.mrb[0].mxu1 %v282_v6  ;;  %v2516_v6 = vpack.c.bf16 %v1715_v57, %v1714_v56  ;;  %v2524_v56 = vpack.c.bf16 %v1719_v40, %v1718_v39  ;;  %v1720_v57 = vld [vmem:[%s3606_s1 + $0x180] sm:$0xff]  ;;  %v1785_v40 = vld [vmem:[%s3606_s1 + $0x388] sm:$0xff] }
  0x8b   : > { %v3197_v17 = vmul.f32 %v3180_v9, %v3191_v14  ;;  %2499 = vmatpush3.bf16.msra.mxu1 %v2496_v60  ;;  %v1027_v21 = vmul.f32 %v3183_v11, %v3191_v14  ;;  %v1026_v22 = vmul.f32 %v3193_v15, %v3177_v8  ;;  %v3211_v23 = vmul.f32 %v3183_v11, %v3193_v15 }
  0x8c   : > { %2501 = vmatprep.subr.bf16.mxu1 %v2500_v10 }
  0x8d   : > { %2288 = vmatprep.mubr.f32.mxu0 %v1026_v22 }
  0x8e   : > { %v3225_v31 = vpop.permute.xlu1 %568  ;;  %v3227_v33 = vpop.permute.xlu0 %253  ;;  %2289 = vmatmul.mubr.f32.vlgmr.msra.gmra.mrb[0].mxu0 %v1027_v21  ;;  %v2640_v21 = vpack.c.bf16 %v1777_v2, %v1776_v1 }
  0x8f   : > { %v1028_v36 = vmul.f32 %v3180_v9, %v3225_v31  ;;  %v3233_v37 = vmul.f32 %v3214_v25, %v3225_v31  ;;  %v283_v38 = vmul.f32 %v3223_v30, %v3227_v33  ;;  %2503 = vmatpush3.bf16.msra.mxu1 %v2500_v10  ;;  %2627 = vmatpush3.bf16.msra.mxu0 %v2624_v63  ;;  %v1717_v10 = vld [vmem:[%s3606_s1 + $0x168] sm:$0xff] }
  0x90   : > { %2505 = vmatprep.subr.bf16.mxu1 %v2504_v27  ;;  %2629 = vmatprep.subr.bf16.mxu0 %v2628_v35 }
  0x91   : > { %2115 = vmatprep.mubr.f32.mxu1 %v283_v38  ;;  %2291 = vmatprep.mubr.f32.mxu0 %v1028_v36  ;;  %v1454_v36 = vld [vmem:[%s2931_s21 + $0x42] sm:$0xff]  ;;  %v2520_v38 = vpack.c.bf16 %v1717_v10, %v1716_v7 }
  0x92   : > { %v3255_v47 = vpop.permute.xlu1 %573  ;;  %v3257_v48 = vpop.permute.xlu0 %258 }
  0x93   : > { %v1029_v50 = vmul.f32 %v3214_v25, %v3255_v47  ;;  %v3263_v51 = vmul.f32 %v3244_v41, %v3255_v47  ;;  %v284_v52 = vmul.f32 %v3253_v45, %v3257_v48  ;;  %2507 = vmatpush3.bf16.msra.mxu1 %v2504_v27  ;;  %2631 = vmatpush3.bf16.msra.mxu0 %v2628_v35  ;;  %v1779_v35 = vld [vmem:[%s3606_s1 + $0x358] sm:$0xff] }
  0x94   : > { %2509 = vmatprep.subr.bf16.mxu1 %v2508_v42  ;;  %2633 = vmatprep.subr.bf16.mxu0 %v2632_v49 }
  0x95   : > { %2116 = vmatmul.mubr.f32.gmra.mrb[2].mxu1 %v284_v52  ;;  %2292 = vmatmul.mubr.f32.gmra.mrb[2].mxu0 %v1029_v50 }
  0x96   : > { %v3282_v59 = vpop.permute.xlu1 %578  ;;  %v3284_v60 = vpop.permute.xlu0 %263 }
  0x97   : > { %v1030_v62 = vmul.f32 %v3244_v41, %v3282_v59  ;;  %v285_v63 = vmul.f32 %v3280_v58, %v3284_v60  ;;  %2511 = vmatpush3.bf16.msra.mxu1 %v2508_v42  ;;  %2635 = vmatpush3.bf16.msra.mxu0 %v2632_v49  ;;  %v3337_v42 = vld [vmem:[%s2931_s21 + $0x30] sm:$0xff]  ;;  %v2644_v49 = vpack.c.bf16 %v1779_v35, %v1778_v29 }
  0x98   : > { %2513 = vmatprep.subr.bf16.mxu1 %v2512_v55  ;;  %2637 = vmatprep.subr.bf16.mxu0 %v2636_v61  ;;  %v1722_v35 = vld [vmem:[%s3606_s1 + $0x190] sm:$0xff] }
  0x99   : > { %2118 = vmatprep.mubr.f32.mxu1 %v285_v63  ;;  %2294 = vmatprep.mubr.f32.mxu0 %v1030_v62  ;;  %v540_v62 = vld [vmem:[%s2931_s21 + $0x2] sm:$0xff]  ;;  %v3364_v63 = vld [vmem:[%s2931_s21 + $0x38] sm:$0xff] }
  0x9a   : > { %v3311_v19 = vpop.permute.xlu1 %583  ;;  %v3313_v20 = vpop.permute.xlu0 %268  ;;  %v596_v29 = vmul.f32 %v3193_v15, %v540_v62  ;;  %v1784_v15 = vld [vmem:[%s3606_s1 + $0x380] sm:$0xff]  ;;  %v1727_v62 = vld [vmem:[%s3606_s1 + $0x1b8] sm:$0xff] }
  0x9b   : > { %v1031_v22 = vmul.f32 %v3309_v13, %v3311_v19  ;;  %v3319_v27 = vmul.f32 %v3297_v3, %v3311_v19  ;;  %v286_v28 = vmul.f32 %v3306_v12, %v3313_v20  ;;  %2515 = vmatpush3.bf16.msra.mxu1 %v2512_v55  ;;  %2639 = vmatpush3.bf16.msra.mxu0 %v2636_v61  ;;  %v1781_v55 = vld [vmem:[%s3606_s1 + $0x368] sm:$0xff] }
  0x9c   : > { %2517 = vmatprep.subr.bf16.mxu1 %v2516_v6  ;;  %2641 = vmatprep.subr.bf16.mxu0 %v2640_v21  ;;  %v1721_v61 = vld [vmem:[%s3606_s1 + $0x188] sm:$0xff] }
  0x9d   : > { %2119 = vmatmul.mubr.f32.gmra.mrb[4].mxu1 %v286_v28  ;;  %2295 = vmatmul.mubr.f32.gmra.mrb[4].mxu0 %v1031_v22  ;;  %v1783_v22 = vld [vmem:[%s3606_s1 + $0x378] sm:$0xff]  ;;  %v2528_v28 = vpack.c.bf16 %v1721_v61, %v1720_v57  ;;  %v600_v57 = vmul.f32 %v3214_v25, %v3282_v59  ;;  %v1726_v61 = vld [vmem:[%s3606_s1 + $0x1b0] sm:$0xff]  ;;  %v1788_v25 = vld [vmem:[%s3606_s1 + $0x3a0] sm:$0xff] }
  0x9e   : > { %v3339_v43 = vpop.permute.xlu1 %588  ;;  %v3341_v44 = vpop.permute.xlu0 %273 }
  0x9f   : > { %v1032_v50 = vmul.f32 %v3297_v3, %v3339_v43  ;;  %v3346_v52 = vmul.f32 %v1454_v36, %v3339_v43  ;;  %v287_v53 = vmul.f32 %v3337_v42, %v3341_v44  ;;  %2519 = vmatpush3.bf16.msra.mxu1 %v2516_v6  ;;  %2643 = vmatpush3.bf16.msra.mxu0 %v2640_v21  ;;  %v1782_v21 = vld [vmem:[%s3606_s1 + $0x370] sm:$0xff] }
  0xa0   : > { %2521 = vmatprep.subr.bf16.mxu1 %v2520_v38  ;;  %2645 = vmatprep.subr.bf16.mxu0 %v2644_v49  ;;  %v2648_v6 = vpack.c.bf16 %v1781_v55, %v1780_v54  ;;  %v2652_v39 = vpack.c.bf16 %v1783_v22, %v1782_v21  ;;  %v1724_v54 = vld [vmem:[%s3606_s1 + $0x1a0] sm:$0xff]  ;;  %v1725_v55 = vld [vmem:[%s3606_s1 + $0x1a8] sm:$0xff]  ;;  %v2540_v21 = vpack.c.bf16 %v1727_v62, %v1726_v61  ;;  %v1795_v61 = vld [vmem:[%s3606_s1 + $0x3d8] sm:$0xff] }
  0xa1   : > { %2121 = vmatprep.mubr.f32.mxu1 %v287_v53  ;;  %2297 = vmatprep.mubr.f32.mxu0 %v1032_v50  ;;  %v598_v53 = vmul.f32 %v3183_v11, %v3225_v31  ;;  %v1787_v11 = vld [vmem:[%s3606_s1 + $0x398] sm:$0xff]  ;;  %v2536_v31 = vpack.c.bf16 %v1725_v55, %v1724_v54  ;;  %v602_v22 = vmul.f32 %v3309_v13, %v3339_v43  ;;  %v1790_v43 = vld [vmem:[%s3606_s1 + $0x3b0] sm:$0xff]  ;;  %v1793_v55 = vld [vmem:[%s3606_s1 + $0x3c8] sm:$0xff] }
  0xa2   : > { %v3366_v1 = vpop.permute.xlu1 %593  ;;  %v3368_v2 = vpop.permute.xlu0 %278 }
  0xa3   : > { %v1033_v7 = vmul.f32 %v1454_v36, %v3366_v1  ;;  %v288_v10 = vmul.f32 %v3364_v63, %v3368_v2  ;;  %2523 = vmatpush3.bf16.msra.mxu1 %v2520_v38  ;;  %2647 = vmatpush3.bf16.msra.mxu0 %v2644_v49  ;;  %v1723_v36 = vld [vmem:[%s3606_s1 + $0x198] sm:$0xff]  ;;  %v1172_v38 = vmul.f32 %v3223_v30, %v3171_v5 }
  0xa4   : > { %2525 = vmatprep.subr.bf16.mxu1 %v2524_v56  ;;  %2649 = vmatprep.subr.bf16.mxu0 %v2648_v6  ;;  %v597_v49 = vmul.f32 %v3191_v14, %v3177_v8  ;;  %v2532_v50 = vpack.c.bf16 %v1723_v36, %v1722_v35  ;;  %v1786_v8 = vld [vmem:[%s3606_s1 + $0x390] sm:$0xff]  ;;  %v599_v14 = vmul.f32 %v3180_v9, %v3255_v47  ;;  %v1791_v36 = vld [vmem:[%s3606_s1 + $0x3b8] sm:$0xff] }
  0xa5   : > { %2122 = vmatmul.mubr.f32.gmra.mrb[6].mxu1 %v288_v10  ;;  %2298 = vmatmul.mubr.f32.gmra.mrb[6].mxu0 %v1033_v7  ;;  %v2660_v9 = vpack.c.bf16 %v1787_v11, %v1786_v8  ;;  %v1174_v47 = vmul.f32 %v3280_v58, %v3227_v33  ;;  %v1789_v7 = vld [vmem:[%s3606_s1 + $0x3a8] sm:$0xff]  ;;  %v601_v10 = vmul.f32 %v3244_v41, %v3311_v19  ;;  %v1732_v8 = vld [vmem:[%s3606_s1 + $0x1e0] sm:$0xff] }
  0xa6   : > { %2156 = vmatprep.mubr.f32.mxu1 %v596_v29  ;;  %2332 = vmatprep.mubr.f32.mxu0 %v1172_v38  ;;  %v1729_v29 = vld [vmem:[%s3606_s1 + $0x1c8] sm:$0xff]  ;;  %v1175_v41 = vmul.f32 %v3306_v12, %v3257_v48  ;;  %v2664_v19 = vpack.c.bf16 %v1789_v7, %v1788_v25  ;;  %v1176_v35 = vmul.f32 %v3337_v42, %v3284_v60  ;;  %v3451_v38 = vld [vmem:[%s2931_s21 + $0x40] sm:$0xff] }
  0xa7   : > { %2527 = vmatpush3.bf16.msra.mxu1 %v2524_v56  ;;  %2651 = vmatpush3.bf16.msra.mxu0 %v2648_v6  ;;  %v2656_v56 = vpack.c.bf16 %v1785_v40, %v1784_v15  ;;  %v1173_v6 = vmul.f32 %v3253_v45, %v3169_v4  ;;  %v742_v40 = vmul.f32 %v3171_v5, %v3160_v0  ;;  %v1171_v0 = vld [vmem:[%s2931_s21 + $0x48] sm:$0xff]  ;;  %v1792_v5 = vld [vmem:[%s3606_s1 + $0x3c0] sm:$0xff] }
  0xa8   : > { %2529 = vmatprep.subr.bf16.mxu1 %v2528_v28  ;;  %2653 = vmatprep.subr.bf16.mxu0 %v2652_v39  ;;  %v1178_v54 = vmul.f32 %v3451_v38, %v3341_v44  ;;  %v1733_v11 = vld [vmem:[%s3606_s1 + $0x1e8] sm:$0xff]  ;;  %v1796_v25 = vld [vmem:[%s3606_s1 + $0x3e0] sm:$0xff] }
  0xa9   : > { %v2552_v62 = vpack.c.bf16 %v1733_v11, %v1732_v8  ;;  %v1797_v7 = vld [vmem:[%s3606_s1 + $0x3e8] sm:$0xff] }
  0xaa   : > { %2157 = vmatmul.mubr.f32.vlgmr.msra.gmra.mrb[0].mxu1 %v597_v49  ;;  %v1730_v49 = vld [vmem:[%s3606_s1 + $0x1d0] sm:$0xff] }
  0xab   : > { %2159 = vmatprep.mubr.f32.mxu1 %v598_v53  ;;  %2531 = vmatpush3.bf16.msra.mxu1 %v2528_v28  ;;  %v1728_v28 = vld [vmem:[%s3606_s1 + $0x1c0] sm:$0xff]  ;;  %v1177_v53 = vmul.f32 %v3364_v63, %v3313_v20 }
  0xac   : > { %2533 = vmatprep.subr.bf16.mxu1 %v2532_v50  ;;  %2655 = vmatpush3.bf16.msra.mxu0 %v2652_v39  ;;  %v603_v39 = vmul.f32 %v3297_v3, %v3366_v1  ;;  %v2544_v15 = vpack.c.bf16 %v1729_v29, %v1728_v28  ;;  %v2668_v3 = vpack.c.bf16 %v1791_v36, %v1790_v43  ;;  %v1798_v28 = vld [vmem:[%s3606_s1 + $0x3f0] sm:$0xff]  ;;  %v1799_v29 = vld [vmem:[%s3606_s1 + $0x3f8] sm:$0xff] }
  0xad   : > { %2657 = vmatprep.subr.bf16.mxu0 %v2656_v56  ;;  %v2684_v43 = vpack.c.bf16 %v1799_v29, %v1798_v28  ;;  %v743_v36 = vmul.f32 %v3223_v30, %v3169_v4  ;;  %v745_v4 = vmul.f32 %v3280_v58, %v3257_v48  ;;  %v747_v48 = vmul.f32 %v3337_v42, %v3313_v20  ;;  %v1810_v42 = vld [vmem:[%s3606_s1 + $0x450] sm:$0xff] }
  0xae   : > { %2160 = vmatmul.mubr.f32.gmra.mrb[2].mxu1 %v599_v14  ;;  %v1179_v14 = vmul.f32 %v1171_v0, %v3368_v2  ;;  %v1460_v20 = vmul.f32 %v3309_v13, %v3282_v59  ;;  %v1812_v59 = vld [vmem:[%s3606_s1 + $0x460] sm:$0xff]  ;;  %v1813_v13 = vld [vmem:[%s3606_s1 + $0x468] sm:$0xff] }
  0xaf   : > { %2162 = vmatprep.mubr.f32.mxu1 %v600_v57  ;;  %2535 = vmatpush3.bf16.msra.mxu1 %v2532_v50  ;;  %v1731_v50 = vld [vmem:[%s3606_s1 + $0x1d8] sm:$0xff]  ;;  %v1794_v57 = vld [vmem:[%s3606_s1 + $0x3d0] sm:$0xff] }
  0xb0   : > { %2333 = vmatmul.mubr.f32.vlgmr.msra.gmra.mrb[0].mxu0 %v1173_v6  ;;  %2537 = vmatprep.subr.bf16.mxu1 %v2536_v31  ;;  %v1734_v6 = vld [vmem:[%s3606_s1 + $0x1f0] sm:$0xff] }
  0xb1   : > { %2335 = vmatprep.mubr.f32.mxu0 %v1174_v47  ;;  %2659 = vmatpush3.bf16.msra.mxu0 %v2656_v56  ;;  %v2548_v56 = vpack.c.bf16 %v1731_v50, %v1730_v49  ;;  %v2676_v47 = vpack.c.bf16 %v1795_v61, %v1794_v57  ;;  %v1805_v49 = vld [vmem:[%s3606_s1 + $0x428] sm:$0xff]  ;;  %v1807_v50 = vld [vmem:[%s3606_s1 + $0x438] sm:$0xff] }
  0xb2   : > { %2163 = vmatmul.mubr.f32.gmra.mrb[4].mxu1 %v601_v10  ;;  %2661 = vmatprep.subr.bf16.mxu0 %v2660_v9 }
  0xb3   : > { %2165 = vmatprep.mubr.f32.mxu1 %v602_v22  ;;  %2539 = vmatpush3.bf16.msra.mxu1 %v2536_v31  ;;  %v2672_v31 = vpack.c.bf16 %v1793_v55, %v1792_v5  ;;  %v2680_v22 = vpack.c.bf16 %v1797_v7, %v1796_v25 }
  0xb4   : > { %2336 = vmatmul.mubr.f32.gmra.mrb[2].mxu0 %v1175_v41  ;;  %2541 = vmatprep.subr.bf16.mxu1 %v2540_v21 }
  0xb5   : > { %2338 = vmatprep.mubr.f32.mxu0 %v1176_v35  ;;  %2663 = vmatpush3.bf16.msra.mxu0 %v2660_v9  ;;  %v1735_v9 = vld [vmem:[%s3606_s1 + $0x1f8] sm:$0xff] }
  0xb6   : > { %2166 = vmatmul.mubr.f32.gmra.mrb[6].mxu1 %v603_v39  ;;  %2665 = vmatprep.subr.bf16.mxu0 %v2664_v19  ;;  %v2556_v10 = vpack.c.bf16 %v1735_v9, %v1734_v6  ;;  %v1803_v35 = vld [vmem:[%s3606_s1 + $0x418] sm:$0xff] }
  0xb7   : > { %2543 = vmatpush3.bf16.msra.mxu1 %v2540_v21  ;;  %2200 = vmatprep.mubr.f32.mxu1 %v742_v40  ;;  %v1800_v21 = vld [vmem:[%s3606_s1 + $0x400] sm:$0xff] }
  0xb8   : > { %2339 = vmatmul.mubr.f32.gmra.mrb[4].mxu0 %v1177_v53  ;;  %2545 = vmatprep.subr.bf16.mxu1 %v2544_v15  ;;  %v1804_v40 = vld [vmem:[%s3606_s1 + $0x420] sm:$0xff]  ;;  %v1809_v53 = vld [vmem:[%s3606_s1 + $0x448] sm:$0xff] }
  0xb9   : > { %2341 = vmatprep.mubr.f32.mxu0 %v1178_v54  ;;  %2667 = vmatpush3.bf16.msra.mxu0 %v2664_v19  ;;  %v1802_v19 = vld [vmem:[%s3606_s1 + $0x410] sm:$0xff]  ;;  %v2696_v30 = vpack.c.bf16 %v1805_v49, %v1804_v40 }
  0xba   : > { %2669 = vmatprep.subr.bf16.mxu0 %v2668_v3  ;;  %v2692_v39 = vpack.c.bf16 %v1803_v35, %v1802_v19 }
  0xbb   : > { %2547 = vmatpush3.bf16.msra.mxu1 %v2544_v15  ;;  %v744_v15 = vmul.f32 %v3253_v45, %v3227_v33  ;;  %v746_v33 = vmul.f32 %v3306_v12, %v3284_v60  ;;  %v1806_v45 = vld [vmem:[%s3606_s1 + $0x430] sm:$0xff]  ;;  %v748_v60 = vmul.f32 %v3364_v63, %v3341_v44  ;;  %v1808_v12 = vld [vmem:[%s3606_s1 + $0x440] sm:$0xff]  ;;  %v1811_v44 = vld [vmem:[%s3606_s1 + $0x458] sm:$0xff]  ;;  %v2712_v63 = vpack.c.bf16 %v1813_v13, %v1812_v59 }
  0xbc   : > { %2342 = vmatmul.mubr.f32.gmra.mrb[6].mxu0 %v1179_v14  ;;  %2549 = vmatprep.subr.bf16.mxu1 %v2548_v56  ;;  %v2700_v58 = vpack.c.bf16 %v1807_v50, %v1806_v45 }
  0xbd   : > { %2671 = vmatpush3.bf16.msra.mxu0 %v2668_v3  ;;  %2376 = vmatprep.mubr.f32.mxu0 %v3048_v16  ;;  %v1801_v16 = vld [vmem:[%s3606_s1 + $0x408] sm:$0xff] }
  0xbe   : > { %2673 = vmatprep.subr.bf16.mxu0 %v2672_v31  ;;  %v2688_v41 = vpack.c.bf16 %v1801_v16, %v1800_v21 }
  0xbf   : > { %2551 = vmatpush3.bf16.msra.mxu1 %v2548_v56 }
  0xc0   : > { %2553 = vmatprep.subr.bf16.mxu1 %v2552_v62 }
  0xc1   : > { %2675 = vmatpush3.bf16.msra.mxu0 %v2672_v31 }
  0xc2   : > { %2677 = vmatprep.subr.bf16.mxu0 %v2676_v47 }
  0xc3   : > { %2555 = vmatpush3.bf16.msra.mxu1 %v2552_v62 }
  0xc4   : > { %2557 = vmatprep.subr.bf16.mxu1 %v2556_v10 }
  0xc5   : > { %2679 = vmatpush3.bf16.msra.mxu0 %v2676_v47 }
  0xc6   : > { %2681 = vmatprep.subr.bf16.mxu0 %v2680_v22 }
  0xc7   : > { %2559 = vmatpush3.bf16.msra.mxu1 %v2556_v10 }
  0xc8   : > { %2720 = vmatprep.subr.bf16.mxu1 %v2688_v41 }
  0xc9   : > { %2683 = vmatpush3.bf16.msra.mxu0 %v2680_v22 }
  0xca   : > { %2201 = vmatmul.mubr.f32.vlgmr.msra.gmra.mrb[0].mxu1 %v743_v36  ;;  %2685 = vmatprep.subr.bf16.mxu0 %v2684_v43 }
  0xcb   : > { %2203 = vmatprep.mubr.f32.mxu1 %v744_v15  ;;  %2728 = vmatpush3.bf16.msra.mxu1 %v2688_v41 }
  0xcc   : > { %2721 = vmatprep.subr.bf16.mxu1 %v2692_v39 }
  0xcd   : > { %2687 = vmatpush3.bf16.msra.mxu0 %v2684_v43 }
  0xce   : > { %2204 = vmatmul.mubr.f32.gmra.mrb[2].mxu1 %v745_v4  ;;  %2689 = vmatprep.subr.bf16.mxu0 %v2688_v41 }
  0xcf   : > { %2206 = vmatprep.mubr.f32.mxu1 %v746_v33  ;;  %2729 = vmatpush3.bf16.msra.mxu1 %v2692_v39 }
  0xd0   : > { %2377 = vmatmul.mubr.f32.vlgmr.msra.gmra.mrb[0].mxu0 %v3051_v18  ;;  %2722 = vmatprep.subr.bf16.mxu1 %v2696_v30  ;;  %v749_v18 = vmul.f32 %v3451_v38, %v3368_v2 }
  0xd1   : > { %2691 = vmatpush3.bf16.msra.mxu0 %v2688_v41  ;;  %2379 = vmatprep.mubr.f32.mxu0 %v3068_v24  ;;  %v2704_v24 = vpack.c.bf16 %v1809_v53, %v1808_v12 }
  0xd2   : > { %2207 = vmatmul.mubr.f32.gmra.mrb[4].mxu1 %v747_v48  ;;  %2693 = vmatprep.subr.bf16.mxu0 %v2692_v39 }
  0xd3   : > { %2209 = vmatprep.mubr.f32.mxu1 %v748_v60  ;;  %2730 = vmatpush3.bf16.msra.mxu1 %v2696_v30 }
  0xd4   : > { %2380 = vmatmul.mubr.f32.gmra.mrb[2].mxu0 %v3072_v26  ;;  %2723 = vmatprep.subr.bf16.mxu1 %v2700_v58  ;;  %v2708_v26 = vpack.c.bf16 %v1811_v44, %v1810_v42 }
  0xd5   : > { %2695 = vmatpush3.bf16.msra.mxu0 %v2692_v39  ;;  %2382 = vmatprep.mubr.f32.mxu0 %v3090_v32  ;;  %v1317_v32 = vld [vmem:[%s2931_s21 + $0x49] sm:$0xff] }
  0xd6   : > { %2210 = vmatmul.mubr.f32.gmra.mrb[6].mxu1 %v749_v18  ;;  %2697 = vmatprep.subr.bf16.mxu0 %v2696_v30 }
  0xd7   : > { %2731 = vmatpush3.bf16.msra.mxu1 %v2700_v58  ;;  %2426 = vmatprep.mubr.f32.mxu1 %v1460_v20 }
  0xd8   : > { %2383 = vmatmul.mubr.f32.gmra.mrb[4].mxu0 %v3093_v34  ;;  %2724 = vmatprep.subr.bf16.mxu1 %v2704_v24  ;;  %v1814_v34 = vld [vmem:[%s3606_s1 + $0x470] sm:$0xff] }
  0xd9   : > { %2699 = vmatpush3.bf16.msra.mxu0 %v2696_v30  ;;  %2385 = vmatprep.mubr.f32.mxu0 %v3126_v46  ;;  %v1815_v46 = vld [vmem:[%s3606_s1 + $0x478] sm:$0xff] }
  0xda   : > { %2701 = vmatprep.subr.bf16.mxu0 %v2700_v58  ;;  %v2716_v2 = vpack.c.bf16 %v1815_v46, %v1814_v34 }
  0xdb   : > { %2732 = vmatpush3.bf16.msra.mxu1 %v2704_v24 }
  0xdc   : > { %2386 = vmatmul.mubr.f32.gmra.mrb[6].mxu0 %v1317_v32  ;;  %2725 = vmatprep.subr.bf16.mxu1 %v2708_v26 }
  0xdd   : > { %2703 = vmatpush3.bf16.msra.mxu0 %v2700_v58  ;;  %2420 = vmatprep.mubr.f32.mxu0 %v3211_v23  ;;  %v1455_v23 = vld [vmem:[%s2931_s21 + $0x4a] sm:$0xff] }
  0xde   : > { %2705 = vmatprep.subr.bf16.mxu0 %v2704_v24  ;;  %v1463_v38 = vmul.f32 %v1455_v23, %v3366_v1 }
  0xdf   : > { %2733 = vmatpush3.bf16.msra.mxu1 %v2708_v26 }
  0xe0   : > { %2726 = vmatprep.subr.bf16.mxu1 %v2712_v63 }
  0xe1   : > { %2707 = vmatpush3.bf16.msra.mxu0 %v2704_v24 }
  0xe2   : > { %2709 = vmatprep.subr.bf16.mxu0 %v2708_v26 }
  0xe3   : > { %2734 = vmatpush3.bf16.msra.mxu1 %v2712_v63 }
  0xe4   : > { %2727 = vmatprep.subr.bf16.mxu1 %v2716_v2 }
  0xe5   : > { %2711 = vmatpush3.bf16.msra.mxu0 %v2708_v26 }
  0xe6   : > { %2713 = vmatprep.subr.bf16.mxu0 %v2712_v63 }
  0xe7   : > { %2735 = vmatpush3.bf16.msra.mxu1 %v2716_v2 }
  0xe9   : > { %2715 = vmatpush3.bf16.msra.mxu0 %v2712_v63 }
  0xea   : > { %2717 = vmatprep.subr.bf16.mxu0 %v2716_v2  ;;  %2427 = vmatmul.mubr.f32.vlgmr.msra.gmra.mrb[8].mxu1 %v3319_v27 }
  0xeb   : > { %2429 = vmatprep.mubr.f32.mxu1 %v3346_v52 }
  0xed   : > { %2719 = vmatpush3.bf16.msra.mxu0 %v2716_v2 }
  0xee   : > { %2430 = vmatmul.mubr.f32.gmra.mrb[10].mxu1 %v1463_v38 }
  0xf0   : > { %2421 = vmatmul.mubr.f32.vlgmr.msra.gmra.mrb[0].mxu0 %v3197_v17 }
  0xf1   : > { %2423 = vmatprep.mubr.f32.mxu0 %v3233_v37 }
  0xf4   : > { %2424 = vmatmul.mubr.f32.gmra.mrb[2].mxu0 %v3263_v51  ;;  %v1816_v51 = vld [vmem:[%s3607_s2] ss:$0 sm:$0xff] }
 0x19d   : > { %v2202_v3 = vpop.f32.mrb[0].mxu1 }
 0x19e   : > { %v833_v54 = vpop.f32.mrb[1].mxu1 }
 0x1a1   : > { %v2205_v0 = vpop.f32.mrb[2].mxu1 }
 0x1a2   : > { %v843_v5 = vpop.f32.mrb[3].mxu1 }
 0x1a5   : > { %v2208_v55 = vpop.f32.mrb[4].mxu1 }
 0x1a6   : > { %v853_v56 = vpop.f32.mrb[5].mxu1 }
 0x1a9   : > { %v2211_v27 = vpop.f32.mrb[6].mxu1 }
 0x1aa   : > { %v863_v8 = vpop.f32.mrb[7].mxu1 }
 0x1ab   : > { %v2384_v52 = vpop.f32.mrb[4].mxu0 }
 0x1ac   : > { %v2740_v11 = vadd.f32 %v2384_v52, %v2208_v55  ;;  %v1421_v1 = vpop.f32.mrb[5].mxu0 }
 0x1ad   : > { %v2742_v14 = vadd.f32 %v1421_v1, %v853_v56 }
 0x1af   : > { %v2387_v31 = vpop.f32.mrb[6].mxu0 }
 0x1b0   : > { %v2744_v57 = vadd.f32 %v2387_v31, %v2211_v27  ;;  %v1431_v17 = vpop.f32.mrb[7].mxu0 }
 0x1b1   : > { %v2746_v61 = vadd.f32 %v1431_v17, %v863_v8 }
 0x1bd   : > { %v2428_v37 = vpop.f32.mrb[8].mxu1 }
 0x1be   : > { %v2741_v62 = vadd.f32 %v2740_v11, %v2428_v37  ;;  %v1567_v6 = vpop.f32.mrb[9].mxu1 }
 0x1bf   : > { %v2743_v9 = vadd.f32 %v2742_v14, %v1567_v6 }
 0x1c0   : > { %v1606_v47 = vadd.f32 %v2741_v62, %v1816_v51 }
 0x1c1   : > { %v1605_v25 = vadd.f32 %v2743_v9, %v1816_v51  ;;  %v2431_v7 = vpop.f32.mrb[10].mxu1 }
 0x1c2   : > { %v1614_v10 = vmax.f32 %v1606_v47, 0.0  ;;  %v2745_v21 = vadd.f32 %v2744_v57, %v2431_v7  ;;  %v1577_v16 = vpop.f32.mrb[11].mxu1 }
 0x1c3   : > { %v1613_v22 = vmax.f32 %v1605_v25, 0.0  ;;  %v2422_v28 = vpop.f32.mrb[0].mxu0  ;;  %v2747_v29 = vadd.f32 %v2746_v61, %v1577_v16 }
 0x1c4   : > { %1622 = vst [vmem:[%s3592_s13 + $0x28] sm:$0xff] %v1614_v10  ;;  %v2736_v41 = vadd.f32 %v2422_v28, %v2202_v3  ;;  %v1608_v19 = vadd.f32 %v2745_v21, %v1816_v51  ;;  %v1547_v35 = vpop.f32.mrb[1].mxu0 }
 0x1c5   : > { %1621 = vst [vmem:[%s3592_s13 + $0x20] sm:$0xff] %v1613_v22  ;;  %v2737_v43 = vadd.f32 %v1547_v35, %v833_v54  ;;  %v1607_v36 = vadd.f32 %v2747_v29, %v1816_v51 }
 0x1c6   : > { %v1602_v39 = vadd.f32 %v2736_v41, %v1816_v51  ;;  %v1616_v15 = vmax.f32 %v1608_v19, 0.0 }
 0x1c7   : > { %v1601_v40 = vadd.f32 %v2737_v43, %v1816_v51  ;;  %v1615_v49 = vmax.f32 %v1607_v36, 0.0  ;;  %v2425_v4 = vpop.f32.mrb[2].mxu0 }
 0x1c8   : > { %v1610_v30 = vmax.f32 %v1602_v39, 0.0  ;;  %1624 = vst [vmem:[%s3592_s13 + $0x38] sm:$0xff] %v1616_v15  ;;  %v2738_v33 = vadd.f32 %v2425_v4, %v2205_v0  ;;  %v1557_v45 = vpop.f32.mrb[3].mxu0 }
 0x1c9   : > { %v1609_v50 = vmax.f32 %v1601_v40, 0.0  ;;  %1623 = vst [vmem:[%s3592_s13 + $0x30] sm:$0xff] %v1615_v49  ;;  %v2739_v48 = vadd.f32 %v1557_v45, %v843_v5 }
 0x1ca   : > { %1618 = vst [vmem:[%s3592_s13 + $0x8] sm:$0xff] %v1610_v30  ;;  %v1604_v58 = vadd.f32 %v2738_v33, %v1816_v51 }
 0x1cb   : > { %1617 = vst [vmem:[%s3592_s13] sm:$0xff] %v1609_v50  ;;  %v1603_v60 = vadd.f32 %v2739_v48, %v1816_v51 }
 0x1cc   : > { %v1612_v12 = vmax.f32 %v1604_v58, 0.0 }
 0x1cd   : > { %v1611_v53 = vmax.f32 %v1603_v60, 0.0 }
 0x1ce   : > { %1620 = vst [vmem:[%s3592_s13 + $0x18] sm:$0xff] %v1612_v12 }
 0x1cf   : > { %1619 = vst [vmem:[%s3592_s13 + $0x10] sm:$0xff] %v1611_v53 }
 0x1d0 PF: > { %s15_s18 = sadd.s32 1, %s2818_s18  }
 0x1d1   : > { %p12_p4 = scmp.ge.s32.totalorder %s15_s18, 4  }
 0x1d3   :  { %14 = sbr.rel (!%p12_p4) target bundleno = 1 (0x1), region = 78 }

// kernel: random_attempt_forward.8
= control target key start
LH: loop header
LB: loop body
LE: loop exit
PB: predicated region body
PF: predicated region fallthrough
CT: control target
= control target key end

     0   :  { %s5551_s18 = smov 0   ;;  %s7213_s0 = inlined_call_operand.vmem [shape: f32[2,290,128], index: 0, kind: input, shape index: {}]   ;;  %s7214_s1 = inlined_call_operand.vmem [shape: f32[9,128,128], index: 1, kind: input, shape index: {}]   ;;  %s7215_s2 = inlined_call_operand.vmem [shape: f32[1,128], index: 2, kind: input, shape index: {}]   ;;  %s7216_s3 = inlined_call_operand.vmem [shape: f32[256,1], index: 3, kind: input, shape index: {}]   ;;  %s7217_s4 = inlined_call_operand.vmem [shape: f32[256,1], index: 4, kind: input, shape index: {}]   ;;  %s7218_s5 = inlined_call_operand.vmem [shape: f32[2,256,128], index: 5, kind: output, shape index: {}]  }
   0x1 LB: > { %s3648_s19 = sadd.s32 4294967295, %s5518_s18   ;;  %p3652_p0 = scmp.ge.s32.totalorder %s5518_s18, 1  ;;  %s5518_s18 = sphi %s5551_s18, %s15_s18  }
   0x2   : > { %p187_p1 = scmp.lt.s32.totalorder %s5518_s18, 3 }
   0x4   : > { %p188_p2 = pnand %p3652_p0, %p187_p1 }
   0x6   : > { %191 = sbr.rel (%p188_p2) target bundleno = 650 (0x28a), region = 40 }
   0xd   : > { %v1030_v0 = vld [vmem:[%s7217_s4 + $0x10] sm:$0xff]  ;;  %v1028_v1 = vld [vmem:[%s7217_s4] sm:$0xff]  ;;  %v5520_v2 = vmov 0   ;;  %v1031_v3 = vld [vmem:[%s7217_s4 + $0x18] sm:$0xff]  ;;  %p5597_p3 = scmp.lt.s32.totalorder %s3648_s19, 1 }
   0xe   : > { %5511 = vset.pattern.permute.xlu1 %v5520_v2  ;;  %5510 = vset.pattern.permute.xlu0 %v5520_v2  ;;  %v1029_v4 = vld [vmem:[%s7217_s4 + $0x8] sm:$0xff]  ;;  %v1032_v6 = vld [vmem:[%s7217_s4 + $0x20] sm:$0xff]  ;;  %v1035_v7 = vld [vmem:[%s7217_s4 + $0x38] sm:$0xff] }
   0xf   : > { %1072 = vperm.xlu1 %5511, %v1030_v0   ;;  %1062 = vperm.xlu0 %5510, %v1028_v1   ;;  %v1033_v5 = vld [vmem:[%s7217_s4 + $0x28] sm:$0xff]  ;;  %v1034_v8 = vld [vmem:[%s7217_s4 + $0x30] sm:$0xff]  ;;  %v3656_v9 = vld [vmem:[%s7214_s1 + $0x80] sm:$0xff]  ;;  %s7405_s19 = smov (!%p5597_p3, %s3648_s19), 1 }
  0x10   : > { %v3657_v10 = vld [vmem:[%s7214_s1 + $0x88] sm:$0xff]  ;;  %v3704_v11 = vld [vmem:[%s7214_s1 + $0x200] sm:$0xff]  ;;  %v3658_v15 = vld [vmem:[%s7214_s1 + $0x90] sm:$0xff]  ;;  %s5500_s6 = smul.u32 296, %s7405_s19  ;;  %s3787_s20 = sshll.u32 %s7405_s19, 8 }
  0x11   : > { %v4940_v12 = vpack.c.bf16 %v3657_v10, %v3656_v9  ;;  %v3705_v13 = vld [vmem:[%s7214_s1 + $0x208] sm:$0xff]  ;;  %v3659_v16 = vld [vmem:[%s7214_s1 + $0x98] sm:$0xff]  ;;  %v3706_v17 = vld [vmem:[%s7214_s1 + $0x210] sm:$0xff]  ;;  %s7141_s25 = scalar_lea.vmem %s7218_s5, %s3787_s20 }
  0x12   : > { %v5601_v14 = vpack.c.bf16 %v3705_v13, %v3704_v11  ;;  %v1037_v18 = vld [vmem:[%s7217_s4 + $0x48] sm:$0xff]  ;;  %v1036_v19 = vld [vmem:[%s7217_s4 + $0x40] sm:$0xff]  ;;  %v4944_v20 = vpack.c.bf16 %v3659_v16, %v3658_v15  ;;  %v3707_v21 = vld [vmem:[%s7214_s1 + $0x218] sm:$0xff]  ;;  %s5691_s24 = scalar_lea.vmem %s7213_s0, %s5500_s6 }
  0x13   : > { %1077 = vperm.xlu1 %5511, %v1031_v3   ;;  %1067 = vperm.xlu0 %5510, %v1029_v4   ;;  %v5622_v22 = vpack.c.bf16 %v3707_v21, %v3706_v17  ;;  %v3660_v23 = vld [vmem:[%s7214_s1 + $0xa0] sm:$0xff]  ;;  %v3661_v24 = vld [vmem:[%s7214_s1 + $0xa8] sm:$0xff]  ;;  %v3662_v28 = vld [vmem:[%s7214_s1 + $0xb0] sm:$0xff] }
  0x14   : > { %4941 = vmatprep.subr.bf16.mxu1 %v4940_v12  ;;  %5069 = vmatprep.subr.bf16.mxu0 %v5601_v14  ;;  %v3708_v25 = vld [vmem:[%s7214_s1 + $0x220] sm:$0xff]  ;;  %v4948_v26 = vpack.c.bf16 %v3661_v24, %v3660_v23  ;;  %v3709_v27 = vld [vmem:[%s7214_s1 + $0x228] sm:$0xff]  ;;  %v3663_v29 = vld [vmem:[%s7214_s1 + $0xb8] sm:$0xff] }
  0x15   : > { %4943 = vmatpush3.bf16.msra.mxu1 %v4940_v12  ;;  %7236 = vst [vmem:[#allocation2_spill] sm:$0xff] %v5622_v22  ;;  %5071 = vmatpush3.bf16.msra.mxu0 %v5601_v14  ;;  %v1039_v30 = vld [vmem:[%s7217_s4 + $0x58] sm:$0xff]  ;;  %v1038_v31 = vld [vmem:[%s7217_s4 + $0x50] sm:$0xff]  ;;  %v5656_v32 = vpack.c.bf16 %v3709_v27, %v3708_v25  ;;  %v4952_v35 = vpack.c.bf16 %v3663_v29, %v3662_v28  ;;  %v3664_v36 = vld [vmem:[%s7214_s1 + $0xc0] sm:$0xff] }
  0x16   : > { %4945 = vmatprep.subr.bf16.mxu1 %v4944_v20  ;;  %5073 = vmatprep.subr.bf16.mxu0 %v5622_v22  ;;  %v3710_v33 = vld [vmem:[%s7214_s1 + $0x230] sm:$0xff]  ;;  %v3711_v34 = vld [vmem:[%s7214_s1 + $0x238] sm:$0xff]  ;;  %v3665_v37 = vld [vmem:[%s7214_s1 + $0xc8] sm:$0xff] }
  0x17   : > { %1087 = vperm.xlu1 %5511, %v1033_v5   ;;  %1082 = vperm.xlu0 %5510, %v1032_v6   ;;  %7237 = vst [vmem:[#allocation3_spill] sm:$0xff] %v5656_v32  ;;  %v1041_v38 = vld [vmem:[%s7217_s4 + $0x68] sm:$0xff]  ;;  %v1040_v39 = vld [vmem:[%s7217_s4 + $0x60] sm:$0xff]  ;;  %v5679_v40 = vpack.c.bf16 %v3711_v34, %v3710_v33  ;;  %v4956_v43 = vpack.c.bf16 %v3665_v37, %v3664_v36  ;;  %v3666_v44 = vld [vmem:[%s7214_s1 + $0xd0] sm:$0xff] }
  0x18   : > { %v3712_v41 = vld [vmem:[%s7214_s1 + $0x240] sm:$0xff]  ;;  %v3713_v42 = vld [vmem:[%s7214_s1 + $0x248] sm:$0xff]  ;;  %v3667_v45 = vld [vmem:[%s7214_s1 + $0xd8] sm:$0xff] }
  0x19   : > { %4947 = vmatpush3.bf16.msra.mxu1 %v4944_v20  ;;  %5075 = vmatpush3.bf16.msra.mxu0 %v5622_v22  ;;  %7238 = vst [vmem:[#allocation4_spill] sm:$0xff] %v5679_v40  ;;  %v1043_v46 = vld [vmem:[%s7217_s4 + $0x78] sm:$0xff]  ;;  %v1042_v47 = vld [vmem:[%s7217_s4 + $0x70] sm:$0xff]  ;;  %v5706_v48 = vpack.c.bf16 %v3713_v42, %v3712_v41  ;;  %v497_v51 = vld [vmem:[%s5691_s24 + $0x1] sm:$0xff]  ;;  %v4960_v52 = vpack.c.bf16 %v3667_v45, %v3666_v44 }
  0x1a   : > { %4949 = vmatprep.subr.bf16.mxu1 %v4948_v26  ;;  %5077 = vmatprep.subr.bf16.mxu0 %v5656_v32  ;;  %v3714_v49 = vld [vmem:[%s7214_s1 + $0x250] sm:$0xff]  ;;  %v3715_v50 = vld [vmem:[%s7214_s1 + $0x258] sm:$0xff]  ;;  %v3668_v54 = vld [vmem:[%s7214_s1 + $0xe0] sm:$0xff] }
  0x1b   : > { %1097 = vperm.xlu1 %5511, %v1035_v7   ;;  %1092 = vperm.xlu0 %5510, %v1034_v8   ;;  %7239 = vst [vmem:[#allocation5_spill] sm:$0xff] %v5706_v48  ;;  %v1864_v53 = vld [vmem:[%s5691_s24 + $0x11] sm:$0xff]  ;;  %v3669_v55 = vld [vmem:[%s7214_s1 + $0xe8] sm:$0xff]  ;;  %v1044_v56 = vld [vmem:[%s7217_s4 + $0x80] sm:$0xff]  ;;  %v5730_v58 = vpack.c.bf16 %v3715_v50, %v3714_v49 }
  0x1c   : > { %v257_v57 = vld [vmem:[%s7216_s3] sm:$0xff]  ;;  %4252 = vmatprep.mubr.f32.mxu1 %v497_v51  ;;  %v3717_v60 = vld [vmem:[%s7214_s1 + $0x268] sm:$0xff]  ;;  %4572 = vmatprep.mubr.f32.mxu0 %v1864_v53  ;;  %v4964_v61 = vpack.c.bf16 %v3669_v55, %v3668_v54  ;;  %v3670_v62 = vld [vmem:[%s7214_s1 + $0xf0] sm:$0xff] }
  0x1d   : > { %4951 = vmatpush3.bf16.msra.mxu1 %v4948_v26  ;;  %5079 = vmatpush3.bf16.msra.mxu0 %v5656_v32  ;;  %7240 = vst [vmem:[#allocation6_spill] sm:$0xff] %v5730_v58  ;;  %v3716_v59 = vld [vmem:[%s7214_s1 + $0x260] sm:$0xff]  ;;  %v3671_v63 = vld [vmem:[%s7214_s1 + $0xf8] sm:$0xff]  ;;  %v1045_v0 = vld [vmem:[%s7217_s4 + $0x88] sm:$0xff] }
  0x1e   : > { %4953 = vmatprep.subr.bf16.mxu1 %v4952_v35  ;;  %5081 = vmatprep.subr.bf16.mxu0 %v5679_v40  ;;  %v258_v1 = vld [vmem:[%s7216_s3 + $0x8] sm:$0xff]  ;;  %v5752_v2 = vpack.c.bf16 %v3717_v60, %v3716_v59  ;;  %v3718_v3 = vld [vmem:[%s7214_s1 + $0x270] sm:$0xff]  ;;  %v3719_v4 = vld [vmem:[%s7214_s1 + $0x278] sm:$0xff]  ;;  %v4968_v5 = vpack.c.bf16 %v3671_v63, %v3670_v62 }
  0x1f   : > { %1107 = vperm.xlu1 %5511, %v1037_v18   ;;  %1102 = vperm.xlu0 %5510, %v1036_v19   ;;  %v1046_v6 = vld [vmem:[%s7217_s4 + $0x90] sm:$0xff]  ;;  %v5768_v8 = vpack.c.bf16 %v3719_v4, %v3718_v3  ;;  %v3720_v9 = vld [vmem:[%s7214_s1 + $0x280] sm:$0xff]  ;;  %v3721_v10 = vld [vmem:[%s7214_s1 + $0x288] sm:$0xff] }
  0x20   : > { %7241 = vst [vmem:[#allocation7_spill] sm:$0xff] %v5752_v2  ;;  %v259_v7 = vld [vmem:[%s7216_s3 + $0x10] sm:$0xff]  ;;  %v1047_v11 = vld [vmem:[%s7217_s4 + $0x98] sm:$0xff]  ;;  %v5100_v13 = vpack.c.bf16 %v3721_v10, %v3720_v9  ;;  %v1866_v19 = vld [vmem:[%s5691_s24 + $0x21] sm:$0xff] }
  0x21   : > { %4955 = vmatpush3.bf16.msra.mxu1 %v4952_v35  ;;  %5083 = vmatpush3.bf16.msra.mxu0 %v5679_v40  ;;  %7242 = vst [vmem:[#allocation8_spill] sm:$0xff] %v5768_v8  ;;  %v260_v12 = vld [vmem:[%s7216_s3 + $0x18] sm:$0xff]  ;;  %v498_v15 = vld [vmem:[%s5691_s24 + $0x9] sm:$0xff]  ;;  %v1048_v20 = vld [vmem:[%s7217_s4 + $0xa0] sm:$0xff] }
  0x22   : > { %4957 = vmatprep.subr.bf16.mxu1 %v4956_v43  ;;  %5085 = vmatprep.subr.bf16.mxu0 %v5706_v48  ;;  %v3722_v16 = vld [vmem:[%s7214_s1 + $0x290] sm:$0xff]  ;;  %v3723_v17 = vld [vmem:[%s7214_s1 + $0x298] sm:$0xff]  ;;  %v261_v21 = vld [vmem:[%s7216_s3 + $0x20] sm:$0xff] }
  0x23   : > { %1117 = vperm.xlu1 %5511, %v1039_v30   ;;  %1112 = vperm.xlu0 %5510, %v1038_v31   ;;  %v1865_v18 = vld [vmem:[%s5691_s24 + $0x19] sm:$0xff]  ;;  %v5104_v23 = vpack.c.bf16 %v3723_v17, %v3722_v16  ;;  %v3725_v25 = vld [vmem:[%s7214_s1 + $0x2a8] sm:$0xff]  ;;  %v1868_v27 = vld [vmem:[%s5691_s24 + $0x31] sm:$0xff] }
  0x24   : > { %v3724_v24 = vld [vmem:[%s7214_s1 + $0x2a0] sm:$0xff]  ;;  %v1867_v26 = vld [vmem:[%s5691_s24 + $0x29] sm:$0xff]  ;;  %v3727_v33 = vld [vmem:[%s7214_s1 + $0x2b8] sm:$0xff] }
  0x25   : > { %4959 = vmatpush3.bf16.msra.mxu1 %v4956_v43  ;;  %5087 = vmatpush3.bf16.msra.mxu0 %v5706_v48  ;;  %v1049_v28 = vld [vmem:[%s7217_s4 + $0xa8] sm:$0xff]  ;;  %v5108_v30 = vpack.c.bf16 %v3725_v25, %v3724_v24  ;;  %v3726_v31 = vld [vmem:[%s7214_s1 + $0x2b0] sm:$0xff]  ;;  %v1869_v34 = vld [vmem:[%s5691_s24 + $0x39] sm:$0xff] }
  0x26   : > { %4961 = vmatprep.subr.bf16.mxu1 %v4960_v52  ;;  %5089 = vmatprep.subr.bf16.mxu0 %v5730_v58  ;;  %v262_v29 = vld [vmem:[%s7216_s3 + $0x28] sm:$0xff]  ;;  %v1050_v36 = vld [vmem:[%s7217_s4 + $0xb0] sm:$0xff]  ;;  %v1051_v44 = vld [vmem:[%s7217_s4 + $0xb8] sm:$0xff] }
  0x27   : > { %1127 = vperm.xlu1 %5511, %v1041_v38   ;;  %1122 = vperm.xlu0 %5510, %v1040_v39   ;;  %v1870_v35 = vld [vmem:[%s5691_s24 + $0x41] sm:$0xff]  ;;  %v263_v37 = vld [vmem:[%s7216_s3 + $0x30] sm:$0xff]  ;;  %v5112_v38 = vpack.c.bf16 %v3727_v33, %v3726_v31  ;;  %v264_v45 = vld [vmem:[%s7216_s3 + $0x38] sm:$0xff] }
  0x28   : > { %v3728_v39 = vld [vmem:[%s7214_s1 + $0x2c0] sm:$0xff]  ;;  %v3729_v41 = vld [vmem:[%s7214_s1 + $0x2c8] sm:$0xff]  ;;  %v1872_v43 = vld [vmem:[%s5691_s24 + $0x51] sm:$0xff] }
  0x29   : > { %4963 = vmatpush3.bf16.msra.mxu1 %v4960_v52  ;;  %5091 = vmatpush3.bf16.msra.mxu0 %v5730_v58  ;;  %v1871_v42 = vld [vmem:[%s5691_s24 + $0x49] sm:$0xff]  ;;  %v3731_v49 = vld [vmem:[%s7214_s1 + $0x2d8] sm:$0xff]  ;;  %v1874_v51 = vld [vmem:[%s5691_s24 + $0x61] sm:$0xff] }
  0x2a   : > { %4965 = vmatprep.subr.bf16.mxu1 %v4964_v61  ;;  %5093 = vmatprep.subr.bf16.mxu0 %v5752_v2  ;;  %v1873_v50 = vld [vmem:[%s5691_s24 + $0x59] sm:$0xff]  ;;  %v1876_v59 = vld [vmem:[%s5691_s24 + $0x71] sm:$0xff]  ;;  %v1053_v60 = vld [vmem:[%s7217_s4 + $0xc8] sm:$0xff] }
  0x2b   : > { %1137 = vperm.xlu1 %5511, %v1043_v46   ;;  %1132 = vperm.xlu0 %5510, %v1042_v47   ;;  %v5116_v46 = vpack.c.bf16 %v3729_v41, %v3728_v39  ;;  %v3730_v47 = vld [vmem:[%s7214_s1 + $0x2d0] sm:$0xff]  ;;  %v1052_v52 = vld [vmem:[%s7217_s4 + $0xc0] sm:$0xff]  ;;  %v3735_v4 = vld [vmem:[%s7214_s1 + $0x2f8] sm:$0xff] }
  0x2c   : > { %v5120_v54 = vpack.c.bf16 %v3731_v49, %v3730_v47  ;;  %v3732_v55 = vld [vmem:[%s7214_s1 + $0x2e0] sm:$0xff]  ;;  %v3734_v3 = vld [vmem:[%s7214_s1 + $0x2f0] sm:$0xff]  ;;  %v3737_v16 = vld [vmem:[%s7214_s1 + $0x308] sm:$0xff] }
  0x2d   : > { %4967 = vmatpush3.bf16.msra.mxu1 %v4964_v61  ;;  %5095 = vmatpush3.bf16.msra.mxu0 %v5752_v2  ;;  %v266_v61 = vld [vmem:[%s7216_s3 + $0x48] sm:$0xff]  ;;  %v481_v63 = vld [vmem:[%s7214_s1] sm:$0xff]  ;;  %v5128_v10 = vpack.c.bf16 %v3735_v4, %v3734_v3  ;;  %v1055_v17 = vld [vmem:[%s7217_s4 + $0xd8] sm:$0xff] }
  0x2e   : > { %4969 = vmatprep.subr.bf16.mxu1 %v4968_v5  ;;  %5097 = vmatprep.subr.bf16.mxu0 %v5768_v8  ;;  %v515_v24 = vld [vmem:[%s5691_s24 + $0x91] sm:$0xff]  ;;  %v1056_v25 = vld [vmem:[%s7217_s4 + $0xe0] sm:$0xff]  ;;  %v1057_v33 = vld [vmem:[%s7217_s4 + $0xe8] sm:$0xff] }
  0x2f   : > { %1142 = vperm.xlu1 %5511, %v1044_v56   ;;  %291 = vperm.xlu0 %5510, %v257_v57   ;;  %v3733_v56 = vld [vmem:[%s7214_s1 + $0x2e8] sm:$0xff]  ;;  %v519_v39 = vld [vmem:[%s5691_s24 + $0xb1] sm:$0xff]  ;;  %v3672_v4 = vld [vmem:[%s7214_s1 + $0x100] sm:$0xff] }
  0x30   : > { %v1875_v57 = vld [vmem:[%s5691_s24 + $0x69] sm:$0xff]  ;;  %v5124_v62 = vpack.c.bf16 %v3733_v56, %v3732_v55  ;;  %v517_v31 = vld [vmem:[%s5691_s24 + $0xa1] sm:$0xff]  ;;  %v1059_v49 = vld [vmem:[%s7217_s4 + $0xf8] sm:$0xff] }
  0x31   : > { %4971 = vmatpush3.bf16.msra.mxu1 %v4968_v5  ;;  %5099 = vmatpush3.bf16.msra.mxu0 %v5768_v8  ;;  %v1878_v5 = vld [vmem:[%s5691_s24 + $0x81] sm:$0xff]  ;;  %v1058_v41 = vld [vmem:[%s7217_s4 + $0xf0] sm:$0xff] }
  0x32   : > { %5101 = vmatprep.subr.bf16.mxu0 %v5100_v13  ;;  %v521_v47 = vld [vmem:[%s5691_s24 + $0xc1] sm:$0xff]  ;;  %v523_v55 = vld [vmem:[%s5691_s24 + $0xd1] sm:$0xff] }
  0x33   : > { %1147 = vperm.xlu1 %5511, %v1045_v0   ;;  %296 = vperm.xlu0 %5510, %v258_v1   ;;  %v482_v0 = vld [vmem:[%s7214_s1 + $0x8] sm:$0xff]  ;;  %v1877_v1 = vld [vmem:[%s5691_s24 + $0x79] sm:$0xff] }
  0x34   : > { %4253 = vmatmul.mubr.f32.vlgmr.msra.gmra.mrb[0].mxu1 %v498_v15  ;;  %4573 = vmatmul.mubr.f32.vlgmr.msra.gmra.mrb[0].mxu0 %v1865_v18  ;;  %v4972_v9 = vpack.c.bf16 %v482_v0, %v481_v63  ;;  %v3736_v15 = vld [vmem:[%s7214_s1 + $0x300] sm:$0xff]  ;;  %v274_v56 = vld [vmem:[%s7216_s3 + $0x88] sm:$0xff]  ;;  %v276_v0 = vld [vmem:[%s7216_s3 + $0x98] sm:$0xff] }
  0x35   : > { %4255 = vmatprep.mubr.f32.mxu1 %v1864_v53  ;;  %5103 = vmatpush3.bf16.msra.mxu0 %v5100_v13  ;;  %v265_v53 = vld [vmem:[%s7216_s3 + $0x40] sm:$0xff]  ;;  %v1879_v13 = vld [vmem:[%s5691_s24 + $0x89] sm:$0xff] }
  0x36   : > { %4575 = vmatprep.mubr.f32.mxu0 %v1866_v19  ;;  %5105 = vmatprep.subr.bf16.mxu0 %v5104_v23  ;;  %v525_v63 = vld [vmem:[%s5691_s24 + $0xe1] sm:$0xff] }
  0x37   : > { %1152 = vperm.xlu1 %5511, %v1046_v6   ;;  %301 = vperm.xlu0 %5510, %v259_v7   ;;  %v1054_v6 = vld [vmem:[%s7217_s4 + $0xd0] sm:$0xff]  ;;  %v6376_v2 = vld [vmem:[%s5691_s24 + $0x48] sm:$0xff] }
  0x38   : > { %4256 = vmatmul.mubr.f32.gmra.mrb[2].mxu1 %v1865_v18  ;;  %4576 = vmatmul.mubr.f32.gmra.mrb[2].mxu0 %v1867_v26  ;;  %v267_v7 = vld [vmem:[%s7216_s3 + $0x50] sm:$0xff]  ;;  %v268_v18 = vld [vmem:[%s7216_s3 + $0x58] sm:$0xff] }
  0x39   : > { %4258 = vmatprep.mubr.f32.mxu1 %v1866_v19  ;;  %5107 = vmatpush3.bf16.msra.mxu0 %v5104_v23  ;;  %v5915_v23 = vpack.c.bf16 %v3737_v16, %v3736_v15  ;;  %v279_v15 = vld [vmem:[%s7216_s3 + $0xb0] sm:$0xff]  ;;  %v282_v16 = vld [vmem:[%s7216_s3 + $0xc8] sm:$0xff] }
  0x3a   : > { %4578 = vmatprep.mubr.f32.mxu0 %v1868_v27  ;;  %5109 = vmatprep.subr.bf16.mxu0 %v5108_v30 }
  0x3b   : > { %1157 = vperm.xlu1 %5511, %v1047_v11   ;;  %306 = vperm.xlu0 %5510, %v260_v12   ;;  %v483_v11 = vld [vmem:[%s7214_s1 + $0x10] sm:$0xff]  ;;  %v484_v12 = vld [vmem:[%s7214_s1 + $0x18] sm:$0xff] }
  0x3c   : > { %4259 = vmatmul.mubr.f32.gmra.mrb[4].mxu1 %v1867_v26  ;;  %4579 = vmatmul.mubr.f32.gmra.mrb[4].mxu0 %v1869_v34  ;;  %v4976_v19 = vpack.c.bf16 %v484_v12, %v483_v11  ;;  %v269_v26 = vld [vmem:[%s7216_s3 + $0x60] sm:$0xff] }
  0x3d   : > { %4261 = vmatprep.mubr.f32.mxu1 %v1868_v27  ;;  %5111 = vmatpush3.bf16.msra.mxu0 %v5108_v30  ;;  %v516_v30 = vld [vmem:[%s5691_s24 + $0x99] sm:$0xff] }
  0x3e   : > { %4581 = vmatprep.mubr.f32.mxu0 %v1870_v35  ;;  %5113 = vmatprep.subr.bf16.mxu0 %v5112_v38  ;;  %v528_v12 = vld [vmem:[%s5691_s24 + $0xf9] sm:$0xff] }
  0x3f   : > { %1162 = vperm.xlu1 %5511, %v1048_v20   ;;  %311 = vperm.xlu0 %5510, %v261_v21   ;;  %v485_v20 = vld [vmem:[%s7214_s1 + $0x20] sm:$0xff]  ;;  %v486_v21 = vld [vmem:[%s7214_s1 + $0x28] sm:$0xff] }
  0x40   : > { %4262 = vmatmul.mubr.f32.gmra.mrb[6].mxu1 %v1869_v34  ;;  %4582 = vmatmul.mubr.f32.gmra.mrb[6].mxu0 %v1871_v42  ;;  %v4980_v27 = vpack.c.bf16 %v486_v21, %v485_v20  ;;  %v270_v34 = vld [vmem:[%s7216_s3 + $0x68] sm:$0xff]  ;;  %v285_v21 = vld [vmem:[%s7216_s3 + $0xe0] sm:$0xff] }
  0x41   : > { %4264 = vmatprep.mubr.f32.mxu1 %v1870_v35  ;;  %5115 = vmatpush3.bf16.msra.mxu0 %v5112_v38  ;;  %v518_v38 = vld [vmem:[%s5691_s24 + $0xa9] sm:$0xff] }
  0x42   : > { %4584 = vmatprep.mubr.f32.mxu0 %v1872_v43  ;;  %5117 = vmatprep.subr.bf16.mxu0 %v5116_v46  ;;  %v286_v20 = vld [vmem:[%s7216_s3 + $0xe8] sm:$0xff] }
  0x43   : > { %1167 = vperm.xlu1 %5511, %v1049_v28   ;;  %316 = vperm.xlu0 %5510, %v262_v29   ;;  %v487_v28 = vld [vmem:[%s7214_s1 + $0x30] sm:$0xff]  ;;  %v488_v29 = vld [vmem:[%s7214_s1 + $0x38] sm:$0xff] }
  0x44   : > { %4265 = vmatmul.mubr.f32.gmra.mrb[8].mxu1 %v1871_v42  ;;  %4585 = vmatmul.mubr.f32.gmra.mrb[8].mxu0 %v1873_v50  ;;  %v4984_v35 = vpack.c.bf16 %v488_v29, %v487_v28  ;;  %v271_v42 = vld [vmem:[%s7216_s3 + $0x70] sm:$0xff]  ;;  %v2172_v28 = vld [vmem:[%s5691_s24 + $0x22] sm:$0xff] }
  0x45   : > { %4267 = vmatprep.mubr.f32.mxu1 %v1872_v43  ;;  %5119 = vmatpush3.bf16.msra.mxu0 %v5116_v46  ;;  %v520_v46 = vld [vmem:[%s5691_s24 + $0xb9] sm:$0xff] }
  0x46   : > { %4587 = vmatprep.mubr.f32.mxu0 %v1874_v51  ;;  %5121 = vmatprep.subr.bf16.mxu0 %v5120_v54 }
  0x47   : > { %1172 = vperm.xlu1 %5511, %v1050_v36   ;;  %321 = vperm.xlu0 %5510, %v263_v37   ;;  %v489_v36 = vld [vmem:[%s7214_s1 + $0x40] sm:$0xff]  ;;  %v490_v37 = vld [vmem:[%s7214_s1 + $0x48] sm:$0xff] }
  0x48   : > { %4268 = vmatmul.mubr.f32.gmra.mrb[10].mxu1 %v1873_v50  ;;  %4588 = vmatmul.mubr.f32.gmra.mrb[10].mxu0 %v1875_v57  ;;  %v4988_v43 = vpack.c.bf16 %v490_v37, %v489_v36  ;;  %v272_v50 = vld [vmem:[%s7216_s3 + $0x78] sm:$0xff] }
  0x49   : > { %4270 = vmatprep.mubr.f32.mxu1 %v1874_v51  ;;  %5123 = vmatpush3.bf16.msra.mxu0 %v5120_v54  ;;  %v522_v54 = vld [vmem:[%s5691_s24 + $0xc9] sm:$0xff]  ;;  %v999_v36 = vld [vmem:[%s5691_s24 + $0x1a] sm:$0xff] }
  0x4a   : > { %4590 = vmatprep.mubr.f32.mxu0 %v1876_v59  ;;  %5125 = vmatprep.subr.bf16.mxu0 %v5124_v62  ;;  %v3155_v37 = vld [vmem:[%s5691_s24 + $0x3a] sm:$0xff] }
  0x4b   : > { %1177 = vperm.xlu1 %5511, %v1051_v44   ;;  %326 = vperm.xlu0 %5510, %v264_v45   ;;  %v491_v44 = vld [vmem:[%s7214_s1 + $0x50] sm:$0xff]  ;;  %v492_v45 = vld [vmem:[%s7214_s1 + $0x58] sm:$0xff] }
  0x4c   : > { %4271 = vmatmul.mubr.f32.gmra.mrb[12].mxu1 %v1875_v57  ;;  %4591 = vmatmul.mubr.f32.gmra.mrb[12].mxu0 %v1877_v1  ;;  %v4992_v51 = vpack.c.bf16 %v492_v45, %v491_v44  ;;  %v273_v57 = vld [vmem:[%s7216_s3 + $0x80] sm:$0xff] }
  0x4d   : > { %4273 = vmatprep.mubr.f32.mxu1 %v1876_v59  ;;  %5127 = vmatpush3.bf16.msra.mxu0 %v5124_v62  ;;  %v524_v62 = vld [vmem:[%s5691_s24 + $0xd9] sm:$0xff] }
  0x4e   : > { %4593 = vmatprep.mubr.f32.mxu0 %v1878_v5  ;;  %4973 = vmatprep.subr.bf16.mxu1 %v4972_v9 }
  0x4f   : > { %1182 = vperm.xlu1 %5511, %v1052_v52   ;;  %331 = vperm.xlu0 %5510, %v265_v53   ;;  %v493_v52 = vld [vmem:[%s7214_s1 + $0x60] sm:$0xff]  ;;  %v494_v53 = vld [vmem:[%s7214_s1 + $0x68] sm:$0xff] }
  0x50   : > { %4274 = vmatmul.mubr.f32.gmra.mrb[14].mxu1 %v1877_v1  ;;  %4594 = vmatmul.mubr.f32.gmra.mrb[14].mxu0 %v1879_v13  ;;  %v4996_v59 = vpack.c.bf16 %v494_v53, %v493_v52  ;;  %v275_v1 = vld [vmem:[%s7216_s3 + $0x90] sm:$0xff] }
  0x51   : > { %5129 = vmatprep.subr.bf16.mxu0 %v5128_v10  ;;  %4975 = vmatpush3.bf16.msra.mxu1 %v4972_v9  ;;  %v278_v9 = vld [vmem:[%s7216_s3 + $0xa8] sm:$0xff] }
  0x52   : > { %5131 = vmatpush3.bf16.msra.mxu0 %v5128_v10  ;;  %4276 = vmatprep.mubr.f32.mxu1 %v1878_v5  ;;  %v3673_v5 = vld [vmem:[%s7214_s1 + $0x108] sm:$0xff]  ;;  %v277_v10 = vld [vmem:[%s7216_s3 + $0xa0] sm:$0xff] }
  0x53   : > { %1187 = vperm.xlu1 %5511, %v1053_v60   ;;  %336 = vperm.xlu0 %5510, %v266_v61   ;;  %v495_v60 = vld [vmem:[%s7214_s1 + $0x70] sm:$0xff]  ;;  %v496_v61 = vld [vmem:[%s7214_s1 + $0x78] sm:$0xff]  ;;  %v6009_v11 = vpack.c.bf16 %v3673_v5, %v3672_v4 }
  0x54   : > { %4977 = vmatprep.subr.bf16.mxu1 %v4976_v19  ;;  %4277 = vmatmul.mubr.f32.gmra.mrb[16].mxu1 %v1879_v13  ;;  %v5000_v3 = vpack.c.bf16 %v496_v61, %v495_v60  ;;  %v280_v13 = vld [vmem:[%s7216_s3 + $0xb8] sm:$0xff] }
  0x55   : > { %5133 = vmatprep.subr.bf16.mxu0 %v5915_v23  ;;  %4279 = vmatprep.mubr.f32.mxu1 %v515_v24  ;;  %v288_v24 = vld [vmem:[%s7216_s3 + $0xf8] sm:$0xff] }
  0x56   : > { %4979 = vmatpush3.bf16.msra.mxu1 %v4976_v19  ;;  %v283_v19 = vld [vmem:[%s7216_s3 + $0xd0] sm:$0xff] }
  0x57   : > { %1192 = vperm.xlu1 %5511, %v1054_v6   ;;  %341 = vperm.xlu0 %5510, %v267_v7   ;;  %v526_v6 = vld [vmem:[%s5691_s24 + $0xe9] sm:$0xff]  ;;  %v527_v7 = vld [vmem:[%s5691_s24 + $0xf1] sm:$0xff] }
  0x58   : > { %4981 = vmatprep.subr.bf16.mxu1 %v4980_v27  ;;  %4280 = vmatmul.mubr.f32.gmra.mrb[18].mxu1 %v516_v30 }
  0x59   : > { %4282 = vmatprep.mubr.f32.mxu1 %v517_v31 }
  0x5a   : > { %4983 = vmatpush3.bf16.msra.mxu1 %v4980_v27  ;;  %v3154_v27 = vld [vmem:[%s5691_s24 + $0x32] sm:$0xff] }
  0x5b   : > { %1197 = vperm.xlu1 %5511, %v1055_v17   ;;  %346 = vperm.xlu0 %5510, %v268_v18   ;;  %v281_v17 = vld [vmem:[%s7216_s3 + $0xc0] sm:$0xff]  ;;  %v284_v18 = vld [vmem:[%s7216_s3 + $0xd8] sm:$0xff] }
  0x5c   : > { %4985 = vmatprep.subr.bf16.mxu1 %v4984_v35  ;;  %4283 = vmatmul.mubr.f32.gmra.mrb[20].mxu1 %v518_v38  ;;  %v2173_v38 = vld [vmem:[%s5691_s24 + $0x2a] sm:$0xff] }
  0x5d   : > { %4285 = vmatprep.mubr.f32.mxu1 %v519_v39 }
  0x5e   : > { %4987 = vmatpush3.bf16.msra.mxu1 %v4984_v35 }
  0x5f   : > { %1202 = vperm.xlu1 %5511, %v1056_v25   ;;  %351 = vperm.xlu0 %5510, %v269_v26   ;;  %v287_v25 = vld [vmem:[%s7216_s3 + $0xf0] sm:$0xff] }
  0x60   : > { %4989 = vmatprep.subr.bf16.mxu1 %v4988_v43  ;;  %4286 = vmatmul.mubr.f32.gmra.mrb[22].mxu1 %v520_v46  ;;  %v998_v26 = vld [vmem:[%s5691_s24 + $0x12] sm:$0xff] }
  0x61   : > { %4288 = vmatprep.mubr.f32.mxu1 %v521_v47 }
  0x62   : > { %4991 = vmatpush3.bf16.msra.mxu1 %v4988_v43  ;;  %v3739_v43 = vld [vmem:[%s7214_s1 + $0x318] sm:$0xff] }
  0x63   : > { %1207 = vperm.xlu1 %5511, %v1057_v33   ;;  %356 = vperm.xlu0 %5510, %v270_v34  }
  0x64   : > { %4993 = vmatprep.subr.bf16.mxu1 %v4992_v51  ;;  %4289 = vmatmul.mubr.f32.gmra.mrb[24].mxu1 %v522_v54 }
  0x65   : > { %4291 = vmatprep.mubr.f32.mxu1 %v523_v55  ;;  %v3740_v55 = vld [vmem:[%s7214_s1 + $0x320] sm:$0xff] }
  0x66   : > { %4995 = vmatpush3.bf16.msra.mxu1 %v4992_v51  ;;  %v3156_v51 = vld [vmem:[%s5691_s24 + $0x42] sm:$0xff] }
  0x67   : > { %1212 = vperm.xlu1 %5511, %v1058_v41   ;;  %361 = vperm.xlu0 %5510, %v271_v42   ;;  %v3738_v42 = vld [vmem:[%s7214_s1 + $0x310] sm:$0xff] }
  0x68   : > { %4997 = vmatprep.subr.bf16.mxu1 %v4996_v59  ;;  %4292 = vmatmul.mubr.f32.gmra.mrb[26].mxu1 %v524_v62  ;;  %v5136_v52 = vpack.c.bf16 %v3739_v43, %v3738_v42  ;;  %v3746_v43 = vld [vmem:[%s7214_s1 + $0x350] sm:$0xff] }
  0x69   : > { %4294 = vmatprep.mubr.f32.mxu1 %v525_v63 }
  0x6a   : > { %4999 = vmatpush3.bf16.msra.mxu1 %v4996_v59 }
  0x6b   : > { %1217 = vperm.xlu1 %5511, %v1059_v49   ;;  %366 = vperm.xlu0 %5510, %v272_v50   ;;  %v3157_v49 = vld [vmem:[%s5691_s24 + $0x4a] sm:$0xff] }
  0x6c   : > { %5001 = vmatprep.subr.bf16.mxu1 %v5000_v3  ;;  %4295 = vmatmul.mubr.f32.gmra.mrb[28].mxu1 %v526_v6  ;;  %v3742_v6 = vld [vmem:[%s7214_s1 + $0x330] sm:$0xff] }
  0x6d   : > { %4297 = vmatprep.mubr.f32.mxu1 %v527_v7  ;;  %v3743_v7 = vld [vmem:[%s7214_s1 + $0x338] sm:$0xff] }
  0x6e   : > { %5003 = vmatpush3.bf16.msra.mxu1 %v5000_v3 }
  0x6f   : > { %376 = vperm.xlu1 %5511, %v274_v56   ;;  %371 = vperm.xlu0 %5510, %v273_v57   ;;  %v3741_v56 = vld [vmem:[%s7214_s1 + $0x328] sm:$0xff] }
  0x70   : > { %5005 = vmatprep.subr.bf16.mxu1 %v6009_v11  ;;  %4298 = vmatmul.mubr.f32.gmra.mrb[30].mxu1 %v528_v12  ;;  %v5140_v3 = vpack.c.bf16 %v3741_v56, %v3740_v55  ;;  %v6141_v55 = vld [vmem:[%s5691_s24 + $0x8a] sm:$0xff]  ;;  %v3164_v56 = vld [vmem:[%s5691_s24 + $0x82] sm:$0xff] }
  0x73   : > { %386 = vperm.xlu1 %5511, %v276_v0   ;;  %381 = vperm.xlu0 %5510, %v275_v1   ;;  %v3159_v0 = vld [vmem:[%s5691_s24 + $0x5a] sm:$0xff]  ;;  %v3158_v1 = vld [vmem:[%s5691_s24 + $0x52] sm:$0xff] }
  0x77   : > { %396 = vperm.xlu1 %5511, %v278_v9   ;;  %391 = vperm.xlu0 %5510, %v277_v10  }
  0x7b   : > { %406 = vperm.xlu1 %5511, %v280_v13   ;;  %401 = vperm.xlu0 %5510, %v279_v15  }
  0x7f   : > { %416 = vperm.xlu1 %5511, %v282_v16   ;;  %411 = vperm.xlu0 %5510, %v281_v17   ;;  %v3161_v16 = vld [vmem:[%s5691_s24 + $0x6a] sm:$0xff]  ;;  %v3160_v17 = vld [vmem:[%s5691_s24 + $0x62] sm:$0xff] }
  0x83   : > { %426 = vperm.xlu1 %5511, %v284_v18   ;;  %421 = vperm.xlu0 %5510, %v283_v19   ;;  %v5144_v18 = vpack.c.bf16 %v3743_v7, %v3742_v6 }
  0x87   : > { %436 = vperm.xlu1 %5511, %v286_v20   ;;  %431 = vperm.xlu0 %5510, %v285_v21   ;;  %v3744_v21 = vld [vmem:[%s7214_s1 + $0x340] sm:$0xff] }
  0x8b   : > { %446 = vperm.xlu1 %5511, %v288_v24   ;;  %441 = vperm.xlu0 %5510, %v287_v25   ;;  %v3745_v24 = vld [vmem:[%s7214_s1 + $0x348] sm:$0xff] }
  0x8e   : > { %v1073_v29 = vpop.permute.xlu1 %1072  ;;  %v6046_v30 = vpop.permute.xlu0 %1062 }
  0x8f   : > { %v6048_v31 = vmul.f32 %v1073_v29, %v998_v26  ;;  %v6050_v33 = vmul.f32 %v3154_v27, %v1073_v29  ;;  %v2202_v34 = vmul.f32 %v6046_v30, %v998_v26  ;;  %v6054_v35 = vmul.f32 %v2172_v28, %v6046_v30 }
  0x90   : > { %v2204_v50 = vmul.f32 %v2172_v28, %v1073_v29 }
  0x91   : > { %7243 = vst [vmem:[#allocation9_spill] sm:$0xff] %v6050_v33  ;;  %7244 = vst [vmem:[#allocation10_spill] sm:$0xff] %v6054_v35  ;;  %4652 = vmatprep.mubr.f32.mxu0 %v2202_v34  ;;  %v6351_v33 = vld [vmem:[%s5691_s24 + $0x40] sm:$0xff] }
  0x92   : > { %v1078_v39 = vpop.permute.xlu1 %1077  ;;  %v6059_v41 = vpop.permute.xlu0 %1067 }
  0x93   : > { %v6067_v44 = vmul.f32 %v1078_v39, %v999_v36  ;;  %v6069_v45 = vmul.f32 %v3155_v37, %v1078_v39  ;;  %v2203_v46 = vmul.f32 %v6059_v41, %v999_v36  ;;  %v6073_v47 = vmul.f32 %v2173_v38, %v6059_v41  ;;  %v3163_v36 = vld [vmem:[%s5691_s24 + $0x7a] sm:$0xff] }
  0x94   : > { %v2205_v61 = vmul.f32 %v2173_v38, %v1078_v39 }
  0x95   : > { %7245 = vst [vmem:[#allocation11_spill] sm:$0xff] %v6069_v45  ;;  %7246 = vst [vmem:[#allocation12_spill] sm:$0xff] %v6073_v47  ;;  %4653 = vmatmul.mubr.f32.vlgmr.msra.gmra.mrb[0].mxu0 %v2203_v46  ;;  %v3747_v46 = vld [vmem:[%s7214_s1 + $0x358] sm:$0xff] }
  0x96   : > { %v1088_v53 = vpop.permute.xlu1 %1087  ;;  %v1083_v54 = vpop.permute.xlu0 %1082  ;;  %4655 = vmatprep.mubr.f32.mxu0 %v2204_v50  ;;  %5135 = vmatpush3.bf16.msra.mxu0 %v5915_v23 }
  0x97   : > { %v6083_v57 = vmul.f32 %v2173_v38, %v1088_v53  ;;  %v6085_v59 = vmul.f32 %v3157_v49, %v1088_v53  ;;  %v6087_v60 = vmul.f32 %v2172_v28, %v1083_v54  ;;  %v2206_v62 = vmul.f32 %v3154_v27, %v1083_v54  ;;  %5137 = vmatprep.subr.bf16.mxu0 %v5136_v52 }
  0x98   : > { %v6089_v63 = vmul.f32 %v3156_v51, %v1083_v54  ;;  %v2207_v12 = vmul.f32 %v3155_v37, %v1088_v53  ;;  %v5148_v38 = vpack.c.bf16 %v3745_v24, %v3744_v21 }
  0x99   : > { %7247 = vst [vmem:[#allocation13_spill] sm:$0xff] %v6085_v59  ;;  %4656 = vmatmul.mubr.f32.gmra.mrb[2].mxu0 %v2205_v61  ;;  %v5152_v61 = vpack.c.bf16 %v3747_v46, %v3746_v43  ;;  %v6182_v46 = vld [vmem:[%s5691_s24 + $0xa2] sm:$0xff] }
  0x9a   : > { %7248 = vst [vmem:[#allocation14_spill] sm:$0xff] %v6089_v63  ;;  %v1098_v4 = vpop.permute.xlu1 %1097  ;;  %v1093_v5 = vpop.permute.xlu0 %1092  ;;  %4658 = vmatprep.mubr.f32.mxu0 %v2206_v62  ;;  %5139 = vmatpush3.bf16.msra.mxu0 %v5136_v52 }
  0x9b   : > { %v6100_v9 = vmul.f32 %v3155_v37, %v1098_v4  ;;  %v6102_v10 = vmul.f32 %v3159_v0, %v1098_v4  ;;  %v6104_v23 = vmul.f32 %v3154_v27, %v1093_v5  ;;  %v2208_v13 = vmul.f32 %v3156_v51, %v1093_v5  ;;  %5141 = vmatprep.subr.bf16.mxu0 %v5140_v3  ;;  %v3162_v37 = vld [vmem:[%s5691_s24 + $0x72] sm:$0xff] }
  0x9c   : > { %v6106_v15 = vmul.f32 %v3158_v1, %v1093_v5  ;;  %v2209_v28 = vmul.f32 %v3157_v49, %v1098_v4 }
  0x9d   : > { %7249 = vst [vmem:[#allocation15_spill] sm:$0xff] %v6102_v10  ;;  %4659 = vmatmul.mubr.f32.gmra.mrb[4].mxu0 %v2207_v12 }
  0x9e   : > { %7250 = vst [vmem:[#allocation16_spill] sm:$0xff] %v6106_v15  ;;  %v1108_v19 = vpop.permute.xlu1 %1107  ;;  %v1103_v20 = vpop.permute.xlu0 %1102  ;;  %4661 = vmatprep.mubr.f32.mxu0 %v2208_v13  ;;  %5143 = vmatpush3.bf16.msra.mxu0 %v5140_v3  ;;  %v6324_v15 = vld [vmem:[%s5691_s24 + $0x38] sm:$0xff] }
  0x9f   : > { %v6116_v25 = vmul.f32 %v3157_v49, %v1108_v19  ;;  %v6118_v26 = vmul.f32 %v3161_v16, %v1108_v19  ;;  %v6120_v27 = vmul.f32 %v3156_v51, %v1103_v20  ;;  %v2210_v29 = vmul.f32 %v3158_v1, %v1103_v20  ;;  %5145 = vmatprep.subr.bf16.mxu0 %v5144_v18 }
  0xa0   : > { %v6122_v34 = vmul.f32 %v3160_v17, %v1103_v20  ;;  %v2211_v52 = vmul.f32 %v3159_v0, %v1108_v19  ;;  %v6163_v19 = vld [vmem:[%s5691_s24 + $0x92] sm:$0xff] }
  0xa1   : > { %7251 = vst [vmem:[#allocation17_spill] sm:$0xff] %v6118_v26  ;;  %4662 = vmatmul.mubr.f32.gmra.mrb[6].mxu0 %v2209_v28 }
  0xa2   : > { %7252 = vst [vmem:[#allocation18_spill] sm:$0xff] %v6122_v34  ;;  %v1118_v39 = vpop.permute.xlu1 %1117  ;;  %v1113_v42 = vpop.permute.xlu0 %1112  ;;  %4664 = vmatprep.mubr.f32.mxu0 %v2210_v29  ;;  %5147 = vmatpush3.bf16.msra.mxu0 %v5144_v18  ;;  %v6160_v18 = vld [vmem:[%s5691_s24 + $0x9a] sm:$0xff] }
  0xa3   : > { %v6132_v49 = vmul.f32 %v3159_v0, %v1118_v39  ;;  %v6134_v50 = vmul.f32 %v3163_v36, %v1118_v39  ;;  %v6136_v51 = vmul.f32 %v3158_v1, %v1113_v42  ;;  %v2212_v53 = vmul.f32 %v3160_v17, %v1113_v42  ;;  %5149 = vmatprep.subr.bf16.mxu0 %v5148_v38  ;;  %v3748_v1 = vld [vmem:[%s7214_s1 + $0x360] sm:$0xff]  ;;  %v3749_v0 = vld [vmem:[%s7214_s1 + $0x368] sm:$0xff] }
  0xa4   : > { %v6138_v54 = vmul.f32 %v3162_v37, %v1113_v42  ;;  %v2213_v7 = vmul.f32 %v3161_v16, %v1118_v39  ;;  %v5156_v20 = vpack.c.bf16 %v3749_v0, %v3748_v1 }
  0xa5   : > { %7253 = vst [vmem:[#allocation19_spill] sm:$0xff] %v6134_v50  ;;  %4665 = vmatmul.mubr.f32.gmra.mrb[8].mxu0 %v2211_v52  ;;  %v225_v52 = vld [vmem:[%s5691_s24] sm:$0xff] }
  0xa6   : > { %7254 = vst [vmem:[#allocation20_spill] sm:$0xff] %v6138_v54  ;;  %v1128_v62 = vpop.permute.xlu1 %1127  ;;  %v1123_v3 = vpop.permute.xlu0 %1122  ;;  %4667 = vmatprep.mubr.f32.mxu0 %v2212_v53  ;;  %5151 = vmatpush3.bf16.msra.mxu0 %v5148_v38  ;;  %v1526_v53 = vld [vmem:[%s5691_s24 + $0x10] sm:$0xff] }
  0xa7   : > { %v6150_v4 = vmul.f32 %v3161_v16, %v1128_v62  ;;  %v6153_v5 = vmul.f32 %v6141_v55, %v1128_v62  ;;  %v6155_v6 = vmul.f32 %v3160_v17, %v1123_v3  ;;  %v2214_v12 = vmul.f32 %v3162_v37, %v1123_v3  ;;  %5153 = vmatprep.subr.bf16.mxu0 %v5152_v61  ;;  %v3750_v16 = vld [vmem:[%s7214_s1 + $0x370] sm:$0xff]  ;;  %v3751_v17 = vld [vmem:[%s7214_s1 + $0x378] sm:$0xff] }
  0xa8   : > { %v6157_v13 = vmul.f32 %v3164_v56, %v1123_v3  ;;  %v2215_v39 = vmul.f32 %v3163_v36, %v1128_v62  ;;  %v5160_v3 = vpack.c.bf16 %v3751_v17, %v3750_v16  ;;  %v3675_v16 = vld [vmem:[%s7214_s1 + $0x118] sm:$0xff] }
  0xa9   : > { %7255 = vst [vmem:[#allocation21_spill] sm:$0xff] %v6153_v5  ;;  %4668 = vmatmul.mubr.f32.gmra.mrb[10].mxu0 %v2213_v7 }
  0xaa   : > { %7256 = vst [vmem:[#allocation22_spill] sm:$0xff] %v6157_v13  ;;  %v1138_v21 = vpop.permute.xlu1 %1137  ;;  %v1133_v24 = vpop.permute.xlu0 %1132  ;;  %4670 = vmatprep.mubr.f32.mxu0 %v2214_v12  ;;  %5155 = vmatpush3.bf16.msra.mxu0 %v5152_v61 }
  0xab   : > { %v6171_v28 = vmul.f32 %v3163_v36, %v1138_v21  ;;  %v6174_v29 = vmul.f32 %v6160_v18, %v1138_v21  ;;  %v6176_v38 = vmul.f32 %v3162_v37, %v1133_v24  ;;  %v2216_v42 = vmul.f32 %v3164_v56, %v1133_v24  ;;  %5157 = vmatprep.subr.bf16.mxu0 %v5156_v20  ;;  %v3752_v36 = vld [vmem:[%s7214_s1 + $0x380] sm:$0xff]  ;;  %v3753_v37 = vld [vmem:[%s7214_s1 + $0x388] sm:$0xff] }
  0xac   : > { %v6179_v43 = vmul.f32 %v6163_v19, %v1133_v24  ;;  %v3674_v24 = vld [vmem:[%s7214_s1 + $0x110] sm:$0xff]  ;;  %v2217_v17 = vmul.f32 %v6141_v55, %v1138_v21 }
  0xad   : > { %7257 = vst [vmem:[#allocation23_spill] sm:$0xff] %v6174_v29  ;;  %4671 = vmatmul.mubr.f32.gmra.mrb[12].mxu0 %v2215_v39  ;;  %v6212_v39 = vld [vmem:[%s5691_s24 + $0xaa] sm:$0xff] }
  0xae   : > { %7258 = vst [vmem:[#allocation24_spill] sm:$0xff] %v6179_v43  ;;  %v1143_v1 = vpop.permute.xlu1 %1142  ;;  %v6186_v0 = vpop.permute.xlu0 %291  ;;  %4673 = vmatprep.mubr.f32.mxu0 %v2216_v42  ;;  %5159 = vmatpush3.bf16.msra.mxu0 %v5156_v20  ;;  %v1527_v42 = vld [vmem:[%s5691_s24 + $0x18] sm:$0xff]  ;;  %v5008_v43 = vpack.c.bf16 %v3675_v16, %v3674_v24  ;;  %v6245_v16 = vld [vmem:[%s5691_s24 + $0x20] sm:$0xff] }
  0xaf   : > { %v6194_v62 = vmul.f32 %v3164_v56, %v1143_v1  ;;  %v2218_v61 = vmul.f32 %v6163_v19, %v1143_v1  ;;  %v6198_v7 = vmul.f32 %v6182_v46, %v1143_v1  ;;  %v449_v12 = vmul.f32 %v6186_v0, %v225_v52  ;;  %v226_v1 = vld [vmem:[%s5691_s24 + $0x8] sm:$0xff]  ;;  %5161 = vmatprep.subr.bf16.mxu0 %v5160_v3 }
  0xb0   : > { %v6209_v56 = vmul.f32 %v1526_v53, %v6186_v0  ;;  %v6216_v52 = vpack.c.bf16 %v3753_v37, %v3752_v36  ;;  %v3676_v36 = vld [vmem:[%s7214_s1 + $0x120] sm:$0xff]  ;;  %v3677_v37 = vld [vmem:[%s7214_s1 + $0x128] sm:$0xff] }
  0xb1   : > { %7259 = vst [vmem:[#allocation25_spill] sm:$0xff] %v6198_v7  ;;  %4332 = vmatprep.mubr.f32.mxu1 %v449_v12  ;;  %4674 = vmatmul.mubr.f32.gmra.mrb[14].mxu0 %v2217_v17  ;;  %v6238_v12 = vld [vmem:[%s5691_s24 + $0xb2] sm:$0xff]  ;;  %v5012_v24 = vpack.c.bf16 %v3677_v37, %v3676_v36  ;;  %v6266_v36 = vld [vmem:[%s5691_s24 + $0xba] sm:$0xff] }
  0xb2   : > { %7260 = vst [vmem:[#allocation26_spill] sm:$0xff] %v6209_v56  ;;  %v1148_v7 = vpop.permute.xlu1 %1147  ;;  %v6218_v29 = vpop.permute.xlu0 %296  ;;  %4676 = vmatprep.mubr.f32.mxu0 %v2218_v61  ;;  %5163 = vmatpush3.bf16.msra.mxu0 %v5160_v3 }
  0xb3   : > { %v6221_v21 = vmul.f32 %v6141_v55, %v1148_v7  ;;  %v2219_v5 = vmul.f32 %v6160_v18, %v1148_v7  ;;  %v6225_v13 = vmul.f32 %v6212_v39, %v1148_v7  ;;  %v450_v20 = vmul.f32 %v6218_v29, %v226_v1  ;;  %5165 = vmatprep.subr.bf16.mxu0 %v6216_v52 }
  0xb4   : > { %v6235_v55 = vmul.f32 %v1527_v42, %v6218_v29 }
  0xb5   : > { %7261 = vst [vmem:[#allocation27_spill] sm:$0xff] %v6225_v13  ;;  %4333 = vmatmul.mubr.f32.vlgmr.msra.gmra.mrb[0].mxu1 %v450_v20  ;;  %4677 = vmatmul.mubr.f32.gmra.mrb[16].mxu0 %v2219_v5  ;;  %v3678_v5 = vld [vmem:[%s7214_s1 + $0x130] sm:$0xff] }
  0xb6   : > { %7262 = vst [vmem:[#allocation28_spill] sm:$0xff] %v6235_v55  ;;  %v1153_v61 = vpop.permute.xlu1 %1152  ;;  %v6241_v7 = vpop.permute.xlu0 %301  ;;  %5007 = vmatpush3.bf16.msra.mxu1 %v6009_v11  ;;  %v3679_v11 = vld [vmem:[%s7214_s1 + $0x138] sm:$0xff] }
  0xb7   : > { %v6248_v17 = vmul.f32 %v6163_v19, %v1153_v61  ;;  %v2220_v1 = vmul.f32 %v6182_v46, %v1153_v61  ;;  %v6252_v3 = vmul.f32 %v6238_v12, %v1153_v61  ;;  %v451_v20 = vmul.f32 %v1526_v53, %v6241_v7  ;;  %5009 = vmatprep.subr.bf16.mxu1 %v5008_v43 }
  0xb8   : > { %v6263_v19 = vmul.f32 %v6245_v16, %v6241_v7  ;;  %v5016_v61 = vpack.c.bf16 %v3679_v11, %v3678_v5 }
  0xb9   : > { %7263 = vst [vmem:[#allocation29_spill] sm:$0xff] %v6248_v17  ;;  %7264 = vst [vmem:[#allocation30_spill] sm:$0xff] %v6252_v3  ;;  %4335 = vmatprep.mubr.f32.mxu1 %v451_v20  ;;  %4679 = vmatprep.mubr.f32.mxu0 %v2220_v1  ;;  %v6271_v3 = vld [vmem:[%s5691_s24 + $0x28] sm:$0xff]  ;;  %v3680_v1 = vld [vmem:[%s7214_s1 + $0x140] sm:$0xff] }
  0xba   : > { %7265 = vst [vmem:[#allocation31_spill] sm:$0xff] %v6263_v19  ;;  %v1158_v37 = vpop.permute.xlu1 %1157  ;;  %v6268_v53 = vpop.permute.xlu0 %306  ;;  %5011 = vmatpush3.bf16.msra.mxu1 %v5008_v43  ;;  %v3681_v43 = vld [vmem:[%s7214_s1 + $0x148] sm:$0xff] }
  0xbb   : > { %v6274_v13 = vmul.f32 %v6160_v18, %v1158_v37  ;;  %v2221_v50 = vmul.f32 %v6212_v39, %v1158_v37  ;;  %v6278_v54 = vmul.f32 %v6266_v36, %v1158_v37  ;;  %v452_v26 = vmul.f32 %v1527_v42, %v6268_v53  ;;  %5013 = vmatprep.subr.bf16.mxu1 %v5012_v24  ;;  %v6292_v20 = vld [vmem:[%s5691_s24 + $0xc2] sm:$0xff]  ;;  %v6297_v37 = vld [vmem:[%s5691_s24 + $0x30] sm:$0xff] }
  0xbc   : > { %v6289_v18 = vmul.f32 %v6271_v3, %v6268_v53  ;;  %v5020_v11 = vpack.c.bf16 %v3681_v43, %v3680_v1  ;;  %v6319_v1 = vld [vmem:[%s5691_s24 + $0xca] sm:$0xff] }
  0xbd   : > { %7266 = vst [vmem:[#allocation32_spill] sm:$0xff] %v6274_v13  ;;  %7267 = vst [vmem:[#allocation33_spill] sm:$0xff] %v6278_v54  ;;  %4336 = vmatmul.mubr.f32.gmra.mrb[2].mxu1 %v452_v26  ;;  %4680 = vmatmul.mubr.f32.gmra.mrb[18].mxu0 %v2221_v50  ;;  %v3682_v50 = vld [vmem:[%s7214_s1 + $0x150] sm:$0xff] }
  0xbe   : > { %7268 = vst [vmem:[#allocation34_spill] sm:$0xff] %v6289_v18  ;;  %v1163_v5 = vpop.permute.xlu1 %1162  ;;  %v6294_v42 = vpop.permute.xlu0 %311  ;;  %5015 = vmatpush3.bf16.msra.mxu1 %v5012_v24  ;;  %v3683_v24 = vld [vmem:[%s7214_s1 + $0x158] sm:$0xff]  ;;  %v6438_v18 = vld [vmem:[%s5691_s24 + $0x60] sm:$0xff]  ;;  %v997_v17 = vld [vmem:[%s5691_s24 + $0xa] sm:$0xff] }
  0xbf   : > { %v6300_v54 = vmul.f32 %v6182_v46, %v1163_v5  ;;  %v2222_v34 = vmul.f32 %v6238_v12, %v1163_v5  ;;  %v6304_v10 = vmul.f32 %v6292_v20, %v1163_v5  ;;  %v453_v26 = vmul.f32 %v6245_v16, %v6294_v42  ;;  %5017 = vmatprep.subr.bf16.mxu1 %v5016_v61 }
  0xc0   : > { %v6316_v46 = vmul.f32 %v6297_v37, %v6294_v42 }
  0xc1   : > { %7269 = vst [vmem:[#allocation35_spill] sm:$0xff] %v6300_v54  ;;  %7270 = vst [vmem:[#allocation36_spill] sm:$0xff] %v6304_v10  ;;  %4338 = vmatprep.mubr.f32.mxu1 %v453_v26  ;;  %4682 = vmatprep.mubr.f32.mxu0 %v2222_v34  ;;  %v5024_v10 = vpack.c.bf16 %v3683_v24, %v3682_v50  ;;  %v3684_v34 = vld [vmem:[%s7214_s1 + $0x160] sm:$0xff]  ;;  %v6346_v50 = vld [vmem:[%s5691_s24 + $0xd2] sm:$0xff] }
  0xc2   : > { %7271 = vst [vmem:[#allocation37_spill] sm:$0xff] %v6316_v46  ;;  %v1168_v43 = vpop.permute.xlu1 %1167  ;;  %v6321_v5 = vpop.permute.xlu0 %316  ;;  %5019 = vmatpush3.bf16.msra.mxu1 %v5016_v61  ;;  %v3685_v61 = vld [vmem:[%s7214_s1 + $0x168] sm:$0xff] }
  0xc3   : > { %v6327_v59 = vmul.f32 %v6212_v39, %v1168_v43  ;;  %v2223_v63 = vmul.f32 %v6266_v36, %v1168_v43  ;;  %v6331_v45 = vmul.f32 %v6319_v1, %v1168_v43  ;;  %v454_v26 = vmul.f32 %v6271_v3, %v6321_v5  ;;  %5021 = vmatprep.subr.bf16.mxu1 %v5020_v11  ;;  %v6574_v54 = vld [vmem:[%s5691_s24 + $0xa8] sm:$0xff] }
  0xc4   : > { %v6343_v39 = vmul.f32 %v6324_v15, %v6321_v5 }
  0xc5   : > { %7272 = vst [vmem:[#allocation38_spill] sm:$0xff] %v6327_v59  ;;  %7273 = vst [vmem:[#allocation39_spill] sm:$0xff] %v6331_v45  ;;  %4339 = vmatmul.mubr.f32.gmra.mrb[4].mxu1 %v454_v26  ;;  %4683 = vmatmul.mubr.f32.gmra.mrb[20].mxu0 %v2223_v63  ;;  %v5028_v45 = vpack.c.bf16 %v3685_v61, %v3684_v34  ;;  %v3686_v63 = vld [vmem:[%s7214_s1 + $0x170] sm:$0xff]  ;;  %v3175_v34 = vld [vmem:[%s5691_s24 + $0xda] sm:$0xff] }
  0xc6   : > { %7274 = vst [vmem:[#allocation40_spill] sm:$0xff] %v6343_v39  ;;  %v1173_v24 = vpop.permute.xlu1 %1172  ;;  %v6348_v43 = vpop.permute.xlu0 %321  ;;  %5023 = vmatpush3.bf16.msra.mxu1 %v5020_v11  ;;  %v3687_v11 = vld [vmem:[%s7214_s1 + $0x178] sm:$0xff]  ;;  %v6504_v59 = vld [vmem:[%s5691_s24 + $0x80] sm:$0xff] }
  0xc7   : > { %v6354_v47 = vmul.f32 %v6238_v12, %v1173_v24  ;;  %v2224_v35 = vmul.f32 %v6292_v20, %v1173_v24  ;;  %v6358_v8 = vmul.f32 %v6346_v50, %v1173_v24  ;;  %v455_v26 = vmul.f32 %v6297_v37, %v6348_v43  ;;  %5025 = vmatprep.subr.bf16.mxu1 %v5024_v10 }
  0xc8   : > { %v6370_v12 = vmul.f32 %v6351_v33, %v6348_v43 }
  0xc9   : > { %7275 = vst [vmem:[#allocation41_spill] sm:$0xff] %v6354_v47  ;;  %7276 = vst [vmem:[#allocation42_spill] sm:$0xff] %v6358_v8  ;;  %4341 = vmatprep.mubr.f32.mxu1 %v455_v26  ;;  %4685 = vmatprep.mubr.f32.mxu0 %v2224_v35  ;;  %v5032_v8 = vpack.c.bf16 %v3687_v11, %v3686_v63  ;;  %v3688_v35 = vld [vmem:[%s7214_s1 + $0x180] sm:$0xff]  ;;  %v6487_v47 = vld [vmem:[%s5691_s24 + $0x78] sm:$0xff] }
  0xca   : > { %7277 = vst [vmem:[#allocation43_spill] sm:$0xff] %v6370_v12  ;;  %v1178_v61 = vpop.permute.xlu1 %1177  ;;  %v6373_v24 = vpop.permute.xlu0 %326  ;;  %5027 = vmatpush3.bf16.msra.mxu1 %v5024_v10  ;;  %v3689_v10 = vld [vmem:[%s7214_s1 + $0x188] sm:$0xff] }
  0xcb   : > { %v6379_v58 = vmul.f32 %v6266_v36, %v1178_v61  ;;  %v2225_v48 = vmul.f32 %v6319_v1, %v1178_v61  ;;  %v6382_v40 = vmul.f32 %v3175_v34, %v1178_v61  ;;  %v456_v12 = vmul.f32 %v6324_v15, %v6373_v24  ;;  %5029 = vmatprep.subr.bf16.mxu1 %v5028_v45  ;;  %v3176_v26 = vld [vmem:[%s5691_s24 + $0xe2] sm:$0xff] }
  0xcc   : > { %v6394_v36 = vmul.f32 %v6376_v2, %v6373_v24  ;;  %v6399_v61 = vpack.c.bf16 %v3689_v10, %v3688_v35  ;;  %v6420_v10 = vld [vmem:[%s5691_s24 + $0x58] sm:$0xff] }
  0xcd   : > { %7278 = vst [vmem:[#allocation44_spill] sm:$0xff] %v6379_v58  ;;  %7279 = vst [vmem:[#allocation45_spill] sm:$0xff] %v6382_v40  ;;  %4342 = vmatmul.mubr.f32.gmra.mrb[6].mxu1 %v456_v12  ;;  %4686 = vmatmul.mubr.f32.gmra.mrb[22].mxu0 %v2225_v48  ;;  %v6402_v40 = vld [vmem:[%s5691_s24 + $0x50] sm:$0xff] }
  0xce   : > { %7280 = vst [vmem:[#allocation46_spill] sm:$0xff] %v6394_v36  ;;  %v1183_v63 = vpop.permute.xlu1 %1182  ;;  %v6397_v11 = vpop.permute.xlu0 %331  ;;  %5031 = vmatpush3.bf16.msra.mxu1 %v5028_v45  ;;  %v3177_v45 = vld [vmem:[%s5691_s24 + $0xea] sm:$0xff] }
  0xcf   : > { %v6405_v39 = vmul.f32 %v6292_v20, %v1183_v63  ;;  %v2226_v32 = vmul.f32 %v6346_v50, %v1183_v63  ;;  %v6408_v46 = vmul.f32 %v3176_v26, %v1183_v63  ;;  %v457_v12 = vmul.f32 %v6351_v33, %v6397_v11  ;;  %5033 = vmatprep.subr.bf16.mxu1 %v5032_v8 }
  0xd0   : > { %v6414_v48 = vmul.f32 %v6402_v40, %v6397_v11 }
  0xd1   : > { %7281 = vst [vmem:[#allocation47_spill] sm:$0xff] %v6405_v39  ;;  %7282 = vst [vmem:[#allocation48_spill] sm:$0xff] %v6408_v46  ;;  %4344 = vmatprep.mubr.f32.mxu1 %v457_v12  ;;  %4688 = vmatprep.mubr.f32.mxu0 %v2226_v32  ;;  %v3178_v12 = vld [vmem:[%s5691_s24 + $0xf2] sm:$0xff] }
  0xd2   : > { %7283 = vst [vmem:[#allocation49_spill] sm:$0xff] %v6414_v48  ;;  %v1188_v35 = vpop.permute.xlu1 %1187  ;;  %v6417_v20 = vpop.permute.xlu0 %336  ;;  %5035 = vmatpush3.bf16.msra.mxu1 %v5032_v8 }
  0xd3   : > { %v6423_v63 = vmul.f32 %v6319_v1, %v1188_v35  ;;  %v2227_v46 = vmul.f32 %v3175_v34, %v1188_v35  ;;  %v6425_v36 = vmul.f32 %v3177_v45, %v1188_v35  ;;  %v458_v48 = vmul.f32 %v6376_v2, %v6417_v20  ;;  %5037 = vmatprep.subr.bf16.mxu1 %v6399_v61 }
  0xd4   : > { %v6432_v32 = vmul.f32 %v6420_v10, %v6417_v20 }
  0xd5   : > { %7284 = vst [vmem:[#allocation50_spill] sm:$0xff] %v6423_v63  ;;  %7285 = vst [vmem:[#allocation51_spill] sm:$0xff] %v6425_v36  ;;  %4345 = vmatmul.mubr.f32.gmra.mrb[8].mxu1 %v458_v48  ;;  %4689 = vmatmul.mubr.f32.gmra.mrb[24].mxu0 %v2227_v46  ;;  %v3179_v46 = vld [vmem:[%s5691_s24 + $0xfa] sm:$0xff] }
  0xd6   : > { %7286 = vst [vmem:[#allocation52_spill] sm:$0xff] %v6432_v32  ;;  %v1193_v8 = vpop.permute.xlu1 %1192  ;;  %v6435_v1 = vpop.permute.xlu0 %341 }
  0xd7   : > { %v6441_v35 = vmul.f32 %v6346_v50, %v1193_v8  ;;  %v2228_v36 = vmul.f32 %v3176_v26, %v1193_v8  ;;  %v6443_v22 = vmul.f32 %v3178_v12, %v1193_v8  ;;  %v459_v19 = vmul.f32 %v6402_v40, %v6435_v1  ;;  %v6455_v50 = vld [vmem:[%s5691_s24 + $0x68] sm:$0xff] }
  0xd8   : > { %v6449_v32 = vmul.f32 %v6438_v18, %v6435_v1 }
  0xd9   : > { %7287 = vst [vmem:[#allocation53_spill] sm:$0xff] %v6441_v35  ;;  %7288 = vst [vmem:[#allocation54_spill] sm:$0xff] %v6443_v22  ;;  %4347 = vmatprep.mubr.f32.mxu1 %v459_v19  ;;  %4691 = vmatprep.mubr.f32.mxu0 %v2228_v36  ;;  %v3180_v19 = vld [vmem:[%s5691_s24 + $0x102] sm:$0xff] }
  0xda   : > { %7289 = vst [vmem:[#allocation55_spill] sm:$0xff] %v6449_v32  ;;  %v1198_v48 = vpop.permute.xlu1 %1197  ;;  %v6452_v55 = vpop.permute.xlu0 %346 }
  0xdb   : > { %v6457_v56 = vmul.f32 %v3175_v34, %v1198_v48  ;;  %v2229_v8 = vmul.f32 %v3177_v45, %v1198_v48  ;;  %v6459_v22 = vmul.f32 %v3179_v46, %v1198_v48  ;;  %v460_v35 = vmul.f32 %v6420_v10, %v6452_v55  ;;  %v6471_v34 = vld [vmem:[%s5691_s24 + $0x70] sm:$0xff] }
  0xdc   : > { %v6465_v32 = vmul.f32 %v6455_v50, %v6452_v55 }
  0xdd   : > { %7290 = vst [vmem:[#allocation56_spill] sm:$0xff] %v6457_v56  ;;  %7291 = vst [vmem:[#allocation57_spill] sm:$0xff] %v6459_v22  ;;  %4348 = vmatmul.mubr.f32.gmra.mrb[10].mxu1 %v460_v35  ;;  %4692 = vmatmul.mubr.f32.gmra.mrb[26].mxu0 %v2229_v8  ;;  %v3181_v35 = vld [vmem:[%s5691_s24 + $0x10a] sm:$0xff] }
  0xde   : > { %7292 = vst [vmem:[#allocation58_spill] sm:$0xff] %v6465_v32  ;;  %v1203_v36 = vpop.permute.xlu1 %1202  ;;  %v6468_v63 = vpop.permute.xlu0 %351 }
  0xdf   : > { %v6473_v56 = vmul.f32 %v3176_v26, %v1203_v36  ;;  %v2230_v48 = vmul.f32 %v3178_v12, %v1203_v36  ;;  %v6475_v22 = vmul.f32 %v3180_v19, %v1203_v36  ;;  %v461_v39 = vmul.f32 %v6438_v18, %v6468_v63 }
  0xe0   : > { %v6481_v32 = vmul.f32 %v6471_v34, %v6468_v63 }
  0xe1   : > { %7293 = vst [vmem:[#allocation59_spill] sm:$0xff] %v6473_v56  ;;  %7294 = vst [vmem:[#allocation60_spill] sm:$0xff] %v6475_v22  ;;  %4350 = vmatprep.mubr.f32.mxu1 %v461_v39  ;;  %4694 = vmatprep.mubr.f32.mxu0 %v2230_v48 }
  0xe2   : > { %7295 = vst [vmem:[#allocation61_spill] sm:$0xff] %v6481_v32  ;;  %v1208_v8 = vpop.permute.xlu1 %1207  ;;  %v6484_v58 = vpop.permute.xlu0 %356 }
  0xe3   : > { %v6489_v26 = vmul.f32 %v3177_v45, %v1208_v8  ;;  %v2231_v36 = vmul.f32 %v3179_v46, %v1208_v8  ;;  %v6491_v22 = vmul.f32 %v3181_v35, %v1208_v8  ;;  %v462_v56 = vmul.f32 %v6455_v50, %v6484_v58 }
  0xe4   : > { %v6497_v32 = vmul.f32 %v6487_v47, %v6484_v58 }
  0xe5   : > { %7296 = vst [vmem:[#allocation62_spill] sm:$0xff] %v6489_v26  ;;  %7297 = vst [vmem:[#allocation63_spill] sm:$0xff] %v6491_v22  ;;  %4351 = vmatmul.mubr.f32.gmra.mrb[12].mxu1 %v462_v56  ;;  %4695 = vmatmul.mubr.f32.gmra.mrb[28].mxu0 %v2231_v36  ;;  %v6521_v26 = vld [vmem:[%s5691_s24 + $0x88] sm:$0xff] }
  0xe6   : > { %7298 = vst [vmem:[#allocation64_spill] sm:$0xff] %v6497_v32  ;;  %v6499_v39 = vpop.permute.xlu1 %1212  ;;  %v6501_v48 = vpop.permute.xlu0 %361 }
  0xe7   : > { %7299 = vst [vmem:[#allocation65_spill] sm:$0xff] %v6499_v39  ;;  %v6507_v45 = vmul.f32 %v3178_v12, %v6499_v39  ;;  %v2232_v8 = vmul.f32 %v3180_v19, %v6499_v39  ;;  %v463_v22 = vmul.f32 %v6471_v34, %v6501_v48  ;;  %v6514_v32 = vmul.f32 %v6504_v59, %v6501_v48 }
  0xe9   : > { %7300 = vst [vmem:[#allocation66_spill] sm:$0xff] %v6507_v45  ;;  %7301 = vst [vmem:[#allocation67_spill] sm:$0xff] %v6514_v32  ;;  %4353 = vmatprep.mubr.f32.mxu1 %v463_v22  ;;  %4697 = vmatprep.mubr.f32.mxu0 %v2232_v8  ;;  %v2540_v32 = vmul.f32 %v6245_v16, %v6186_v0  ;;  %v3754_v8 = vld [vmem:[%s7214_s1 + $0x390] sm:$0xff]  ;;  %v2541_v16 = vmul.f32 %v6271_v3, %v6218_v29  ;;  %v3756_v3 = vld [vmem:[%s7214_s1 + $0x3a0] sm:$0xff] }
  0xea   : > { %v6516_v56 = vpop.permute.xlu1 %1217  ;;  %v6518_v36 = vpop.permute.xlu0 %366  ;;  %v2542_v45 = vmul.f32 %v6297_v37, %v6241_v7  ;;  %v2543_v37 = vmul.f32 %v6324_v15, %v6268_v53 }
  0xeb   : > { %7302 = vst [vmem:[#allocation68_spill] sm:$0xff] %v6516_v56  ;;  %v6524_v12 = vmul.f32 %v3179_v46, %v6516_v56  ;;  %v2233_v19 = vmul.f32 %v3181_v35, %v6516_v56  ;;  %v464_v39 = vmul.f32 %v6487_v47, %v6518_v36  ;;  %v6533_v22 = vmul.f32 %v6521_v26, %v6518_v36  ;;  %v3755_v46 = vld [vmem:[%s7214_s1 + $0x398] sm:$0xff] }
  0xec   : > { %v6542_v35 = vld [vmem:[%s5691_s24 + $0x98] sm:$0xff]  ;;  %v5168_v29 = vpack.c.bf16 %v3755_v46, %v3754_v8 }
  0xed   : > { %7303 = vst [vmem:[#allocation69_spill] sm:$0xff] %v6524_v12  ;;  %7304 = vst [vmem:[#allocation70_spill] sm:$0xff] %v6533_v22  ;;  %4354 = vmatmul.mubr.f32.gmra.mrb[14].mxu1 %v464_v39  ;;  %4698 = vmatmul.mubr.f32.gmra.mrb[30].mxu0 %v2233_v19  ;;  %v6551_v39 = vld [vmem:[%s5691_s24 + $0x90] sm:$0xff] }
  0xee   : > { %v6544_v56 = vpop.permute.xlu1 %376  ;;  %v6546_v0 = vpop.permute.xlu0 %371  ;;  %4732 = vmatprep.mubr.f32.mxu0 %v2540_v32 }
  0xef   : > { %v466_v19 = vmul.f32 %v6521_v26, %v6544_v56  ;;  %v6557_v22 = vmul.f32 %v6542_v35, %v6544_v56  ;;  %v465_v12 = vmul.f32 %v6504_v59, %v6546_v0  ;;  %v6565_v32 = vmul.f32 %v6551_v39, %v6546_v0 }
  0xf1   : > { %7305 = vst [vmem:[#allocation71_spill] sm:$0xff] %v6557_v22  ;;  %7306 = vst [vmem:[#allocation72_spill] sm:$0xff] %v6565_v32  ;;  %4356 = vmatprep.mubr.f32.mxu1 %v465_v12  ;;  %4733 = vmatmul.mubr.f32.vlgmr.msra.gmra.mrb[0].mxu0 %v2541_v16  ;;  %v3757_v22 = vld [vmem:[%s7214_s1 + $0x3a8] sm:$0xff]  ;;  %v6583_v12 = vld [vmem:[%s5691_s24 + $0xa0] sm:$0xff] }
  0xf2   : > { %v6576_v13 = vpop.permute.xlu1 %386  ;;  %v6578_v7 = vpop.permute.xlu0 %381  ;;  %4357 = vmatmul.mubr.f32.gmra.mrb[16].mxu1 %v466_v19  ;;  %4735 = vmatprep.mubr.f32.mxu0 %v2542_v45  ;;  %v2544_v45 = vmul.f32 %v6351_v33, %v6294_v42  ;;  %v5172_v53 = vpack.c.bf16 %v3757_v22, %v3756_v3  ;;  %v3758_v19 = vld [vmem:[%s7214_s1 + $0x3b0] sm:$0xff]  ;;  %v2545_v42 = vmul.f32 %v6376_v2, %v6321_v5 }
  0xf3   : > { %v468_v8 = vmul.f32 %v6542_v35, %v6576_v13  ;;  %v6589_v46 = vmul.f32 %v6574_v54, %v6576_v13  ;;  %v467_v16 = vmul.f32 %v6551_v39, %v6578_v7  ;;  %5167 = vmatpush3.bf16.msra.mxu0 %v6216_v52  ;;  %v6598_v15 = vmul.f32 %v6583_v12, %v6578_v7  ;;  %v6607_v52 = vld [vmem:[%s5691_s24 + $0xb8] sm:$0xff]  ;;  %v6616_v22 = vld [vmem:[%s5691_s24 + $0xb0] sm:$0xff] }
  0xf4   : > { %5169 = vmatprep.subr.bf16.mxu0 %v5168_v29 }
  0xf5   : > { %7307 = vst [vmem:[#allocation73_spill] sm:$0xff] %v6589_v46  ;;  %7308 = vst [vmem:[#allocation74_spill] sm:$0xff] %v6598_v15  ;;  %4359 = vmatprep.mubr.f32.mxu1 %v467_v16  ;;  %4736 = vmatmul.mubr.f32.gmra.mrb[2].mxu0 %v2543_v37  ;;  %v3759_v46 = vld [vmem:[%s7214_s1 + $0x3b8] sm:$0xff] }
  0xf6   : > { %v6609_v32 = vpop.permute.xlu1 %396  ;;  %v6611_v33 = vpop.permute.xlu0 %391  ;;  %4360 = vmatmul.mubr.f32.gmra.mrb[18].mxu1 %v468_v8  ;;  %4738 = vmatprep.mubr.f32.mxu0 %v2544_v45  ;;  %v2546_v8 = vmul.f32 %v6402_v40, %v6348_v43  ;;  %v5176_v5 = vpack.c.bf16 %v3759_v46, %v3758_v19  ;;  %v3760_v45 = vld [vmem:[%s7214_s1 + $0x3c0] sm:$0xff]  ;;  %v2547_v43 = vmul.f32 %v6420_v10, %v6373_v24 }
  0xf7   : > { %v470_v3 = vmul.f32 %v6574_v54, %v6609_v32  ;;  %v6622_v37 = vmul.f32 %v6607_v52, %v6609_v32  ;;  %v469_v16 = vmul.f32 %v6583_v12, %v6611_v33  ;;  %5171 = vmatpush3.bf16.msra.mxu0 %v5168_v29  ;;  %v6630_v2 = vmul.f32 %v6616_v22, %v6611_v33  ;;  %v6639_v29 = vld [vmem:[%s5691_s24 + $0xc8] sm:$0xff]  ;;  %v6648_v46 = vld [vmem:[%s5691_s24 + $0xc0] sm:$0xff] }
  0xf8   : > { %5173 = vmatprep.subr.bf16.mxu0 %v5172_v53 }
  0xf9   : > { %7309 = vst [vmem:[#allocation75_spill] sm:$0xff] %v6622_v37  ;;  %7310 = vst [vmem:[#allocation76_spill] sm:$0xff] %v6630_v2  ;;  %4362 = vmatprep.mubr.f32.mxu1 %v469_v16  ;;  %4739 = vmatmul.mubr.f32.gmra.mrb[4].mxu0 %v2545_v42  ;;  %v3761_v37 = vld [vmem:[%s7214_s1 + $0x3c8] sm:$0xff] }
  0xfa   : > { %v6641_v15 = vpop.permute.xlu1 %406  ;;  %v6643_v40 = vpop.permute.xlu0 %401  ;;  %4363 = vmatmul.mubr.f32.gmra.mrb[20].mxu1 %v470_v3  ;;  %4741 = vmatprep.mubr.f32.mxu0 %v2546_v8  ;;  %v2548_v3 = vmul.f32 %v6438_v18, %v6397_v11  ;;  %v5180_v10 = vpack.c.bf16 %v3761_v37, %v3760_v45  ;;  %v3762_v8 = vld [vmem:[%s7214_s1 + $0x3d0] sm:$0xff]  ;;  %v2549_v11 = vmul.f32 %v6455_v50, %v6417_v20 }
  0xfb   : > { %v472_v19 = vmul.f32 %v6607_v52, %v6641_v15  ;;  %v6654_v42 = vmul.f32 %v6639_v29, %v6641_v15  ;;  %v471_v16 = vmul.f32 %v6616_v22, %v6643_v40  ;;  %5175 = vmatpush3.bf16.msra.mxu0 %v5172_v53  ;;  %v6662_v24 = vmul.f32 %v6648_v46, %v6643_v40  ;;  %v6671_v53 = vld [vmem:[%s5691_s24 + $0xd8] sm:$0xff]  ;;  %v6680_v37 = vld [vmem:[%s5691_s24 + $0xd0] sm:$0xff] }
  0xfc   : > { %5177 = vmatprep.subr.bf16.mxu0 %v5176_v5 }
  0xfd   : > { %7311 = vst [vmem:[#allocation77_spill] sm:$0xff] %v6654_v42  ;;  %7312 = vst [vmem:[#allocation78_spill] sm:$0xff] %v6662_v24  ;;  %4365 = vmatprep.mubr.f32.mxu1 %v471_v16  ;;  %4742 = vmatmul.mubr.f32.gmra.mrb[6].mxu0 %v2547_v43  ;;  %v3763_v42 = vld [vmem:[%s7214_s1 + $0x3d8] sm:$0xff] }
  0xfe   : > { %v6673_v2 = vpop.permute.xlu1 %416  ;;  %v6675_v18 = vpop.permute.xlu0 %411  ;;  %4366 = vmatmul.mubr.f32.gmra.mrb[22].mxu1 %v472_v19  ;;  %4744 = vmatprep.mubr.f32.mxu0 %v2548_v3  ;;  %v2550_v19 = vmul.f32 %v6471_v34, %v6435_v1  ;;  %v5184_v50 = vpack.c.bf16 %v3763_v42, %v3762_v8  ;;  %v3764_v3 = vld [vmem:[%s7214_s1 + $0x3e0] sm:$0xff]  ;;  %v2551_v34 = vmul.f32 %v6487_v47, %v6452_v55 }
  0xff   : > { %v474_v45 = vmul.f32 %v6639_v29, %v6673_v2  ;;  %v6686_v43 = vmul.f32 %v6671_v53, %v6673_v2  ;;  %v473_v16 = vmul.f32 %v6648_v46, %v6675_v18  ;;  %5179 = vmatpush3.bf16.msra.mxu0 %v5176_v5  ;;  %v6694_v20 = vmul.f32 %v6680_v37, %v6675_v18  ;;  %v6703_v5 = vld [vmem:[%s5691_s24 + $0xe8] sm:$0xff]  ;;  %v6712_v42 = vld [vmem:[%s5691_s24 + $0xe0] sm:$0xff] }
 0x100   : > { %5181 = vmatprep.subr.bf16.mxu0 %v5180_v10 }
 0x101   : > { %7313 = vst [vmem:[#allocation79_spill] sm:$0xff] %v6686_v43  ;;  %7314 = vst [vmem:[#allocation80_spill] sm:$0xff] %v6694_v20  ;;  %4368 = vmatprep.mubr.f32.mxu1 %v473_v16  ;;  %4745 = vmatmul.mubr.f32.gmra.mrb[8].mxu0 %v2549_v11  ;;  %v3765_v43 = vld [vmem:[%s7214_s1 + $0x3e8] sm:$0xff] }
 0x102   : > { %v6705_v24 = vpop.permute.xlu1 %426  ;;  %v6707_v1 = vpop.permute.xlu0 %421  ;;  %4369 = vmatmul.mubr.f32.gmra.mrb[24].mxu1 %v474_v45  ;;  %4747 = vmatprep.mubr.f32.mxu0 %v2550_v19  ;;  %v2552_v45 = vmul.f32 %v6504_v59, %v6468_v63  ;;  %v5188_v55 = vpack.c.bf16 %v3765_v43, %v3764_v3  ;;  %v3766_v19 = vld [vmem:[%s7214_s1 + $0x3f0] sm:$0xff]  ;;  %v2553_v63 = vmul.f32 %v6521_v26, %v6484_v58 }
 0x103   : > { %v476_v8 = vmul.f32 %v6671_v53, %v6705_v24  ;;  %v6718_v11 = vmul.f32 %v6703_v5, %v6705_v24  ;;  %v475_v16 = vmul.f32 %v6680_v37, %v6707_v1  ;;  %5183 = vmatpush3.bf16.msra.mxu0 %v5180_v10  ;;  %v6726_v47 = vmul.f32 %v6712_v42, %v6707_v1  ;;  %v6735_v10 = vld [vmem:[%s5691_s24 + $0xf8] sm:$0xff]  ;;  %v6744_v43 = vld [vmem:[%s5691_s24 + $0xf0] sm:$0xff] }
 0x104   : > { %5185 = vmatprep.subr.bf16.mxu0 %v5184_v50 }
 0x105   : > { %7315 = vst [vmem:[#allocation81_spill] sm:$0xff] %v6718_v11  ;;  %7316 = vst [vmem:[#allocation82_spill] sm:$0xff] %v6726_v47  ;;  %4371 = vmatprep.mubr.f32.mxu1 %v475_v16  ;;  %4748 = vmatmul.mubr.f32.gmra.mrb[10].mxu0 %v2551_v34  ;;  %v3767_v11 = vld [vmem:[%s7214_s1 + $0x3f8] sm:$0xff]  ;;  %v6768_v47 = vld [vmem:[%s5691_s24 + $0x108] sm:$0xff] }
 0x106   : > { %v6737_v20 = vpop.permute.xlu1 %436  ;;  %v6739_v59 = vpop.permute.xlu0 %431  ;;  %4372 = vmatmul.mubr.f32.gmra.mrb[26].mxu1 %v476_v8  ;;  %4750 = vmatprep.mubr.f32.mxu0 %v2552_v45  ;;  %v2554_v8 = vmul.f32 %v6551_v39, %v6501_v48  ;;  %v5192_v26 = vpack.c.bf16 %v3767_v11, %v3766_v19  ;;  %v3768_v45 = vld [vmem:[%s7214_s1 + $0x400] sm:$0xff]  ;;  %v2555_v11 = vmul.f32 %v6542_v35, %v6518_v36 }
 0x107   : > { %v478_v3 = vmul.f32 %v6703_v5, %v6737_v20  ;;  %v6750_v34 = vmul.f32 %v6735_v10, %v6737_v20  ;;  %v477_v16 = vmul.f32 %v6712_v42, %v6739_v59  ;;  %5187 = vmatpush3.bf16.msra.mxu0 %v5184_v50  ;;  %v6758_v58 = vmul.f32 %v6744_v43, %v6739_v59  ;;  %v3769_v50 = vld [vmem:[%s7214_s1 + $0x408] sm:$0xff]  ;;  %v6777_v19 = vld [vmem:[%s5691_s24 + $0x100] sm:$0xff] }
 0x108   : > { %5189 = vmatprep.subr.bf16.mxu0 %v5188_v55  ;;  %v6793_v36 = vpack.c.bf16 %v3769_v50, %v3768_v45  ;;  %v3693_v45 = vld [vmem:[%s7214_s1 + $0x1a8] sm:$0xff]  ;;  %v7321_v50 = vld [vmem:[#allocation32_spill] sm:$0xff] }
 0x109   : > { %7317 = vst [vmem:[#allocation83_spill] sm:$0xff] %v6750_v34  ;;  %7318 = vst [vmem:[#allocation84_spill] sm:$0xff] %v6758_v58  ;;  %4374 = vmatprep.mubr.f32.mxu1 %v477_v16  ;;  %4751 = vmatmul.mubr.f32.gmra.mrb[12].mxu0 %v2553_v63  ;;  %v996_v34 = vld [vmem:[%s5691_s24 + $0x2] sm:$0xff] }
 0x10a   : > { %v6770_v48 = vpop.permute.xlu1 %446  ;;  %v6772_v39 = vpop.permute.xlu0 %441  ;;  %4375 = vmatmul.mubr.f32.gmra.mrb[28].mxu1 %v478_v3  ;;  %4753 = vmatprep.mubr.f32.mxu0 %v2554_v8  ;;  %v2556_v3 = vmul.f32 %v6583_v12, %v6546_v0  ;;  %v1220_v35 = vmul.f32 %v6046_v30, %v996_v34  ;;  %v3691_v0 = vld [vmem:[%s7214_s1 + $0x198] sm:$0xff]  ;;  %v2557_v12 = vmul.f32 %v6574_v54, %v6544_v56  ;;  %v3694_v56 = vld [vmem:[%s7214_s1 + $0x1b0] sm:$0xff] }
 0x10b   : > { %v480_v63 = vmul.f32 %v6735_v10, %v6770_v48  ;;  %v6783_v16 = vmul.f32 %v6768_v47, %v6770_v48  ;;  %v479_v58 = vmul.f32 %v6744_v43, %v6772_v39  ;;  %5191 = vmatpush3.bf16.msra.mxu0 %v5188_v55  ;;  %v6791_v8 = vmul.f32 %v6777_v19, %v6772_v39 }
 0x10c   : > { %5193 = vmatprep.subr.bf16.mxu0 %v5192_v26  ;;  %v1221_v30 = vmul.f32 %v6059_v41, %v997_v17  ;;  %v2558_v55 = vmul.f32 %v6616_v22, %v6578_v7  ;;  %v2559_v41 = vmul.f32 %v6607_v52, %v6576_v13  ;;  %v2560_v54 = vmul.f32 %v6648_v46, %v6611_v33  ;;  %v3695_v7 = vld [vmem:[%s7214_s1 + $0x1b8] sm:$0xff]  ;;  %v3696_v52 = vld [vmem:[%s7214_s1 + $0x1c0] sm:$0xff]  ;;  %v3698_v22 = vld [vmem:[%s7214_s1 + $0x1d0] sm:$0xff] }
 0x10d   : > { %7319 = vst [vmem:[#allocation85_spill] sm:$0xff] %v6783_v16  ;;  %4377 = vmatprep.mubr.f32.mxu1 %v479_v58  ;;  %4754 = vmatmul.mubr.f32.gmra.mrb[14].mxu0 %v2555_v11  ;;  %v3690_v16 = vld [vmem:[%s7214_s1 + $0x190] sm:$0xff]  ;;  %v3692_v58 = vld [vmem:[%s7214_s1 + $0x1a0] sm:$0xff]  ;;  %v2562_v13 = vmul.f32 %v6680_v37, %v6643_v40 }
 0x10e   : > { %4378 = vmatmul.mubr.f32.gmra.mrb[30].mxu1 %v480_v63  ;;  %4756 = vmatprep.mubr.f32.mxu0 %v2556_v3  ;;  %v5040_v34 = vpack.c.bf16 %v3691_v0, %v3690_v16  ;;  %v5044_v17 = vpack.c.bf16 %v3693_v45, %v3692_v58  ;;  %v3700_v40 = vld [vmem:[%s7214_s1 + $0x1e0] sm:$0xff]  ;;  %v2852_v11 = vld [vmem:[%s5691_s24 + $0x51] sm:$0xff]  ;;  %v3777_v16 = vld [vmem:[%s7214_s1 + $0x448] sm:$0xff] }
 0x10f   : > { %4412 = vmatprep.mubr.f32.mxu1 %v1220_v35  ;;  %5195 = vmatpush3.bf16.msra.mxu0 %v5192_v26  ;;  %v3774_v26 = vld [vmem:[%s7214_s1 + $0x430] sm:$0xff]  ;;  %v3776_v63 = vld [vmem:[%s7214_s1 + $0x440] sm:$0xff]  ;;  %v7324_v35 = vld [vmem:[#allocation41_spill] sm:$0xff] }
 0x110   : > { %5197 = vmatprep.subr.bf16.mxu0 %v6793_v36  ;;  %v7323_v3 = vld [vmem:[#allocation38_spill] sm:$0xff]  ;;  %v2855_v58 = vld [vmem:[%s5691_s24 + $0x69] sm:$0xff] }
 0x111   : > { %4757 = vmatmul.mubr.f32.gmra.mrb[16].mxu0 %v2557_v12  ;;  %v2854_v0 = vld [vmem:[%s5691_s24 + $0x61] sm:$0xff]  ;;  %v5212_v12 = vpack.c.bf16 %v3777_v16, %v3776_v63  ;;  %v7351_v63 = vld [vmem:[#allocation61_spill] sm:$0xff] }
 0x112   : > { %4413 = vmatmul.mubr.f32.vlgmr.msra.gmra.mrb[0].mxu1 %v1221_v30  ;;  %4759 = vmatprep.mubr.f32.mxu0 %v2558_v55  ;;  %v3778_v30 = vld [vmem:[%s7214_s1 + $0x450] sm:$0xff]  ;;  %v3779_v55 = vld [vmem:[%s7214_s1 + $0x458] sm:$0xff]  ;;  %v7326_v45 = vld [vmem:[#allocation47_spill] sm:$0xff] }
 0x113   : > { %5039 = vmatpush3.bf16.msra.mxu1 %v6399_v61  ;;  %4415 = vmatprep.mubr.f32.mxu1 %v6048_v31  ;;  %v2561_v31 = vmul.f32 %v6639_v29, %v6609_v32  ;;  %v5048_v61 = vpack.c.bf16 %v3695_v7, %v3694_v56  ;;  %v2564_v32 = vmul.f32 %v6712_v42, %v6675_v18  ;;  %v3702_v18 = vld [vmem:[%s7214_s1 + $0x1f0] sm:$0xff]  ;;  %v3781_v56 = vld [vmem:[%s7214_s1 + $0x468] sm:$0xff]  ;;  %v7327_v7 = vld [vmem:[#allocation50_spill] sm:$0xff] }
 0x114   : > { %5041 = vmatprep.subr.bf16.mxu1 %v5040_v34  ;;  %v2876_v16 = vld [vmem:[%s5691_s24 + $0x111] sm:$0xff] }
 0x115   : > { %4760 = vmatmul.mubr.f32.gmra.mrb[18].mxu0 %v2559_v41  ;;  %v2856_v41 = vld [vmem:[%s5691_s24 + $0x71] sm:$0xff] }
 0x116   : > { %4416 = vmatmul.mubr.f32.gmra.mrb[2].mxu1 %v6067_v44  ;;  %4762 = vmatprep.mubr.f32.mxu0 %v2560_v54  ;;  %v3697_v44 = vld [vmem:[%s7214_s1 + $0x1c8] sm:$0xff]  ;;  %v5216_v54 = vpack.c.bf16 %v3779_v55, %v3778_v30  ;;  %v7356_v30 = vld [vmem:[#allocation70_spill] sm:$0xff] }
 0x117   : > { %4418 = vmatprep.mubr.f32.mxu1 %v6087_v60  ;;  %5043 = vmatpush3.bf16.msra.mxu1 %v5040_v34  ;;  %v2563_v60 = vmul.f32 %v6671_v53, %v6641_v15  ;;  %v5052_v33 = vpack.c.bf16 %v3697_v44, %v3696_v52  ;;  %v2566_v15 = vmul.f32 %v6744_v43, %v6707_v1  ;;  %v2538_v53 = vld [vmem:[%s5691_s24 + $0x110] sm:$0xff]  ;;  %v2846_v1 = vld [vmem:[%s5691_s24 + $0x21] sm:$0xff] }
 0x118   : > { %5045 = vmatprep.subr.bf16.mxu1 %v5044_v17  ;;  %v2570_v37 = vmul.f32 %v2538_v53, %v6772_v39  ;;  %v7322_v39 = vld [vmem:[#allocation35_spill] sm:$0xff]  ;;  %v7325_v34 = vld [vmem:[#allocation44_spill] sm:$0xff]  ;;  %v7357_v55 = vld [vmem:[#allocation10_spill] sm:$0xff] }
 0x119   : > { %4763 = vmatmul.mubr.f32.gmra.mrb[20].mxu0 %v2561_v31  ;;  %v2857_v31 = vld [vmem:[%s5691_s24 + $0x79] sm:$0xff]  ;;  %v3782_v44 = vld [vmem:[%s7214_s1 + $0x470] sm:$0xff] }
 0x11a   : > { %4419 = vmatmul.mubr.f32.gmra.mrb[4].mxu1 %v6083_v57  ;;  %4765 = vmatprep.mubr.f32.mxu0 %v2562_v13  ;;  %v3699_v57 = vld [vmem:[%s7214_s1 + $0x1d8] sm:$0xff] }
 0x11b   : > { %4421 = vmatprep.mubr.f32.mxu1 %v6104_v23  ;;  %5047 = vmatpush3.bf16.msra.mxu1 %v5044_v17  ;;  %v2565_v23 = vmul.f32 %v6703_v5, %v6673_v2  ;;  %v5056_v29 = vpack.c.bf16 %v3699_v57, %v3698_v22  ;;  %v2568_v2 = vmul.f32 %v6777_v19, %v6739_v59  ;;  %v2850_v59 = vld [vmem:[%s5691_s24 + $0x41] sm:$0xff]  ;;  %v7328_v13 = vld [vmem:[#allocation53_spill] sm:$0xff] }
 0x11c   : > { %5049 = vmatprep.subr.bf16.mxu1 %v5048_v61  ;;  %v3780_v17 = vld [vmem:[%s7214_s1 + $0x460] sm:$0xff]  ;;  %v7330_v22 = vld [vmem:[#allocation59_spill] sm:$0xff]  ;;  %v6958_v57 = vld [vmem:[%s5691_s24 + $0x91] sm:$0xff] }
 0x11d   : > { %4766 = vmatmul.mubr.f32.gmra.mrb[22].mxu0 %v2563_v60  ;;  %v5220_v52 = vpack.c.bf16 %v3781_v56, %v3780_v17  ;;  %v3783_v60 = vld [vmem:[%s7214_s1 + $0x478] sm:$0xff]  ;;  %v7363_v17 = vld [vmem:[#allocation11_spill] sm:$0xff] }
 0x11e   : > { %4422 = vmatmul.mubr.f32.gmra.mrb[6].mxu1 %v6100_v9  ;;  %4768 = vmatprep.mubr.f32.mxu0 %v2564_v32  ;;  %v3701_v9 = vld [vmem:[%s7214_s1 + $0x1e8] sm:$0xff]  ;;  %v7329_v32 = vld [vmem:[#allocation56_spill] sm:$0xff]  ;;  %v7364_v56 = vld [vmem:[#allocation73_spill] sm:$0xff] }
 0x11f   : > { %4424 = vmatprep.mubr.f32.mxu1 %v6120_v27  ;;  %5051 = vmatpush3.bf16.msra.mxu1 %v5048_v61  ;;  %v2567_v27 = vmul.f32 %v6735_v10, %v6705_v24  ;;  %v5060_v46 = vpack.c.bf16 %v3701_v9, %v3700_v40  ;;  %v2539_v24 = vld [vmem:[%s5691_s24 + $0x118] sm:$0xff]  ;;  %v2858_v61 = vld [vmem:[%s5691_s24 + $0x81] sm:$0xff] }
 0x120   : > { %5053 = vmatprep.subr.bf16.mxu1 %v5052_v33  ;;  %v7320_v10 = vld [vmem:[#allocation29_spill] sm:$0xff]  ;;  %v7332_v40 = vld [vmem:[#allocation66_spill] sm:$0xff] }
 0x121   : > { %4769 = vmatmul.mubr.f32.gmra.mrb[24].mxu0 %v2565_v23  ;;  %v5224_v23 = vpack.c.bf16 %v3783_v60, %v3782_v44  ;;  %v6967_v9 = vld [vmem:[%s5691_s24 + $0xa1] sm:$0xff]  ;;  %v6977_v53 = vld [vmem:[%s5691_s24 + $0xb1] sm:$0xff] }
 0x122   : > { %4425 = vmatmul.mubr.f32.gmra.mrb[8].mxu1 %v6116_v25  ;;  %4771 = vmatprep.mubr.f32.mxu0 %v2566_v15  ;;  %v3703_v25 = vld [vmem:[%s7214_s1 + $0x1f8] sm:$0xff]  ;;  %v7331_v15 = vld [vmem:[#allocation62_spill] sm:$0xff]  ;;  %v7371_v60 = vld [vmem:[#allocation15_spill] sm:$0xff] }
 0x123   : > { %4427 = vmatprep.mubr.f32.mxu1 %v6136_v51  ;;  %5055 = vmatpush3.bf16.msra.mxu1 %v5052_v33  ;;  %v2569_v51 = vmul.f32 %v6768_v47, %v6737_v20  ;;  %v5064_v5 = vpack.c.bf16 %v3703_v25, %v3702_v18  ;;  %v3771_v20 = vld [vmem:[%s7214_s1 + $0x418] sm:$0xff]  ;;  %v3772_v47 = vld [vmem:[%s7214_s1 + $0x420] sm:$0xff]  ;;  %v2859_v33 = vld [vmem:[%s5691_s24 + $0x89] sm:$0xff] }
 0x124   : > { %5057 = vmatprep.subr.bf16.mxu1 %v5056_v29  ;;  %v7335_v18 = vld [vmem:[#allocation28_spill] sm:$0xff]  ;;  %v6983_v25 = vld [vmem:[%s5691_s24 + $0xb9] sm:$0xff] }
 0x125   : > { %4772 = vmatmul.mubr.f32.gmra.mrb[26].mxu0 %v2567_v27  ;;  %v7333_v27 = vld [vmem:[#allocation69_spill] sm:$0xff]  ;;  %v7370_v44 = vld [vmem:[#allocation78_spill] sm:$0xff] }
 0x126   : > { %4428 = vmatmul.mubr.f32.gmra.mrb[10].mxu1 %v6132_v49  ;;  %4774 = vmatprep.mubr.f32.mxu0 %v2568_v2  ;;  %v2571_v49 = vmul.f32 %v2539_v24, %v6770_v48  ;;  %v2851_v48 = vld [vmem:[%s5691_s24 + $0x49] sm:$0xff]  ;;  %v6988_v24 = vld [vmem:[%s5691_s24 + $0xc1] sm:$0xff] }
 0x127   : > { %4430 = vmatprep.mubr.f32.mxu1 %v6155_v6  ;;  %5059 = vmatpush3.bf16.msra.mxu1 %v5056_v29  ;;  %v3770_v6 = vld [vmem:[%s7214_s1 + $0x410] sm:$0xff]  ;;  %v6963_v29 = vld [vmem:[%s5691_s24 + $0x99] sm:$0xff] }
 0x128   : > { %5061 = vmatprep.subr.bf16.mxu1 %v5060_v46  ;;  %v5200_v42 = vpack.c.bf16 %v3771_v20, %v3770_v6  ;;  %v6973_v2 = vld [vmem:[%s5691_s24 + $0xa9] sm:$0xff] }
 0x129   : > { %4775 = vmatmul.mubr.f32.gmra.mrb[28].mxu0 %v2569_v51  ;;  %v7336_v51 = vld [vmem:[#allocation31_spill] sm:$0xff]  ;;  %v7341_v20 = vld [vmem:[#allocation40_spill] sm:$0xff] }
 0x12a   : > { %4431 = vmatmul.mubr.f32.gmra.mrb[12].mxu1 %v6150_v4  ;;  %4777 = vmatprep.mubr.f32.mxu0 %v2570_v37  ;;  %v2847_v4 = vld [vmem:[%s5691_s24 + $0x29] sm:$0xff]  ;;  %v7337_v37 = vld [vmem:[#allocation2_spill] sm:$0xff] }
 0x12b   : > { %4433 = vmatprep.mubr.f32.mxu1 %v6176_v38  ;;  %5063 = vmatpush3.bf16.msra.mxu1 %v5060_v46  ;;  %v2848_v38 = vld [vmem:[%s5691_s24 + $0x31] sm:$0xff]  ;;  %v7334_v46 = vld [vmem:[#allocation26_spill] sm:$0xff]  ;;  %v7340_v6 = vld [vmem:[#allocation3_spill] sm:$0xff] }
 0x12c   : > { %5065 = vmatprep.subr.bf16.mxu1 %v5064_v5 }
 0x12d   : > { %4778 = vmatmul.mubr.f32.gmra.mrb[30].mxu0 %v2571_v49  ;;  %v6995_v49 = vld [vmem:[%s5691_s24 + $0xc9] sm:$0xff] }
 0x12e   : > { %4434 = vmatmul.mubr.f32.gmra.mrb[14].mxu1 %v6171_v28  ;;  %4812 = vmatprep.mubr.f32.mxu0 %v2846_v1  ;;  %v3773_v28 = vld [vmem:[%s7214_s1 + $0x428] sm:$0xff]  ;;  %v7339_v1 = vld [vmem:[#allocation37_spill] sm:$0xff] }
 0x12f   : > { %4436 = vmatprep.mubr.f32.mxu1 %v6194_v62  ;;  %5067 = vmatpush3.bf16.msra.mxu1 %v5064_v5  ;;  %v2849_v62 = vld [vmem:[%s5691_s24 + $0x39] sm:$0xff]  ;;  %v5204_v43 = vpack.c.bf16 %v3773_v28, %v3772_v47  ;;  %v7343_v47 = vld [vmem:[#allocation4_spill] sm:$0xff] }
 0x130   : > { %5228 = vmatprep.subr.bf16.mxu1 %v5601_v14  ;;  %v7338_v5 = vld [vmem:[#allocation34_spill] sm:$0xff] }
 0x131   : > { %4813 = vmatmul.mubr.f32.vlgmr.msra.gmra.mrb[0].mxu0 %v2847_v4  ;;  %v7007_v4 = vld [vmem:[%s5691_s24 + $0xd9] sm:$0xff] }
 0x132   : > { %4437 = vmatmul.mubr.f32.gmra.mrb[16].mxu1 %v6221_v21  ;;  %5199 = vmatpush3.bf16.msra.mxu0 %v6793_v36  ;;  %v3775_v21 = vld [vmem:[%s7214_s1 + $0x438] sm:$0xff]  ;;  %v7344_v28 = vld [vmem:[#allocation46_spill] sm:$0xff] }
 0x133   : > { %4439 = vmatprep.mubr.f32.mxu1 %v7320_v10  ;;  %4815 = vmatprep.mubr.f32.mxu0 %v2848_v38  ;;  %v5208_v19 = vpack.c.bf16 %v3775_v21, %v3774_v26  ;;  %v2853_v36 = vld [vmem:[%s5691_s24 + $0x59] sm:$0xff]  ;;  %v7342_v38 = vld [vmem:[#allocation43_spill] sm:$0xff]  ;;  %v7347_v26 = vld [vmem:[#allocation52_spill] sm:$0xff] }
 0x134   : > { %5201 = vmatprep.subr.bf16.mxu0 %v5200_v42  ;;  %v7345_v10 = vld [vmem:[#allocation49_spill] sm:$0xff] }
 0x135   : > { %4816 = vmatmul.mubr.f32.gmra.mrb[2].mxu0 %v2849_v62  ;;  %v7019_v62 = vld [vmem:[%s5691_s24 + $0xe9] sm:$0xff]  ;;  %v7031_v21 = vld [vmem:[%s5691_s24 + $0xf9] sm:$0xff] }
 0x136   : > { %4440 = vmatmul.mubr.f32.gmra.mrb[18].mxu1 %v7321_v50  ;;  %4818 = vmatprep.mubr.f32.mxu0 %v2850_v59  ;;  %v7023_v59 = vld [vmem:[%s5691_s24 + $0xf1] sm:$0xff]  ;;  %v7348_v50 = vld [vmem:[#allocation55_spill] sm:$0xff] }
 0x137   : > { %4442 = vmatprep.mubr.f32.mxu1 %v7322_v39  ;;  %5203 = vmatpush3.bf16.msra.mxu0 %v5200_v42  ;;  %v7011_v42 = vld [vmem:[%s5691_s24 + $0xe1] sm:$0xff] }
 0x138   : > { %5205 = vmatprep.subr.bf16.mxu0 %v5204_v43  ;;  %v7349_v39 = vld [vmem:[#allocation6_spill] sm:$0xff] }
 0x139   : > { %4819 = vmatmul.mubr.f32.gmra.mrb[4].mxu0 %v2851_v48  ;;  %v7035_v48 = vld [vmem:[%s5691_s24 + $0x101] sm:$0xff] }
 0x13a   : > { %4443 = vmatmul.mubr.f32.gmra.mrb[20].mxu1 %v7323_v3  ;;  %4821 = vmatprep.mubr.f32.mxu0 %v2852_v11  ;;  %v7350_v11 = vld [vmem:[#allocation58_spill] sm:$0xff]  ;;  %v7352_v3 = vld [vmem:[#allocation7_spill] sm:$0xff] }
 0x13b   : > { %4445 = vmatprep.mubr.f32.mxu1 %v7324_v35  ;;  %5207 = vmatpush3.bf16.msra.mxu0 %v5204_v43  ;;  %v7346_v43 = vld [vmem:[#allocation5_spill] sm:$0xff] }
 0x13c   : > { %5209 = vmatprep.subr.bf16.mxu0 %v5208_v19  ;;  %v2877_v35 = vld [vmem:[%s5691_s24 + $0x119] sm:$0xff] }
 0x13d   : > { %4822 = vmatmul.mubr.f32.gmra.mrb[6].mxu0 %v2853_v36  ;;  %v7353_v36 = vld [vmem:[#allocation64_spill] sm:$0xff] }
 0x13e   : > { %4446 = vmatmul.mubr.f32.gmra.mrb[22].mxu1 %v7325_v34  ;;  %4824 = vmatprep.mubr.f32.mxu0 %v2854_v0  ;;  %v7354_v0 = vld [vmem:[#allocation67_spill] sm:$0xff]  ;;  %v7358_v34 = vld [vmem:[#allocation72_spill] sm:$0xff] }
 0x13f   : > { %4448 = vmatprep.mubr.f32.mxu1 %v7326_v45  ;;  %5211 = vmatpush3.bf16.msra.mxu0 %v5208_v19  ;;  %v7043_v19 = vld [vmem:[%s5691_s24 + $0x109] sm:$0xff] }
 0x140   : > { %5213 = vmatprep.subr.bf16.mxu0 %v5212_v12  ;;  %v7360_v45 = vld [vmem:[#allocation71_spill] sm:$0xff] }
 0x141   : > { %4825 = vmatmul.mubr.f32.gmra.mrb[8].mxu0 %v2855_v58  ;;  %v7359_v58 = vld [vmem:[#allocation12_spill] sm:$0xff] }
 0x142   : > { %4449 = vmatmul.mubr.f32.gmra.mrb[24].mxu1 %v7327_v7  ;;  %4827 = vmatprep.mubr.f32.mxu0 %v2856_v41  ;;  %v7361_v41 = vld [vmem:[#allocation9_spill] sm:$0xff]  ;;  %v7365_v7 = vld [vmem:[#allocation14_spill] sm:$0xff] }
 0x143   : > { %4451 = vmatprep.mubr.f32.mxu1 %v7328_v13  ;;  %5215 = vmatpush3.bf16.msra.mxu0 %v5212_v12  ;;  %v7355_v12 = vld [vmem:[#allocation8_spill] sm:$0xff]  ;;  %v7367_v13 = vld [vmem:[#allocation13_spill] sm:$0xff] }
 0x144   : > { %5217 = vmatprep.subr.bf16.mxu0 %v5216_v54 }
 0x145   : > { %4828 = vmatmul.mubr.f32.gmra.mrb[10].mxu0 %v2857_v31  ;;  %v7366_v31 = vld [vmem:[#allocation76_spill] sm:$0xff] }
 0x146   : > { %4452 = vmatmul.mubr.f32.gmra.mrb[26].mxu1 %v7329_v32  ;;  %4830 = vmatprep.mubr.f32.mxu0 %v2858_v61  ;;  %v7368_v61 = vld [vmem:[#allocation75_spill] sm:$0xff]  ;;  %v7372_v32 = vld [vmem:[#allocation77_spill] sm:$0xff] }
 0x147   : > { %4454 = vmatprep.mubr.f32.mxu1 %v7330_v22  ;;  %5219 = vmatpush3.bf16.msra.mxu0 %v5216_v54  ;;  %v7362_v54 = vld [vmem:[#allocation74_spill] sm:$0xff]  ;;  %v7374_v22 = vld [vmem:[#allocation80_spill] sm:$0xff] }
 0x148   : > { %5221 = vmatprep.subr.bf16.mxu0 %v5220_v52 }
 0x149   : > { %4831 = vmatmul.mubr.f32.gmra.mrb[12].mxu0 %v2859_v33  ;;  %v7373_v33 = vld [vmem:[#allocation18_spill] sm:$0xff] }
 0x14a   : > { %4455 = vmatmul.mubr.f32.gmra.mrb[28].mxu1 %v7331_v15  ;;  %4833 = vmatprep.mubr.f32.mxu0 %v6958_v57  ;;  %v7376_v15 = vld [vmem:[#allocation79_spill] sm:$0xff] }
 0x14b   : > { %4457 = vmatprep.mubr.f32.mxu1 %v7332_v40  ;;  %5223 = vmatpush3.bf16.msra.mxu0 %v5220_v52  ;;  %v7369_v52 = vld [vmem:[#allocation16_spill] sm:$0xff] }
 0x14c   : > { %5225 = vmatprep.subr.bf16.mxu0 %v5224_v23  ;;  %v7377_v40 = vld [vmem:[#allocation20_spill] sm:$0xff] }
 0x14d   : > { %4834 = vmatmul.mubr.f32.gmra.mrb[14].mxu0 %v6963_v29 }
 0x14e   : > { %4458 = vmatmul.mubr.f32.gmra.mrb[30].mxu1 %v7333_v27  ;;  %4836 = vmatprep.mubr.f32.mxu0 %v6967_v9  ;;  %v7378_v27 = vld [vmem:[#allocation82_spill] sm:$0xff] }
 0x14f   : > { %4492 = vmatprep.mubr.f32.mxu1 %v7334_v46  ;;  %5227 = vmatpush3.bf16.msra.mxu0 %v5224_v23  ;;  %v7375_v23 = vld [vmem:[#allocation17_spill] sm:$0xff]  ;;  %v7379_v46 = vld [vmem:[#allocation19_spill] sm:$0xff] }
 0x151   : > { %4837 = vmatmul.mubr.f32.gmra.mrb[16].mxu0 %v6973_v2 }
 0x152   : > { %4493 = vmatmul.mubr.f32.vlgmr.msra.gmra.mrb[0].mxu1 %v7335_v18  ;;  %4839 = vmatprep.mubr.f32.mxu0 %v6977_v53  ;;  %v7380_v18 = vld [vmem:[#allocation81_spill] sm:$0xff] }
 0x153   : > { %5236 = vmatpush3.bf16.msra.mxu1 %v5601_v14  ;;  %4495 = vmatprep.mubr.f32.mxu1 %v7336_v51  ;;  %v7000_v14 = vld [vmem:[%s5691_s24 + $0xd1] sm:$0xff]  ;;  %v7381_v51 = vld [vmem:[#allocation22_spill] sm:$0xff] }
 0x154   : > { %5229 = vmatprep.subr.bf16.mxu1 %v7337_v37 }
 0x155   : > { %4840 = vmatmul.mubr.f32.gmra.mrb[18].mxu0 %v6983_v25 }
 0x156   : > { %4496 = vmatmul.mubr.f32.gmra.mrb[2].mxu1 %v7338_v5  ;;  %4842 = vmatprep.mubr.f32.mxu0 %v6988_v24  ;;  %v7383_v5 = vld [vmem:[#allocation21_spill] sm:$0xff] }
 0x157   : > { %4498 = vmatprep.mubr.f32.mxu1 %v7339_v1  ;;  %5237 = vmatpush3.bf16.msra.mxu1 %v7337_v37  ;;  %v7382_v37 = vld [vmem:[#allocation84_spill] sm:$0xff]  ;;  %v7384_v1 = vld [vmem:[#allocation83_spill] sm:$0xff] }
 0x158   : > { %5230 = vmatprep.subr.bf16.mxu1 %v7340_v6 }
 0x159   : > { %4843 = vmatmul.mubr.f32.gmra.mrb[20].mxu0 %v6995_v49 }
 0x15a   : > { %4499 = vmatmul.mubr.f32.gmra.mrb[4].mxu1 %v7341_v20  ;;  %4845 = vmatprep.mubr.f32.mxu0 %v7000_v14  ;;  %v7386_v20 = vld [vmem:[#allocation23_spill] sm:$0xff] }
 0x15b   : > { %4501 = vmatprep.mubr.f32.mxu1 %v7342_v38  ;;  %5238 = vmatpush3.bf16.msra.mxu1 %v7340_v6  ;;  %v7385_v6 = vld [vmem:[#allocation24_spill] sm:$0xff]  ;;  %v7387_v38 = vld [vmem:[#allocation85_spill] sm:$0xff] }
 0x15c   : > { %5231 = vmatprep.subr.bf16.mxu1 %v7343_v47 }
 0x15d   : > { %4846 = vmatmul.mubr.f32.gmra.mrb[22].mxu0 %v7007_v4 }
 0x15e   : > { %4502 = vmatmul.mubr.f32.gmra.mrb[6].mxu1 %v7344_v28  ;;  %4848 = vmatprep.mubr.f32.mxu0 %v7011_v42  ;;  %v7389_v28 = vld [vmem:[#allocation27_spill] sm:$0xff] }
 0x15f   : > { %4504 = vmatprep.mubr.f32.mxu1 %v7345_v10  ;;  %5239 = vmatpush3.bf16.msra.mxu1 %v7343_v47  ;;  %v7388_v47 = vld [vmem:[#allocation25_spill] sm:$0xff]  ;;  %v7390_v10 = vld [vmem:[#allocation30_spill] sm:$0xff] }
 0x160   : > { %5232 = vmatprep.subr.bf16.mxu1 %v7346_v43 }
 0x161   : > { %4849 = vmatmul.mubr.f32.gmra.mrb[24].mxu0 %v7019_v62 }
 0x162   : > { %4505 = vmatmul.mubr.f32.gmra.mrb[8].mxu1 %v7347_v26  ;;  %4851 = vmatprep.mubr.f32.mxu0 %v7023_v59  ;;  %v7393_v26 = vld [vmem:[#allocation39_spill] sm:$0xff] }
 0x163   : > { %4507 = vmatprep.mubr.f32.mxu1 %v7348_v50  ;;  %5240 = vmatpush3.bf16.msra.mxu1 %v7346_v43  ;;  %v7391_v43 = vld [vmem:[#allocation33_spill] sm:$0xff] }
 0x164   : > { %5233 = vmatprep.subr.bf16.mxu1 %v7349_v39  ;;  %v7399_v50 = vld [vmem:[#allocation57_spill] sm:$0xff] }
 0x165   : > { %4852 = vmatmul.mubr.f32.gmra.mrb[26].mxu0 %v7031_v21 }
 0x166   : > { %4508 = vmatmul.mubr.f32.gmra.mrb[10].mxu1 %v7350_v11  ;;  %4854 = vmatprep.mubr.f32.mxu0 %v7035_v48  ;;  %v7402_v11 = vld [vmem:[#allocation63_spill] sm:$0xff] }
 0x167   : > { %4510 = vmatprep.mubr.f32.mxu1 %v7351_v63  ;;  %5241 = vmatpush3.bf16.msra.mxu1 %v7349_v39 }
 0x168   : > { %5234 = vmatprep.subr.bf16.mxu1 %v7352_v3 }
 0x169   : > { %4855 = vmatmul.mubr.f32.gmra.mrb[28].mxu0 %v7043_v19 }
 0x16a   : > { %4511 = vmatmul.mubr.f32.gmra.mrb[12].mxu1 %v7353_v36  ;;  %4857 = vmatprep.mubr.f32.mxu0 %v2876_v16 }
 0x16b   : > { %4513 = vmatprep.mubr.f32.mxu1 %v7354_v0  ;;  %5242 = vmatpush3.bf16.msra.mxu1 %v7352_v3 }
 0x16c   : > { %5235 = vmatprep.subr.bf16.mxu1 %v7355_v12 }
 0x16d   : > { %4858 = vmatmul.mubr.f32.gmra.mrb[30].mxu0 %v2877_v35 }
 0x16e   : > { %4514 = vmatmul.mubr.f32.gmra.mrb[14].mxu1 %v7356_v30  ;;  %4892 = vmatprep.mubr.f32.mxu0 %v7357_v55 }
 0x16f   : > { %4516 = vmatprep.mubr.f32.mxu1 %v7358_v34  ;;  %5243 = vmatpush3.bf16.msra.mxu1 %v7355_v12 }
 0x171   : > { %4893 = vmatmul.mubr.f32.vlgmr.msra.gmra.mrb[0].mxu0 %v7359_v58 }
 0x172   : > { %4517 = vmatmul.mubr.f32.gmra.mrb[16].mxu1 %v7360_v45  ;;  %4895 = vmatprep.mubr.f32.mxu0 %v7361_v41  ;;  %v7134_v41 = vld [vmem:[%s7215_s2] ss:$0 sm:$0xff] }
 0x173   : > { %4519 = vmatprep.mubr.f32.mxu1 %v7362_v54 }
 0x175   : > { %4896 = vmatmul.mubr.f32.gmra.mrb[2].mxu0 %v7363_v17 }
 0x176   : > { %4520 = vmatmul.mubr.f32.gmra.mrb[18].mxu1 %v7364_v56  ;;  %4898 = vmatprep.mubr.f32.mxu0 %v7365_v7 }
 0x177   : > { %4522 = vmatprep.mubr.f32.mxu1 %v7366_v31 }
 0x179   : > { %4899 = vmatmul.mubr.f32.gmra.mrb[4].mxu0 %v7367_v13 }
 0x17a   : > { %4523 = vmatmul.mubr.f32.gmra.mrb[20].mxu1 %v7368_v61  ;;  %4901 = vmatprep.mubr.f32.mxu0 %v7369_v52 }
 0x17b   : > { %4525 = vmatprep.mubr.f32.mxu1 %v7370_v44 }
 0x17d   : > { %4902 = vmatmul.mubr.f32.gmra.mrb[6].mxu0 %v7371_v60 }
 0x17e   : > { %4526 = vmatmul.mubr.f32.gmra.mrb[22].mxu1 %v7372_v32  ;;  %4904 = vmatprep.mubr.f32.mxu0 %v7373_v33 }
 0x17f   : > { %4528 = vmatprep.mubr.f32.mxu1 %v7374_v22 }
 0x181   : > { %4905 = vmatmul.mubr.f32.gmra.mrb[8].mxu0 %v7375_v23 }
 0x182   : > { %4529 = vmatmul.mubr.f32.gmra.mrb[24].mxu1 %v7376_v15  ;;  %4907 = vmatprep.mubr.f32.mxu0 %v7377_v40 }
 0x183   : > { %4531 = vmatprep.mubr.f32.mxu1 %v7378_v27 }
 0x185   : > { %4908 = vmatmul.mubr.f32.gmra.mrb[10].mxu0 %v7379_v46 }
 0x186   : > { %4532 = vmatmul.mubr.f32.gmra.mrb[26].mxu1 %v7380_v18  ;;  %4910 = vmatprep.mubr.f32.mxu0 %v7381_v51 }
 0x187   : > { %4534 = vmatprep.mubr.f32.mxu1 %v7382_v37 }
 0x189   : > { %4911 = vmatmul.mubr.f32.gmra.mrb[12].mxu0 %v7383_v5 }
 0x18a   : > { %4535 = vmatmul.mubr.f32.gmra.mrb[28].mxu1 %v7384_v1  ;;  %4913 = vmatprep.mubr.f32.mxu0 %v7385_v6 }
 0x18b   : > { %4537 = vmatprep.mubr.f32.mxu1 %v6791_v8  ;;  %v7392_v8 = vld [vmem:[#allocation36_spill] sm:$0xff] }
 0x18d   : > { %4914 = vmatmul.mubr.f32.gmra.mrb[14].mxu0 %v7386_v20 }
 0x18e   : > { %4538 = vmatmul.mubr.f32.gmra.mrb[30].mxu1 %v7387_v38  ;;  %4916 = vmatprep.mubr.f32.mxu0 %v7388_v47 }
 0x18f   : > { %4596 = vmatprep.mubr.f32.mxu1 %v6958_v57  ;;  %v7394_v57 = vld [vmem:[#allocation42_spill] sm:$0xff] }
 0x191   : > { %4917 = vmatmul.mubr.f32.gmra.mrb[16].mxu0 %v7389_v28 }
 0x192   : > { %4597 = vmatmul.mubr.f32.vlgmr.msra.gmra.mrb[16].mxu1 %v6963_v29  ;;  %4919 = vmatprep.mubr.f32.mxu0 %v7390_v10  ;;  %v7395_v29 = vld [vmem:[#allocation45_spill] sm:$0xff] }
 0x193   : > { %4599 = vmatprep.mubr.f32.mxu1 %v6967_v9  ;;  %v7396_v9 = vld [vmem:[#allocation48_spill] sm:$0xff] }
 0x195   : > { %4920 = vmatmul.mubr.f32.gmra.mrb[18].mxu0 %v7391_v43 }
 0x196   : > { %4600 = vmatmul.mubr.f32.gmra.mrb[18].mxu1 %v6973_v2  ;;  %4922 = vmatprep.mubr.f32.mxu0 %v7392_v8  ;;  %v7397_v2 = vld [vmem:[#allocation51_spill] sm:$0xff] }
 0x197   : > { %4602 = vmatprep.mubr.f32.mxu1 %v6977_v53  ;;  %v7398_v53 = vld [vmem:[#allocation54_spill] sm:$0xff] }
 0x199   : > { %4923 = vmatmul.mubr.f32.gmra.mrb[20].mxu0 %v7393_v26 }
 0x19a   : > { %4603 = vmatmul.mubr.f32.gmra.mrb[20].mxu1 %v6983_v25  ;;  %4925 = vmatprep.mubr.f32.mxu0 %v7394_v57  ;;  %v3182_v25 = vld [vmem:[%s5691_s24 + $0x112] sm:$0xff] }
 0x19b   : > { %4605 = vmatprep.mubr.f32.mxu1 %v6988_v24  ;;  %v7400_v24 = vld [vmem:[#allocation60_spill] sm:$0xff] }
 0x19d   : > { %4926 = vmatmul.mubr.f32.gmra.mrb[22].mxu0 %v7395_v29 }
 0x19e   : > { %4606 = vmatmul.mubr.f32.gmra.mrb[22].mxu1 %v6995_v49  ;;  %4928 = vmatprep.mubr.f32.mxu0 %v7396_v9  ;;  %v7401_v49 = vld [vmem:[#allocation65_spill] sm:$0xff] }
 0x19f   : > { %4608 = vmatprep.mubr.f32.mxu1 %v7000_v14  ;;  %v3214_v39 = vmul.f32 %v3182_v25, %v7401_v49  ;;  %v3183_v14 = vld [vmem:[%s5691_s24 + $0x11a] sm:$0xff] }
 0x1a1   : > { %4929 = vmatmul.mubr.f32.gmra.mrb[24].mxu0 %v7397_v2 }
 0x1a2   : > { %4609 = vmatmul.mubr.f32.gmra.mrb[24].mxu1 %v7007_v4  ;;  %4931 = vmatprep.mubr.f32.mxu0 %v7398_v53  ;;  %v7403_v4 = vld [vmem:[#allocation68_spill] sm:$0xff] }
 0x1a3   : > { %4611 = vmatprep.mubr.f32.mxu1 %v7011_v42  ;;  %v3215_v63 = vmul.f32 %v3183_v14, %v7403_v4 }
 0x1a5   : > { %4932 = vmatmul.mubr.f32.gmra.mrb[26].mxu0 %v7399_v50 }
 0x1a6   : > { %4612 = vmatmul.mubr.f32.gmra.mrb[26].mxu1 %v7019_v62  ;;  %4934 = vmatprep.mubr.f32.mxu0 %v7400_v24 }
 0x1a7   : > { %4614 = vmatprep.mubr.f32.mxu1 %v7023_v59 }
 0x1a9   : > { %4935 = vmatmul.mubr.f32.gmra.mrb[28].mxu0 %v7402_v11 }
 0x1aa   : > { %4615 = vmatmul.mubr.f32.gmra.mrb[28].mxu1 %v7031_v21  ;;  %4937 = vmatprep.mubr.f32.mxu0 %v3214_v39 }
 0x1ab   : > { %4617 = vmatprep.mubr.f32.mxu1 %v7035_v48 }
 0x1ad   : > { %4938 = vmatmul.mubr.f32.gmra.mrb[30].mxu0 %v3215_v63 }
 0x1ae   : > { %4618 = vmatmul.mubr.f32.gmra.mrb[30].mxu1 %v7043_v19 }
 0x225   : > { %v4494_v42 = vpop.f32.mrb[0].mxu1 }
 0x226   : > { %v1673_v62 = vpop.f32.mrb[1].mxu1 }
 0x229   : > { %v4497_v16 = vpop.f32.mrb[2].mxu1 }
 0x22a   : > { %v1683_v59 = vpop.f32.mrb[3].mxu1 }
 0x22d   : > { %v4500_v3 = vpop.f32.mrb[4].mxu1 }
 0x22e   : > { %v1693_v36 = vpop.f32.mrb[5].mxu1 }
 0x231   : > { %v4503_v35 = vpop.f32.mrb[6].mxu1 }
 0x232   : > { %v1703_v0 = vpop.f32.mrb[7].mxu1 }
 0x235   : > { %v4506_v12 = vpop.f32.mrb[8].mxu1 }
 0x236   : > { %v1713_v30 = vpop.f32.mrb[9].mxu1 }
 0x239   : > { %v4509_v21 = vpop.f32.mrb[10].mxu1 }
 0x23a   : > { %v1723_v55 = vpop.f32.mrb[11].mxu1 }
 0x23d   : > { %v7123_v34 = vpop.f32.mrb[12].mxu1 }
 0x23e   : > { %v7125_v58 = vpop.f32.mrb[13].mxu1 }
 0x241   : > { %v7127_v48 = vpop.f32.mrb[14].mxu1 }
 0x242   : > { %v7129_v19 = vpop.f32.mrb[15].mxu1 }
 0x244   : > { %v4894_v45 = vpop.f32.mrb[0].mxu0 }
 0x245   : > { %v5244_v54 = vadd.f32 %v4894_v45, %v4494_v42  ;;  %v3299_v17 = vpop.f32.mrb[1].mxu0 }
 0x246   : > { %v5245_v56 = vadd.f32 %v3299_v17, %v1673_v62 }
 0x247   : > { %v3498_v7 = vadd.f32 %v5244_v54, %v7134_v41 }
 0x248   : > { %v3497_v31 = vadd.f32 %v5245_v56, %v7134_v41  ;;  %v4897_v13 = vpop.f32.mrb[2].mxu0 }
 0x249   : > { %v3530_v61 = vmax.f32 %v3498_v7, 0.0  ;;  %v5246_v52 = vadd.f32 %v4897_v13, %v4497_v16  ;;  %v3309_v44 = vpop.f32.mrb[3].mxu0 }
 0x24a   : > { %v3529_v60 = vmax.f32 %v3497_v31, 0.0  ;;  %v5247_v32 = vadd.f32 %v3309_v44, %v1683_v59 }
 0x24b   : > { %3562 = vst [vmem:[%s7141_s25 + $0x8] sm:$0xff] %v3530_v61  ;;  %v3500_v33 = vadd.f32 %v5246_v52, %v7134_v41 }
 0x24c   : > { %3561 = vst [vmem:[%s7141_s25] sm:$0xff] %v3529_v60  ;;  %v3499_v22 = vadd.f32 %v5247_v32, %v7134_v41  ;;  %v4900_v23 = vpop.f32.mrb[4].mxu0 }
 0x24d   : > { %v3532_v15 = vmax.f32 %v3500_v33, 0.0  ;;  %v5248_v40 = vadd.f32 %v4900_v23, %v4500_v3  ;;  %v3319_v27 = vpop.f32.mrb[5].mxu0 }
 0x24e   : > { %v3531_v46 = vmax.f32 %v3499_v22, 0.0  ;;  %v5249_v18 = vadd.f32 %v3319_v27, %v1693_v36 }
 0x24f   : > { %3564 = vst [vmem:[%s7141_s25 + $0x18] sm:$0xff] %v3532_v15  ;;  %v3502_v51 = vadd.f32 %v5248_v40, %v7134_v41 }
 0x250   : > { %3563 = vst [vmem:[%s7141_s25 + $0x10] sm:$0xff] %v3531_v46  ;;  %v3501_v37 = vadd.f32 %v5249_v18, %v7134_v41  ;;  %v4903_v5 = vpop.f32.mrb[6].mxu0 }
 0x251   : > { %v3534_v1 = vmax.f32 %v3502_v51, 0.0  ;;  %v5250_v6 = vadd.f32 %v4903_v5, %v4503_v35  ;;  %v3329_v20 = vpop.f32.mrb[7].mxu0 }
 0x252   : > { %v3533_v38 = vmax.f32 %v3501_v37, 0.0  ;;  %v5251_v47 = vadd.f32 %v3329_v20, %v1703_v0 }
 0x253   : > { %3566 = vst [vmem:[%s7141_s25 + $0x28] sm:$0xff] %v3534_v1  ;;  %v3504_v28 = vadd.f32 %v5250_v6, %v7134_v41 }
 0x254   : > { %3565 = vst [vmem:[%s7141_s25 + $0x20] sm:$0xff] %v3533_v38  ;;  %v3503_v10 = vadd.f32 %v5251_v47, %v7134_v41  ;;  %v4906_v43 = vpop.f32.mrb[8].mxu0 }
 0x255   : > { %v3536_v8 = vmax.f32 %v3504_v28, 0.0  ;;  %v5252_v26 = vadd.f32 %v4906_v43, %v4506_v12  ;;  %v3339_v57 = vpop.f32.mrb[9].mxu0 }
 0x256   : > { %v3535_v29 = vmax.f32 %v3503_v10, 0.0  ;;  %v5253_v9 = vadd.f32 %v3339_v57, %v1713_v30 }
 0x257   : > { %3568 = vst [vmem:[%s7141_s25 + $0x38] sm:$0xff] %v3536_v8  ;;  %v3506_v2 = vadd.f32 %v5252_v26, %v7134_v41 }
 0x258   : > { %3567 = vst [vmem:[%s7141_s25 + $0x30] sm:$0xff] %v3535_v29  ;;  %v3505_v53 = vadd.f32 %v5253_v9, %v7134_v41  ;;  %v4909_v25 = vpop.f32.mrb[10].mxu0 }
 0x259   : > { %v3538_v50 = vmax.f32 %v3506_v2, 0.0  ;;  %v5254_v24 = vadd.f32 %v4909_v25, %v4509_v21  ;;  %v3349_v49 = vpop.f32.mrb[11].mxu0 }
 0x25a   : > { %v3537_v39 = vmax.f32 %v3505_v53, 0.0  ;;  %v5255_v14 = vadd.f32 %v3349_v49, %v1723_v55 }
 0x25b   : > { %3570 = vst [vmem:[%s7141_s25 + $0x48] sm:$0xff] %v3538_v50  ;;  %v3508_v11 = vadd.f32 %v5254_v24, %v7134_v41 }
 0x25c   : > { %3569 = vst [vmem:[%s7141_s25 + $0x40] sm:$0xff] %v3537_v39  ;;  %v3507_v4 = vadd.f32 %v5255_v14, %v7134_v41  ;;  %v4912_v63 = vpop.f32.mrb[12].mxu0 }
 0x25d   : > { %v3540_v42 = vmax.f32 %v3508_v11, 0.0  ;;  %v5256_v62 = vadd.f32 %v4912_v63, %v7123_v34  ;;  %v3359_v16 = vpop.f32.mrb[13].mxu0 }
 0x25e   : > { %v3539_v59 = vmax.f32 %v3507_v4, 0.0  ;;  %v5257_v3 = vadd.f32 %v3359_v16, %v7125_v58 }
 0x25f   : > { %3572 = vst [vmem:[%s7141_s25 + $0x58] sm:$0xff] %v3540_v42  ;;  %v3510_v36 = vadd.f32 %v5256_v62, %v7134_v41 }
 0x260   : > { %3571 = vst [vmem:[%s7141_s25 + $0x50] sm:$0xff] %v3539_v59  ;;  %v3509_v35 = vadd.f32 %v5257_v3, %v7134_v41  ;;  %v4915_v0 = vpop.f32.mrb[14].mxu0 }
 0x261   : > { %v3542_v12 = vmax.f32 %v3510_v36, 0.0  ;;  %v5258_v30 = vadd.f32 %v4915_v0, %v7127_v48  ;;  %v3369_v21 = vpop.f32.mrb[15].mxu0 }
 0x262   : > { %v3541_v55 = vmax.f32 %v3509_v35, 0.0  ;;  %v5259_v34 = vadd.f32 %v3369_v21, %v7129_v19 }
 0x263   : > { %3574 = vst [vmem:[%s7141_s25 + $0x68] sm:$0xff] %v3542_v12  ;;  %v3512_v45 = vadd.f32 %v5258_v30, %v7134_v41 }
 0x264   : > { %3573 = vst [vmem:[%s7141_s25 + $0x60] sm:$0xff] %v3541_v55  ;;  %v3511_v58 = vadd.f32 %v5259_v34, %v7134_v41  ;;  %v4918_v54 = vpop.f32.mrb[16].mxu0 }
 0x265   : > { %v3544_v17 = vmax.f32 %v3512_v45, 0.0  ;;  %v4598_v56 = vpop.f32.mrb[16].mxu1  ;;  %v3379_v7 = vpop.f32.mrb[17].mxu0 }
 0x266   : > { %v3543_v31 = vmax.f32 %v3511_v58, 0.0  ;;  %v5260_v13 = vadd.f32 %v4918_v54, %v4598_v56  ;;  %v2059_v61 = vpop.f32.mrb[17].mxu1 }
 0x267   : > { %3576 = vst [vmem:[%s7141_s25 + $0x78] sm:$0xff] %v3544_v17  ;;  %v5261_v48 = vadd.f32 %v3379_v7, %v2059_v61 }
 0x268   : > { %3575 = vst [vmem:[%s7141_s25 + $0x70] sm:$0xff] %v3543_v31  ;;  %v3514_v19 = vadd.f32 %v5260_v13, %v7134_v41  ;;  %v4921_v52 = vpop.f32.mrb[18].mxu0 }
 0x269   : > { %v3513_v44 = vadd.f32 %v5261_v48, %v7134_v41  ;;  %v4601_v60 = vpop.f32.mrb[18].mxu1  ;;  %v3389_v32 = vpop.f32.mrb[19].mxu0 }
 0x26a   : > { %v3546_v33 = vmax.f32 %v3514_v19, 0.0  ;;  %v5262_v22 = vadd.f32 %v4921_v52, %v4601_v60  ;;  %v2069_v23 = vpop.f32.mrb[19].mxu1 }
 0x26b   : > { %v3545_v15 = vmax.f32 %v3513_v44, 0.0  ;;  %v5263_v40 = vadd.f32 %v3389_v32, %v2069_v23 }
 0x26c   : > { %3578 = vst [vmem:[%s7141_s25 + $0x88] sm:$0xff] %v3546_v33  ;;  %v3516_v27 = vadd.f32 %v5262_v22, %v7134_v41  ;;  %v4924_v46 = vpop.f32.mrb[20].mxu0 }
 0x26d   : > { %3577 = vst [vmem:[%s7141_s25 + $0x80] sm:$0xff] %v3545_v15  ;;  %v3515_v18 = vadd.f32 %v5263_v40, %v7134_v41  ;;  %v4604_v51 = vpop.f32.mrb[20].mxu1  ;;  %v3399_v37 = vpop.f32.mrb[21].mxu0 }
 0x26e   : > { %v3548_v5 = vmax.f32 %v3516_v27, 0.0  ;;  %v5264_v1 = vadd.f32 %v4924_v46, %v4604_v51  ;;  %v2079_v6 = vpop.f32.mrb[21].mxu1 }
 0x26f   : > { %v3547_v20 = vmax.f32 %v3515_v18, 0.0  ;;  %v5265_v38 = vadd.f32 %v3399_v37, %v2079_v6 }
 0x270   : > { %3580 = vst [vmem:[%s7141_s25 + $0x98] sm:$0xff] %v3548_v5  ;;  %v3518_v47 = vadd.f32 %v5264_v1, %v7134_v41  ;;  %v4927_v28 = vpop.f32.mrb[22].mxu0 }
 0x271   : > { %3579 = vst [vmem:[%s7141_s25 + $0x90] sm:$0xff] %v3547_v20  ;;  %v3517_v10 = vadd.f32 %v5265_v38, %v7134_v41  ;;  %v4607_v43 = vpop.f32.mrb[22].mxu1  ;;  %v3409_v8 = vpop.f32.mrb[23].mxu0 }
 0x272   : > { %v3550_v26 = vmax.f32 %v3518_v47, 0.0  ;;  %v5266_v57 = vadd.f32 %v4927_v28, %v4607_v43  ;;  %v2089_v29 = vpop.f32.mrb[23].mxu1 }
 0x273   : > { %v3549_v9 = vmax.f32 %v3517_v10, 0.0  ;;  %v5267_v2 = vadd.f32 %v3409_v8, %v2089_v29 }
 0x274   : > { %3582 = vst [vmem:[%s7141_s25 + $0xa8] sm:$0xff] %v3550_v26  ;;  %v3520_v53 = vadd.f32 %v5266_v57, %v7134_v41  ;;  %v4930_v25 = vpop.f32.mrb[24].mxu0 }
 0x275   : > { %3581 = vst [vmem:[%s7141_s25 + $0xa0] sm:$0xff] %v3549_v9  ;;  %v3519_v50 = vadd.f32 %v5267_v2, %v7134_v41  ;;  %v4610_v24 = vpop.f32.mrb[24].mxu1  ;;  %v3419_v49 = vpop.f32.mrb[25].mxu0 }
 0x276   : > { %v3552_v39 = vmax.f32 %v3520_v53, 0.0  ;;  %v5268_v14 = vadd.f32 %v4930_v25, %v4610_v24  ;;  %v2099_v11 = vpop.f32.mrb[25].mxu1 }
 0x277   : > { %v3551_v4 = vmax.f32 %v3519_v50, 0.0  ;;  %v5269_v63 = vadd.f32 %v3419_v49, %v2099_v11 }
 0x278   : > { %3584 = vst [vmem:[%s7141_s25 + $0xb8] sm:$0xff] %v3552_v39  ;;  %v3522_v42 = vadd.f32 %v5268_v14, %v7134_v41  ;;  %v4933_v62 = vpop.f32.mrb[26].mxu0 }
 0x279   : > { %3583 = vst [vmem:[%s7141_s25 + $0xb0] sm:$0xff] %v3551_v4  ;;  %v3521_v16 = vadd.f32 %v5269_v63, %v7134_v41  ;;  %v4613_v59 = vpop.f32.mrb[26].mxu1  ;;  %v3429_v3 = vpop.f32.mrb[27].mxu0 }
 0x27a   : > { %v3554_v36 = vmax.f32 %v3522_v42, 0.0  ;;  %v5270_v35 = vadd.f32 %v4933_v62, %v4613_v59  ;;  %v2109_v0 = vpop.f32.mrb[27].mxu1 }
 0x27b   : > { %v3553_v12 = vmax.f32 %v3521_v16, 0.0  ;;  %v5271_v30 = vadd.f32 %v3429_v3, %v2109_v0 }
 0x27c   : > { %3586 = vst [vmem:[%s7141_s25 + $0xc8] sm:$0xff] %v3554_v36  ;;  %v3524_v21 = vadd.f32 %v5270_v35, %v7134_v41  ;;  %v4936_v55 = vpop.f32.mrb[28].mxu0 }
 0x27d   : > { %3585 = vst [vmem:[%s7141_s25 + $0xc0] sm:$0xff] %v3553_v12  ;;  %v3523_v34 = vadd.f32 %v5271_v30, %v7134_v41  ;;  %v4616_v45 = vpop.f32.mrb[28].mxu1  ;;  %v3439_v58 = vpop.f32.mrb[29].mxu0 }
 0x27e   : > { %v3556_v54 = vmax.f32 %v3524_v21, 0.0  ;;  %v5272_v17 = vadd.f32 %v4936_v55, %v4616_v45  ;;  %v2119_v56 = vpop.f32.mrb[29].mxu1 }
 0x27f   : > { %v3555_v7 = vmax.f32 %v3523_v34, 0.0  ;;  %v5273_v31 = vadd.f32 %v3439_v58, %v2119_v56 }
 0x280   : > { %3588 = vst [vmem:[%s7141_s25 + $0xd8] sm:$0xff] %v3556_v54  ;;  %v3526_v13 = vadd.f32 %v5272_v17, %v7134_v41  ;;  %v4939_v61 = vpop.f32.mrb[30].mxu0 }
 0x281   : > { %3587 = vst [vmem:[%s7141_s25 + $0xd0] sm:$0xff] %v3555_v7  ;;  %v3525_v48 = vadd.f32 %v5273_v31, %v7134_v41  ;;  %v4619_v19 = vpop.f32.mrb[30].mxu1  ;;  %v3449_v52 = vpop.f32.mrb[31].mxu0 }
 0x282   : > { %v3558_v44 = vmax.f32 %v3526_v13, 0.0  ;;  %v5274_v60 = vadd.f32 %v4939_v61, %v4619_v19  ;;  %v2129_v32 = vpop.f32.mrb[31].mxu1 }
 0x283   : > { %v3557_v33 = vmax.f32 %v3525_v48, 0.0  ;;  %v5275_v22 = vadd.f32 %v3449_v52, %v2129_v32 }
 0x284   : > { %3590 = vst [vmem:[%s7141_s25 + $0xe8] sm:$0xff] %v3558_v44  ;;  %v3528_v23 = vadd.f32 %v5274_v60, %v7134_v41 }
 0x285   : > { %3589 = vst [vmem:[%s7141_s25 + $0xe0] sm:$0xff] %v3557_v33  ;;  %v3527_v15 = vadd.f32 %v5275_v22, %v7134_v41 }
 0x286   : > { %v3560_v40 = vmax.f32 %v3528_v23, 0.0 }
 0x287   : > { %v3559_v27 = vmax.f32 %v3527_v15, 0.0 }
 0x288   : > { %3592 = vst [vmem:[%s7141_s25 + $0xf8] sm:$0xff] %v3560_v40 }
 0x289   : > { %3591 = vst [vmem:[%s7141_s25 + $0xf0] sm:$0xff] %v3559_v27 }
 0x28a PF: > { %s15_s18 = sadd.s32 1, %s5518_s18  }
 0x28b   : > { %p12_p4 = scmp.ge.s32.totalorder %s15_s18, 4  }
 0x28d   :  { %14 = sbr.rel (!%p12_p4) target bundleno = 1 (0x1), region = 78 }

// kernel: random_attempt_forward.12
= control target key start
LH: loop header
LB: loop body
LE: loop exit
PB: predicated region body
PF: predicated region fallthrough
CT: control target
= control target key end

     0   :  { %s2225_s18 = smov 0   ;;  %s2748_s0 = inlined_call_operand.vmem [shape: f32[2,26,128], index: 0, kind: input, shape index: {}]   ;;  %s2749_s1 = inlined_call_operand.vmem [shape: f32[9,128,128], index: 1, kind: input, shape index: {}]   ;;  %s2750_s2 = inlined_call_operand.vmem [shape: f32[1,128], index: 2, kind: input, shape index: {}]   ;;  %s2751_s3 = inlined_call_operand.vmem [shape: f32[16,1], index: 3, kind: input, shape index: {}]   ;;  %s2752_s4 = inlined_call_operand.vmem [shape: f32[16,1], index: 4, kind: input, shape index: {}]   ;;  %s2753_s5 = inlined_call_operand.vmem [shape: f32[2,16,128], index: 5, kind: output, shape index: {}]  }
   0x1 LB: > { %s1246_s19 = sadd.s32 4294967295, %s2192_s18   ;;  %p1250_p0 = scmp.ge.s32.totalorder %s2192_s18, 1  ;;  %s2192_s18 = sphi %s2225_s18, %s15_s18  }
   0x2   : > { %p187_p1 = scmp.lt.s32.totalorder %s2192_s18, 3 }
   0x4   : > { %p188_p2 = pnand %p1250_p0, %p187_p1 }
   0x5   : > { %v428_v0 = vld [vmem:[%s2752_s4] sm:$0xff] (!%p188_p2)  ;;  %p2239_p3 = scmp.lt.s32.totalorder (!%p188_p2), %s1246_s19, 1  ;;  %v2194_v2 = vmov (!%p188_p2), 0   ;;  %v429_v3 = vld [vmem:[%s2752_s4 + $0x8] sm:$0xff] (!%p188_p2)  ;;  %v1257_v10 = vld [vmem:[%s2749_s1 + $0x90] sm:$0xff] (!%p188_p2) }
   0x6   : > { %191 = sbr.rel (%p188_p2) target bundleno = 496 (0x1f0), region = 40  ;;  %v227_v1 = vld [vmem:[%s2751_s3] sm:$0xff] (!%p188_p2)  ;;  %2181 = vset.pattern.permute.xlu1 (!%p188_p2), %v2194_v2  ;;  %2180 = vset.pattern.permute.xlu0 (!%p188_p2), %v2194_v2  ;;  %v228_v4 = vld [vmem:[%s2751_s3 + $0x8] sm:$0xff] (!%p188_p2)  ;;  %v1258_v12 = vld [vmem:[%s2749_s1 + $0x98] sm:$0xff] (!%p188_p2) }
   0x7   : > { %v1255_v5 = vld [vmem:[%s2749_s1 + $0x80] sm:$0xff] (!%p188_p2)  ;;  %v1256_v6 = vld [vmem:[%s2749_s1 + $0x88] sm:$0xff] (!%p188_p2)  ;;  %432 = vperm.xlu0 (!%p188_p2), %2180, %v428_v0   ;;  %231 = vperm.xlu1 (!%p188_p2), %2181, %v227_v1   ;;  %v1305_v13 = vld [vmem:[%s2749_s1 + $0x210] sm:$0xff] (!%p188_p2)  ;;  %v1871_v15 = vpack.c.bf16 (!%p188_p2), %v1258_v12, %v1257_v10 }
   0x8   : > { %v1867_v7 = vpack.c.bf16 (!%p188_p2), %v1256_v6, %v1255_v5  ;;  %v1303_v8 = vld [vmem:[%s2749_s1 + $0x200] sm:$0xff] (!%p188_p2)  ;;  %v1304_v9 = vld [vmem:[%s2749_s1 + $0x208] sm:$0xff] (!%p188_p2)  ;;  %v1306_v14 = vld [vmem:[%s2749_s1 + $0x218] sm:$0xff] (!%p188_p2) }
   0x9   : > { %v1995_v11 = vpack.c.bf16 (!%p188_p2), %v1304_v9, %v1303_v8  ;;  %v1999_v16 = vpack.c.bf16 (!%p188_p2), %v1306_v14, %v1305_v13  ;;  %v1259_v17 = vld [vmem:[%s2749_s1 + $0xa0] sm:$0xff] (!%p188_p2)  ;;  %v1260_v18 = vld [vmem:[%s2749_s1 + $0xa8] sm:$0xff] (!%p188_p2)  ;;  %v1261_v22 = vld [vmem:[%s2749_s1 + $0xb0] sm:$0xff] (!%p188_p2) }
   0xa   : > { %1868 = vmatprep.subr.bf16.mxu1 (!%p188_p2), %v1867_v7  ;;  %v1307_v19 = vld [vmem:[%s2749_s1 + $0x220] sm:$0xff] (!%p188_p2)  ;;  %v1308_v20 = vld [vmem:[%s2749_s1 + $0x228] sm:$0xff] (!%p188_p2)  ;;  %v1875_v21 = vpack.c.bf16 (!%p188_p2), %v1260_v18, %v1259_v17  ;;  %v1262_v23 = vld [vmem:[%s2749_s1 + $0xb8] sm:$0xff] (!%p188_p2) }
   0xb   : > { %1996 = vmatprep.subr.bf16.mxu0 (!%p188_p2), %v1995_v11  ;;  %1870 = vmatpush3.bf16.msra.mxu1 (!%p188_p2), %v1867_v7  ;;  %v2003_v24 = vpack.c.bf16 (!%p188_p2), %v1308_v20, %v1307_v19  ;;  %v1309_v25 = vld [vmem:[%s2749_s1 + $0x230] sm:$0xff] (!%p188_p2)  ;;  %v1310_v26 = vld [vmem:[%s2749_s1 + $0x238] sm:$0xff] (!%p188_p2)  ;;  %v1879_v27 = vpack.c.bf16 (!%p188_p2), %v1262_v23, %v1261_v22  ;;  %v1263_v28 = vld [vmem:[%s2749_s1 + $0xc0] sm:$0xff] (!%p188_p2) }
   0xc   : > { %437 = vperm.xlu0 (!%p188_p2), %2180, %v429_v3   ;;  %236 = vperm.xlu1 (!%p188_p2), %2181, %v228_v4   ;;  %v1264_v29 = vld [vmem:[%s2749_s1 + $0xc8] sm:$0xff] (!%p188_p2)  ;;  %v2007_v30 = vpack.c.bf16 (!%p188_p2), %v1310_v26, %v1309_v25  ;;  %v1311_v32 = vld [vmem:[%s2749_s1 + $0x240] sm:$0xff] (!%p188_p2)  ;;  %v1265_v36 = vld [vmem:[%s2749_s1 + $0xd0] sm:$0xff] (!%p188_p2) }
   0xd   : > { %s2756_s19 = smov (!%p2239_p3, %s1246_s19), 1  ;;  %1998 = vmatpush3.bf16.msra.mxu0 %v1995_v11  ;;  %1872 = vmatprep.subr.bf16.mxu1 %v1871_v15  ;;  %v1312_v33 = vld [vmem:[%s2749_s1 + $0x248] sm:$0xff]  ;;  %v1883_v35 = vpack.c.bf16 %v1264_v29, %v1263_v28  ;;  %v1266_v37 = vld [vmem:[%s2749_s1 + $0xd8] sm:$0xff]  ;;  %v1313_v39 = vld [vmem:[%s2749_s1 + $0x250] sm:$0xff] }
   0xe   : > { %s1388_s30 = sshll.u32 %s2756_s19, 5  ;;  %2000 = vmatprep.subr.bf16.mxu0 %v1999_v16  ;;  %v2011_v38 = vpack.c.bf16 %v1312_v33, %v1311_v32  ;;  %v1314_v40 = vld [vmem:[%s2749_s1 + $0x258] sm:$0xff]  ;;  %v1887_v41 = vpack.c.bf16 %v1266_v37, %v1265_v36  ;;  %v1267_v42 = vld [vmem:[%s2749_s1 + $0xe0] sm:$0xff]  ;;  %v1268_v43 = vld [vmem:[%s2749_s1 + $0xe8] sm:$0xff]  ;;  %s1389_s9 = sshll.u32 %s2756_s19, 4 }
   0xf   : > { %1874 = vmatpush3.bf16.msra.mxu1 %v1871_v15  ;;  %s2305_s16 = scalar_lea.vmem %s2748_s0, %s1388_s30  ;;  %v2015_v44 = vpack.c.bf16 %v1314_v40, %v1313_v39  ;;  %v1315_v45 = vld [vmem:[%s2749_s1 + $0x260] sm:$0xff]  ;;  %v1316_v46 = vld [vmem:[%s2749_s1 + $0x268] sm:$0xff]  ;;  %v1891_v47 = vpack.c.bf16 %v1268_v43, %v1267_v42  ;;  %v1269_v48 = vld [vmem:[%s2749_s1 + $0xf0] sm:$0xff]  ;;  %s224_s11 = scalar_lea.vmem %s2753_s5, %s1389_s9 }
  0x10   : > { %1876 = vmatprep.subr.bf16.mxu1 %v1875_v21  ;;  %v257_v31 = vld [vmem:[%s2305_s16 + $0x1] sm:$0xff]  ;;  %v1270_v49 = vld [vmem:[%s2749_s1 + $0xf8] sm:$0xff]  ;;  %v2019_v50 = vpack.c.bf16 %v1316_v46, %v1315_v45  ;;  %v1317_v51 = vld [vmem:[%s2749_s1 + $0x270] sm:$0xff] }
  0x11   : > { %2002 = vmatpush3.bf16.msra.mxu0 %v1999_v16  ;;  %1584 = vmatprep.mubr.f32.mxu1 %v257_v31  ;;  %v634_v34 = vld [vmem:[%s2305_s16 + $0x5] sm:$0xff]  ;;  %v1318_v52 = vld [vmem:[%s2749_s1 + $0x278] sm:$0xff]  ;;  %v1895_v53 = vpack.c.bf16 %v1270_v49, %v1269_v48  ;;  %v243_v60 = vld [vmem:[%s2749_s1 + $0x10] sm:$0xff] }
  0x12   : > { %2004 = vmatprep.subr.bf16.mxu0 %v2003_v24  ;;  %1724 = vmatprep.mubr.f32.mxu0 %v634_v34  ;;  %v241_v54 = vld [vmem:[%s2749_s1] sm:$0xff]  ;;  %v242_v55 = vld [vmem:[%s2749_s1 + $0x8] sm:$0xff]  ;;  %v2023_v56 = vpack.c.bf16 %v1318_v52, %v1317_v51  ;;  %v244_v61 = vld [vmem:[%s2749_s1 + $0x18] sm:$0xff] }
  0x13   : > { %1878 = vmatpush3.bf16.msra.mxu1 %v1875_v21  ;;  %v1319_v57 = vld [vmem:[%s2749_s1 + $0x280] sm:$0xff]  ;;  %v1320_v58 = vld [vmem:[%s2749_s1 + $0x288] sm:$0xff]  ;;  %v1899_v59 = vpack.c.bf16 %v242_v55, %v241_v54  ;;  %v1321_v0 = vld [vmem:[%s2749_s1 + $0x290] sm:$0xff]  ;;  %v1903_v2 = vpack.c.bf16 %v244_v61, %v243_v60 }
  0x14   : > { %1880 = vmatprep.subr.bf16.mxu1 %v1879_v27  ;;  %v2027_v62 = vpack.c.bf16 %v1320_v58, %v1319_v57  ;;  %v2376_v63 = vld [vmem:[%s2305_s16 + $0x9] sm:$0xff]  ;;  %v1322_v1 = vld [vmem:[%s2749_s1 + $0x298] sm:$0xff]  ;;  %v245_v4 = vld [vmem:[%s2749_s1 + $0x20] sm:$0xff] }
  0x15   : > { %2006 = vmatpush3.bf16.msra.mxu0 %v2003_v24  ;;  %v635_v3 = vld [vmem:[%s2305_s16 + $0xd] sm:$0xff]  ;;  %v2031_v6 = vpack.c.bf16 %v1322_v1, %v1321_v0  ;;  %v1323_v7 = vld [vmem:[%s2749_s1 + $0x2a0] sm:$0xff]  ;;  %v248_v11 = vld [vmem:[%s2749_s1 + $0x38] sm:$0xff] }
  0x16   : > { %2008 = vmatprep.subr.bf16.mxu0 %v2007_v30  ;;  %v246_v5 = vld [vmem:[%s2749_s1 + $0x28] sm:$0xff]  ;;  %v247_v10 = vld [vmem:[%s2749_s1 + $0x30] sm:$0xff]  ;;  %v1326_v14 = vld [vmem:[%s2749_s1 + $0x2b8] sm:$0xff] }
  0x17   : > { %1882 = vmatpush3.bf16.msra.mxu1 %v1879_v27  ;;  %v1324_v8 = vld [vmem:[%s2749_s1 + $0x2a8] sm:$0xff]  ;;  %v1907_v9 = vpack.c.bf16 %v246_v5, %v245_v4  ;;  %v1325_v13 = vld [vmem:[%s2749_s1 + $0x2b0] sm:$0xff]  ;;  %v1911_v15 = vpack.c.bf16 %v248_v11, %v247_v10  ;;  %v249_v16 = vld [vmem:[%s2749_s1 + $0x40] sm:$0xff] }
  0x18   : > { %1884 = vmatprep.subr.bf16.mxu1 %v1883_v35  ;;  %v2035_v12 = vpack.c.bf16 %v1324_v8, %v1323_v7  ;;  %v250_v17 = vld [vmem:[%s2749_s1 + $0x48] sm:$0xff]  ;;  %v2039_v18 = vpack.c.bf16 %v1326_v14, %v1325_v13  ;;  %v1327_v19 = vld [vmem:[%s2749_s1 + $0x2c0] sm:$0xff]  ;;  %v251_v22 = vld [vmem:[%s2749_s1 + $0x50] sm:$0xff] }
  0x19   : > { %2010 = vmatpush3.bf16.msra.mxu0 %v2007_v30  ;;  %v1328_v20 = vld [vmem:[%s2749_s1 + $0x2c8] sm:$0xff]  ;;  %v1915_v21 = vpack.c.bf16 %v250_v17, %v249_v16  ;;  %v252_v23 = vld [vmem:[%s2749_s1 + $0x58] sm:$0xff]  ;;  %v1329_v25 = vld [vmem:[%s2749_s1 + $0x2d0] sm:$0xff] }
  0x1a   : > { %2012 = vmatprep.subr.bf16.mxu0 %v2011_v38  ;;  %v2043_v24 = vpack.c.bf16 %v1328_v20, %v1327_v19  ;;  %v1330_v26 = vld [vmem:[%s2749_s1 + $0x2d8] sm:$0xff]  ;;  %v1919_v27 = vpack.c.bf16 %v252_v23, %v251_v22  ;;  %v253_v28 = vld [vmem:[%s2749_s1 + $0x60] sm:$0xff]  ;;  %v254_v29 = vld [vmem:[%s2749_s1 + $0x68] sm:$0xff] }
  0x1b   : > { %1886 = vmatpush3.bf16.msra.mxu1 %v1883_v35  ;;  %v2047_v30 = vpack.c.bf16 %v1330_v26, %v1329_v25  ;;  %v1331_v31 = vld [vmem:[%s2749_s1 + $0x2e0] sm:$0xff]  ;;  %v1332_v32 = vld [vmem:[%s2749_s1 + $0x2e8] sm:$0xff]  ;;  %v1923_v33 = vpack.c.bf16 %v254_v29, %v253_v28  ;;  %v255_v34 = vld [vmem:[%s2749_s1 + $0x70] sm:$0xff] }
  0x1c   : > { %1888 = vmatprep.subr.bf16.mxu1 %v1887_v41  ;;  %v256_v35 = vld [vmem:[%s2749_s1 + $0x78] sm:$0xff]  ;;  %v2051_v36 = vpack.c.bf16 %v1332_v32, %v1331_v31  ;;  %v1333_v37 = vld [vmem:[%s2749_s1 + $0x2f0] sm:$0xff]  ;;  %v1271_v40 = vld [vmem:[%s2749_s1 + $0x100] sm:$0xff] }
  0x1d   : > { %2014 = vmatpush3.bf16.msra.mxu0 %v2011_v38  ;;  %v1334_v38 = vld [vmem:[%s2749_s1 + $0x2f8] sm:$0xff]  ;;  %v1927_v39 = vpack.c.bf16 %v256_v35, %v255_v34  ;;  %v1335_v43 = vld [vmem:[%s2749_s1 + $0x300] sm:$0xff]  ;;  %v2472_v48 = vld [vmem:[%s2305_s16 + $0xa] sm:$0xff] }
  0x1e   : > { %2016 = vmatprep.subr.bf16.mxu0 %v2015_v44  ;;  %v2055_v42 = vpack.c.bf16 %v1334_v38, %v1333_v37  ;;  %v225_v49 = vld [vmem:[%s2305_s16] sm:$0xff]  ;;  %v828_v55 = vld [vmem:[%s2305_s16 + $0x8] sm:$0xff]  ;;  %v1023_v57 = vld [vmem:[%s2305_s16 + $0x12] sm:$0xff] }
  0x1f   : > { %1890 = vmatpush3.bf16.msra.mxu1 %v1887_v41  ;;  %v1272_v41 = vld [vmem:[%s2749_s1 + $0x108] sm:$0xff]  ;;  %v1273_v58 = vld [vmem:[%s2749_s1 + $0x110] sm:$0xff]  ;;  %v1275_v7 = vld [vmem:[%s2749_s1 + $0x120] sm:$0xff] }
  0x20   : > { %1892 = vmatprep.subr.bf16.mxu1 %v1891_v47  ;;  %v1931_v45 = vpack.c.bf16 %v1272_v41, %v1271_v40  ;;  %v537_v60 = vld [vmem:[%s2305_s16 + $0xc] sm:$0xff]  ;;  %v426_v0 = vld [vmem:[%s2305_s16 + $0x2] sm:$0xff]  ;;  %v1342_v20 = vld [vmem:[%s2749_s1 + $0x338] sm:$0xff] }
  0x21   : > { %2018 = vmatpush3.bf16.msra.mxu0 %v2015_v44  ;;  %v1336_v44 = vld [vmem:[%s2749_s1 + $0x308] sm:$0xff]  ;;  %v1337_v61 = vld [vmem:[%s2749_s1 + $0x310] sm:$0xff]  ;;  %v1279_v23 = vld [vmem:[%s2749_s1 + $0x140] sm:$0xff] }
  0x22   : > { %2020 = vmatprep.subr.bf16.mxu0 %v2019_v50  ;;  %v2059_v46 = vpack.c.bf16 %v1336_v44, %v1335_v43  ;;  %v1276_v11 = vld [vmem:[%s2749_s1 + $0x128] sm:$0xff]  ;;  %v1277_v17 = vld [vmem:[%s2749_s1 + $0x130] sm:$0xff]  ;;  %v1343_v25 = vld [vmem:[%s2749_s1 + $0x340] sm:$0xff] }
  0x23   : > { %1894 = vmatpush3.bf16.msra.mxu1 %v1891_v47  ;;  %v730_v47 = vld [vmem:[%s2305_s16 + $0x6] sm:$0xff]  ;;  %v1341_v19 = vld [vmem:[%s2749_s1 + $0x330] sm:$0xff]  ;;  %v1346_v32 = vld [vmem:[%s2749_s1 + $0x358] sm:$0xff] }
  0x24   : > { %1896 = vmatprep.subr.bf16.mxu1 %v1895_v53  ;;  %v1340_v13 = vld [vmem:[%s2749_s1 + $0x328] sm:$0xff]  ;;  %v2071_v22 = vpack.c.bf16 %v1342_v20, %v1341_v19  ;;  %v1281_v29 = vld [vmem:[%s2749_s1 + $0x150] sm:$0xff]  ;;  %v1283_v35 = vld [vmem:[%s2749_s1 + $0x160] sm:$0xff] }
  0x25   : > { %2022 = vmatpush3.bf16.msra.mxu0 %v2019_v50  ;;  %v1344_v26 = vld [vmem:[%s2749_s1 + $0x348] sm:$0xff]  ;;  %v1345_v31 = vld [vmem:[%s2749_s1 + $0x350] sm:$0xff]  ;;  %v1347_v37 = vld [vmem:[%s2749_s1 + $0x360] sm:$0xff] }
  0x26   : > { %2024 = vmatprep.subr.bf16.mxu0 %v2023_v56  ;;  %v2075_v28 = vpack.c.bf16 %v1344_v26, %v1343_v25  ;;  %v2079_v34 = vpack.c.bf16 %v1346_v32, %v1345_v31  ;;  %v1348_v38 = vld [vmem:[%s2749_s1 + $0x368] sm:$0xff]  ;;  %v1285_v41 = vld [vmem:[%s2749_s1 + $0x170] sm:$0xff]  ;;  %v1350_v44 = vld [vmem:[%s2749_s1 + $0x378] sm:$0xff] }
  0x27   : > { %1898 = vmatpush3.bf16.msra.mxu1 %v1895_v53  ;;  %v2083_v40 = vpack.c.bf16 %v1348_v38, %v1347_v37  ;;  %v1349_v43 = vld [vmem:[%s2749_s1 + $0x370] sm:$0xff] }
  0x28   : > { %1900 = vmatprep.subr.bf16.mxu1 %v1899_v59 }
  0x29   : > { %2026 = vmatpush3.bf16.msra.mxu0 %v2023_v56  ;;  %v731_v56 = vld [vmem:[%s2305_s16 + $0xe] sm:$0xff] }
  0x2a   : > { %2028 = vmatprep.subr.bf16.mxu0 %v2027_v62  ;;  %1585 = vmatmul.mubr.f32.vlgmr.msra.gmra.mrb[0].mxu1 %v2376_v63 }
  0x2b   : > { %1902 = vmatpush3.bf16.msra.mxu1 %v1899_v59  ;;  %v1274_v59 = vld [vmem:[%s2749_s1 + $0x118] sm:$0xff] }
  0x2c   : > { %1725 = vmatmul.mubr.f32.vlgmr.msra.gmra.mrb[0].mxu0 %v635_v3  ;;  %1904 = vmatprep.subr.bf16.mxu1 %v1903_v2 }
  0x2d   : > { %2030 = vmatpush3.bf16.msra.mxu0 %v2027_v62  ;;  %v1338_v62 = vld [vmem:[%s2749_s1 + $0x318] sm:$0xff] }
  0x2e   : > { %2032 = vmatprep.subr.bf16.mxu0 %v2031_v6  ;;  %v2063_v10 = vpack.c.bf16 %v1338_v62, %v1337_v61  ;;  %v1354_v61 = vld [vmem:[%s2749_s1 + $0x398] sm:$0xff] }
  0x2f   : > { %1906 = vmatpush3.bf16.msra.mxu1 %v1903_v2 }
  0x30   : > { %1908 = vmatprep.subr.bf16.mxu1 %v1907_v9 }
  0x31   : > { %2034 = vmatpush3.bf16.msra.mxu0 %v2031_v6  ;;  %v1935_v6 = vpack.c.bf16 %v1274_v59, %v1273_v58  ;;  %v1290_v58 = vld [vmem:[%s2749_s1 + $0x198] sm:$0xff]  ;;  %v536_v59 = vld [vmem:[%s2305_s16 + $0x4] sm:$0xff] }
  0x32   : > { %2036 = vmatprep.subr.bf16.mxu0 %v2035_v12 }
  0x33   : > { %1910 = vmatpush3.bf16.msra.mxu1 %v1907_v9 }
  0x34   : > { %1912 = vmatprep.subr.bf16.mxu1 %v1911_v15 }
  0x35   : > { %2038 = vmatpush3.bf16.msra.mxu0 %v2035_v12  ;;  %v1339_v12 = vld [vmem:[%s2749_s1 + $0x320] sm:$0xff] }
  0x36   : > { %2040 = vmatprep.subr.bf16.mxu0 %v2039_v18  ;;  %v2067_v16 = vpack.c.bf16 %v1340_v13, %v1339_v12  ;;  %v1357_v12 = vld [vmem:[%s2749_s1 + $0x3b0] sm:$0xff]  ;;  %v1358_v13 = vld [vmem:[%s2749_s1 + $0x3b8] sm:$0xff] }
  0x37   : > { %1914 = vmatpush3.bf16.msra.mxu1 %v1911_v15  ;;  %v1939_v15 = vpack.c.bf16 %v1276_v11, %v1275_v7  ;;  %v1291_v7 = vld [vmem:[%s2749_s1 + $0x1a0] sm:$0xff]  ;;  %v1294_v11 = vld [vmem:[%s2749_s1 + $0x1b8] sm:$0xff] }
  0x38   : > { %1916 = vmatprep.subr.bf16.mxu1 %v1915_v21 }
  0x39   : > { %2042 = vmatpush3.bf16.msra.mxu0 %v2039_v18  ;;  %v1278_v18 = vld [vmem:[%s2749_s1 + $0x138] sm:$0xff] }
  0x3a   : > { %2044 = vmatprep.subr.bf16.mxu0 %v2043_v24 }
  0x3b   : > { %1918 = vmatpush3.bf16.msra.mxu1 %v1915_v21  ;;  %v1943_v21 = vpack.c.bf16 %v1278_v18, %v1277_v17  ;;  %v1359_v17 = vld [vmem:[%s2749_s1 + $0x3c0] sm:$0xff]  ;;  %v1360_v18 = vld [vmem:[%s2749_s1 + $0x3c8] sm:$0xff] }
  0x3c   : > { %1920 = vmatprep.subr.bf16.mxu1 %v1919_v27  ;;  %v2107_v20 = vpack.c.bf16 %v1360_v18, %v1359_v17 }
  0x3d   : > { %2046 = vmatpush3.bf16.msra.mxu0 %v2043_v24  ;;  %v1280_v24 = vld [vmem:[%s2749_s1 + $0x148] sm:$0xff] }
  0x3e   : > { %2048 = vmatprep.subr.bf16.mxu0 %v2047_v30 }
  0x3f   : > { %1922 = vmatpush3.bf16.msra.mxu1 %v1919_v27  ;;  %v1947_v27 = vpack.c.bf16 %v1280_v24, %v1279_v23  ;;  %v1361_v23 = vld [vmem:[%s2749_s1 + $0x3d0] sm:$0xff]  ;;  %v1362_v24 = vld [vmem:[%s2749_s1 + $0x3d8] sm:$0xff] }
  0x40   : > { %1924 = vmatprep.subr.bf16.mxu1 %v1923_v33  ;;  %v2111_v26 = vpack.c.bf16 %v1362_v24, %v1361_v23 }
  0x41   : > { %2050 = vmatpush3.bf16.msra.mxu0 %v2047_v30  ;;  %v1282_v30 = vld [vmem:[%s2749_s1 + $0x158] sm:$0xff] }
  0x42   : > { %2052 = vmatprep.subr.bf16.mxu0 %v2051_v36 }
  0x43   : > { %1926 = vmatpush3.bf16.msra.mxu1 %v1923_v33  ;;  %v1951_v33 = vpack.c.bf16 %v1282_v30, %v1281_v29  ;;  %v1363_v29 = vld [vmem:[%s2749_s1 + $0x3e0] sm:$0xff]  ;;  %v1364_v30 = vld [vmem:[%s2749_s1 + $0x3e8] sm:$0xff] }
  0x44   : > { %1928 = vmatprep.subr.bf16.mxu1 %v1927_v39  ;;  %v2115_v32 = vpack.c.bf16 %v1364_v30, %v1363_v29 }
  0x45   : > { %2054 = vmatpush3.bf16.msra.mxu0 %v2051_v36  ;;  %v1284_v36 = vld [vmem:[%s2749_s1 + $0x168] sm:$0xff] }
  0x46   : > { %2056 = vmatprep.subr.bf16.mxu0 %v2055_v42 }
  0x47   : > { %1930 = vmatpush3.bf16.msra.mxu1 %v1927_v39  ;;  %v1955_v39 = vpack.c.bf16 %v1284_v36, %v1283_v35  ;;  %v1365_v35 = vld [vmem:[%s2749_s1 + $0x3f0] sm:$0xff]  ;;  %v1366_v36 = vld [vmem:[%s2749_s1 + $0x3f8] sm:$0xff] }
  0x48   : > { %1932 = vmatprep.subr.bf16.mxu1 %v1931_v45  ;;  %v2119_v38 = vpack.c.bf16 %v1366_v36, %v1365_v35 }
  0x49   : > { %2058 = vmatpush3.bf16.msra.mxu0 %v2055_v42  ;;  %v1286_v42 = vld [vmem:[%s2749_s1 + $0x178] sm:$0xff] }
  0x4a   : > { %2060 = vmatprep.subr.bf16.mxu0 %v2059_v46 }
  0x86   : > { %v433_v50 = vpop.permute.xlu0 %432  ;;  %v2475_v51 = vpop.permute.xlu1 %231 }
  0x87   : > { %v732_v52 = vmul.f32 %v730_v47, %v433_v50  ;;  %v2478_v53 = vmul.f32 %v2472_v48, %v433_v50  ;;  %v239_v54 = vmul.f32 %v2475_v51, %v225_v49  ;;  %v830_v8 = vmul.f32 %v828_v55, %v2475_v51  ;;  %v1287_v47 = vld [vmem:[%s2749_s1 + $0x180] sm:$0xff]  ;;  %v1288_v49 = vld [vmem:[%s2749_s1 + $0x188] sm:$0xff] }
  0x88   : > { %v440_v14 = vmul.f32 %v433_v50, %v426_v0  ;;  %v1351_v50 = vld [vmem:[%s2749_s1 + $0x380] sm:$0xff] }
  0x89   : > { %1759 = vmatprep.mubr.f32.mxu0 %v732_v52  ;;  %1619 = vmatprep.mubr.f32.mxu1 %v239_v54  ;;  %v1352_v52 = vld [vmem:[%s2749_s1 + $0x388] sm:$0xff]  ;;  %v1963_v54 = vpack.c.bf16 %v1288_v49, %v1287_v47 }
  0x8a   : > { %v1372_v47 = vld [vmem:[%s2749_s1 + $0x428] sm:$0xff] }
  0x8b   : > { %v2498_v1 = vpop.permute.xlu0 %437  ;;  %v2500_v2 = vpop.permute.xlu1 %236 }
  0x8c   : > { %v733_v3 = vmul.f32 %v731_v56, %v2498_v1  ;;  %v2504_v4 = vmul.f32 %v1023_v57, %v2498_v1  ;;  %v240_v5 = vmul.f32 %v828_v55, %v2500_v2  ;;  %v2512_v9 = vmul.f32 %v537_v60, %v2500_v2  ;;  %v829_v56 = vld [vmem:[%s2305_s16 + $0x10] sm:$0xff] }
  0x8d   : > { %v2091_v55 = vpack.c.bf16 %v1352_v52, %v1351_v50  ;;  %v1289_v57 = vld [vmem:[%s2749_s1 + $0x190] sm:$0xff]  ;;  %v441_v62 = vmul.f32 %v2472_v48, %v2498_v1  ;;  %v831_v0 = vmul.f32 %v829_v56, %v2500_v2  ;;  %v1355_v48 = vld [vmem:[%s2749_s1 + $0x3a0] sm:$0xff]  ;;  %v1356_v1 = vld [vmem:[%s2749_s1 + $0x3a8] sm:$0xff] }
  0x8e   : > { %1620 = vmatmul.mubr.f32.vlgmr.msra.gmra.mrb[0].mxu1 %v240_v5  ;;  %1760 = vmatmul.mubr.f32.vlgmr.msra.gmra.mrb[0].mxu0 %v733_v3  ;;  %v1353_v60 = vld [vmem:[%s2749_s1 + $0x390] sm:$0xff]  ;;  %v1967_v3 = vpack.c.bf16 %v1290_v58, %v1289_v57  ;;  %v538_v5 = vmul.f32 %v536_v59, %v2475_v51  ;;  %v2099_v2 = vpack.c.bf16 %v1356_v1, %v1355_v48  ;;  %v1378_v57 = vld [vmem:[%s2749_s1 + $0x458] sm:$0xff]  ;;  %v1379_v59 = vld [vmem:[%s2749_s1 + $0x460] sm:$0xff] }
  0x8f   : > { %1934 = vmatpush3.bf16.msra.mxu1 %v1931_v45  ;;  %2062 = vmatpush3.bf16.msra.mxu0 %v2059_v46  ;;  %v1959_v45 = vpack.c.bf16 %v1286_v42, %v1285_v41  ;;  %v2087_v46 = vpack.c.bf16 %v1350_v44, %v1349_v43  ;;  %v1369_v42 = vld [vmem:[%s2749_s1 + $0x410] sm:$0xff]  ;;  %v1370_v43 = vld [vmem:[%s2749_s1 + $0x418] sm:$0xff] }
  0x90   : > { %1654 = vmatprep.mubr.f32.mxu1 %v440_v14  ;;  %1936 = vmatprep.subr.bf16.mxu1 %v1935_v6  ;;  %v927_v44 = vld [vmem:[%s2305_s16 + $0x11] sm:$0xff] }
  0x91   : > { %2064 = vmatprep.subr.bf16.mxu0 %v2063_v10  ;;  %1794 = vmatprep.mubr.f32.mxu0 %v830_v8  ;;  %v1292_v8 = vld [vmem:[%s2749_s1 + $0x1a8] sm:$0xff]  ;;  %v1373_v50 = vld [vmem:[%s2749_s1 + $0x430] sm:$0xff] }
  0x92   : > { %v1971_v51 = vpack.c.bf16 %v1292_v8, %v1291_v7  ;;  %v1377_v56 = vld [vmem:[%s2749_s1 + $0x450] sm:$0xff]  ;;  %v1383_v8 = vld [vmem:[%s2750_s2] ss:$0 sm:$0xff] }
  0x93   : > { %1938 = vmatpush3.bf16.msra.mxu1 %v1935_v6  ;;  %2066 = vmatpush3.bf16.msra.mxu0 %v2063_v10  ;;  %v2095_v6 = vpack.c.bf16 %v1354_v61, %v1353_v60  ;;  %v1293_v10 = vld [vmem:[%s2749_s1 + $0x1b0] sm:$0xff]  ;;  %v2143_v58 = vpack.c.bf16 %v1378_v57, %v1377_v56  ;;  %v1380_v60 = vld [vmem:[%s2749_s1 + $0x468] sm:$0xff] }
  0x94   : > { %1940 = vmatprep.subr.bf16.mxu1 %v1939_v15  ;;  %2068 = vmatprep.subr.bf16.mxu0 %v2067_v16  ;;  %v1975_v14 = vpack.c.bf16 %v1294_v11, %v1293_v10  ;;  %v2147_v61 = vpack.c.bf16 %v1380_v60, %v1379_v59 }
  0x97   : > { %1942 = vmatpush3.bf16.msra.mxu1 %v1939_v15  ;;  %2070 = vmatpush3.bf16.msra.mxu0 %v2067_v16  ;;  %v2103_v15 = vpack.c.bf16 %v1358_v13, %v1357_v12  ;;  %v1295_v16 = vld [vmem:[%s2749_s1 + $0x1c0] sm:$0xff] }
  0x98   : > { %1944 = vmatprep.subr.bf16.mxu1 %v1943_v21  ;;  %2072 = vmatprep.subr.bf16.mxu0 %v2071_v22 }
  0x9b   : > { %1946 = vmatpush3.bf16.msra.mxu1 %v1943_v21  ;;  %2074 = vmatpush3.bf16.msra.mxu0 %v2071_v22  ;;  %v1297_v21 = vld [vmem:[%s2749_s1 + $0x1d0] sm:$0xff]  ;;  %v1298_v22 = vld [vmem:[%s2749_s1 + $0x1d8] sm:$0xff] }
  0x9c   : > { %1948 = vmatprep.subr.bf16.mxu1 %v1947_v27  ;;  %2076 = vmatprep.subr.bf16.mxu0 %v2075_v28  ;;  %v1983_v25 = vpack.c.bf16 %v1298_v22, %v1297_v21 }
  0x9f   : > { %1950 = vmatpush3.bf16.msra.mxu1 %v1947_v27  ;;  %2078 = vmatpush3.bf16.msra.mxu0 %v2075_v28  ;;  %v1299_v27 = vld [vmem:[%s2749_s1 + $0x1e0] sm:$0xff]  ;;  %v1300_v28 = vld [vmem:[%s2749_s1 + $0x1e8] sm:$0xff] }
  0xa0   : > { %1952 = vmatprep.subr.bf16.mxu1 %v1951_v33  ;;  %2080 = vmatprep.subr.bf16.mxu0 %v2079_v34  ;;  %v1987_v31 = vpack.c.bf16 %v1300_v28, %v1299_v27 }
  0xa3   : > { %1954 = vmatpush3.bf16.msra.mxu1 %v1951_v33  ;;  %2082 = vmatpush3.bf16.msra.mxu0 %v2079_v34  ;;  %v1301_v33 = vld [vmem:[%s2749_s1 + $0x1f0] sm:$0xff]  ;;  %v1302_v34 = vld [vmem:[%s2749_s1 + $0x1f8] sm:$0xff] }
  0xa4   : > { %1956 = vmatprep.subr.bf16.mxu1 %v1955_v39  ;;  %2084 = vmatprep.subr.bf16.mxu0 %v2083_v40  ;;  %v1991_v37 = vpack.c.bf16 %v1302_v34, %v1301_v33 }
  0xa7   : > { %1958 = vmatpush3.bf16.msra.mxu1 %v1955_v39  ;;  %2086 = vmatpush3.bf16.msra.mxu0 %v2083_v40  ;;  %v1367_v39 = vld [vmem:[%s2749_s1 + $0x400] sm:$0xff]  ;;  %v1368_v40 = vld [vmem:[%s2749_s1 + $0x408] sm:$0xff] }
  0xa8   : > { %1960 = vmatprep.subr.bf16.mxu1 %v1959_v45  ;;  %2088 = vmatprep.subr.bf16.mxu0 %v2087_v46  ;;  %v2123_v41 = vpack.c.bf16 %v1368_v40, %v1367_v39 }
  0xab   : > { %1962 = vmatpush3.bf16.msra.mxu1 %v1959_v45  ;;  %2090 = vmatpush3.bf16.msra.mxu0 %v2087_v46  ;;  %v2127_v45 = vpack.c.bf16 %v1370_v43, %v1369_v42  ;;  %v1371_v46 = vld [vmem:[%s2749_s1 + $0x420] sm:$0xff] }
  0xac   : > { %1964 = vmatprep.subr.bf16.mxu1 %v1963_v54  ;;  %2092 = vmatprep.subr.bf16.mxu0 %v2091_v55  ;;  %v2131_v49 = vpack.c.bf16 %v1372_v47, %v1371_v46 }
  0xae   : > { %1655 = vmatmul.mubr.f32.vlgmr.msra.gmra.mrb[0].mxu1 %v441_v62  ;;  %1795 = vmatmul.mubr.f32.vlgmr.msra.gmra.mrb[0].mxu0 %v831_v0  ;;  %v1381_v62 = vld [vmem:[%s2749_s1 + $0x470] sm:$0xff]  ;;  %v1382_v0 = vld [vmem:[%s2749_s1 + $0x478] sm:$0xff] }
  0xaf   : > { %1966 = vmatpush3.bf16.msra.mxu1 %v1963_v54  ;;  %1689 = vmatprep.mubr.f32.mxu1 %v538_v5  ;;  %v1375_v54 = vld [vmem:[%s2749_s1 + $0x440] sm:$0xff] }
  0xb0   : > { %2094 = vmatpush3.bf16.msra.mxu0 %v2091_v55  ;;  %1968 = vmatprep.subr.bf16.mxu1 %v1967_v3 }
  0xb1   : > { %2096 = vmatprep.subr.bf16.mxu0 %v2095_v6  ;;  %1829 = vmatprep.mubr.f32.mxu0 %v2376_v63  ;;  %v1296_v63 = vld [vmem:[%s2749_s1 + $0x1c8] sm:$0xff] }
  0xb2   : > { %v1979_v19 = vpack.c.bf16 %v1296_v63, %v1295_v16 }
  0xb3   : > { %1970 = vmatpush3.bf16.msra.mxu1 %v1967_v3  ;;  %v2151_v3 = vpack.c.bf16 %v1382_v0, %v1381_v62 }
  0xb4   : > { %2098 = vmatpush3.bf16.msra.mxu0 %v2095_v6  ;;  %1972 = vmatprep.subr.bf16.mxu1 %v1971_v51 }
  0xb5   : > { %2100 = vmatprep.subr.bf16.mxu0 %v2099_v2 }
  0xb7   : > { %1974 = vmatpush3.bf16.msra.mxu1 %v1971_v51 }
  0xb8   : > { %2102 = vmatpush3.bf16.msra.mxu0 %v2099_v2  ;;  %1976 = vmatprep.subr.bf16.mxu1 %v1975_v14 }
  0xb9   : > { %2104 = vmatprep.subr.bf16.mxu0 %v2103_v15 }
  0xbb   : > { %1978 = vmatpush3.bf16.msra.mxu1 %v1975_v14 }
  0xbc   : > { %2106 = vmatpush3.bf16.msra.mxu0 %v2103_v15  ;;  %1980 = vmatprep.subr.bf16.mxu1 %v1979_v19 }
  0xbd   : > { %2108 = vmatprep.subr.bf16.mxu0 %v2107_v20 }
  0xbf   : > { %1982 = vmatpush3.bf16.msra.mxu1 %v1979_v19 }
  0xc0   : > { %2110 = vmatpush3.bf16.msra.mxu0 %v2107_v20  ;;  %1984 = vmatprep.subr.bf16.mxu1 %v1983_v25 }
  0xc1   : > { %2112 = vmatprep.subr.bf16.mxu0 %v2111_v26 }
  0xc3   : > { %1986 = vmatpush3.bf16.msra.mxu1 %v1983_v25 }
  0xc4   : > { %2114 = vmatpush3.bf16.msra.mxu0 %v2111_v26  ;;  %1988 = vmatprep.subr.bf16.mxu1 %v1987_v31 }
  0xc5   : > { %2116 = vmatprep.subr.bf16.mxu0 %v2115_v32 }
  0xc7   : > { %1990 = vmatpush3.bf16.msra.mxu1 %v1987_v31 }
  0xc8   : > { %2118 = vmatpush3.bf16.msra.mxu0 %v2115_v32  ;;  %1992 = vmatprep.subr.bf16.mxu1 %v1991_v37 }
  0xc9   : > { %2120 = vmatprep.subr.bf16.mxu0 %v2119_v38 }
  0xcb   : > { %1994 = vmatpush3.bf16.msra.mxu1 %v1991_v37 }
  0xcc   : > { %2122 = vmatpush3.bf16.msra.mxu0 %v2119_v38 }
  0xcd   : > { %2124 = vmatprep.subr.bf16.mxu0 %v2123_v41 }
  0xce   : > { %1690 = vmatmul.mubr.f32.vlgmr.msra.gmra.mrb[0].mxu1 %v2512_v9  ;;  %v1374_v9 = vld [vmem:[%s2749_s1 + $0x438] sm:$0xff] }
  0xcf   : > { %1830 = vmatmul.mubr.f32.vlgmr.msra.gmra.mrb[0].mxu0 %v927_v44  ;;  %v2135_v52 = vpack.c.bf16 %v1374_v9, %v1373_v50 }
  0xd0   : > { %2126 = vmatpush3.bf16.msra.mxu0 %v2123_v41  ;;  %1864 = vmatprep.mubr.f32.mxu0 %v2478_v53  ;;  %v1376_v53 = vld [vmem:[%s2749_s1 + $0x448] sm:$0xff] }
  0xd1   : > { %2128 = vmatprep.subr.bf16.mxu0 %v2127_v45  ;;  %v2139_v55 = vpack.c.bf16 %v1376_v53, %v1375_v54 }
  0xd4   : > { %2130 = vmatpush3.bf16.msra.mxu0 %v2127_v45 }
  0xd5   : > { %2132 = vmatprep.subr.bf16.mxu0 %v2131_v49 }
  0xd8   : > { %2134 = vmatpush3.bf16.msra.mxu0 %v2131_v49 }
  0xd9   : > { %2136 = vmatprep.subr.bf16.mxu0 %v2135_v52 }
  0xdc   : > { %2138 = vmatpush3.bf16.msra.mxu0 %v2135_v52 }
  0xdd   : > { %2140 = vmatprep.subr.bf16.mxu0 %v2139_v55 }
  0xe0   : > { %2142 = vmatpush3.bf16.msra.mxu0 %v2139_v55 }
  0xe1   : > { %2144 = vmatprep.subr.bf16.mxu0 %v2143_v58 }
  0xe4   : > { %2146 = vmatpush3.bf16.msra.mxu0 %v2143_v58 }
  0xe5   : > { %2148 = vmatprep.subr.bf16.mxu0 %v2147_v61 }
  0xe8   : > { %2150 = vmatpush3.bf16.msra.mxu0 %v2147_v61 }
  0xe9   : > { %2152 = vmatprep.subr.bf16.mxu0 %v2151_v3 }
  0xec   : > { %2154 = vmatpush3.bf16.msra.mxu0 %v2151_v3 }
  0xef   : > { %1865 = vmatmul.mubr.f32.vlgmr.msra.gmra.mrb[0].mxu0 %v2504_v4 }
 0x1a1   : > { %v1691_v5 = vpop.f32.mrb[0].mxu1 }
 0x1a2   : > { %v623_v6 = vpop.f32.mrb[1].mxu1 }
 0x1c2   : > { %v1866_v7 = vpop.f32.mrb[0].mxu0 }
 0x1c3   : > { %v2155_v48 = vadd.f32 %v1866_v7, %v1691_v5  ;;  %v1109_v1 = vpop.f32.mrb[1].mxu0 }
 0x1c4   : > { %v2156_v51 = vadd.f32 %v1109_v1, %v623_v6 }
 0x1c5   : > { %v1128_v2 = vadd.f32 %v2155_v48, %v1383_v8 }
 0x1c6   : > { %v1127_v10 = vadd.f32 %v2156_v51, %v1383_v8 }
 0x1c7   : > { %v1132_v11 = vmul.f32 0.70710677, %v1128_v2  ;;  %v1130_v62 = vmul.f32 0.5, %v1128_v2 }
 0x1c8   : > { %v1131_v12 = vmul.f32 0.70710677, %v1127_v10  ;;  %v1129_v3 = vmul.f32 0.5, %v1127_v10 }
 0x1c9   : > { %v1385_v13 = vclamps-f32 %v1132_v11, 4.0 }
 0x1ca   : > { %v1384_v14 = vclamps-f32 %v1131_v12, 4.0 }
 0x1cb   : > { %v1138_v15 = vmul.f32 %v1385_v13, %v1385_v13 }
 0x1cc   : > { %v1137_v16 = vmul.f32 %v1384_v14, %v1384_v14 }
 0x1cd   : > { %v1140_v63 = vmul.f32 -2.7261424e-10, %v1138_v15  ;;  %v1166_v4 = vmul.f32 -1.45660715e-05, %v1138_v15 }
 0x1ce   : > { %v1139_v17 = vmul.f32 -2.7261424e-10, %v1137_v16  ;;  %v1165_v18 = vmul.f32 -1.45660715e-05, %v1137_v16 }
 0x1cf   : > { %v1142_v19 = vadd.f32 2.7706815e-08, %v1140_v63  ;;  %v1168_v20 = vadd.f32 -0.00021337405, %v1166_v4 }
 0x1d0   : > { %v1141_v21 = vadd.f32 2.7706815e-08, %v1139_v17  ;;  %v1167_v22 = vadd.f32 -0.00021337405, %v1165_v18 }
 0x1d1   : > { %v1144_v23 = vmul.f32 %v1142_v19, %v1138_v15  ;;  %v1170_v24 = vmul.f32 %v1168_v20, %v1138_v15 }
 0x1d2   : > { %v1143_v25 = vmul.f32 %v1141_v21, %v1137_v16  ;;  %v1169_v26 = vmul.f32 %v1167_v22, %v1137_v16 }
 0x1d3   : > { %v1146_v27 = vadd.f32 -2.101024e-06, %v1144_v23  ;;  %v1172_v28 = vadd.f32 -0.001682827, %v1170_v24 }
 0x1d4   : > { %v1145_v29 = vadd.f32 -2.101024e-06, %v1143_v25  ;;  %v1171_v30 = vadd.f32 -0.001682827, %v1169_v26 }
 0x1d5   : > { %v1148_v31 = vmul.f32 %v1146_v27, %v1138_v15  ;;  %v1174_v32 = vmul.f32 %v1172_v28, %v1138_v15 }
 0x1d6   : > { %v1147_v33 = vmul.f32 %v1145_v29, %v1137_v16  ;;  %v1173_v34 = vmul.f32 %v1171_v30, %v1137_v16 }
 0x1d7   : > { %v1150_v35 = vadd.f32 -5.6925062e-05, %v1148_v31  ;;  %v1176_v36 = vadd.f32 -0.0073733293, %v1174_v32 }
 0x1d8   : > { %v1149_v37 = vadd.f32 -5.6925062e-05, %v1147_v33  ;;  %v1175_v38 = vadd.f32 -0.0073733293, %v1173_v34 }
 0x1d9   : > { %v1152_v39 = vmul.f32 %v1150_v35, %v1138_v15  ;;  %v1178_v40 = vmul.f32 %v1176_v36, %v1138_v15 }
 0x1da   : > { %v1151_v41 = vmul.f32 %v1149_v37, %v1137_v16  ;;  %v1177_v42 = vmul.f32 %v1175_v38, %v1137_v16 }
 0x1db   : > { %v1154_v43 = vadd.f32 -0.00073499064, %v1152_v39  ;;  %v1180_v44 = vadd.f32 -0.014264739, %v1178_v40 }
 0x1dc   : > { %v1153_v45 = vadd.f32 -0.00073499064, %v1151_v41  ;;  %v1179_v46 = vadd.f32 -0.014264739, %v1177_v42 }
 0x1dd   : > { %v1156_v47 = vmul.f32 %v1154_v43, %v1138_v15  ;;  %2182 = vrcp.f32 %v1180_v44 }
 0x1de   : > { %v1155_v49 = vmul.f32 %v1153_v45, %v1137_v16  ;;  %2184 = vrcp.f32 %v1179_v46 }
 0x1df   : > { %v1158_v50 = vadd.f32 -0.0029546, %v1156_v47 }
 0x1e0   : > { %v1157_v9 = vadd.f32 -0.0029546, %v1155_v49 }
 0x1e1   : > { %v1160_v52 = vmul.f32 %v1158_v50, %v1138_v15 }
 0x1e2   : > { %v1159_v54 = vmul.f32 %v1157_v9, %v1137_v16 }
 0x1e3   : > { %v1162_v53 = vadd.f32 -0.016096033, %v1160_v52 }
 0x1e4   : > { %v1161_v55 = vadd.f32 -0.016096033, %v1159_v54 }
 0x1e5   : > { %v1164_v56 = vmul.f32 %v1385_v13, %v1162_v53 }
 0x1e6   : > { %v1163_v57 = vmul.f32 %v1384_v14, %v1161_v55 }
 0x1e7   : > { %v2183_v58 = vpop.eup %2182 }
 0x1e8   : > { %v2185_v59 = vpop.eup %2184  ;;  %v1184_v60 = vmul.f32 %v2183_v58, %v1164_v56 }
 0x1e9   : > { %v1183_v61 = vmul.f32 %v2185_v59, %v1163_v57 }
 0x1ea   : > { %v1186_v0 = vadd.f32 1.0, %v1184_v60 }
 0x1eb   : > { %v1185_v5 = vadd.f32 1.0, %v1183_v61 }
 0x1ec   : > { %v1188_v6 = vmul.f32 %v1186_v0, %v1130_v62 }
 0x1ed   : > { %v1187_v7 = vmul.f32 %v1185_v5, %v1129_v3 }
 0x1ee   : > { %1190 = vst [vmem:[%s224_s11 + $0x8] sm:$0xff] %v1188_v6 }
 0x1ef   : > { %1189 = vst [vmem:[%s224_s11] sm:$0xff] %v1187_v7 }
 0x1f0 PF: > { %s15_s18 = sadd.s32 1, %s2192_s18  }
 0x1f1   : > { %p12_p4 = scmp.ge.s32.totalorder %s15_s18, 4  }
 0x1f3   :  { %14 = sbr.rel (!%p12_p4) target bundleno = 1 (0x1), region = 78 }

// kernel: random_attempt_forward.13
= control target key start
LH: loop header
LB: loop body
LE: loop exit
PB: predicated region body
PF: predicated region fallthrough
CT: control target
= control target key end

     0   :  { %v1879_v47 = vmov 1983009808   ;;  %v302_v49 = vlaneseq  ;;  %s2877_s0 = inlined_call_operand.vmem [shape: f32[2,2048], index: 0, kind: input, shape index: {}]   ;;  %s2878_s1 = inlined_call_operand.vmem [shape: f32[2048,128], index: 1, kind: input, shape index: {}]   ;;  %s2879_s2 = inlined_call_operand.vmem [shape: f32[1,128], index: 2, kind: input, shape index: {}]   ;;  %s2880_s3 = inlined_call_operand.vmem [shape: f32[128,128], index: 3, kind: input, shape index: {}]   ;;  %s2881_s4 = inlined_call_operand.vmem [shape: f32[1,128], index: 4, kind: input, shape index: {}]   ;;  %s2882_s5 = inlined_call_operand.vmem [shape: f32[128,128], index: 5, kind: input, shape index: {}]   ;;  %s2883_s6 = inlined_call_operand.vmem [shape: f32[1,128], index: 6, kind: input, shape index: {}]   ;;  %s2884_s7 = inlined_call_operand.hbm [shape: f32[2,128], index: 7, kind: output, shape index: {}]  }
   0x1   :  { %v47_v0 = vld [vmem:[%s2878_s1 + $0x80] sm:$0xff]  ;;  %v48_v1 = vld [vmem:[%s2878_s1 + $0x88] sm:$0xff]  ;;  %v49_v11 = vld [vmem:[%s2878_s1 + $0x90] sm:$0xff]  ;;  %v300_v48 = vunpack.c.l.s4 %v1879_v47 }
   0x2   :  { %v31_v2 = vld [vmem:[%s2878_s1] sm:$0xff]  ;;  %v1538_v3 = vpack.c.bf16 %v48_v1, %v47_v0  ;;  %v32_v4 = vld [vmem:[%s2878_s1 + $0x8] sm:$0xff]  ;;  %v50_v13 = vld [vmem:[%s2878_s1 + $0x98] sm:$0xff]  ;;  %v303_v0 = vshrl.u32 %v302_v49, 7 }
   0x3   :  { %v79_v5 = vld [vmem:[%s2878_s1 + $0x180] sm:$0xff]  ;;  %v80_v6 = vld [vmem:[%s2878_s1 + $0x188] sm:$0xff]  ;;  %v1540_v7 = vpack.c.bf16 %v32_v4, %v31_v2  ;;  %v33_v14 = vld [vmem:[%s2878_s1 + $0x10] sm:$0xff]  ;;  %v1542_v16 = vpack.c.bf16 %v50_v13, %v49_v11  ;;  %v301_v63 = vunpack.c.0.s8 %v300_v48 }
   0x4   :  { %v1570_v8 = vpack.c.bf16 %v80_v6, %v79_v5  ;;  %v63_v9 = vld [vmem:[%s2878_s1 + $0x100] sm:$0xff]  ;;  %v64_v10 = vld [vmem:[%s2878_s1 + $0x108] sm:$0xff]  ;;  %1539 = vmatprep.subr.bf16.mxu0 %v1538_v3  ;;  %v34_v15 = vld [vmem:[%s2878_s1 + $0x18] sm:$0xff] }
   0x5   :  { %v1572_v12 = vpack.c.bf16 %v64_v10, %v63_v9  ;;  %1541 = vmatpush3.bf16.msra.mxu0 %v1540_v7  ;;  %v1544_v17 = vpack.c.bf16 %v34_v15, %v33_v14  ;;  %v81_v18 = vld [vmem:[%s2878_s1 + $0x190] sm:$0xff]  ;;  %v82_v19 = vld [vmem:[%s2878_s1 + $0x198] sm:$0xff]  ;;  %v51_v23 = vld [vmem:[%s2878_s1 + $0xa0] sm:$0xff]  ;;  %v2074_v13 = vsub.s32 %v301_v63, %v303_v0 }
   0x6   :  { %1571 = vmatprep.subr.bf16.mxu1 %v1570_v8  ;;  %v65_v20 = vld [vmem:[%s2878_s1 + $0x110] sm:$0xff]  ;;  %v1574_v21 = vpack.c.bf16 %v82_v19, %v81_v18  ;;  %v66_v22 = vld [vmem:[%s2878_s1 + $0x118] sm:$0xff]  ;;  %v52_v24 = vld [vmem:[%s2878_s1 + $0xa8] sm:$0xff]  ;;  %1543 = vmatprep.subr.bf16.mxu0 %v1542_v16 }
   0x7   :  { %1573 = vmatpush3.bf16.msra.mxu1 %v1572_v12  ;;  %v1576_v25 = vpack.c.bf16 %v66_v22, %v65_v20  ;;  %v1546_v26 = vpack.c.bf16 %v52_v24, %v51_v23  ;;  %v35_v27 = vld [vmem:[%s2878_s1 + $0x20] sm:$0xff]  ;;  %v36_v28 = vld [vmem:[%s2878_s1 + $0x28] sm:$0xff]  ;;  %v53_v35 = vld [vmem:[%s2878_s1 + $0xb0] sm:$0xff] }
   0x8   :  { %v83_v29 = vld [vmem:[%s2878_s1 + $0x1a0] sm:$0xff]  ;;  %1575 = vmatprep.subr.bf16.mxu1 %v1574_v21  ;;  %v84_v30 = vld [vmem:[%s2878_s1 + $0x1a8] sm:$0xff]  ;;  %v1548_v33 = vpack.c.bf16 %v36_v28, %v35_v27  ;;  %v54_v36 = vld [vmem:[%s2878_s1 + $0xb8] sm:$0xff] }
   0x9   :  { %v67_v31 = vld [vmem:[%s2878_s1 + $0x120] sm:$0xff]  ;;  %v68_v32 = vld [vmem:[%s2878_s1 + $0x128] sm:$0xff]  ;;  %1545 = vmatpush3.bf16.msra.mxu0 %v1544_v17  ;;  %v1578_v34 = vpack.c.bf16 %v84_v30, %v83_v29  ;;  %v37_v37 = vld [vmem:[%s2878_s1 + $0x30] sm:$0xff]  ;;  %v1550_v39 = vpack.c.bf16 %v54_v36, %v53_v35 }
   0xa   :  { %1547 = vmatprep.subr.bf16.mxu0 %v1546_v26  ;;  %v1580_v38 = vpack.c.bf16 %v68_v32, %v67_v31  ;;  %v38_v40 = vld [vmem:[%s2878_s1 + $0x38] sm:$0xff]  ;;  %v85_v41 = vld [vmem:[%s2878_s1 + $0x1b0] sm:$0xff]  ;;  %v55_v46 = vld [vmem:[%s2878_s1 + $0xc0] sm:$0xff] }
   0xb   :  { %1577 = vmatpush3.bf16.msra.mxu1 %v1576_v25  ;;  %v86_v42 = vld [vmem:[%s2878_s1 + $0x1b8] sm:$0xff]  ;;  %v69_v44 = vld [vmem:[%s2878_s1 + $0x130] sm:$0xff]  ;;  %v56_v50 = vld [vmem:[%s2878_s1 + $0xc8] sm:$0xff]  ;;  %v1552_v51 = vpack.c.bf16 %v38_v40, %v37_v37 }
   0xc   :  { %1579 = vmatprep.subr.bf16.mxu1 %v1578_v34  ;;  %v1582_v43 = vpack.c.bf16 %v86_v42, %v85_v41  ;;  %v70_v45 = vld [vmem:[%s2878_s1 + $0x138] sm:$0xff]  ;;  %v87_v52 = vld [vmem:[%s2878_s1 + $0x1c0] sm:$0xff]  ;;  %v88_v53 = vld [vmem:[%s2878_s1 + $0x1c8] sm:$0xff]  ;;  %v1554_v55 = vpack.c.bf16 %v56_v50, %v55_v46 }
   0xd   :  { %1549 = vmatpush3.bf16.msra.mxu0 %v1548_v33  ;;  %v1584_v54 = vpack.c.bf16 %v70_v45, %v69_v44  ;;  %v39_v56 = vld [vmem:[%s2878_s1 + $0x40] sm:$0xff]  ;;  %v40_v57 = vld [vmem:[%s2878_s1 + $0x48] sm:$0xff]  ;;  %v1586_v59 = vpack.c.bf16 %v88_v53, %v87_v52  ;;  %v57_v61 = vld [vmem:[%s2878_s1 + $0xd0] sm:$0xff] }
   0xe   :  { %1551 = vmatprep.subr.bf16.mxu0 %v1550_v39  ;;  %v71_v58 = vld [vmem:[%s2878_s1 + $0x140] sm:$0xff]  ;;  %v72_v60 = vld [vmem:[%s2878_s1 + $0x148] sm:$0xff]  ;;  %v58_v62 = vld [vmem:[%s2878_s1 + $0xd8] sm:$0xff]  ;;  %v1556_v3 = vpack.c.bf16 %v40_v57, %v39_v56 }
   0xf   :  { %1581 = vmatpush3.bf16.msra.mxu1 %v1580_v38  ;;  %v89_v1 = vld [vmem:[%s2878_s1 + $0x1d0] sm:$0xff]  ;;  %v90_v2 = vld [vmem:[%s2878_s1 + $0x1d8] sm:$0xff]  ;;  %v1588_v4 = vpack.c.bf16 %v72_v60, %v71_v58  ;;  %v1558_v5 = vpack.c.bf16 %v58_v62, %v57_v61  ;;  %v59_v11 = vld [vmem:[%s2878_s1 + $0xe0] sm:$0xff] }
  0x10   :  { %1583 = vmatprep.subr.bf16.mxu1 %v1582_v43  ;;  %v41_v6 = vld [vmem:[%s2878_s1 + $0x50] sm:$0xff]  ;;  %v42_v7 = vld [vmem:[%s2878_s1 + $0x58] sm:$0xff]  ;;  %v1590_v9 = vpack.c.bf16 %v90_v2, %v89_v1  ;;  %v60_v12 = vld [vmem:[%s2878_s1 + $0xe8] sm:$0xff] }
  0x11   :  { %1553 = vmatpush3.bf16.msra.mxu0 %v1552_v51  ;;  %v73_v8 = vld [vmem:[%s2878_s1 + $0x150] sm:$0xff]  ;;  %v74_v10 = vld [vmem:[%s2878_s1 + $0x158] sm:$0xff]  ;;  %v91_v14 = vld [vmem:[%s2878_s1 + $0x1e0] sm:$0xff]  ;;  %v1560_v16 = vpack.c.bf16 %v42_v7, %v41_v6  ;;  %v1562_v19 = vpack.c.bf16 %v60_v12, %v59_v11 }
  0x12   :  { %1555 = vmatprep.subr.bf16.mxu0 %v1554_v55  ;;  %v92_v15 = vld [vmem:[%s2878_s1 + $0x1e8] sm:$0xff]  ;;  %v43_v17 = vld [vmem:[%s2878_s1 + $0x60] sm:$0xff]  ;;  %v1592_v18 = vpack.c.bf16 %v74_v10, %v73_v8  ;;  %v61_v25 = vld [vmem:[%s2878_s1 + $0xf0] sm:$0xff] }
  0x13   :  { %1585 = vmatpush3.bf16.msra.mxu1 %v1584_v54  ;;  %v44_v20 = vld [vmem:[%s2878_s1 + $0x68] sm:$0xff]  ;;  %v75_v21 = vld [vmem:[%s2878_s1 + $0x160] sm:$0xff]  ;;  %v1594_v23 = vpack.c.bf16 %v92_v15, %v91_v14  ;;  %v62_v26 = vld [vmem:[%s2878_s1 + $0xf8] sm:$0xff] }
  0x14   :  { %1587 = vmatprep.subr.bf16.mxu1 %v1586_v59  ;;  %v27_v22 = vld [vmem:[%s2877_s0] sm:$0xff]  ;;  %v76_v24 = vld [vmem:[%s2878_s1 + $0x168] sm:$0xff]  ;;  %v93_v29 = vld [vmem:[%s2878_s1 + $0x1f0] sm:$0xff]  ;;  %v1564_v31 = vpack.c.bf16 %v44_v20, %v43_v17  ;;  %v1566_v35 = vpack.c.bf16 %v62_v26, %v61_v25 }
  0x15   :  { %1557 = vmatpush3.bf16.msra.mxu0 %v1556_v3  ;;  %v305_v27 = vrot.slane %v27_v22, %v2074_v13  ;;  %v298_v28 = vcombine.high %v27_v22, %v27_v22  ;;  %v94_v30 = vld [vmem:[%s2878_s1 + $0x1f8] sm:$0xff]  ;;  %v1596_v34 = vpack.c.bf16 %v76_v24, %v75_v21  ;;  %v45_v36 = vld [vmem:[%s2878_s1 + $0x70] sm:$0xff]  ;;  %v111_v41 = vld [vmem:[%s2878_s1 + $0x280] sm:$0xff] }
  0x16   :  { %1559 = vmatprep.subr.bf16.mxu0 %v1558_v5  ;;  %v46_v37 = vld [vmem:[%s2878_s1 + $0x78] sm:$0xff]  ;;  %v77_v38 = vld [vmem:[%s2878_s1 + $0x170] sm:$0xff]  ;;  %v1598_v39 = vpack.c.bf16 %v94_v30, %v93_v29  ;;  %v112_v42 = vld [vmem:[%s2878_s1 + $0x288] sm:$0xff] }
  0x17   :  { %1589 = vmatpush3.bf16.msra.mxu1 %v1588_v4  ;;  %v313_v32 = vcombine.high %v305_v27, %v305_v27  ;;  %v312_v33 = vrot.slane %v298_v28, %v2074_v13  ;;  %v78_v40 = vld [vmem:[%s2878_s1 + $0x178] sm:$0xff]  ;;  %v143_v44 = vld [vmem:[%s2878_s1 + $0x380] sm:$0xff]  ;;  %v144_v45 = vld [vmem:[%s2878_s1 + $0x388] sm:$0xff]  ;;  %v1568_v46 = vpack.c.bf16 %v46_v37, %v45_v36  ;;  %v1602_v48 = vpack.c.bf16 %v112_v42, %v111_v41 }
  0x18   :  { %1591 = vmatprep.subr.bf16.mxu1 %v1590_v9  ;;  %v1600_v47 = vpack.c.bf16 %v78_v40, %v77_v38  ;;  %v95_v49 = vld [vmem:[%s2878_s1 + $0x200] sm:$0xff]  ;;  %v96_v50 = vld [vmem:[%s2878_s1 + $0x208] sm:$0xff]  ;;  %v1634_v52 = vpack.c.bf16 %v144_v45, %v143_v44  ;;  %v113_v54 = vld [vmem:[%s2878_s1 + $0x290] sm:$0xff] }
  0x19   :  { %1561 = vmatpush3.bf16.msra.mxu0 %v1560_v16  ;;  %446 = vmatprep.mubr.f32.mxu0 %v313_v32  ;;  %v314_v43 = vcombine.high %v312_v33, %v312_v33  ;;  %v127_v51 = vld [vmem:[%s2878_s1 + $0x300] sm:$0xff]  ;;  %v128_v53 = vld [vmem:[%s2878_s1 + $0x308] sm:$0xff]  ;;  %v114_v55 = vld [vmem:[%s2878_s1 + $0x298] sm:$0xff]  ;;  %v1604_v58 = vpack.c.bf16 %v96_v50, %v95_v49 }
  0x1a   :  { %1563 = vmatprep.subr.bf16.mxu0 %v1562_v19  ;;  %v145_v56 = vld [vmem:[%s2878_s1 + $0x390] sm:$0xff]  ;;  %v146_v57 = vld [vmem:[%s2878_s1 + $0x398] sm:$0xff]  ;;  %v1636_v59 = vpack.c.bf16 %v128_v53, %v127_v51  ;;  %v1606_v60 = vpack.c.bf16 %v114_v55, %v113_v54  ;;  %v115_v2 = vld [vmem:[%s2878_s1 + $0x2a0] sm:$0xff] }
  0x1b   :  { %1593 = vmatpush3.bf16.msra.mxu1 %v1592_v18  ;;  %516 = vmatprep.mubr.f32.mxu1 %v314_v43  ;;  %v97_v61 = vld [vmem:[%s2878_s1 + $0x210] sm:$0xff]  ;;  %v98_v62 = vld [vmem:[%s2878_s1 + $0x218] sm:$0xff]  ;;  %v1638_v0 = vpack.c.bf16 %v146_v57, %v145_v56  ;;  %v116_v3 = vld [vmem:[%s2878_s1 + $0x2a8] sm:$0xff] }
  0x1c   :  { %1595 = vmatprep.subr.bf16.mxu1 %v1594_v23  ;;  %v129_v63 = vld [vmem:[%s2878_s1 + $0x310] sm:$0xff]  ;;  %v130_v1 = vld [vmem:[%s2878_s1 + $0x318] sm:$0xff]  ;;  %v147_v4 = vld [vmem:[%s2878_s1 + $0x3a0] sm:$0xff]  ;;  %v1608_v6 = vpack.c.bf16 %v98_v62, %v97_v61  ;;  %v1610_v8 = vpack.c.bf16 %v116_v3, %v115_v2 }
  0x1d   :  { %1565 = vmatpush3.bf16.msra.mxu0 %v1564_v31  ;;  %v148_v5 = vld [vmem:[%s2878_s1 + $0x3a8] sm:$0xff]  ;;  %v1640_v7 = vpack.c.bf16 %v130_v1, %v129_v63  ;;  %v99_v9 = vld [vmem:[%s2878_s1 + $0x220] sm:$0xff]  ;;  %v117_v15 = vld [vmem:[%s2878_s1 + $0x2b0] sm:$0xff] }
  0x1e   :  { %1567 = vmatprep.subr.bf16.mxu0 %v1566_v35  ;;  %v100_v10 = vld [vmem:[%s2878_s1 + $0x228] sm:$0xff]  ;;  %v131_v11 = vld [vmem:[%s2878_s1 + $0x320] sm:$0xff]  ;;  %v1642_v12 = vpack.c.bf16 %v148_v5, %v147_v4  ;;  %v118_v16 = vld [vmem:[%s2878_s1 + $0x2b8] sm:$0xff] }
  0x1f   :  { %1597 = vmatpush3.bf16.msra.mxu1 %v1596_v34  ;;  %v132_v14 = vld [vmem:[%s2878_s1 + $0x328] sm:$0xff]  ;;  %v149_v17 = vld [vmem:[%s2878_s1 + $0x3b0] sm:$0xff]  ;;  %v150_v18 = vld [vmem:[%s2878_s1 + $0x3b8] sm:$0xff]  ;;  %v1612_v19 = vpack.c.bf16 %v100_v10, %v99_v9  ;;  %v1614_v21 = vpack.c.bf16 %v118_v16, %v117_v15 }
  0x20   :  { %1599 = vmatprep.subr.bf16.mxu1 %v1598_v39  ;;  %v1644_v20 = vpack.c.bf16 %v132_v14, %v131_v11  ;;  %v101_v22 = vld [vmem:[%s2878_s1 + $0x230] sm:$0xff]  ;;  %v102_v23 = vld [vmem:[%s2878_s1 + $0x238] sm:$0xff]  ;;  %v1646_v25 = vpack.c.bf16 %v150_v18, %v149_v17  ;;  %v120_v28 = vld [vmem:[%s2878_s1 + $0x2c8] sm:$0xff] }
  0x21   :  { %1569 = vmatpush3.bf16.msra.mxu0 %v1568_v46  ;;  %v133_v24 = vld [vmem:[%s2878_s1 + $0x330] sm:$0xff]  ;;  %v134_v26 = vld [vmem:[%s2878_s1 + $0x338] sm:$0xff]  ;;  %v151_v29 = vld [vmem:[%s2878_s1 + $0x3c0] sm:$0xff]  ;;  %v1616_v32 = vpack.c.bf16 %v102_v23, %v101_v22 }
  0x22   :  { %1603 = vmatprep.subr.bf16.mxu0 %v1602_v48  ;;  %v152_v30 = vld [vmem:[%s2878_s1 + $0x3c8] sm:$0xff]  ;;  %v1648_v35 = vpack.c.bf16 %v134_v26, %v133_v24  ;;  %v103_v37 = vld [vmem:[%s2878_s1 + $0x240] sm:$0xff]  ;;  %v121_v42 = vld [vmem:[%s2878_s1 + $0x2d0] sm:$0xff] }
  0x23   :  { %1601 = vmatpush3.bf16.msra.mxu1 %v1600_v47  ;;  %v28_v31 = vld [vmem:[%s2877_s0 + $0x8] sm:$0xff]  ;;  %v135_v39 = vld [vmem:[%s2878_s1 + $0x340] sm:$0xff]  ;;  %v1650_v40 = vpack.c.bf16 %v152_v30, %v151_v29  ;;  %v122_v43 = vld [vmem:[%s2878_s1 + $0x2d8] sm:$0xff] }
  0x24   :  { %1635 = vmatprep.subr.bf16.mxu1 %v1634_v52  ;;  %447 = vmatmul.mubr.f32.vlgmr.msra.gmra.mrb[0].mxu0 %v305_v27  ;;  %v119_v27 = vld [vmem:[%s2878_s1 + $0x2c0] sm:$0xff]  ;;  %v315_v34 = vcombine.high %v28_v31, %v28_v31  ;;  %v104_v38 = vld [vmem:[%s2878_s1 + $0x248] sm:$0xff]  ;;  %v153_v46 = vld [vmem:[%s2878_s1 + $0x3d0] sm:$0xff]  ;;  %v1622_v51 = vpack.c.bf16 %v122_v43, %v121_v42 }
  0x25   :  { %1605 = vmatpush3.bf16.msra.mxu0 %v1604_v58  ;;  %v1618_v36 = vpack.c.bf16 %v120_v28, %v119_v27  ;;  %v136_v41 = vld [vmem:[%s2878_s1 + $0x348] sm:$0xff]  ;;  %v154_v47 = vld [vmem:[%s2878_s1 + $0x3d8] sm:$0xff]  ;;  %v1620_v48 = vpack.c.bf16 %v104_v38, %v103_v37  ;;  %v105_v52 = vld [vmem:[%s2878_s1 + $0x250] sm:$0xff] }
  0x26   :  { %517 = vmatmul.mubr.f32.vlgmr.msra.gmra.mrb[0].mxu1 %v312_v33  ;;  %1607 = vmatprep.subr.bf16.mxu0 %v1606_v60  ;;  %v2235_v33 = vrot.slane %v28_v31, %v2074_v13  ;;  %v2258_v45 = vrot.slane %v315_v34, %v2074_v13  ;;  %v1652_v50 = vpack.c.bf16 %v136_v41, %v135_v39  ;;  %v106_v53 = vld [vmem:[%s2878_s1 + $0x258] sm:$0xff]  ;;  %v137_v54 = vld [vmem:[%s2878_s1 + $0x350] sm:$0xff]  ;;  %v123_v57 = vld [vmem:[%s2878_s1 + $0x2e0] sm:$0xff] }
  0x27   :  { %1637 = vmatpush3.bf16.msra.mxu1 %v1636_v59  ;;  %v1654_v55 = vpack.c.bf16 %v154_v47, %v153_v46  ;;  %v138_v56 = vld [vmem:[%s2878_s1 + $0x358] sm:$0xff]  ;;  %v124_v58 = vld [vmem:[%s2878_s1 + $0x2e8] sm:$0xff]  ;;  %v155_v59 = vld [vmem:[%s2878_s1 + $0x3e0] sm:$0xff]  ;;  %v1624_v61 = vpack.c.bf16 %v106_v53, %v105_v52 }
  0x28   :  { %1639 = vmatprep.subr.bf16.mxu1 %v1638_v0  ;;  %v330_v44 = vcombine.high %v2235_v33, %v2235_v33  ;;  %v331_v49 = vcombine.high %v2258_v45, %v2258_v45  ;;  %v156_v60 = vld [vmem:[%s2878_s1 + $0x3e8] sm:$0xff]  ;;  %v1656_v62 = vpack.c.bf16 %v138_v56, %v137_v54  ;;  %v1626_v63 = vpack.c.bf16 %v124_v58, %v123_v57  ;;  %v107_v0 = vld [vmem:[%s2878_s1 + $0x260] sm:$0xff]  ;;  %v125_v5 = vld [vmem:[%s2878_s1 + $0x2f0] sm:$0xff] }
  0x29   :  { %1609 = vmatpush3.bf16.msra.mxu0 %v1608_v6  ;;  %v108_v1 = vld [vmem:[%s2878_s1 + $0x268] sm:$0xff]  ;;  %v139_v2 = vld [vmem:[%s2878_s1 + $0x360] sm:$0xff]  ;;  %v1658_v3 = vpack.c.bf16 %v156_v60, %v155_v59  ;;  %v126_v6 = vld [vmem:[%s2878_s1 + $0x2f8] sm:$0xff] }
  0x2a   :  { %1611 = vmatprep.subr.bf16.mxu0 %v1610_v8  ;;  %586 = vmatprep.mubr.f32.mxu0 %v330_v44  ;;  %v140_v4 = vld [vmem:[%s2878_s1 + $0x368] sm:$0xff]  ;;  %v158_v8 = vld [vmem:[%s2878_s1 + $0x3f8] sm:$0xff]  ;;  %v1628_v9 = vpack.c.bf16 %v108_v1, %v107_v0  ;;  %v1630_v11 = vpack.c.bf16 %v126_v6, %v125_v5  ;;  %v141_v15 = vld [vmem:[%s2878_s1 + $0x370] sm:$0xff] }
  0x2b   :  { %1641 = vmatpush3.bf16.msra.mxu1 %v1640_v7  ;;  %656 = vmatprep.mubr.f32.mxu1 %v331_v49  ;;  %v157_v7 = vld [vmem:[%s2878_s1 + $0x3f0] sm:$0xff]  ;;  %v1660_v10 = vpack.c.bf16 %v140_v4, %v139_v2  ;;  %v110_v14 = vld [vmem:[%s2878_s1 + $0x278] sm:$0xff]  ;;  %v175_v18 = vld [vmem:[%s2878_s1 + $0x480] sm:$0xff] }
  0x2c   :  { %1643 = vmatprep.subr.bf16.mxu1 %v1642_v12  ;;  %v109_v12 = vld [vmem:[%s2878_s1 + $0x270] sm:$0xff]  ;;  %v1662_v16 = vpack.c.bf16 %v158_v8, %v157_v7  ;;  %v142_v17 = vld [vmem:[%s2878_s1 + $0x378] sm:$0xff]  ;;  %v159_v23 = vld [vmem:[%s2878_s1 + $0x400] sm:$0xff] }
  0x2d   :  { %1613 = vmatpush3.bf16.msra.mxu0 %v1612_v19  ;;  %v176_v19 = vld [vmem:[%s2878_s1 + $0x488] sm:$0xff]  ;;  %v1632_v22 = vpack.c.bf16 %v110_v14, %v109_v12  ;;  %v1664_v24 = vpack.c.bf16 %v142_v17, %v141_v15  ;;  %v191_v27 = vld [vmem:[%s2878_s1 + $0x500] sm:$0xff]  ;;  %v177_v30 = vld [vmem:[%s2878_s1 + $0x490] sm:$0xff] }
  0x2e   :  { %1615 = vmatprep.subr.bf16.mxu0 %v1614_v21  ;;  %v208_v21 = vld [vmem:[%s2878_s1 + $0x588] sm:$0xff]  ;;  %v178_v31 = vld [vmem:[%s2878_s1 + $0x498] sm:$0xff]  ;;  %v29_v37 = vld [vmem:[%s2877_s0 + $0x10] sm:$0xff] }
  0x2f   :  { %1645 = vmatpush3.bf16.msra.mxu1 %v1644_v20  ;;  %v207_v20 = vld [vmem:[%s2878_s1 + $0x580] sm:$0xff]  ;;  %v160_v26 = vld [vmem:[%s2878_s1 + $0x408] sm:$0xff]  ;;  %v210_v34 = vld [vmem:[%s2878_s1 + $0x598] sm:$0xff]  ;;  %v1670_v38 = vpack.c.bf16 %v178_v31, %v177_v30  ;;  %v2377_v42 = vrot.slane %v29_v37, %v2074_v13  ;;  %v332_v43 = vcombine.high %v29_v37, %v29_v37 }
  0x30   :  { %1647 = vmatprep.subr.bf16.mxu1 %v1646_v25  ;;  %v1666_v25 = vpack.c.bf16 %v176_v19, %v175_v18  ;;  %v192_v28 = vld [vmem:[%s2878_s1 + $0x508] sm:$0xff]  ;;  %v1698_v29 = vpack.c.bf16 %v208_v21, %v207_v20  ;;  %v161_v39 = vld [vmem:[%s2878_s1 + $0x410] sm:$0xff]  ;;  %v194_v46 = vld [vmem:[%s2878_s1 + $0x518] sm:$0xff] }
  0x31   :  { %1617 = vmatpush3.bf16.msra.mxu0 %v1616_v32  ;;  %v209_v32 = vld [vmem:[%s2878_s1 + $0x590] sm:$0xff]  ;;  %v179_v47 = vld [vmem:[%s2878_s1 + $0x4a0] sm:$0xff]  ;;  %v2398_v52 = vrot.slane %v332_v43, %v2074_v13  ;;  %v164_v56 = vld [vmem:[%s2878_s1 + $0x428] sm:$0xff] }
  0x32   :  { %1619 = vmatprep.subr.bf16.mxu0 %v1618_v36  ;;  %v1700_v36 = vpack.c.bf16 %v192_v28, %v191_v27  ;;  %v193_v41 = vld [vmem:[%s2878_s1 + $0x510] sm:$0xff]  ;;  %v1702_v44 = vpack.c.bf16 %v210_v34, %v209_v32  ;;  %v211_v49 = vld [vmem:[%s2878_s1 + $0x5a0] sm:$0xff]  ;;  %v196_v59 = vld [vmem:[%s2878_s1 + $0x528] sm:$0xff] }
  0x33   :  { %1649 = vmatpush3.bf16.msra.mxu1 %v1648_v35  ;;  %v1668_v35 = vpack.c.bf16 %v160_v26, %v159_v23  ;;  %v195_v57 = vld [vmem:[%s2878_s1 + $0x520] sm:$0xff]  ;;  %v181_v60 = vld [vmem:[%s2878_s1 + $0x4b0] sm:$0xff]  ;;  %v166_v4 = vld [vmem:[%s2878_s1 + $0x438] sm:$0xff] }
  0x34   :  { %1651 = vmatprep.subr.bf16.mxu1 %v1650_v40  ;;  %v162_v40 = vld [vmem:[%s2878_s1 + $0x418] sm:$0xff]  ;;  %v1708_v1 = vpack.c.bf16 %v196_v59, %v195_v57  ;;  %v197_v5 = vld [vmem:[%s2878_s1 + $0x530] sm:$0xff]  ;;  %v183_v8 = vld [vmem:[%s2878_s1 + $0x4c0] sm:$0xff] }
  0x35   :  { %1621 = vmatpush3.bf16.msra.mxu0 %v1620_v48  ;;  %v180_v48 = vld [vmem:[%s2878_s1 + $0x4a8] sm:$0xff]  ;;  %v1672_v53 = vpack.c.bf16 %v162_v40, %v161_v39  ;;  %v198_v7 = vld [vmem:[%s2878_s1 + $0x538] sm:$0xff]  ;;  %v199_v18 = vld [vmem:[%s2878_s1 + $0x540] sm:$0xff] }
  0x36   :  { %1623 = vmatprep.subr.bf16.mxu0 %v1622_v51  ;;  %v347_v51 = vcombine.high %v2377_v42, %v2377_v42  ;;  %v1674_v54 = vpack.c.bf16 %v180_v48, %v179_v47  ;;  %v1712_v14 = vpack.c.bf16 %v198_v7, %v197_v5  ;;  %v168_v17 = vld [vmem:[%s2878_s1 + $0x448] sm:$0xff]  ;;  %v185_v21 = vld [vmem:[%s2878_s1 + $0x4d0] sm:$0xff]  ;;  %v202_v32 = vld [vmem:[%s2878_s1 + $0x558] sm:$0xff] }
  0x37   :  { %1653 = vmatpush3.bf16.msra.mxu1 %v1652_v50  ;;  %v212_v50 = vld [vmem:[%s2878_s1 + $0x5a8] sm:$0xff]  ;;  %v217_v23 = vld [vmem:[%s2878_s1 + $0x5d0] sm:$0xff]  ;;  %v187_v34 = vld [vmem:[%s2878_s1 + $0x4e0] sm:$0xff] }
  0x38   :  { %1655 = vmatprep.subr.bf16.mxu1 %v1654_v55  ;;  %v163_v55 = vld [vmem:[%s2878_s1 + $0x420] sm:$0xff]  ;;  %v1706_v58 = vpack.c.bf16 %v212_v50, %v211_v49  ;;  %v200_v20 = vld [vmem:[%s2878_s1 + $0x548] sm:$0xff]  ;;  %v169_v28 = vld [vmem:[%s2878_s1 + $0x450] sm:$0xff] }
  0x39   :  { %1625 = vmatpush3.bf16.msra.mxu0 %v1624_v61  ;;  %v182_v61 = vld [vmem:[%s2878_s1 + $0x4b8] sm:$0xff]  ;;  %v1676_v0 = vpack.c.bf16 %v164_v56, %v163_v55  ;;  %v1716_v26 = vpack.c.bf16 %v200_v20, %v199_v18  ;;  %v201_v30 = vld [vmem:[%s2878_s1 + $0x550] sm:$0xff]  ;;  %v220_v37 = vld [vmem:[%s2878_s1 + $0x5e8] sm:$0xff] }
  0x3a   :  { %1627 = vmatprep.subr.bf16.mxu0 %v1626_v63  ;;  %v214_v63 = vld [vmem:[%s2878_s1 + $0x5b8] sm:$0xff]  ;;  %v1678_v2 = vpack.c.bf16 %v182_v61, %v181_v60  ;;  %v171_v39 = vld [vmem:[%s2878_s1 + $0x460] sm:$0xff]  ;;  %v1720_v40 = vpack.c.bf16 %v202_v32, %v201_v30  ;;  %v172_v43 = vld [vmem:[%s2878_s1 + $0x468] sm:$0xff] }
  0x3b   :  { %1657 = vmatpush3.bf16.msra.mxu1 %v1656_v62  ;;  %v213_v62 = vld [vmem:[%s2878_s1 + $0x5b0] sm:$0xff]  ;;  %v190_v49 = vld [vmem:[%s2878_s1 + $0x4f8] sm:$0xff] }
  0x3c   :  { %1659 = vmatprep.subr.bf16.mxu1 %v1658_v3  ;;  %v165_v3 = vld [vmem:[%s2878_s1 + $0x430] sm:$0xff]  ;;  %v1710_v6 = vpack.c.bf16 %v214_v63, %v213_v62 }
  0x3d   :  { %1629 = vmatpush3.bf16.msra.mxu0 %v1628_v9  ;;  %v184_v9 = vld [vmem:[%s2878_s1 + $0x4c8] sm:$0xff]  ;;  %v1680_v12 = vpack.c.bf16 %v166_v4, %v165_v3  ;;  %v189_v48 = vld [vmem:[%s2878_s1 + $0x4f0] sm:$0xff] }
  0x3e   :  { %1631 = vmatprep.subr.bf16.mxu0 %v1630_v11  ;;  %v216_v11 = vld [vmem:[%s2878_s1 + $0x5c8] sm:$0xff]  ;;  %v1682_v15 = vpack.c.bf16 %v184_v9, %v183_v8 }
  0x3f   :  { %1661 = vmatpush3.bf16.msra.mxu1 %v1660_v10  ;;  %v215_v10 = vld [vmem:[%s2878_s1 + $0x5c0] sm:$0xff] }
  0x40   :  { %1663 = vmatprep.subr.bf16.mxu1 %v1662_v16  ;;  %v167_v16 = vld [vmem:[%s2878_s1 + $0x440] sm:$0xff]  ;;  %v1714_v19 = vpack.c.bf16 %v216_v11, %v215_v10 }
  0x41   :  { %1633 = vmatpush3.bf16.msra.mxu0 %v1632_v22  ;;  %v186_v22 = vld [vmem:[%s2878_s1 + $0x4d8] sm:$0xff] }
  0x42   :  { %1667 = vmatprep.subr.bf16.mxu0 %v1666_v25  ;;  %v1684_v25 = vpack.c.bf16 %v168_v17, %v167_v16  ;;  %v1686_v27 = vpack.c.bf16 %v186_v22, %v185_v21 }
  0x43   :  { %1665 = vmatpush3.bf16.msra.mxu1 %v1664_v24  ;;  %v218_v24 = vld [vmem:[%s2878_s1 + $0x5d8] sm:$0xff] }
  0x44   :  { %1699 = vmatprep.subr.bf16.mxu1 %v1698_v29  ;;  %587 = vmatmul.mubr.f32.vlgmr.msra.gmra.mrb[2].mxu0 %v2235_v33  ;;  %v1704_v33 = vpack.c.bf16 %v194_v46, %v193_v41  ;;  %v170_v29 = vld [vmem:[%s2878_s1 + $0x458] sm:$0xff]  ;;  %v1718_v31 = vpack.c.bf16 %v218_v24, %v217_v23  ;;  %v204_v46 = vld [vmem:[%s2878_s1 + $0x568] sm:$0xff] }
  0x45   :  { %1669 = vmatpush3.bf16.msra.mxu0 %v1668_v35  ;;  %726 = vmatprep.mubr.f32.mxu0 %v347_v51  ;;  %v188_v35 = vld [vmem:[%s2878_s1 + $0x4e8] sm:$0xff] }
  0x46   :  { %657 = vmatmul.mubr.f32.vlgmr.msra.gmra.mrb[2].mxu1 %v2258_v45  ;;  %1671 = vmatprep.subr.bf16.mxu0 %v1670_v38  ;;  %v348_v45 = vcombine.high %v2398_v52, %v2398_v52  ;;  %v1688_v38 = vpack.c.bf16 %v170_v29, %v169_v28  ;;  %v1690_v41 = vpack.c.bf16 %v188_v35, %v187_v34 }
  0x47   :  { %1701 = vmatpush3.bf16.msra.mxu1 %v1700_v36  ;;  %v219_v36 = vld [vmem:[%s2878_s1 + $0x5e0] sm:$0xff] }
  0x48   :  { %1703 = vmatprep.subr.bf16.mxu1 %v1702_v44  ;;  %796 = vmatprep.mubr.f32.mxu1 %v348_v45  ;;  %v203_v44 = vld [vmem:[%s2878_s1 + $0x560] sm:$0xff]  ;;  %v1722_v47 = vpack.c.bf16 %v220_v37, %v219_v36 }
  0x49   :  { %1673 = vmatpush3.bf16.msra.mxu0 %v1672_v53 }
  0x4a   :  { %1675 = vmatprep.subr.bf16.mxu0 %v1674_v54 }
  0x4b   :  { %1705 = vmatpush3.bf16.msra.mxu1 %v1704_v33 }
  0x4c   :  { %1707 = vmatprep.subr.bf16.mxu1 %v1706_v58 }
  0x4d   :  { %1677 = vmatpush3.bf16.msra.mxu0 %v1676_v0 }
  0x4e   :  { %1679 = vmatprep.subr.bf16.mxu0 %v1678_v2 }
  0x4f   :  { %1709 = vmatpush3.bf16.msra.mxu1 %v1708_v1 }
  0x50   :  { %1711 = vmatprep.subr.bf16.mxu1 %v1710_v6 }
  0x51   :  { %1681 = vmatpush3.bf16.msra.mxu0 %v1680_v12 }
  0x52   :  { %1683 = vmatprep.subr.bf16.mxu0 %v1682_v15 }
  0x53   :  { %1713 = vmatpush3.bf16.msra.mxu1 %v1712_v14 }
  0x54   :  { %1715 = vmatprep.subr.bf16.mxu1 %v1714_v19 }
  0x55   :  { %1685 = vmatpush3.bf16.msra.mxu0 %v1684_v25 }
  0x56   :  { %1687 = vmatprep.subr.bf16.mxu0 %v1686_v27 }
  0x57   :  { %1717 = vmatpush3.bf16.msra.mxu1 %v1716_v26 }
  0x58   :  { %1719 = vmatprep.subr.bf16.mxu1 %v1718_v31 }
  0x59   :  { %12 = vsyncpa [#allocation3], 0  ;;  %v221_v50 = vld [vmem:[%s2878_s1 + $0x5f0] sm:$0xff]  ;;  %v222_v51 = vld [vmem:[%s2878_s1 + $0x5f8] sm:$0xff]  ;;  %1689 = vmatpush3.bf16.msra.mxu0 %v1688_v38  ;;  %v1692_v53 = vpack.c.bf16 %v172_v43, %v171_v39  ;;  %v1724_v54 = vpack.c.bf16 %v204_v46, %v203_v44  ;;  %v1694_v55 = vpack.c.bf16 %v190_v49, %v189_v48  ;;  %vm1881_vm0 = vmmov 0  }
  0x5a   :  { %v30_v33 = vld [vmem:[%s2877_s0 + $0x18] sm:$0xff]  ;;  %1691 = vmatprep.subr.bf16.mxu0 %v1690_v41  ;;  %v173_v56 = vld [vmem:[%s2878_s1 + $0x470] sm:$0xff]  ;;  %v1726_v58 = vpack.c.bf16 %v222_v51, %v221_v50  ;;  %v239_v60 = vld [vmem:[%s2878_s1 + $0x680] sm:$0xff]  ;;  %s1883_s0 = smov [#allocation2]  }
  0x5b   :  { %1721 = vmatpush3.bf16.msra.mxu1 %v1720_v40  ;;  %v174_v57 = vld [vmem:[%s2878_s1 + $0x478] sm:$0xff]  ;;  %v205_v45 = vld [vmem:[%s2878_s1 + $0x570] sm:$0xff]  ;;  %v240_v61 = vld [vmem:[%s2878_s1 + $0x688] sm:$0xff]  ;;  %v349_v0 = vcombine.high %v30_v33, %v30_v33  ;;  %v2569_v11 = vrot.slane %v30_v33, %v2074_v13  ;;  %s1142_s24 = sshll.u32 %s1883_s0, 4  ;;  %s1143_s24 = int_to_ptr.vmem [resolvable:$true] %s1142_s24 }
  0x5c   :  { %1723 = vmatprep.subr.bf16.mxu1 %v1722_v47  ;;  %v206_v59 = vld [vmem:[%s2878_s1 + $0x578] sm:$0xff]  ;;  %v271_v62 = vld [vmem:[%s2878_s1 + $0x780] sm:$0xff]  ;;  %v272_v63 = vld [vmem:[%s2878_s1 + $0x788] sm:$0xff]  ;;  %v1696_v1 = vpack.c.bf16 %v174_v57, %v173_v56  ;;  %v1730_v3 = vpack.c.bf16 %v240_v61, %v239_v60  ;;  %p1860_p1 = scmp.lt.s32.totalorder %s1143_s24, %s1143_s24 }
  0x5d   :  { %1693 = vmatpush3.bf16.msra.mxu0 %v1692_v53  ;;  %v1728_v2 = vpack.c.bf16 %v206_v59, %v205_v45  ;;  %v223_v4 = vld [vmem:[%s2878_s1 + $0x600] sm:$0xff]  ;;  %v224_v5 = vld [vmem:[%s2878_s1 + $0x608] sm:$0xff]  ;;  %v1762_v7 = vpack.c.bf16 %v272_v63, %v271_v62  ;;  %v241_v9 = vld [vmem:[%s2878_s1 + $0x690] sm:$0xff]  ;;  %v2578_v15 = vrot.slane %v349_v0, %v2074_v13  ;;  %v364_v25 = vcombine.high %v2569_v11, %v2569_v11 }
  0x5e   :  { %1695 = vmatprep.subr.bf16.mxu0 %v1694_v55  ;;  %v255_v6 = vld [vmem:[%s2878_s1 + $0x700] sm:$0xff]  ;;  %v256_v8 = vld [vmem:[%s2878_s1 + $0x708] sm:$0xff]  ;;  %v242_v10 = vld [vmem:[%s2878_s1 + $0x698] sm:$0xff]  ;;  %v1732_v16 = vpack.c.bf16 %v224_v5, %v223_v4 }
  0x5f   :  { %1725 = vmatpush3.bf16.msra.mxu1 %v1724_v54  ;;  %v273_v12 = vld [vmem:[%s2878_s1 + $0x790] sm:$0xff]  ;;  %v274_v14 = vld [vmem:[%s2878_s1 + $0x798] sm:$0xff]  ;;  %v1764_v17 = vpack.c.bf16 %v256_v8, %v255_v6  ;;  %v1734_v18 = vpack.c.bf16 %v242_v10, %v241_v9  ;;  %v243_v23 = vld [vmem:[%s2878_s1 + $0x6a0] sm:$0xff]  ;;  %v365_v28 = vcombine.high %v2578_v15, %v2578_v15 }
  0x60   :  { %1727 = vmatprep.subr.bf16.mxu1 %v1726_v58  ;;  %v225_v19 = vld [vmem:[%s2878_s1 + $0x610] sm:$0xff]  ;;  %v226_v20 = vld [vmem:[%s2878_s1 + $0x618] sm:$0xff]  ;;  %v1766_v13 = vpack.c.bf16 %v274_v14, %v273_v12  ;;  %v244_v24 = vld [vmem:[%s2878_s1 + $0x6a8] sm:$0xff] }
  0x61   :  { %1697 = vmatpush3.bf16.msra.mxu0 %v1696_v1  ;;  %v257_v21 = vld [vmem:[%s2878_s1 + $0x710] sm:$0xff]  ;;  %v258_v22 = vld [vmem:[%s2878_s1 + $0x718] sm:$0xff]  ;;  %v275_v26 = vld [vmem:[%s2878_s1 + $0x7a0] sm:$0xff]  ;;  %v1736_v29 = vpack.c.bf16 %v226_v20, %v225_v19  ;;  %v1738_v31 = vpack.c.bf16 %v244_v24, %v243_v23 }
  0x62   :  { %1731 = vmatprep.subr.bf16.mxu0 %v1730_v3  ;;  %v276_v27 = vld [vmem:[%s2878_s1 + $0x7a8] sm:$0xff]  ;;  %v1768_v30 = vpack.c.bf16 %v258_v22, %v257_v21  ;;  %v259_v34 = vld [vmem:[%s2878_s1 + $0x720] sm:$0xff]  ;;  %v245_v36 = vld [vmem:[%s2878_s1 + $0x6b0] sm:$0xff] }
  0x63   :  { %1729 = vmatpush3.bf16.msra.mxu1 %v1728_v2  ;;  %v228_v32 = vld [vmem:[%s2878_s1 + $0x628] sm:$0xff]  ;;  %v1770_v35 = vpack.c.bf16 %v276_v27, %v275_v26  ;;  %v246_v37 = vld [vmem:[%s2878_s1 + $0x6b8] sm:$0xff]  ;;  %v277_v38 = vld [vmem:[%s2878_s1 + $0x7b0] sm:$0xff] }
  0x64   :  { %1763 = vmatprep.subr.bf16.mxu1 %v1762_v7  ;;  %727 = vmatmul.mubr.f32.vlgmr.msra.gmra.mrb[4].mxu0 %v2377_v42  ;;  %v227_v42 = vld [vmem:[%s2878_s1 + $0x620] sm:$0xff]  ;;  %v278_v39 = vld [vmem:[%s2878_s1 + $0x7b8] sm:$0xff]  ;;  %v1742_v43 = vpack.c.bf16 %v246_v37, %v245_v36  ;;  %v229_v44 = vld [vmem:[%s2878_s1 + $0x630] sm:$0xff] }
  0x65   :  { %1733 = vmatpush3.bf16.msra.mxu0 %v1732_v16  ;;  %866 = vmatprep.mubr.f32.mxu0 %v364_v25  ;;  %v1740_v40 = vpack.c.bf16 %v228_v32, %v227_v42  ;;  %v230_v46 = vld [vmem:[%s2878_s1 + $0x638] sm:$0xff]  ;;  %v261_v47 = vld [vmem:[%s2878_s1 + $0x730] sm:$0xff]  ;;  %v1774_v48 = vpack.c.bf16 %v278_v39, %v277_v38  ;;  %v247_v50 = vld [vmem:[%s2878_s1 + $0x6c0] sm:$0xff]  ;;  %v1880_v39 = vmov 0.0|0.0  }
  0x66   :  { %797 = vmatmul.mubr.f32.vlgmr.msra.gmra.mrb[4].mxu1 %v2398_v52  ;;  %1735 = vmatprep.subr.bf16.mxu0 %v1734_v18  ;;  %v260_v52 = vld [vmem:[%s2878_s1 + $0x728] sm:$0xff]  ;;  %v262_v49 = vld [vmem:[%s2878_s1 + $0x738] sm:$0xff]  ;;  %v279_v53 = vld [vmem:[%s2878_s1 + $0x7c0] sm:$0xff]  ;;  %v1744_v54 = vpack.c.bf16 %v230_v46, %v229_v44 }
  0x67   :  { %1765 = vmatpush3.bf16.msra.mxu1 %v1764_v17  ;;  %936 = vmatprep.mubr.f32.mxu1 %v365_v28  ;;  %v1772_v41 = vpack.c.bf16 %v260_v52, %v259_v34  ;;  %v248_v51 = vld [vmem:[%s2878_s1 + $0x6c8] sm:$0xff]  ;;  %v1776_v55 = vpack.c.bf16 %v262_v49, %v261_v47  ;;  %v231_v57 = vld [vmem:[%s2878_s1 + $0x640] sm:$0xff]  ;;  %v249_v61 = vld [vmem:[%s2878_s1 + $0x6d0] sm:$0xff] }
  0x68   :  { %1767 = vmatprep.subr.bf16.mxu1 %v1766_v13  ;;  %v280_v33 = vld [vmem:[%s2878_s1 + $0x7c8] sm:$0xff]  ;;  %v1746_v56 = vpack.c.bf16 %v248_v51, %v247_v50  ;;  %v263_v58 = vld [vmem:[%s2878_s1 + $0x740] sm:$0xff]  ;;  %v250_v62 = vld [vmem:[%s2878_s1 + $0x6d8] sm:$0xff] }
  0x69   :  { %1737 = vmatpush3.bf16.msra.mxu0 %v1736_v29  ;;  %v232_v45 = vld [vmem:[%s2878_s1 + $0x648] sm:$0xff]  ;;  %v1778_v59 = vpack.c.bf16 %v280_v33, %v279_v53  ;;  %v281_v63 = vld [vmem:[%s2878_s1 + $0x7d0] sm:$0xff]  ;;  %v282_v0 = vld [vmem:[%s2878_s1 + $0x7d8] sm:$0xff]  ;;  %v1750_v3 = vpack.c.bf16 %v250_v62, %v249_v61 }
  0x6a   :  { %1739 = vmatprep.subr.bf16.mxu0 %v1738_v31  ;;  %v264_v60 = vld [vmem:[%s2878_s1 + $0x748] sm:$0xff]  ;;  %v1748_v1 = vpack.c.bf16 %v232_v45, %v231_v57  ;;  %v233_v4 = vld [vmem:[%s2878_s1 + $0x650] sm:$0xff]  ;;  %v234_v5 = vld [vmem:[%s2878_s1 + $0x658] sm:$0xff]  ;;  %v1782_v7 = vpack.c.bf16 %v282_v0, %v281_v63 }
  0x6b   :  { %1769 = vmatpush3.bf16.msra.mxu1 %v1768_v30  ;;  %v1780_v2 = vpack.c.bf16 %v264_v60, %v263_v58  ;;  %v265_v6 = vld [vmem:[%s2878_s1 + $0x750] sm:$0xff]  ;;  %v266_v8 = vld [vmem:[%s2878_s1 + $0x758] sm:$0xff]  ;;  %v251_v9 = vld [vmem:[%s2878_s1 + $0x6e0] sm:$0xff]  ;;  %v1752_v16 = vpack.c.bf16 %v234_v5, %v233_v4 }
  0x6c   :  { %1771 = vmatprep.subr.bf16.mxu1 %v1770_v35  ;;  %v252_v10 = vld [vmem:[%s2878_s1 + $0x6e8] sm:$0xff]  ;;  %v283_v12 = vld [vmem:[%s2878_s1 + $0x7e0] sm:$0xff]  ;;  %v1784_v17 = vpack.c.bf16 %v266_v8, %v265_v6  ;;  %v253_v23 = vld [vmem:[%s2878_s1 + $0x6f0] sm:$0xff] }
  0x6d   :  { %1741 = vmatpush3.bf16.msra.mxu0 %v1740_v40  ;;  %v284_v14 = vld [vmem:[%s2878_s1 + $0x7e8] sm:$0xff]  ;;  %v1754_v18 = vpack.c.bf16 %v252_v10, %v251_v9  ;;  %v235_v19 = vld [vmem:[%s2878_s1 + $0x660] sm:$0xff]  ;;  %v254_v24 = vld [vmem:[%s2878_s1 + $0x6f8] sm:$0xff] }
  0x6e   :  { %1743 = vmatprep.subr.bf16.mxu0 %v1742_v43  ;;  %v236_v20 = vld [vmem:[%s2878_s1 + $0x668] sm:$0xff]  ;;  %v267_v21 = vld [vmem:[%s2878_s1 + $0x760] sm:$0xff]  ;;  %v1786_v13 = vpack.c.bf16 %v284_v14, %v283_v12  ;;  %v285_v25 = vld [vmem:[%s2878_s1 + $0x7f0] sm:$0xff]  ;;  %v1758_v29 = vpack.c.bf16 %v254_v24, %v253_v23 }
  0x6f   :  { %1773 = vmatpush3.bf16.msra.mxu1 %v1772_v41  ;;  %v268_v22 = vld [vmem:[%s2878_s1 + $0x768] sm:$0xff]  ;;  %v286_v26 = vld [vmem:[%s2878_s1 + $0x7f8] sm:$0xff]  ;;  %v1756_v27 = vpack.c.bf16 %v236_v20, %v235_v19  ;;  %v237_v30 = vld [vmem:[%s2878_s1 + $0x670] sm:$0xff] }
  0x70   :  { %1775 = vmatprep.subr.bf16.mxu1 %v1774_v48  ;;  %v1788_v28 = vpack.c.bf16 %v268_v22, %v267_v21  ;;  %v238_v31 = vld [vmem:[%s2878_s1 + $0x678] sm:$0xff]  ;;  %v1790_v42 = vpack.c.bf16 %v286_v26, %v285_v25  ;;  %v269_v32 = vld [vmem:[%s2878_s1 + $0x770] sm:$0xff]  ;;  %v948_v36 = vld [vmem:[%s2880_s3] sm:$0xff] }
  0x71   :  { %1745 = vmatpush3.bf16.msra.mxu0 %v1744_v54  ;;  %v270_v34 = vld [vmem:[%s2878_s1 + $0x778] sm:$0xff]  ;;  %v1760_v35 = vpack.c.bf16 %v238_v31, %v237_v30  ;;  %v949_v37 = vld [vmem:[%s2880_s3 + $0x8] sm:$0xff]  ;;  %v952_v41 = vld [vmem:[%s2880_s3 + $0x20] sm:$0xff] }
  0x72   :  { %1747 = vmatprep.subr.bf16.mxu0 %v1746_v56  ;;  %v1792_v52 = vpack.c.bf16 %v270_v34, %v269_v32  ;;  %v1795_v38 = vpack.c.bf16 %v949_v37, %v948_v36  ;;  %v953_v43 = vld [vmem:[%s2880_s3 + $0x28] sm:$0xff]  ;;  %v954_v46 = vld [vmem:[%s2880_s3 + $0x30] sm:$0xff]  ;;  %v955_v47 = vld [vmem:[%s2880_s3 + $0x38] sm:$0xff] }
  0x73   :  { %1777 = vmatpush3.bf16.msra.mxu1 %v1776_v55  ;;  %v1801_v44 = vpack.c.bf16 %v953_v43, %v952_v41  ;;  %v1804_v48 = vpack.c.bf16 %v955_v47, %v954_v46  ;;  %v956_v49 = vld [vmem:[%s2880_s3 + $0x40] sm:$0xff]  ;;  %v957_v50 = vld [vmem:[%s2880_s3 + $0x48] sm:$0xff]  ;;  %v958_v53 = vld [vmem:[%s2880_s3 + $0x50] sm:$0xff] }
  0x74   :  { %1779 = vmatprep.subr.bf16.mxu1 %v1778_v59  ;;  %v1807_v51 = vpack.c.bf16 %v957_v50, %v956_v49  ;;  %v959_v33 = vld [vmem:[%s2880_s3 + $0x58] sm:$0xff]  ;;  %v960_v55 = vld [vmem:[%s2880_s3 + $0x60] sm:$0xff]  ;;  %v961_v56 = vld [vmem:[%s2880_s3 + $0x68] sm:$0xff]  ;;  %v1882_v59 = vmov 0.0  }
  0x75   :  { %1749 = vmatpush3.bf16.msra.mxu0 %v1748_v1  ;;  %v1810_v54 = vpack.c.bf16 %v959_v33, %v958_v53  ;;  %v1813_v57 = vpack.c.bf16 %v961_v56, %v960_v55  ;;  %v962_v45 = vld [vmem:[%s2880_s3 + $0x70] sm:$0xff]  ;;  %v963_v58 = vld [vmem:[%s2880_s3 + $0x78] sm:$0xff]  ;;  %v1150_v62 = vld [vmem:[%s2879_s2] ss:$0 sm:$0xff] }
  0x76   :  { %1751 = vmatprep.subr.bf16.mxu0 %v1750_v3  ;;  %v1816_v60 = vpack.c.bf16 %v963_v58, %v962_v45  ;;  %v1042_v3 = vld [vmem:[%s2882_s5] sm:$0xff]  ;;  %v1043_v4 = vld [vmem:[%s2882_s5 + $0x8] sm:$0xff]  ;;  %v1044_v5 = vld [vmem:[%s2882_s5 + $0x10] sm:$0xff] }
  0x77   :  { %1781 = vmatpush3.bf16.msra.mxu1 %v1780_v2  ;;  %v1045_v8 = vld [vmem:[%s2882_s5 + $0x18] sm:$0xff]  ;;  %v1046_v14 = vld [vmem:[%s2882_s5 + $0x20] sm:$0xff]  ;;  %v1052_v23 = vld [vmem:[%s2882_s5 + $0x50] sm:$0xff] }
  0x78   :  { %1783 = vmatprep.subr.bf16.mxu1 %v1782_v7  ;;  %v1819_v7 = vpack.c.bf16 %v1043_v4, %v1042_v3  ;;  %v1822_v10 = vpack.c.bf16 %v1045_v8, %v1044_v5  ;;  %v1049_v19 = vld [vmem:[%s2882_s5 + $0x38] sm:$0xff]  ;;  %v1050_v21 = vld [vmem:[%s2882_s5 + $0x40] sm:$0xff]  ;;  %v1056_v56 = vld [vmem:[%s2882_s5 + $0x70] sm:$0xff] }
  0x79   :  { %1753 = vmatpush3.bf16.msra.mxu0 %v1752_v16  ;;  %v1047_v16 = vld [vmem:[%s2882_s5 + $0x28] sm:$0xff]  ;;  %v1053_v24 = vld [vmem:[%s2882_s5 + $0x58] sm:$0xff]  ;;  %v1054_v26 = vld [vmem:[%s2882_s5 + $0x60] sm:$0xff] }
  0x7a   :  { %1755 = vmatprep.subr.bf16.mxu0 %v1754_v18  ;;  %v1048_v18 = vld [vmem:[%s2882_s5 + $0x30] sm:$0xff]  ;;  %v1834_v25 = vpack.c.bf16 %v1053_v24, %v1052_v23  ;;  %v1152_v58 = vld [vmem:[%s2881_s4] ss:$0 sm:$0xff] }
  0x7b   :  { %1785 = vmatpush3.bf16.msra.mxu1 %v1784_v17  ;;  %v1825_v17 = vpack.c.bf16 %v1047_v16, %v1046_v14  ;;  %v1828_v20 = vpack.c.bf16 %v1049_v19, %v1048_v18 }
  0x7c   :  { %1787 = vmatprep.subr.bf16.mxu1 %v1786_v13  ;;  %v1051_v13 = vld [vmem:[%s2882_s5 + $0x48] sm:$0xff] }
  0x7d   :  { %1757 = vmatpush3.bf16.msra.mxu0 %v1756_v27  ;;  %v1831_v22 = vpack.c.bf16 %v1051_v13, %v1050_v21  ;;  %v1055_v27 = vld [vmem:[%s2882_s5 + $0x68] sm:$0xff] }
  0x7e   :  { %1759 = vmatprep.subr.bf16.mxu0 %v1758_v29 }
  0x7f   :  { %1789 = vmatpush3.bf16.msra.mxu1 %v1788_v28  ;;  %v1837_v28 = vpack.c.bf16 %v1055_v27, %v1054_v26 }
  0x80   :  { %1791 = vmatprep.subr.bf16.mxu1 %v1790_v42 }
  0x81   :  { %1761 = vmatpush3.bf16.msra.mxu0 %v1760_v35 }
  0x82   :  { %1794 = vmatprep.subr.bf16.mxu0 %v1880_v39 }
  0x83   :  { %1793 = vmatpush3.bf16.msra.mxu1 %v1792_v52 }
  0x84   :  { %867 = vmatmul.mubr.f32.vlgmr.msra.gmra.mrb[6].mxu0 %v2569_v11  ;;  %1818 = vmatprep.subr.bf16.mxu1 %v1880_v39  ;;  %v950_v11 = vld [vmem:[%s2880_s3 + $0x10] sm:$0xff] }
  0x85   :  { %1796 = vmatpush3.bf16.msra.mxu0 %v1795_v38  ;;  %1500 = vmatprep.mubr.msk.f32.mxu0 %vm1881_vm0, %v1882_v59 }
  0x86   :  { %937 = vmatmul.mubr.f32.vlgmr.msra.gmra.mrb[6].mxu1 %v2578_v15  ;;  %1797 = vmatprep.subr.bf16.mxu0 %v1880_v39  ;;  %v951_v15 = vld [vmem:[%s2880_s3 + $0x18] sm:$0xff] }
  0x87   :  { %v1798_v40 = vpack.c.bf16 %v951_v15, %v950_v11  ;;  %1535 = vmatprep.mubr.msk.f32.mxu1 %vm1881_vm0, %v1882_v59  ;;  %1820 = vmatpush3.bf16.msra.mxu1 %v1819_v7 }
  0x88   :  { %1821 = vmatprep.subr.bf16.mxu1 %v1880_v39 }
  0x89   :  { %1799 = vmatpush3.bf16.msra.mxu0 %v1798_v40 }
  0x8a   :  { %1800 = vmatprep.subr.bf16.mxu0 %v1880_v39 }
  0x8b   :  { %1823 = vmatpush3.bf16.msra.mxu1 %v1822_v10 }
  0x8c   :  { %1824 = vmatprep.subr.bf16.mxu1 %v1880_v39 }
  0x8d   :  { %1802 = vmatpush3.bf16.msra.mxu0 %v1801_v44 }
  0x8e   :  { %1803 = vmatprep.subr.bf16.mxu0 %v1880_v39 }
  0x8f   :  { %1826 = vmatpush3.bf16.msra.mxu1 %v1825_v17 }
  0x90   :  { %1827 = vmatprep.subr.bf16.mxu1 %v1880_v39 }
  0x91   :  { %1805 = vmatpush3.bf16.msra.mxu0 %v1804_v48 }
  0x92   :  { %1806 = vmatprep.subr.bf16.mxu0 %v1880_v39 }
  0x93   :  { %1829 = vmatpush3.bf16.msra.mxu1 %v1828_v20 }
  0x94   :  { %1830 = vmatprep.subr.bf16.mxu1 %v1880_v39 }
  0x95   :  { %1808 = vmatpush3.bf16.msra.mxu0 %v1807_v51 }
  0x96   :  { %1809 = vmatprep.subr.bf16.mxu0 %v1880_v39 }
  0x97   :  { %1832 = vmatpush3.bf16.msra.mxu1 %v1831_v22 }
  0x98   :  { %1833 = vmatprep.subr.bf16.mxu1 %v1880_v39 }
  0x99   :  { %1811 = vmatpush3.bf16.msra.mxu0 %v1810_v54 }
  0x9a   :  { %1812 = vmatprep.subr.bf16.mxu0 %v1880_v39 }
  0x9b   :  { %1835 = vmatpush3.bf16.msra.mxu1 %v1834_v25 }
  0x9c   :  { %1836 = vmatprep.subr.bf16.mxu1 %v1880_v39 }
  0x9d   :  { %1814 = vmatpush3.bf16.msra.mxu0 %v1813_v57  ;;  %v1057_v57 = vld [vmem:[%s2882_s5 + $0x78] sm:$0xff]  ;;  %s1855_s5 = scalar_lea.vmem %s1143_s24, 32 }
  0x9e   :  { %1815 = vmatprep.subr.bf16.mxu0 %v1880_v39  ;;  %v1840_v45 = vpack.c.bf16 %v1057_v57, %v1056_v56  ;;  %p1856_p0 = scmp.ne.s32.totalorder %s1143_s24, %s1855_s5  ;;  %p1861_p2 = scmp.lt.s32.totalorder %s1855_s5, %s1855_s5 }
  0x9f   :  { %1838 = vmatpush3.bf16.msra.mxu1 %v1837_v28 }
  0xa0   :  { %1839 = vmatprep.subr.bf16.mxu1 %v1880_v39  ;;  %p1862_p3 = por %p1861_p2, %p1860_p1 }
  0xa1   :  { %1817 = vmatpush3.bf16.msra.mxu0 %v1816_v60 }
  0xa2   :  { %p1863_p4 = pnand %p1862_p3, %p1856_p0 }
  0xa3   :  { %1841 = vmatpush3.bf16.msra.mxu1 %v1840_v45 }
  0xf7   :  { %v1186_v61 = vpop.f32.mrb[0].mxu0 }
  0xf8   :  { %v1187_v63 = vpop.f32.mrb[1].mxu0 }
  0xf9   :  { %v1221_v0 = vpop.f32.mrb[0].mxu1  ;;  %v1188_v1 = vadd.f32 %v1187_v63, %v1186_v61  ;;  %v1153_v63 = vld [vmem:[%s2883_s6] ss:$0 sm:$0xff] }
  0xfa   :  { %v1222_v2 = vpop.f32.mrb[1].mxu1 }
  0xfb   :  { %v1223_v6 = vadd.f32 %v1222_v2, %v1221_v0  ;;  %v449_v9 = vadd.f32 %v1188_v1, %v1150_v62 }
  0xfd   :  { %v519_v12 = vadd.f32 %v1223_v6, %v449_v9 }
 0x117   :  { %v1256_v29 = vpop.f32.mrb[2].mxu0 }
 0x118   :  { %v1257_v30 = vpop.f32.mrb[3].mxu0 }
 0x119   :  { %v1291_v31 = vpop.f32.mrb[2].mxu1  ;;  %v1258_v42 = vadd.f32 %v1257_v30, %v1256_v29 }
 0x11a   :  { %v1292_v32 = vpop.f32.mrb[3].mxu1 }
 0x11b   :  { %v1293_v34 = vadd.f32 %v1292_v32, %v1291_v31  ;;  %v589_v35 = vadd.f32 %v1258_v42, %v519_v12 }
 0x11d   :  { %v659_v52 = vadd.f32 %v1293_v34, %v589_v35 }
 0x137   :  { %v1326_v36 = vpop.f32.mrb[4].mxu0 }
 0x138   :  { %v1327_v37 = vpop.f32.mrb[5].mxu0 }
 0x139   :  { %v1361_v38 = vpop.f32.mrb[4].mxu1  ;;  %v1328_v11 = vadd.f32 %v1327_v37, %v1326_v36 }
 0x13a   :  { %v1362_v15 = vpop.f32.mrb[5].mxu1 }
 0x13b   :  { %v1363_v40 = vadd.f32 %v1362_v15, %v1361_v38  ;;  %v729_v41 = vadd.f32 %v1328_v11, %v659_v52 }
 0x13d   :  { %v799_v43 = vadd.f32 %v1363_v40, %v729_v41 }
 0x157   :  { %v1396_v44 = vpop.f32.mrb[6].mxu0 }
 0x158   :  { %v1397_v46 = vpop.f32.mrb[7].mxu0 }
 0x159   :  { %v1431_v47 = vpop.f32.mrb[6].mxu1  ;;  %v1398_v39 = vadd.f32 %v1397_v46, %v1396_v44 }
 0x15a   :  { %v1432_v48 = vpop.f32.mrb[7].mxu1 }
 0x15b   :  { %v1433_v49 = vadd.f32 %v1432_v48, %v1431_v47  ;;  %v869_v50 = vadd.f32 %v1398_v39, %v799_v43 }
 0x15d   :  { %v939_v51 = vadd.f32 %v1433_v49, %v869_v50 }
 0x15f   :  { %v1151_v53 = vmul.f32 -1.442695, %v939_v51 }
 0x161   :  { %1851 = vpow2.f32 %v1151_v53 }
 0x16b   :  { %v1852_v33 = vpop.eup %1851 }
 0x16c   :  { %v945_v54 = vadd.f32 1.0, %v1852_v33 }
 0x16e   :  { %1853 = vrcp.f32 %v945_v54 }
 0x178   :  { %v1854_v55 = vpop.eup %1853 }
 0x179   :  { %1501 = vmatmul.mubr.f32.vlgmr.msra.gmra.mrb[8].mxu0 %v1854_v55 }
 0x24c   :  { %v1037_v59 = vpop.f32.mrb[8].mxu0 }
 0x24d   :  { %v1038_v60 = vadd.f32 %v1152_v58, %v1037_v59  ;;  %v1502_v61 = vpop.f32.mrb[9].mxu0 }
 0x24f   :  { %v1041_v62 = vmax.f32 %v1038_v60, 0.0 }
 0x251   :  { %1536 = vmatmul.mubr.f32.vlgmr.msra.gmra.mrb[8].mxu1 %v1041_v62 }
 0x324   :  { %v1131_v0 = vpop.f32.mrb[8].mxu1 }
 0x325   :  { %v1132_v1 = vadd.f32 %v1153_v63, %v1131_v0  ;;  %v1537_v2 = vpop.f32.mrb[9].mxu1 }
 0x327   :  { %1135 = vst [vmem:[#allocation2] sm:$0x3] %v1132_v1 }
 0x328   :  { %1866 = shalt.err (!%p1863_p4)
}
 0x329   :  { %s1867_s26 = scalar_lea.hbm %s2884_s7, 32 }
 0x32a   :  { %p1868_p5 = scmp.ne.s32.totalorder %s2884_s7, %s1867_s26  ;;  %p1871_p6 = scmp.lt.u32.totalorder %s1867_s26, %s2884_s7 }
 0x32c   :  { %p1873_p7 = pnand %p1871_p6, %p1868_p5 }
 0x32e   :  { %1876 = shalt.err (!%p1873_p7)
}
 0x32f   :  { %1145 = dma.vmem_to_hbm [thread:$0]  %s1143_s24, 32, %s2884_s7, [#allocation3]  }
 0x330   :  { %1877 = dma.done.wait [#allocation3], 32  }
 0x331   :  { %1878 = vsyncadd [#allocation3], 4294967264 }
 0x332   :  { %1149 = vsyncpa [#allocation3], 1 }

</bundles_post_ra>
